<compile_context>
chip_gen: v6e
topology: v6e:2x2x1
jax: 0.10.0
libtpu: 0.0.40
codegen_flags: <defaults>
</compile_context>

<pallas_src>
import functools

import jax
import jax.numpy as jnp
from jax.experimental import pallas as pl
from jax.experimental.pallas import tpu as pltpu

EPS = 1e-5  # nn.LayerNorm default


def _layernorm(x, g, b):
    mu = jnp.mean(x, axis=-1, keepdims=True)
    var = jnp.mean((x - mu) ** 2, axis=-1, keepdims=True)
    return (x - mu) * jax.lax.rsqrt(var + EPS) * g + b


def _attend(xn, cn, wq, wk, wv, wo, bo):
    """Multi-head attention on pre-normed inputs.

    xn: (Nq, Dq), cn: (Nk, Dc)
    wq: (H, Dq, Dh), wk/wv: (H, Dc, Dh), wo: (H, Dh, Dq), bo: (1, Dq)
    """
    heads, _, dim_head = wq.shape
    scale = dim_head ** -0.5
    out = None
    for h in range(heads):  # static unroll; leading-dim indexing is free
        q = jnp.dot(xn, wq[h], preferred_element_type=jnp.float32) * scale
        k = jnp.dot(cn, wk[h], preferred_element_type=jnp.float32)
        v = jnp.dot(cn, wv[h], preferred_element_type=jnp.float32)
        # q @ k^T without materializing a transpose.
        sim = jax.lax.dot_general(q, k, (((1,), (1,)), ((), ())),
                                  preferred_element_type=jnp.float32)  # (Nq, Nk)
        sim = sim - jnp.max(sim, axis=-1, keepdims=True)
        p = jnp.exp(sim)
        p = p * pl.reciprocal(jnp.sum(p, axis=-1, keepdims=True), approx=True)
        # TODO(synk): attn_dropout skipped (inference / eval mode).
        o = jnp.dot(p, v, preferred_element_type=jnp.float32)            # (Nq, Dh)
        proj = jnp.dot(o, wo[h], preferred_element_type=jnp.float32)     # (Nq, Dq)
        out = proj if out is None else out + proj
    return out + bo


def _geglu_ff(x, ln_g, ln_b, w1a, b1a, w1g, b1g, w2, b2):
    xn = _layernorm(x, ln_g, ln_b)
    a = jnp.dot(xn, w1a, preferred_element_type=jnp.float32) + b1a
    g = jnp.dot(xn, w1g, preferred_element_type=jnp.float32) + b1g
    # TODO(synk): F.gelu default is exact (erf); tanh approximation used for TPU portability.
    gated = a * jax.nn.gelu(g, approximate=True)
    # TODO(synk): ff_dropout skipped (inference / eval mode).
    return jnp.dot(gated, w2, preferred_element_type=jnp.float32) + b2


def _nft_kernel(*refs, depth):
    (x_ref, lat_ref,
     ca_lnq_g_ref, ca_lnq_b_ref, ca_lnc_g_ref, ca_lnc_b_ref,
     ca_wq_ref, ca_wk_ref, ca_wv_ref, ca_wo_ref, ca_bo_ref,
     cf_ln_g_ref, cf_ln_b_ref, cf_w1a_ref, cf_b1a_ref, cf_w1g_ref, cf_b1g_ref,
     cf_w2_ref, cf_b2_ref,
     sa_ln_g_ref, sa_ln_b_ref, sa_wq_ref, sa_wk_ref, sa_wv_ref, sa_wo_ref, sa_bo_ref,
     sf_ln_g_ref, sf_ln_b_ref, sf_w1a_ref, sf_b1a_ref, sf_w1g_ref, sf_b1g_ref,
     sf_w2_ref, sf_b2_ref,
     o_ref) = refs

    x = x_ref[0]        # (SEQ, C)   current batch element
    lat = lat_ref[...]  # (Nq, D)    shared latents (no broadcast in HBM)

    # --- PreNorm cross-attention (latents attend to the data) + residual ---
    xn = _layernorm(lat, ca_lnq_g_ref[...], ca_lnq_b_ref[...])
    cn = _layernorm(x, ca_lnc_g_ref[...], ca_lnc_b_ref[...])
    h = lat + _attend(xn, cn, ca_wq_ref[...], ca_wk_ref[...], ca_wv_ref[...],
                      ca_wo_ref[...], ca_bo_ref[...])

    # --- PreNorm GEGLU feed-forward + residual ---
    h = h + _geglu_ff(h, cf_ln_g_ref[...], cf_ln_b_ref[...],
                      cf_w1a_ref[...], cf_b1a_ref[...],
                      cf_w1g_ref[...], cf_b1g_ref[...],
                      cf_w2_ref[...], cf_b2_ref[...])

    # --- depth x (self-attention + feed-forward), all resident in VMEM ---
    for d in range(depth):  # static unroll
        hn = _layernorm(h, sa_ln_g_ref[d], sa_ln_b_ref[d])
        # self-attention: context is the same normed tensor (tied PreNorm).
        h = h + _attend(hn, hn, sa_wq_ref[d], sa_wk_ref[d], sa_wv_ref[d],
                        sa_wo_ref[d], sa_bo_ref[d])
        h = h + _geglu_ff(h, sf_ln_g_ref[d], sf_ln_b_ref[d],
                          sf_w1a_ref[d], sf_b1a_ref[d],
                          sf_w1g_ref[d], sf_b1g_ref[d],
                          sf_w2_ref[d], sf_b2_ref[d])

    o_ref[0] = h


def _full_spec(a):
    nd = a.ndim
    return pl.BlockSpec(a.shape, lambda b, nd=nd: (0,) * nd)


_WEIGHT_ORDER = [
    "ca_lnq_g", "ca_lnq_b", "ca_lnc_g", "ca_lnc_b",
    "ca_wq", "ca_wk", "ca_wv", "ca_wo", "ca_bo",
    "cf_ln_g", "cf_ln_b", "cf_w1a", "cf_b1a", "cf_w1g", "cf_b1g", "cf_w2", "cf_b2",
    "sa_ln_g", "sa_ln_b", "sa_wq", "sa_wk", "sa_wv", "sa_wo", "sa_bo",
    "sf_ln_g", "sf_ln_b", "sf_w1a", "sf_b1a", "sf_w1g", "sf_b1g", "sf_w2", "sf_b2",
]


def nft_forward(x, params):
    """x: (B, seq, input_channels) f32 -> (B, num_latents, latent_dim) f32."""
    B, SEQ, C = x.shape
    lat = params["latents"]
    Nq, D = lat.shape
    depth = int(params["sa_wq"].shape[0])

    weights = [params[k] for k in _WEIGHT_ORDER]
    in_specs = ([pl.BlockSpec((1, SEQ, C), lambda b: (b, 0, 0)),
                 _full_spec(lat)]
                + [_full_spec(w) for w in weights])

    return pl.pallas_call(
        functools.partial(_nft_kernel, depth=depth),
        out_shape=jax.ShapeDtypeStruct((B, Nq, D), jnp.float32),
        grid=(B,),
        in_specs=in_specs,
        out_specs=pl.BlockSpec((1, Nq, D), lambda b: (b, 0, 0)),
        compiler_params=pltpu.CompilerParams(
            dimension_semantics=("parallel",)),
    )(x, lat, *weights)


# ----------------------------------------------------------------------------
# Deterministic synthetic parameter init (per-head weight layout).
# ----------------------------------------------------------------------------
def init_params(key, input_channels, latent_dim, num_latents, depth,
                cross_heads=1, cross_dim_head=50,
                latent_heads=8, latent_dim_head=50, ff_mult=4):
    keys = iter(jax.random.split(key, 128))

    def lin(shape, fan_in):
        return (jax.random.normal(next(keys), shape, jnp.float32)
                / jnp.sqrt(jnp.float32(fan_in)))

    D, C = latent_dim, input_channels
    hid = ff_mult * D
    Hc, Dhc = cross_heads, cross_dim_head
    Hs, Dhs = latent_heads, latent_dim_head

    return dict(
        latents=jax.random.normal(next(keys), (num_latents, D), jnp.float32),
        # cross-attention (PreNorm over latents + separate context norm)
        ca_lnq_g=jnp.ones((1, D), jnp.float32), ca_lnq_b=jnp.zeros((1, D), jnp.float32),
        ca_lnc_g=jnp.ones((1, C), jnp.float32), ca_lnc_b=jnp.zeros((1, C), jnp.float32),
        ca_wq=lin((Hc, D, Dhc), D), ca_wk=lin((Hc, C, Dhc), C), ca_wv=lin((Hc, C, Dhc), C),
        ca_wo=lin((Hc, Dhc, D), Hc * Dhc), ca_bo=jnp.zeros((1, D), jnp.float32),
        # cross feed-forward (GEGLU): w1 split into value/gate halves
        cf_ln_g=jnp.ones((1, D), jnp.float32), cf_ln_b=jnp.zeros((1, D), jnp.float32),
        cf_w1a=lin((D, hid), D), cf_b1a=jnp.zeros((1, hid), jnp.float32),
        cf_w1g=lin((D, hid), D), cf_b1g=jnp.zeros((1, hid), jnp.float32),
        cf_w2=lin((hid, D), hid), cf_b2=jnp.zeros((1, D), jnp.float32),
        # self-attention blocks (stacked over depth, per-head leading axis)
        sa_ln_g=jnp.ones((depth, 1, D), jnp.float32),
        sa_ln_b=jnp.zeros((depth, 1, D), jnp.float32),
        sa_wq=lin((depth, Hs, D, Dhs), D),
        sa_wk=lin((depth, Hs, D, Dhs), D),
        sa_wv=lin((depth, Hs, D, Dhs), D),
        sa_wo=lin((depth, Hs, Dhs, D), Hs * Dhs),
        sa_bo=jnp.zeros((depth, 1, D), jnp.float32),
        # self feed-forward blocks
        sf_ln_g=jnp.ones((depth, 1, D), jnp.float32),
        sf_ln_b=jnp.zeros((depth, 1, D), jnp.float32),
        sf_w1a=lin((depth, D, hid), D), sf_b1a=jnp.zeros((depth, 1, hid), jnp.float32),
        sf_w1g=lin((depth, D, hid), D), sf_b1g=jnp.zeros((depth, 1, hid), jnp.float32),
        sf_w2=lin((depth, hid, D), hid), sf_b2=jnp.zeros((depth, 1, D), jnp.float32),
    )


if __name__ == "__main__":
    B, SEQ, C = 2, 8, 4                  # batch, sequence (input_axis=1), input_channels
    LATENT_DIM, NUM_LATENTS, DEPTH = 32, 64, 1

    key = jax.random.PRNGKey(0)
    k_x, k_p = jax.random.split(key)
    x = jax.random.normal(k_x, (B, SEQ, C), dtype=jnp.float32)
    params = init_params(k_p, C, LATENT_DIM, NUM_LATENTS, DEPTH)

    out = jax.jit(lambda xx: nft_forward(xx, params))(x)
    out = jax.block_until_ready(out)
    assert out.shape == (B, NUM_LATENTS, LATENT_DIM), out.shape
    assert bool(jnp.all(jnp.isfinite(out)))
    print("KERNEL_OK")
</pallas_src>

<mosaic_0001>
module attributes {stable_mosaic.version = 11 : i64} {
  func.func @_nft_kernel(%arg0: i32, %arg1: memref<1x8x4xf32, #tpu.memory_space<vmem>>, %arg2: memref<64x32xf32, #tpu.memory_space<vmem>>, %arg3: memref<1x32xf32, #tpu.memory_space<vmem>>, %arg4: memref<1x32xf32, #tpu.memory_space<vmem>>, %arg5: memref<1x4xf32, #tpu.memory_space<vmem>>, %arg6: memref<1x4xf32, #tpu.memory_space<vmem>>, %arg7: memref<1x32x50xf32, #tpu.memory_space<vmem>>, %arg8: memref<1x4x50xf32, #tpu.memory_space<vmem>>, %arg9: memref<1x4x50xf32, #tpu.memory_space<vmem>>, %arg10: memref<1x50x32xf32, #tpu.memory_space<vmem>>, %arg11: memref<1x32xf32, #tpu.memory_space<vmem>>, %arg12: memref<1x32xf32, #tpu.memory_space<vmem>>, %arg13: memref<1x32xf32, #tpu.memory_space<vmem>>, %arg14: memref<32x128xf32, #tpu.memory_space<vmem>>, %arg15: memref<1x128xf32, #tpu.memory_space<vmem>>, %arg16: memref<32x128xf32, #tpu.memory_space<vmem>>, %arg17: memref<1x128xf32, #tpu.memory_space<vmem>>, %arg18: memref<128x32xf32, #tpu.memory_space<vmem>>, %arg19: memref<1x32xf32, #tpu.memory_space<vmem>>, %arg20: memref<1x1x32xf32, #tpu.memory_space<vmem>>, %arg21: memref<1x1x32xf32, #tpu.memory_space<vmem>>, %arg22: memref<1x8x32x50xf32, #tpu.memory_space<vmem>>, %arg23: memref<1x8x32x50xf32, #tpu.memory_space<vmem>>, %arg24: memref<1x8x32x50xf32, #tpu.memory_space<vmem>>, %arg25: memref<1x8x50x32xf32, #tpu.memory_space<vmem>>, %arg26: memref<1x1x32xf32, #tpu.memory_space<vmem>>, %arg27: memref<1x1x32xf32, #tpu.memory_space<vmem>>, %arg28: memref<1x1x32xf32, #tpu.memory_space<vmem>>, %arg29: memref<1x32x128xf32, #tpu.memory_space<vmem>>, %arg30: memref<1x1x128xf32, #tpu.memory_space<vmem>>, %arg31: memref<1x32x128xf32, #tpu.memory_space<vmem>>, %arg32: memref<1x1x128xf32, #tpu.memory_space<vmem>>, %arg33: memref<1x128x32xf32, #tpu.memory_space<vmem>>, %arg34: memref<1x1x32xf32, #tpu.memory_space<vmem>>, %arg35: memref<1x64x32xf32, #tpu.memory_space<vmem>>) attributes {dimension_semantics = [#tpu.dimension_semantics<parallel>], iteration_bounds = array<i64: 2>, scalar_prefetch = 0 : i64, scratch_operands = 0 : i64, tpu.core_type = #tpu.core_type<tc>, window_params = [{transform_indices = @transform_0, window_bounds = array<i64: 1, 8, 4>}, {pipeline_mode = #tpu.pipeline_mode<synchronous>, transform_indices = @transform_1, window_bounds = array<i64: 64, 32>}, {pipeline_mode = #tpu.pipeline_mode<synchronous>, transform_indices = @transform_2, window_bounds = array<i64: 1, 32>}, {pipeline_mode = #tpu.pipeline_mode<synchronous>, transform_indices = @transform_3, window_bounds = array<i64: 1, 32>}, {pipeline_mode = #tpu.pipeline_mode<synchronous>, transform_indices = @transform_4, window_bounds = array<i64: 1, 4>}, {pipeline_mode = #tpu.pipeline_mode<synchronous>, transform_indices = @transform_5, window_bounds = array<i64: 1, 4>}, {pipeline_mode = #tpu.pipeline_mode<synchronous>, transform_indices = @transform_6, window_bounds = array<i64: 1, 32, 50>}, {pipeline_mode = #tpu.pipeline_mode<synchronous>, transform_indices = @transform_7, window_bounds = array<i64: 1, 4, 50>}, {pipeline_mode = #tpu.pipeline_mode<synchronous>, transform_indices = @transform_8, window_bounds = array<i64: 1, 4, 50>}, {pipeline_mode = #tpu.pipeline_mode<synchronous>, transform_indices = @transform_9, window_bounds = array<i64: 1, 50, 32>}, {pipeline_mode = #tpu.pipeline_mode<synchronous>, transform_indices = @transform_10, window_bounds = array<i64: 1, 32>}, {pipeline_mode = #tpu.pipeline_mode<synchronous>, transform_indices = @transform_11, window_bounds = array<i64: 1, 32>}, {pipeline_mode = #tpu.pipeline_mode<synchronous>, transform_indices = @transform_12, window_bounds = array<i64: 1, 32>}, {pipeline_mode = #tpu.pipeline_mode<synchronous>, transform_indices = @transform_13, window_bounds = array<i64: 32, 128>}, {pipeline_mode = #tpu.pipeline_mode<synchronous>, transform_indices = @transform_14, window_bounds = array<i64: 1, 128>}, {pipeline_mode = #tpu.pipeline_mode<synchronous>, transform_indices = @transform_15, window_bounds = array<i64: 32, 128>}, {pipeline_mode = #tpu.pipeline_mode<synchronous>, transform_indices = @transform_16, window_bounds = array<i64: 1, 128>}, {pipeline_mode = #tpu.pipeline_mode<synchronous>, transform_indices = @transform_17, window_bounds = array<i64: 128, 32>}, {pipeline_mode = #tpu.pipeline_mode<synchronous>, transform_indices = @transform_18, window_bounds = array<i64: 1, 32>}, {pipeline_mode = #tpu.pipeline_mode<synchronous>, transform_indices = @transform_19, window_bounds = array<i64: 1, 1, 32>}, {pipeline_mode = #tpu.pipeline_mode<synchronous>, transform_indices = @transform_20, window_bounds = array<i64: 1, 1, 32>}, {pipeline_mode = #tpu.pipeline_mode<synchronous>, transform_indices = @transform_21, window_bounds = array<i64: 1, 8, 32, 50>}, {pipeline_mode = #tpu.pipeline_mode<synchronous>, transform_indices = @transform_22, window_bounds = array<i64: 1, 8, 32, 50>}, {pipeline_mode = #tpu.pipeline_mode<synchronous>, transform_indices = @transform_23, window_bounds = array<i64: 1, 8, 32, 50>}, {pipeline_mode = #tpu.pipeline_mode<synchronous>, transform_indices = @transform_24, window_bounds = array<i64: 1, 8, 50, 32>}, {pipeline_mode = #tpu.pipeline_mode<synchronous>, transform_indices = @transform_25, window_bounds = array<i64: 1, 1, 32>}, {pipeline_mode = #tpu.pipeline_mode<synchronous>, transform_indices = @transform_26, window_bounds = array<i64: 1, 1, 32>}, {pipeline_mode = #tpu.pipeline_mode<synchronous>, transform_indices = @transform_27, window_bounds = array<i64: 1, 1, 32>}, {pipeline_mode = #tpu.pipeline_mode<synchronous>, transform_indices = @transform_28, window_bounds = array<i64: 1, 32, 128>}, {pipeline_mode = #tpu.pipeline_mode<synchronous>, transform_indices = @transform_29, window_bounds = array<i64: 1, 1, 128>}, {pipeline_mode = #tpu.pipeline_mode<synchronous>, transform_indices = @transform_30, window_bounds = array<i64: 1, 32, 128>}, {pipeline_mode = #tpu.pipeline_mode<synchronous>, transform_indices = @transform_31, window_bounds = array<i64: 1, 1, 128>}, {pipeline_mode = #tpu.pipeline_mode<synchronous>, transform_indices = @transform_32, window_bounds = array<i64: 1, 128, 32>}, {pipeline_mode = #tpu.pipeline_mode<synchronous>, transform_indices = @transform_33, window_bounds = array<i64: 1, 1, 32>}, {transform_indices = @transform_34, window_bounds = array<i64: 1, 64, 32>}]} {
    %c0 = arith.constant 0 : index
    %c0_0 = arith.constant 0 : index
    %c0_1 = arith.constant 0 : index
    %0 = vector.load %arg1[%c0, %c0_0, %c0_1] : memref<1x8x4xf32, #tpu.memory_space<vmem>>, vector<1x8x4xf32>
    %1 = vector.shape_cast %0 : vector<1x8x4xf32> to vector<8x4xf32>
    %c0_2 = arith.constant 0 : index
    %c0_3 = arith.constant 0 : index
    %2 = vector.load %arg2[%c0_2, %c0_3] : memref<64x32xf32, #tpu.memory_space<vmem>>, vector<64x32xf32>
    %c0_4 = arith.constant 0 : index
    %c0_5 = arith.constant 0 : index
    %3 = vector.load %arg3[%c0_4, %c0_5] : memref<1x32xf32, #tpu.memory_space<vmem>>, vector<1x32xf32>
    %c0_6 = arith.constant 0 : index
    %c0_7 = arith.constant 0 : index
    %4 = vector.load %arg4[%c0_6, %c0_7] : memref<1x32xf32, #tpu.memory_space<vmem>>, vector<1x32xf32>
    %cst = arith.constant dense<0.000000e+00> : vector<64xf32>
    %5 = vector.multi_reduction <add>, %2, %cst [1] : vector<64x32xf32> to vector<64xf32>
    %6 = vector.shape_cast %5 : vector<64xf32> to vector<64x1xf32>
    %cst_8 = arith.constant 3.200000e+01 : f32
    %7 = vector.broadcast %cst_8 : f32 to vector<64x1xf32>
    %8 = arith.divf %6, %7 : vector<64x1xf32>
    %9 = vector.broadcast %8 : vector<64x1xf32> to vector<64x32xf32>
    %10 = arith.subf %2, %9 : vector<64x32xf32>
    %11 = arith.mulf %10, %10 : vector<64x32xf32>
    %cst_9 = arith.constant dense<0.000000e+00> : vector<64xf32>
    %12 = vector.multi_reduction <add>, %11, %cst_9 [1] : vector<64x32xf32> to vector<64xf32>
    %13 = vector.shape_cast %12 : vector<64xf32> to vector<64x1xf32>
    %cst_10 = arith.constant 3.200000e+01 : f32
    %14 = vector.broadcast %cst_10 : f32 to vector<64x1xf32>
    %15 = arith.divf %13, %14 : vector<64x1xf32>
    %16 = vector.broadcast %8 : vector<64x1xf32> to vector<64x32xf32>
    %17 = arith.subf %2, %16 : vector<64x32xf32>
    %cst_11 = arith.constant 9.99999974E-6 : f32
    %18 = vector.broadcast %cst_11 : f32 to vector<64x1xf32>
    %19 = arith.addf %15, %18 : vector<64x1xf32>
    %20 = math.rsqrt %19 : vector<64x1xf32>
    %21 = vector.broadcast %20 : vector<64x1xf32> to vector<64x32xf32>
    %22 = arith.mulf %17, %21 : vector<64x32xf32>
    %23 = vector.broadcast %3 : vector<1x32xf32> to vector<64x32xf32>
    %24 = arith.mulf %22, %23 : vector<64x32xf32>
    %25 = vector.broadcast %4 : vector<1x32xf32> to vector<64x32xf32>
    %26 = arith.addf %24, %25 : vector<64x32xf32>
    %c0_12 = arith.constant 0 : index
    %c0_13 = arith.constant 0 : index
    %27 = vector.load %arg5[%c0_12, %c0_13] : memref<1x4xf32, #tpu.memory_space<vmem>>, vector<1x4xf32>
    %c0_14 = arith.constant 0 : index
    %c0_15 = arith.constant 0 : index
    %28 = vector.load %arg6[%c0_14, %c0_15] : memref<1x4xf32, #tpu.memory_space<vmem>>, vector<1x4xf32>
    %cst_16 = arith.constant dense<0.000000e+00> : vector<8xf32>
    %29 = vector.multi_reduction <add>, %1, %cst_16 [1] : vector<8x4xf32> to vector<8xf32>
    %30 = vector.shape_cast %29 : vector<8xf32> to vector<8x1xf32>
    %cst_17 = arith.constant 4.000000e+00 : f32
    %31 = vector.broadcast %cst_17 : f32 to vector<8x1xf32>
    %32 = arith.divf %30, %31 : vector<8x1xf32>
    %33 = vector.broadcast %32 : vector<8x1xf32> to vector<8x4xf32>
    %34 = arith.subf %1, %33 : vector<8x4xf32>
    %35 = arith.mulf %34, %34 : vector<8x4xf32>
    %cst_18 = arith.constant dense<0.000000e+00> : vector<8xf32>
    %36 = vector.multi_reduction <add>, %35, %cst_18 [1] : vector<8x4xf32> to vector<8xf32>
    %37 = vector.shape_cast %36 : vector<8xf32> to vector<8x1xf32>
    %cst_19 = arith.constant 4.000000e+00 : f32
    %38 = vector.broadcast %cst_19 : f32 to vector<8x1xf32>
    %39 = arith.divf %37, %38 : vector<8x1xf32>
    %40 = vector.broadcast %32 : vector<8x1xf32> to vector<8x4xf32>
    %41 = arith.subf %1, %40 : vector<8x4xf32>
    %cst_20 = arith.constant 9.99999974E-6 : f32
    %42 = vector.broadcast %cst_20 : f32 to vector<8x1xf32>
    %43 = arith.addf %39, %42 : vector<8x1xf32>
    %44 = math.rsqrt %43 : vector<8x1xf32>
    %45 = vector.broadcast %44 : vector<8x1xf32> to vector<8x4xf32>
    %46 = arith.mulf %41, %45 : vector<8x4xf32>
    %47 = vector.broadcast %27 : vector<1x4xf32> to vector<8x4xf32>
    %48 = arith.mulf %46, %47 : vector<8x4xf32>
    %49 = vector.broadcast %28 : vector<1x4xf32> to vector<8x4xf32>
    %50 = arith.addf %48, %49 : vector<8x4xf32>
    %c0_21 = arith.constant 0 : index
    %c0_22 = arith.constant 0 : index
    %c0_23 = arith.constant 0 : index
    %51 = vector.load %arg7[%c0_21, %c0_22, %c0_23] : memref<1x32x50xf32, #tpu.memory_space<vmem>>, vector<1x32x50xf32>
    %c0_24 = arith.constant 0 : index
    %c0_25 = arith.constant 0 : index
    %c0_26 = arith.constant 0 : index
    %52 = vector.load %arg8[%c0_24, %c0_25, %c0_26] : memref<1x4x50xf32, #tpu.memory_space<vmem>>, vector<1x4x50xf32>
    %c0_27 = arith.constant 0 : index
    %c0_28 = arith.constant 0 : index
    %c0_29 = arith.constant 0 : index
    %53 = vector.load %arg9[%c0_27, %c0_28, %c0_29] : memref<1x4x50xf32, #tpu.memory_space<vmem>>, vector<1x4x50xf32>
    %c0_30 = arith.constant 0 : index
    %c0_31 = arith.constant 0 : index
    %c0_32 = arith.constant 0 : index
    %54 = vector.load %arg10[%c0_30, %c0_31, %c0_32] : memref<1x50x32xf32, #tpu.memory_space<vmem>>, vector<1x50x32xf32>
    %c0_33 = arith.constant 0 : index
    %c0_34 = arith.constant 0 : index
    %55 = vector.load %arg11[%c0_33, %c0_34] : memref<1x32xf32, #tpu.memory_space<vmem>>, vector<1x32xf32>
    %56 = vector.shape_cast %51 : vector<1x32x50xf32> to vector<32x50xf32>
    %cst_35 = arith.constant dense<0.000000e+00> : vector<64x50xf32>
    %57 = tpu.matmul %26, %56, %cst_35 {dimension_numbers = #tpu.dot_dimension_numbers<[1], [0], [0], [1], [0, 0, 1, 1], [], []>} : vector<64x32xf32>, vector<32x50xf32>, vector<64x50xf32> -> vector<64x50xf32>
    %cst_36 = arith.constant 0.141421363 : f32
    %58 = vector.broadcast %cst_36 : f32 to vector<64x50xf32>
    %59 = arith.mulf %57, %58 : vector<64x50xf32>
    %60 = vector.shape_cast %52 : vector<1x4x50xf32> to vector<4x50xf32>
    %cst_37 = arith.constant dense<0.000000e+00> : vector<8x50xf32>
    %61 = tpu.matmul %50, %60, %cst_37 {dimension_numbers = #tpu.dot_dimension_numbers<[1], [0], [0], [1], [0, 0, 1, 1], [], []>} : vector<8x4xf32>, vector<4x50xf32>, vector<8x50xf32> -> vector<8x50xf32>
    %62 = vector.shape_cast %53 : vector<1x4x50xf32> to vector<4x50xf32>
    %cst_38 = arith.constant dense<0.000000e+00> : vector<8x50xf32>
    %63 = tpu.matmul %50, %62, %cst_38 {dimension_numbers = #tpu.dot_dimension_numbers<[1], [0], [0], [1], [0, 0, 1, 1], [], []>} : vector<8x4xf32>, vector<4x50xf32>, vector<8x50xf32> -> vector<8x50xf32>
    %cst_39 = arith.constant dense<0.000000e+00> : vector<64x8xf32>
    %64 = tpu.matmul %59, %61, %cst_39 {dimension_numbers = #tpu.dot_dimension_numbers<[1], [1], [0], [0], [0, 0, 1, 0], [], []>} : vector<64x50xf32>, vector<8x50xf32>, vector<64x8xf32> -> vector<64x8xf32>
    %cst_40 = arith.constant dense<0xFF800000> : vector<64xf32>
    %65 = vector.multi_reduction <maximumf>, %64, %cst_40 [1] : vector<64x8xf32> to vector<64xf32>
    %66 = vector.shape_cast %65 : vector<64xf32> to vector<64x1xf32>
    %67 = vector.broadcast %66 : vector<64x1xf32> to vector<64x8xf32>
    %68 = arith.subf %64, %67 : vector<64x8xf32>
    %69 = math.exp %68 : vector<64x8xf32>
    %cst_41 = arith.constant dense<0.000000e+00> : vector<64xf32>
    %70 = vector.multi_reduction <add>, %69, %cst_41 [1] : vector<64x8xf32> to vector<64xf32>
    %71 = vector.shape_cast %70 : vector<64xf32> to vector<64x1xf32>
    %72 = tpu.reciprocal %71 {approx = true} : vector<64x1xf32> -> vector<64x1xf32>
    %73 = vector.broadcast %72 : vector<64x1xf32> to vector<64x8xf32>
    %74 = arith.mulf %69, %73 : vector<64x8xf32>
    %cst_42 = arith.constant dense<0.000000e+00> : vector<64x50xf32>
    %75 = tpu.matmul %74, %63, %cst_42 {dimension_numbers = #tpu.dot_dimension_numbers<[1], [0], [0], [1], [0, 0, 1, 1], [], []>} : vector<64x8xf32>, vector<8x50xf32>, vector<64x50xf32> -> vector<64x50xf32>
    %76 = vector.shape_cast %54 : vector<1x50x32xf32> to vector<50x32xf32>
    %cst_43 = arith.constant dense<0.000000e+00> : vector<64x32xf32>
    %77 = tpu.matmul %75, %76, %cst_43 {dimension_numbers = #tpu.dot_dimension_numbers<[1], [0], [0], [1], [0, 0, 1, 1], [], []>} : vector<64x50xf32>, vector<50x32xf32>, vector<64x32xf32> -> vector<64x32xf32>
    %78 = vector.broadcast %55 : vector<1x32xf32> to vector<64x32xf32>
    %79 = arith.addf %77, %78 : vector<64x32xf32>
    %80 = arith.addf %2, %79 : vector<64x32xf32>
    %c0_44 = arith.constant 0 : index
    %c0_45 = arith.constant 0 : index
    %81 = vector.load %arg12[%c0_44, %c0_45] : memref<1x32xf32, #tpu.memory_space<vmem>>, vector<1x32xf32>
    %c0_46 = arith.constant 0 : index
    %c0_47 = arith.constant 0 : index
    %82 = vector.load %arg13[%c0_46, %c0_47] : memref<1x32xf32, #tpu.memory_space<vmem>>, vector<1x32xf32>
    %c0_48 = arith.constant 0 : index
    %c0_49 = arith.constant 0 : index
    %83 = vector.load %arg14[%c0_48, %c0_49] : memref<32x128xf32, #tpu.memory_space<vmem>>, vector<32x128xf32>
    %c0_50 = arith.constant 0 : index
    %c0_51 = arith.constant 0 : index
    %84 = vector.load %arg15[%c0_50, %c0_51] : memref<1x128xf32, #tpu.memory_space<vmem>>, vector<1x128xf32>
    %c0_52 = arith.constant 0 : index
    %c0_53 = arith.constant 0 : index
    %85 = vector.load %arg16[%c0_52, %c0_53] : memref<32x128xf32, #tpu.memory_space<vmem>>, vector<32x128xf32>
    %c0_54 = arith.constant 0 : index
    %c0_55 = arith.constant 0 : index
    %86 = vector.load %arg17[%c0_54, %c0_55] : memref<1x128xf32, #tpu.memory_space<vmem>>, vector<1x128xf32>
    %c0_56 = arith.constant 0 : index
    %c0_57 = arith.constant 0 : index
    %87 = vector.load %arg18[%c0_56, %c0_57] : memref<128x32xf32, #tpu.memory_space<vmem>>, vector<128x32xf32>
    %c0_58 = arith.constant 0 : index
    %c0_59 = arith.constant 0 : index
    %88 = vector.load %arg19[%c0_58, %c0_59] : memref<1x32xf32, #tpu.memory_space<vmem>>, vector<1x32xf32>
    %cst_60 = arith.constant dense<0.000000e+00> : vector<64xf32>
    %89 = vector.multi_reduction <add>, %80, %cst_60 [1] : vector<64x32xf32> to vector<64xf32>
    %90 = vector.shape_cast %89 : vector<64xf32> to vector<64x1xf32>
    %cst_61 = arith.constant 3.200000e+01 : f32
    %91 = vector.broadcast %cst_61 : f32 to vector<64x1xf32>
    %92 = arith.divf %90, %91 : vector<64x1xf32>
    %93 = vector.broadcast %92 : vector<64x1xf32> to vector<64x32xf32>
    %94 = arith.subf %80, %93 : vector<64x32xf32>
    %95 = arith.mulf %94, %94 : vector<64x32xf32>
    %cst_62 = arith.constant dense<0.000000e+00> : vector<64xf32>
    %96 = vector.multi_reduction <add>, %95, %cst_62 [1] : vector<64x32xf32> to vector<64xf32>
    %97 = vector.shape_cast %96 : vector<64xf32> to vector<64x1xf32>
    %cst_63 = arith.constant 3.200000e+01 : f32
    %98 = vector.broadcast %cst_63 : f32 to vector<64x1xf32>
    %99 = arith.divf %97, %98 : vector<64x1xf32>
    %100 = vector.broadcast %92 : vector<64x1xf32> to vector<64x32xf32>
    %101 = arith.subf %80, %100 : vector<64x32xf32>
    %cst_64 = arith.constant 9.99999974E-6 : f32
    %102 = vector.broadcast %cst_64 : f32 to vector<64x1xf32>
    %103 = arith.addf %99, %102 : vector<64x1xf32>
    %104 = math.rsqrt %103 : vector<64x1xf32>
    %105 = vector.broadcast %104 : vector<64x1xf32> to vector<64x32xf32>
    %106 = arith.mulf %101, %105 : vector<64x32xf32>
    %107 = vector.broadcast %81 : vector<1x32xf32> to vector<64x32xf32>
    %108 = arith.mulf %106, %107 : vector<64x32xf32>
    %109 = vector.broadcast %82 : vector<1x32xf32> to vector<64x32xf32>
    %110 = arith.addf %108, %109 : vector<64x32xf32>
    %cst_65 = arith.constant dense<0.000000e+00> : vector<64x128xf32>
    %111 = tpu.matmul %110, %83, %cst_65 {dimension_numbers = #tpu.dot_dimension_numbers<[1], [0], [0], [1], [0, 0, 1, 1], [], []>} : vector<64x32xf32>, vector<32x128xf32>, vector<64x128xf32> -> vector<64x128xf32>
    %112 = vector.broadcast %84 : vector<1x128xf32> to vector<64x128xf32>
    %113 = arith.addf %111, %112 : vector<64x128xf32>
    %cst_66 = arith.constant dense<0.000000e+00> : vector<64x128xf32>
    %114 = tpu.matmul %110, %85, %cst_66 {dimension_numbers = #tpu.dot_dimension_numbers<[1], [0], [0], [1], [0, 0, 1, 1], [], []>} : vector<64x32xf32>, vector<32x128xf32>, vector<64x128xf32> -> vector<64x128xf32>
    %115 = vector.broadcast %86 : vector<1x128xf32> to vector<64x128xf32>
    %116 = arith.addf %114, %115 : vector<64x128xf32>
    %117 = arith.mulf %116, %116 : vector<64x128xf32>
    %118 = arith.mulf %116, %117 : vector<64x128xf32>
    %cst_67 = arith.constant 4.471500e-02 : f32
    %119 = vector.broadcast %cst_67 : f32 to vector<64x128xf32>
    %120 = arith.mulf %119, %118 : vector<64x128xf32>
    %121 = arith.addf %116, %120 : vector<64x128xf32>
    %cst_68 = arith.constant 0.797884583 : f32
    %122 = vector.broadcast %cst_68 : f32 to vector<64x128xf32>
    %123 = arith.mulf %122, %121 : vector<64x128xf32>
    %124 = math.tanh %123 : vector<64x128xf32>
    %cst_69 = arith.constant 1.000000e+00 : f32
    %125 = vector.broadcast %cst_69 : f32 to vector<64x128xf32>
    %126 = arith.addf %125, %124 : vector<64x128xf32>
    %cst_70 = arith.constant 5.000000e-01 : f32
    %127 = vector.broadcast %cst_70 : f32 to vector<64x128xf32>
    %128 = arith.mulf %127, %126 : vector<64x128xf32>
    %129 = arith.mulf %116, %128 : vector<64x128xf32>
    %130 = arith.mulf %113, %129 : vector<64x128xf32>
    %cst_71 = arith.constant dense<0.000000e+00> : vector<64x32xf32>
    %131 = tpu.matmul %130, %87, %cst_71 {dimension_numbers = #tpu.dot_dimension_numbers<[1], [0], [0], [1], [0, 0, 1, 1], [], []>} : vector<64x128xf32>, vector<128x32xf32>, vector<64x32xf32> -> vector<64x32xf32>
    %132 = vector.broadcast %88 : vector<1x32xf32> to vector<64x32xf32>
    %133 = arith.addf %131, %132 : vector<64x32xf32>
    %134 = arith.addf %80, %133 : vector<64x32xf32>
    %c0_72 = arith.constant 0 : index
    %c0_73 = arith.constant 0 : index
    %c0_74 = arith.constant 0 : index
    %135 = vector.load %arg20[%c0_72, %c0_73, %c0_74] : memref<1x1x32xf32, #tpu.memory_space<vmem>>, vector<1x1x32xf32>
    %136 = vector.shape_cast %135 : vector<1x1x32xf32> to vector<1x32xf32>
    %c0_75 = arith.constant 0 : index
    %c0_76 = arith.constant 0 : index
    %c0_77 = arith.constant 0 : index
    %137 = vector.load %arg21[%c0_75, %c0_76, %c0_77] : memref<1x1x32xf32, #tpu.memory_space<vmem>>, vector<1x1x32xf32>
    %138 = vector.shape_cast %137 : vector<1x1x32xf32> to vector<1x32xf32>
    %cst_78 = arith.constant dense<0.000000e+00> : vector<64xf32>
    %139 = vector.multi_reduction <add>, %134, %cst_78 [1] : vector<64x32xf32> to vector<64xf32>
    %140 = vector.shape_cast %139 : vector<64xf32> to vector<64x1xf32>
    %cst_79 = arith.constant 3.200000e+01 : f32
    %141 = vector.broadcast %cst_79 : f32 to vector<64x1xf32>
    %142 = arith.divf %140, %141 : vector<64x1xf32>
    %143 = vector.broadcast %142 : vector<64x1xf32> to vector<64x32xf32>
    %144 = arith.subf %134, %143 : vector<64x32xf32>
    %145 = arith.mulf %144, %144 : vector<64x32xf32>
    %cst_80 = arith.constant dense<0.000000e+00> : vector<64xf32>
    %146 = vector.multi_reduction <add>, %145, %cst_80 [1] : vector<64x32xf32> to vector<64xf32>
    %147 = vector.shape_cast %146 : vector<64xf32> to vector<64x1xf32>
    %cst_81 = arith.constant 3.200000e+01 : f32
    %148 = vector.broadcast %cst_81 : f32 to vector<64x1xf32>
    %149 = arith.divf %147, %148 : vector<64x1xf32>
    %150 = vector.broadcast %142 : vector<64x1xf32> to vector<64x32xf32>
    %151 = arith.subf %134, %150 : vector<64x32xf32>
    %cst_82 = arith.constant 9.99999974E-6 : f32
    %152 = vector.broadcast %cst_82 : f32 to vector<64x1xf32>
    %153 = arith.addf %149, %152 : vector<64x1xf32>
    %154 = math.rsqrt %153 : vector<64x1xf32>
    %155 = vector.broadcast %154 : vector<64x1xf32> to vector<64x32xf32>
    %156 = arith.mulf %151, %155 : vector<64x32xf32>
    %157 = vector.broadcast %136 : vector<1x32xf32> to vector<64x32xf32>
    %158 = arith.mulf %156, %157 : vector<64x32xf32>
    %159 = vector.broadcast %138 : vector<1x32xf32> to vector<64x32xf32>
    %160 = arith.addf %158, %159 : vector<64x32xf32>
    %c0_83 = arith.constant 0 : index
    %c0_84 = arith.constant 0 : index
    %c0_85 = arith.constant 0 : index
    %c0_86 = arith.constant 0 : index
    %161 = vector.load %arg22[%c0_83, %c0_84, %c0_85, %c0_86] : memref<1x8x32x50xf32, #tpu.memory_space<vmem>>, vector<1x8x32x50xf32>
    %162 = vector.shape_cast %161 : vector<1x8x32x50xf32> to vector<8x32x50xf32>
    %c0_87 = arith.constant 0 : index
    %c0_88 = arith.constant 0 : index
    %c0_89 = arith.constant 0 : index
    %c0_90 = arith.constant 0 : index
    %163 = vector.load %arg23[%c0_87, %c0_88, %c0_89, %c0_90] : memref<1x8x32x50xf32, #tpu.memory_space<vmem>>, vector<1x8x32x50xf32>
    %164 = vector.shape_cast %163 : vector<1x8x32x50xf32> to vector<8x32x50xf32>
    %c0_91 = arith.constant 0 : index
    %c0_92 = arith.constant 0 : index
    %c0_93 = arith.constant 0 : index
    %c0_94 = arith.constant 0 : index
    %165 = vector.load %arg24[%c0_91, %c0_92, %c0_93, %c0_94] : memref<1x8x32x50xf32, #tpu.memory_space<vmem>>, vector<1x8x32x50xf32>
    %166 = vector.shape_cast %165 : vector<1x8x32x50xf32> to vector<8x32x50xf32>
    %c0_95 = arith.constant 0 : index
    %c0_96 = arith.constant 0 : index
    %c0_97 = arith.constant 0 : index
    %c0_98 = arith.constant 0 : index
    %167 = vector.load %arg25[%c0_95, %c0_96, %c0_97, %c0_98] : memref<1x8x50x32xf32, #tpu.memory_space<vmem>>, vector<1x8x50x32xf32>
    %168 = vector.shape_cast %167 : vector<1x8x50x32xf32> to vector<8x50x32xf32>
    %c0_99 = arith.constant 0 : index
    %c0_100 = arith.constant 0 : index
    %c0_101 = arith.constant 0 : index
    %169 = vector.load %arg26[%c0_99, %c0_100, %c0_101] : memref<1x1x32xf32, #tpu.memory_space<vmem>>, vector<1x1x32xf32>
    %170 = vector.shape_cast %169 : vector<1x1x32xf32> to vector<1x32xf32>
    %171 = vector.extract_strided_slice %162 {offsets = [0, 0, 0], sizes = [1, 32, 50], strides = [1, 1, 1]} : vector<8x32x50xf32> to vector<1x32x50xf32>
    %172 = vector.shape_cast %171 : vector<1x32x50xf32> to vector<32x50xf32>
    %cst_102 = arith.constant dense<0.000000e+00> : vector<64x50xf32>
    %173 = tpu.matmul %160, %172, %cst_102 {dimension_numbers = #tpu.dot_dimension_numbers<[1], [0], [0], [1], [0, 0, 1, 1], [], []>} : vector<64x32xf32>, vector<32x50xf32>, vector<64x50xf32> -> vector<64x50xf32>
    %cst_103 = arith.constant 0.141421363 : f32
    %174 = vector.broadcast %cst_103 : f32 to vector<64x50xf32>
    %175 = arith.mulf %173, %174 : vector<64x50xf32>
    %176 = vector.extract_strided_slice %164 {offsets = [0, 0, 0], sizes = [1, 32, 50], strides = [1, 1, 1]} : vector<8x32x50xf32> to vector<1x32x50xf32>
    %177 = vector.shape_cast %176 : vector<1x32x50xf32> to vector<32x50xf32>
    %cst_104 = arith.constant dense<0.000000e+00> : vector<64x50xf32>
    %178 = tpu.matmul %160, %177, %cst_104 {dimension_numbers = #tpu.dot_dimension_numbers<[1], [0], [0], [1], [0, 0, 1, 1], [], []>} : vector<64x32xf32>, vector<32x50xf32>, vector<64x50xf32> -> vector<64x50xf32>
    %179 = vector.extract_strided_slice %166 {offsets = [0, 0, 0], sizes = [1, 32, 50], strides = [1, 1, 1]} : vector<8x32x50xf32> to vector<1x32x50xf32>
    %180 = vector.shape_cast %179 : vector<1x32x50xf32> to vector<32x50xf32>
    %cst_105 = arith.constant dense<0.000000e+00> : vector<64x50xf32>
    %181 = tpu.matmul %160, %180, %cst_105 {dimension_numbers = #tpu.dot_dimension_numbers<[1], [0], [0], [1], [0, 0, 1, 1], [], []>} : vector<64x32xf32>, vector<32x50xf32>, vector<64x50xf32> -> vector<64x50xf32>
    %cst_106 = arith.constant dense<0.000000e+00> : vector<64x64xf32>
    %182 = tpu.matmul %175, %178, %cst_106 {dimension_numbers = #tpu.dot_dimension_numbers<[1], [1], [0], [0], [0, 0, 1, 0], [], []>} : vector<64x50xf32>, vector<64x50xf32>, vector<64x64xf32> -> vector<64x64xf32>
    %cst_107 = arith.constant dense<0xFF800000> : vector<64xf32>
    %183 = vector.multi_reduction <maximumf>, %182, %cst_107 [1] : vector<64x64xf32> to vector<64xf32>
    %184 = vector.shape_cast %183 : vector<64xf32> to vector<64x1xf32>
    %185 = vector.broadcast %184 : vector<64x1xf32> to vector<64x64xf32>
    %186 = arith.subf %182, %185 : vector<64x64xf32>
    %187 = math.exp %186 : vector<64x64xf32>
    %cst_108 = arith.constant dense<0.000000e+00> : vector<64xf32>
    %188 = vector.multi_reduction <add>, %187, %cst_108 [1] : vector<64x64xf32> to vector<64xf32>
    %189 = vector.shape_cast %188 : vector<64xf32> to vector<64x1xf32>
    %190 = tpu.reciprocal %189 {approx = true} : vector<64x1xf32> -> vector<64x1xf32>
    %191 = vector.broadcast %190 : vector<64x1xf32> to vector<64x64xf32>
    %192 = arith.mulf %187, %191 : vector<64x64xf32>
    %cst_109 = arith.constant dense<0.000000e+00> : vector<64x50xf32>
    %193 = tpu.matmul %192, %181, %cst_109 {dimension_numbers = #tpu.dot_dimension_numbers<[1], [0], [0], [1], [0, 0, 1, 1], [], []>} : vector<64x64xf32>, vector<64x50xf32>, vector<64x50xf32> -> vector<64x50xf32>
    %194 = vector.extract_strided_slice %168 {offsets = [0, 0, 0], sizes = [1, 50, 32], strides = [1, 1, 1]} : vector<8x50x32xf32> to vector<1x50x32xf32>
    %195 = vector.shape_cast %194 : vector<1x50x32xf32> to vector<50x32xf32>
    %cst_110 = arith.constant dense<0.000000e+00> : vector<64x32xf32>
    %196 = tpu.matmul %193, %195, %cst_110 {dimension_numbers = #tpu.dot_dimension_numbers<[1], [0], [0], [1], [0, 0, 1, 1], [], []>} : vector<64x50xf32>, vector<50x32xf32>, vector<64x32xf32> -> vector<64x32xf32>
    %197 = vector.extract_strided_slice %162 {offsets = [1, 0, 0], sizes = [1, 32, 50], strides = [1, 1, 1]} : vector<8x32x50xf32> to vector<1x32x50xf32>
    %198 = vector.shape_cast %197 : vector<1x32x50xf32> to vector<32x50xf32>
    %cst_111 = arith.constant dense<0.000000e+00> : vector<64x50xf32>
    %199 = tpu.matmul %160, %198, %cst_111 {dimension_numbers = #tpu.dot_dimension_numbers<[1], [0], [0], [1], [0, 0, 1, 1], [], []>} : vector<64x32xf32>, vector<32x50xf32>, vector<64x50xf32> -> vector<64x50xf32>
    %cst_112 = arith.constant 0.141421363 : f32
    %200 = vector.broadcast %cst_112 : f32 to vector<64x50xf32>
    %201 = arith.mulf %199, %200 : vector<64x50xf32>
    %202 = vector.extract_strided_slice %164 {offsets = [1, 0, 0], sizes = [1, 32, 50], strides = [1, 1, 1]} : vector<8x32x50xf32> to vector<1x32x50xf32>
    %203 = vector.shape_cast %202 : vector<1x32x50xf32> to vector<32x50xf32>
    %cst_113 = arith.constant dense<0.000000e+00> : vector<64x50xf32>
    %204 = tpu.matmul %160, %203, %cst_113 {dimension_numbers = #tpu.dot_dimension_numbers<[1], [0], [0], [1], [0, 0, 1, 1], [], []>} : vector<64x32xf32>, vector<32x50xf32>, vector<64x50xf32> -> vector<64x50xf32>
    %205 = vector.extract_strided_slice %166 {offsets = [1, 0, 0], sizes = [1, 32, 50], strides = [1, 1, 1]} : vector<8x32x50xf32> to vector<1x32x50xf32>
    %206 = vector.shape_cast %205 : vector<1x32x50xf32> to vector<32x50xf32>
    %cst_114 = arith.constant dense<0.000000e+00> : vector<64x50xf32>
    %207 = tpu.matmul %160, %206, %cst_114 {dimension_numbers = #tpu.dot_dimension_numbers<[1], [0], [0], [1], [0, 0, 1, 1], [], []>} : vector<64x32xf32>, vector<32x50xf32>, vector<64x50xf32> -> vector<64x50xf32>
    %cst_115 = arith.constant dense<0.000000e+00> : vector<64x64xf32>
    %208 = tpu.matmul %201, %204, %cst_115 {dimension_numbers = #tpu.dot_dimension_numbers<[1], [1], [0], [0], [0, 0, 1, 0], [], []>} : vector<64x50xf32>, vector<64x50xf32>, vector<64x64xf32> -> vector<64x64xf32>
    %cst_116 = arith.constant dense<0xFF800000> : vector<64xf32>
    %209 = vector.multi_reduction <maximumf>, %208, %cst_116 [1] : vector<64x64xf32> to vector<64xf32>
    %210 = vector.shape_cast %209 : vector<64xf32> to vector<64x1xf32>
    %211 = vector.broadcast %210 : vector<64x1xf32> to vector<64x64xf32>
    %212 = arith.subf %208, %211 : vector<64x64xf32>
    %213 = math.exp %212 : vector<64x64xf32>
    %cst_117 = arith.constant dense<0.000000e+00> : vector<64xf32>
    %214 = vector.multi_reduction <add>, %213, %cst_117 [1] : vector<64x64xf32> to vector<64xf32>
    %215 = vector.shape_cast %214 : vector<64xf32> to vector<64x1xf32>
    %216 = tpu.reciprocal %215 {approx = true} : vector<64x1xf32> -> vector<64x1xf32>
    %217 = vector.broadcast %216 : vector<64x1xf32> to vector<64x64xf32>
    %218 = arith.mulf %213, %217 : vector<64x64xf32>
    %cst_118 = arith.constant dense<0.000000e+00> : vector<64x50xf32>
    %219 = tpu.matmul %218, %207, %cst_118 {dimension_numbers = #tpu.dot_dimension_numbers<[1], [0], [0], [1], [0, 0, 1, 1], [], []>} : vector<64x64xf32>, vector<64x50xf32>, vector<64x50xf32> -> vector<64x50xf32>
    %220 = vector.extract_strided_slice %168 {offsets = [1, 0, 0], sizes = [1, 50, 32], strides = [1, 1, 1]} : vector<8x50x32xf32> to vector<1x50x32xf32>
    %221 = vector.shape_cast %220 : vector<1x50x32xf32> to vector<50x32xf32>
    %cst_119 = arith.constant dense<0.000000e+00> : vector<64x32xf32>
    %222 = tpu.matmul %219, %221, %cst_119 {dimension_numbers = #tpu.dot_dimension_numbers<[1], [0], [0], [1], [0, 0, 1, 1], [], []>} : vector<64x50xf32>, vector<50x32xf32>, vector<64x32xf32> -> vector<64x32xf32>
    %223 = arith.addf %196, %222 : vector<64x32xf32>
    %224 = vector.extract_strided_slice %162 {offsets = [2, 0, 0], sizes = [1, 32, 50], strides = [1, 1, 1]} : vector<8x32x50xf32> to vector<1x32x50xf32>
    %225 = vector.shape_cast %224 : vector<1x32x50xf32> to vector<32x50xf32>
    %cst_120 = arith.constant dense<0.000000e+00> : vector<64x50xf32>
    %226 = tpu.matmul %160, %225, %cst_120 {dimension_numbers = #tpu.dot_dimension_numbers<[1], [0], [0], [1], [0, 0, 1, 1], [], []>} : vector<64x32xf32>, vector<32x50xf32>, vector<64x50xf32> -> vector<64x50xf32>
    %cst_121 = arith.constant 0.141421363 : f32
    %227 = vector.broadcast %cst_121 : f32 to vector<64x50xf32>
    %228 = arith.mulf %226, %227 : vector<64x50xf32>
    %229 = vector.extract_strided_slice %164 {offsets = [2, 0, 0], sizes = [1, 32, 50], strides = [1, 1, 1]} : vector<8x32x50xf32> to vector<1x32x50xf32>
    %230 = vector.shape_cast %229 : vector<1x32x50xf32> to vector<32x50xf32>
    %cst_122 = arith.constant dense<0.000000e+00> : vector<64x50xf32>
    %231 = tpu.matmul %160, %230, %cst_122 {dimension_numbers = #tpu.dot_dimension_numbers<[1], [0], [0], [1], [0, 0, 1, 1], [], []>} : vector<64x32xf32>, vector<32x50xf32>, vector<64x50xf32> -> vector<64x50xf32>
    %232 = vector.extract_strided_slice %166 {offsets = [2, 0, 0], sizes = [1, 32, 50], strides = [1, 1, 1]} : vector<8x32x50xf32> to vector<1x32x50xf32>
    %233 = vector.shape_cast %232 : vector<1x32x50xf32> to vector<32x50xf32>
    %cst_123 = arith.constant dense<0.000000e+00> : vector<64x50xf32>
    %234 = tpu.matmul %160, %233, %cst_123 {dimension_numbers = #tpu.dot_dimension_numbers<[1], [0], [0], [1], [0, 0, 1, 1], [], []>} : vector<64x32xf32>, vector<32x50xf32>, vector<64x50xf32> -> vector<64x50xf32>
    %cst_124 = arith.constant dense<0.000000e+00> : vector<64x64xf32>
    %235 = tpu.matmul %228, %231, %cst_124 {dimension_numbers = #tpu.dot_dimension_numbers<[1], [1], [0], [0], [0, 0, 1, 0], [], []>} : vector<64x50xf32>, vector<64x50xf32>, vector<64x64xf32> -> vector<64x64xf32>
    %cst_125 = arith.constant dense<0xFF800000> : vector<64xf32>
    %236 = vector.multi_reduction <maximumf>, %235, %cst_125 [1] : vector<64x64xf32> to vector<64xf32>
    %237 = vector.shape_cast %236 : vector<64xf32> to vector<64x1xf32>
    %238 = vector.broadcast %237 : vector<64x1xf32> to vector<64x64xf32>
    %239 = arith.subf %235, %238 : vector<64x64xf32>
    %240 = math.exp %239 : vector<64x64xf32>
    %cst_126 = arith.constant dense<0.000000e+00> : vector<64xf32>
    %241 = vector.multi_reduction <add>, %240, %cst_126 [1] : vector<64x64xf32> to vector<64xf32>
    %242 = vector.shape_cast %241 : vector<64xf32> to vector<64x1xf32>
    %243 = tpu.reciprocal %242 {approx = true} : vector<64x1xf32> -> vector<64x1xf32>
    %244 = vector.broadcast %243 : vector<64x1xf32> to vector<64x64xf32>
    %245 = arith.mulf %240, %244 : vector<64x64xf32>
    %cst_127 = arith.constant dense<0.000000e+00> : vector<64x50xf32>
    %246 = tpu.matmul %245, %234, %cst_127 {dimension_numbers = #tpu.dot_dimension_numbers<[1], [0], [0], [1], [0, 0, 1, 1], [], []>} : vector<64x64xf32>, vector<64x50xf32>, vector<64x50xf32> -> vector<64x50xf32>
    %247 = vector.extract_strided_slice %168 {offsets = [2, 0, 0], sizes = [1, 50, 32], strides = [1, 1, 1]} : vector<8x50x32xf32> to vector<1x50x32xf32>
    %248 = vector.shape_cast %247 : vector<1x50x32xf32> to vector<50x32xf32>
    %cst_128 = arith.constant dense<0.000000e+00> : vector<64x32xf32>
    %249 = tpu.matmul %246, %248, %cst_128 {dimension_numbers = #tpu.dot_dimension_numbers<[1], [0], [0], [1], [0, 0, 1, 1], [], []>} : vector<64x50xf32>, vector<50x32xf32>, vector<64x32xf32> -> vector<64x32xf32>
    %250 = arith.addf %223, %249 : vector<64x32xf32>
    %251 = vector.extract_strided_slice %162 {offsets = [3, 0, 0], sizes = [1, 32, 50], strides = [1, 1, 1]} : vector<8x32x50xf32> to vector<1x32x50xf32>
    %252 = vector.shape_cast %251 : vector<1x32x50xf32> to vector<32x50xf32>
    %cst_129 = arith.constant dense<0.000000e+00> : vector<64x50xf32>
    %253 = tpu.matmul %160, %252, %cst_129 {dimension_numbers = #tpu.dot_dimension_numbers<[1], [0], [0], [1], [0, 0, 1, 1], [], []>} : vector<64x32xf32>, vector<32x50xf32>, vector<64x50xf32> -> vector<64x50xf32>
    %cst_130 = arith.constant 0.141421363 : f32
    %254 = vector.broadcast %cst_130 : f32 to vector<64x50xf32>
    %255 = arith.mulf %253, %254 : vector<64x50xf32>
    %256 = vector.extract_strided_slice %164 {offsets = [3, 0, 0], sizes = [1, 32, 50], strides = [1, 1, 1]} : vector<8x32x50xf32> to vector<1x32x50xf32>
    %257 = vector.shape_cast %256 : vector<1x32x50xf32> to vector<32x50xf32>
    %cst_131 = arith.constant dense<0.000000e+00> : vector<64x50xf32>
    %258 = tpu.matmul %160, %257, %cst_131 {dimension_numbers = #tpu.dot_dimension_numbers<[1], [0], [0], [1], [0, 0, 1, 1], [], []>} : vector<64x32xf32>, vector<32x50xf32>, vector<64x50xf32> -> vector<64x50xf32>
    %259 = vector.extract_strided_slice %166 {offsets = [3, 0, 0], sizes = [1, 32, 50], strides = [1, 1, 1]} : vector<8x32x50xf32> to vector<1x32x50xf32>
    %260 = vector.shape_cast %259 : vector<1x32x50xf32> to vector<32x50xf32>
    %cst_132 = arith.constant dense<0.000000e+00> : vector<64x50xf32>
    %261 = tpu.matmul %160, %260, %cst_132 {dimension_numbers = #tpu.dot_dimension_numbers<[1], [0], [0], [1], [0, 0, 1, 1], [], []>} : vector<64x32xf32>, vector<32x50xf32>, vector<64x50xf32> -> vector<64x50xf32>
    %cst_133 = arith.constant dense<0.000000e+00> : vector<64x64xf32>
    %262 = tpu.matmul %255, %258, %cst_133 {dimension_numbers = #tpu.dot_dimension_numbers<[1], [1], [0], [0], [0, 0, 1, 0], [], []>} : vector<64x50xf32>, vector<64x50xf32>, vector<64x64xf32> -> vector<64x64xf32>
    %cst_134 = arith.constant dense<0xFF800000> : vector<64xf32>
    %263 = vector.multi_reduction <maximumf>, %262, %cst_134 [1] : vector<64x64xf32> to vector<64xf32>
    %264 = vector.shape_cast %263 : vector<64xf32> to vector<64x1xf32>
    %265 = vector.broadcast %264 : vector<64x1xf32> to vector<64x64xf32>
    %266 = arith.subf %262, %265 : vector<64x64xf32>
    %267 = math.exp %266 : vector<64x64xf32>
    %cst_135 = arith.constant dense<0.000000e+00> : vector<64xf32>
    %268 = vector.multi_reduction <add>, %267, %cst_135 [1] : vector<64x64xf32> to vector<64xf32>
    %269 = vector.shape_cast %268 : vector<64xf32> to vector<64x1xf32>
    %270 = tpu.reciprocal %269 {approx = true} : vector<64x1xf32> -> vector<64x1xf32>
    %271 = vector.broadcast %270 : vector<64x1xf32> to vector<64x64xf32>
    %272 = arith.mulf %267, %271 : vector<64x64xf32>
    %cst_136 = arith.constant dense<0.000000e+00> : vector<64x50xf32>
    %273 = tpu.matmul %272, %261, %cst_136 {dimension_numbers = #tpu.dot_dimension_numbers<[1], [0], [0], [1], [0, 0, 1, 1], [], []>} : vector<64x64xf32>, vector<64x50xf32>, vector<64x50xf32> -> vector<64x50xf32>
    %274 = vector.extract_strided_slice %168 {offsets = [3, 0, 0], sizes = [1, 50, 32], strides = [1, 1, 1]} : vector<8x50x32xf32> to vector<1x50x32xf32>
    %275 = vector.shape_cast %274 : vector<1x50x32xf32> to vector<50x32xf32>
    %cst_137 = arith.constant dense<0.000000e+00> : vector<64x32xf32>
    %276 = tpu.matmul %273, %275, %cst_137 {dimension_numbers = #tpu.dot_dimension_numbers<[1], [0], [0], [1], [0, 0, 1, 1], [], []>} : vector<64x50xf32>, vector<50x32xf32>, vector<64x32xf32> -> vector<64x32xf32>
    %277 = arith.addf %250, %276 : vector<64x32xf32>
    %278 = vector.extract_strided_slice %162 {offsets = [4, 0, 0], sizes = [1, 32, 50], strides = [1, 1, 1]} : vector<8x32x50xf32> to vector<1x32x50xf32>
    %279 = vector.shape_cast %278 : vector<1x32x50xf32> to vector<32x50xf32>
    %cst_138 = arith.constant dense<0.000000e+00> : vector<64x50xf32>
    %280 = tpu.matmul %160, %279, %cst_138 {dimension_numbers = #tpu.dot_dimension_numbers<[1], [0], [0], [1], [0, 0, 1, 1], [], []>} : vector<64x32xf32>, vector<32x50xf32>, vector<64x50xf32> -> vector<64x50xf32>
    %cst_139 = arith.constant 0.141421363 : f32
    %281 = vector.broadcast %cst_139 : f32 to vector<64x50xf32>
    %282 = arith.mulf %280, %281 : vector<64x50xf32>
    %283 = vector.extract_strided_slice %164 {offsets = [4, 0, 0], sizes = [1, 32, 50], strides = [1, 1, 1]} : vector<8x32x50xf32> to vector<1x32x50xf32>
    %284 = vector.shape_cast %283 : vector<1x32x50xf32> to vector<32x50xf32>
    %cst_140 = arith.constant dense<0.000000e+00> : vector<64x50xf32>
    %285 = tpu.matmul %160, %284, %cst_140 {dimension_numbers = #tpu.dot_dimension_numbers<[1], [0], [0], [1], [0, 0, 1, 1], [], []>} : vector<64x32xf32>, vector<32x50xf32>, vector<64x50xf32> -> vector<64x50xf32>
    %286 = vector.extract_strided_slice %166 {offsets = [4, 0, 0], sizes = [1, 32, 50], strides = [1, 1, 1]} : vector<8x32x50xf32> to vector<1x32x50xf32>
    %287 = vector.shape_cast %286 : vector<1x32x50xf32> to vector<32x50xf32>
    %cst_141 = arith.constant dense<0.000000e+00> : vector<64x50xf32>
    %288 = tpu.matmul %160, %287, %cst_141 {dimension_numbers = #tpu.dot_dimension_numbers<[1], [0], [0], [1], [0, 0, 1, 1], [], []>} : vector<64x32xf32>, vector<32x50xf32>, vector<64x50xf32> -> vector<64x50xf32>
    %cst_142 = arith.constant dense<0.000000e+00> : vector<64x64xf32>
    %289 = tpu.matmul %282, %285, %cst_142 {dimension_numbers = #tpu.dot_dimension_numbers<[1], [1], [0], [0], [0, 0, 1, 0], [], []>} : vector<64x50xf32>, vector<64x50xf32>, vector<64x64xf32> -> vector<64x64xf32>
    %cst_143 = arith.constant dense<0xFF800000> : vector<64xf32>
    %290 = vector.multi_reduction <maximumf>, %289, %cst_143 [1] : vector<64x64xf32> to vector<64xf32>
    %291 = vector.shape_cast %290 : vector<64xf32> to vector<64x1xf32>
    %292 = vector.broadcast %291 : vector<64x1xf32> to vector<64x64xf32>
    %293 = arith.subf %289, %292 : vector<64x64xf32>
    %294 = math.exp %293 : vector<64x64xf32>
    %cst_144 = arith.constant dense<0.000000e+00> : vector<64xf32>
    %295 = vector.multi_reduction <add>, %294, %cst_144 [1] : vector<64x64xf32> to vector<64xf32>
    %296 = vector.shape_cast %295 : vector<64xf32> to vector<64x1xf32>
    %297 = tpu.reciprocal %296 {approx = true} : vector<64x1xf32> -> vector<64x1xf32>
    %298 = vector.broadcast %297 : vector<64x1xf32> to vector<64x64xf32>
    %299 = arith.mulf %294, %298 : vector<64x64xf32>
    %cst_145 = arith.constant dense<0.000000e+00> : vector<64x50xf32>
    %300 = tpu.matmul %299, %288, %cst_145 {dimension_numbers = #tpu.dot_dimension_numbers<[1], [0], [0], [1], [0, 0, 1, 1], [], []>} : vector<64x64xf32>, vector<64x50xf32>, vector<64x50xf32> -> vector<64x50xf32>
    %301 = vector.extract_strided_slice %168 {offsets = [4, 0, 0], sizes = [1, 50, 32], strides = [1, 1, 1]} : vector<8x50x32xf32> to vector<1x50x32xf32>
    %302 = vector.shape_cast %301 : vector<1x50x32xf32> to vector<50x32xf32>
    %cst_146 = arith.constant dense<0.000000e+00> : vector<64x32xf32>
    %303 = tpu.matmul %300, %302, %cst_146 {dimension_numbers = #tpu.dot_dimension_numbers<[1], [0], [0], [1], [0, 0, 1, 1], [], []>} : vector<64x50xf32>, vector<50x32xf32>, vector<64x32xf32> -> vector<64x32xf32>
    %304 = arith.addf %277, %303 : vector<64x32xf32>
    %305 = vector.extract_strided_slice %162 {offsets = [5, 0, 0], sizes = [1, 32, 50], strides = [1, 1, 1]} : vector<8x32x50xf32> to vector<1x32x50xf32>
    %306 = vector.shape_cast %305 : vector<1x32x50xf32> to vector<32x50xf32>
    %cst_147 = arith.constant dense<0.000000e+00> : vector<64x50xf32>
    %307 = tpu.matmul %160, %306, %cst_147 {dimension_numbers = #tpu.dot_dimension_numbers<[1], [0], [0], [1], [0, 0, 1, 1], [], []>} : vector<64x32xf32>, vector<32x50xf32>, vector<64x50xf32> -> vector<64x50xf32>
    %cst_148 = arith.constant 0.141421363 : f32
    %308 = vector.broadcast %cst_148 : f32 to vector<64x50xf32>
    %309 = arith.mulf %307, %308 : vector<64x50xf32>
    %310 = vector.extract_strided_slice %164 {offsets = [5, 0, 0], sizes = [1, 32, 50], strides = [1, 1, 1]} : vector<8x32x50xf32> to vector<1x32x50xf32>
    %311 = vector.shape_cast %310 : vector<1x32x50xf32> to vector<32x50xf32>
    %cst_149 = arith.constant dense<0.000000e+00> : vector<64x50xf32>
    %312 = tpu.matmul %160, %311, %cst_149 {dimension_numbers = #tpu.dot_dimension_numbers<[1], [0], [0], [1], [0, 0, 1, 1], [], []>} : vector<64x32xf32>, vector<32x50xf32>, vector<64x50xf32> -> vector<64x50xf32>
    %313 = vector.extract_strided_slice %166 {offsets = [5, 0, 0], sizes = [1, 32, 50], strides = [1, 1, 1]} : vector<8x32x50xf32> to vector<1x32x50xf32>
    %314 = vector.shape_cast %313 : vector<1x32x50xf32> to vector<32x50xf32>
    %cst_150 = arith.constant dense<0.000000e+00> : vector<64x50xf32>
    %315 = tpu.matmul %160, %314, %cst_150 {dimension_numbers = #tpu.dot_dimension_numbers<[1], [0], [0], [1], [0, 0, 1, 1], [], []>} : vector<64x32xf32>, vector<32x50xf32>, vector<64x50xf32> -> vector<64x50xf32>
    %cst_151 = arith.constant dense<0.000000e+00> : vector<64x64xf32>
    %316 = tpu.matmul %309, %312, %cst_151 {dimension_numbers = #tpu.dot_dimension_numbers<[1], [1], [0], [0], [0, 0, 1, 0], [], []>} : vector<64x50xf32>, vector<64x50xf32>, vector<64x64xf32> -> vector<64x64xf32>
    %cst_152 = arith.constant dense<0xFF800000> : vector<64xf32>
    %317 = vector.multi_reduction <maximumf>, %316, %cst_152 [1] : vector<64x64xf32> to vector<64xf32>
    %318 = vector.shape_cast %317 : vector<64xf32> to vector<64x1xf32>
    %319 = vector.broadcast %318 : vector<64x1xf32> to vector<64x64xf32>
    %320 = arith.subf %316, %319 : vector<64x64xf32>
    %321 = math.exp %320 : vector<64x64xf32>
    %cst_153 = arith.constant dense<0.000000e+00> : vector<64xf32>
    %322 = vector.multi_reduction <add>, %321, %cst_153 [1] : vector<64x64xf32> to vector<64xf32>
    %323 = vector.shape_cast %322 : vector<64xf32> to vector<64x1xf32>
    %324 = tpu.reciprocal %323 {approx = true} : vector<64x1xf32> -> vector<64x1xf32>
    %325 = vector.broadcast %324 : vector<64x1xf32> to vector<64x64xf32>
    %326 = arith.mulf %321, %325 : vector<64x64xf32>
    %cst_154 = arith.constant dense<0.000000e+00> : vector<64x50xf32>
    %327 = tpu.matmul %326, %315, %cst_154 {dimension_numbers = #tpu.dot_dimension_numbers<[1], [0], [0], [1], [0, 0, 1, 1], [], []>} : vector<64x64xf32>, vector<64x50xf32>, vector<64x50xf32> -> vector<64x50xf32>
    %328 = vector.extract_strided_slice %168 {offsets = [5, 0, 0], sizes = [1, 50, 32], strides = [1, 1, 1]} : vector<8x50x32xf32> to vector<1x50x32xf32>
    %329 = vector.shape_cast %328 : vector<1x50x32xf32> to vector<50x32xf32>
    %cst_155 = arith.constant dense<0.000000e+00> : vector<64x32xf32>
    %330 = tpu.matmul %327, %329, %cst_155 {dimension_numbers = #tpu.dot_dimension_numbers<[1], [0], [0], [1], [0, 0, 1, 1], [], []>} : vector<64x50xf32>, vector<50x32xf32>, vector<64x32xf32> -> vector<64x32xf32>
    %331 = arith.addf %304, %330 : vector<64x32xf32>
    %332 = vector.extract_strided_slice %162 {offsets = [6, 0, 0], sizes = [1, 32, 50], strides = [1, 1, 1]} : vector<8x32x50xf32> to vector<1x32x50xf32>
    %333 = vector.shape_cast %332 : vector<1x32x50xf32> to vector<32x50xf32>
    %cst_156 = arith.constant dense<0.000000e+00> : vector<64x50xf32>
    %334 = tpu.matmul %160, %333, %cst_156 {dimension_numbers = #tpu.dot_dimension_numbers<[1], [0], [0], [1], [0, 0, 1, 1], [], []>} : vector<64x32xf32>, vector<32x50xf32>, vector<64x50xf32> -> vector<64x50xf32>
    %cst_157 = arith.constant 0.141421363 : f32
    %335 = vector.broadcast %cst_157 : f32 to vector<64x50xf32>
    %336 = arith.mulf %334, %335 : vector<64x50xf32>
    %337 = vector.extract_strided_slice %164 {offsets = [6, 0, 0], sizes = [1, 32, 50], strides = [1, 1, 1]} : vector<8x32x50xf32> to vector<1x32x50xf32>
    %338 = vector.shape_cast %337 : vector<1x32x50xf32> to vector<32x50xf32>
    %cst_158 = arith.constant dense<0.000000e+00> : vector<64x50xf32>
    %339 = tpu.matmul %160, %338, %cst_158 {dimension_numbers = #tpu.dot_dimension_numbers<[1], [0], [0], [1], [0, 0, 1, 1], [], []>} : vector<64x32xf32>, vector<32x50xf32>, vector<64x50xf32> -> vector<64x50xf32>
    %340 = vector.extract_strided_slice %166 {offsets = [6, 0, 0], sizes = [1, 32, 50], strides = [1, 1, 1]} : vector<8x32x50xf32> to vector<1x32x50xf32>
    %341 = vector.shape_cast %340 : vector<1x32x50xf32> to vector<32x50xf32>
    %cst_159 = arith.constant dense<0.000000e+00> : vector<64x50xf32>
    %342 = tpu.matmul %160, %341, %cst_159 {dimension_numbers = #tpu.dot_dimension_numbers<[1], [0], [0], [1], [0, 0, 1, 1], [], []>} : vector<64x32xf32>, vector<32x50xf32>, vector<64x50xf32> -> vector<64x50xf32>
    %cst_160 = arith.constant dense<0.000000e+00> : vector<64x64xf32>
    %343 = tpu.matmul %336, %339, %cst_160 {dimension_numbers = #tpu.dot_dimension_numbers<[1], [1], [0], [0], [0, 0, 1, 0], [], []>} : vector<64x50xf32>, vector<64x50xf32>, vector<64x64xf32> -> vector<64x64xf32>
    %cst_161 = arith.constant dense<0xFF800000> : vector<64xf32>
    %344 = vector.multi_reduction <maximumf>, %343, %cst_161 [1] : vector<64x64xf32> to vector<64xf32>
    %345 = vector.shape_cast %344 : vector<64xf32> to vector<64x1xf32>
    %346 = vector.broadcast %345 : vector<64x1xf32> to vector<64x64xf32>
    %347 = arith.subf %343, %346 : vector<64x64xf32>
    %348 = math.exp %347 : vector<64x64xf32>
    %cst_162 = arith.constant dense<0.000000e+00> : vector<64xf32>
    %349 = vector.multi_reduction <add>, %348, %cst_162 [1] : vector<64x64xf32> to vector<64xf32>
    %350 = vector.shape_cast %349 : vector<64xf32> to vector<64x1xf32>
    %351 = tpu.reciprocal %350 {approx = true} : vector<64x1xf32> -> vector<64x1xf32>
    %352 = vector.broadcast %351 : vector<64x1xf32> to vector<64x64xf32>
    %353 = arith.mulf %348, %352 : vector<64x64xf32>
    %cst_163 = arith.constant dense<0.000000e+00> : vector<64x50xf32>
    %354 = tpu.matmul %353, %342, %cst_163 {dimension_numbers = #tpu.dot_dimension_numbers<[1], [0], [0], [1], [0, 0, 1, 1], [], []>} : vector<64x64xf32>, vector<64x50xf32>, vector<64x50xf32> -> vector<64x50xf32>
    %355 = vector.extract_strided_slice %168 {offsets = [6, 0, 0], sizes = [1, 50, 32], strides = [1, 1, 1]} : vector<8x50x32xf32> to vector<1x50x32xf32>
    %356 = vector.shape_cast %355 : vector<1x50x32xf32> to vector<50x32xf32>
    %cst_164 = arith.constant dense<0.000000e+00> : vector<64x32xf32>
    %357 = tpu.matmul %354, %356, %cst_164 {dimension_numbers = #tpu.dot_dimension_numbers<[1], [0], [0], [1], [0, 0, 1, 1], [], []>} : vector<64x50xf32>, vector<50x32xf32>, vector<64x32xf32> -> vector<64x32xf32>
    %358 = arith.addf %331, %357 : vector<64x32xf32>
    %359 = vector.extract_strided_slice %162 {offsets = [7, 0, 0], sizes = [1, 32, 50], strides = [1, 1, 1]} : vector<8x32x50xf32> to vector<1x32x50xf32>
    %360 = vector.shape_cast %359 : vector<1x32x50xf32> to vector<32x50xf32>
    %cst_165 = arith.constant dense<0.000000e+00> : vector<64x50xf32>
    %361 = tpu.matmul %160, %360, %cst_165 {dimension_numbers = #tpu.dot_dimension_numbers<[1], [0], [0], [1], [0, 0, 1, 1], [], []>} : vector<64x32xf32>, vector<32x50xf32>, vector<64x50xf32> -> vector<64x50xf32>
    %cst_166 = arith.constant 0.141421363 : f32
    %362 = vector.broadcast %cst_166 : f32 to vector<64x50xf32>
    %363 = arith.mulf %361, %362 : vector<64x50xf32>
    %364 = vector.extract_strided_slice %164 {offsets = [7, 0, 0], sizes = [1, 32, 50], strides = [1, 1, 1]} : vector<8x32x50xf32> to vector<1x32x50xf32>
    %365 = vector.shape_cast %364 : vector<1x32x50xf32> to vector<32x50xf32>
    %cst_167 = arith.constant dense<0.000000e+00> : vector<64x50xf32>
    %366 = tpu.matmul %160, %365, %cst_167 {dimension_numbers = #tpu.dot_dimension_numbers<[1], [0], [0], [1], [0, 0, 1, 1], [], []>} : vector<64x32xf32>, vector<32x50xf32>, vector<64x50xf32> -> vector<64x50xf32>
    %367 = vector.extract_strided_slice %166 {offsets = [7, 0, 0], sizes = [1, 32, 50], strides = [1, 1, 1]} : vector<8x32x50xf32> to vector<1x32x50xf32>
    %368 = vector.shape_cast %367 : vector<1x32x50xf32> to vector<32x50xf32>
    %cst_168 = arith.constant dense<0.000000e+00> : vector<64x50xf32>
    %369 = tpu.matmul %160, %368, %cst_168 {dimension_numbers = #tpu.dot_dimension_numbers<[1], [0], [0], [1], [0, 0, 1, 1], [], []>} : vector<64x32xf32>, vector<32x50xf32>, vector<64x50xf32> -> vector<64x50xf32>
    %cst_169 = arith.constant dense<0.000000e+00> : vector<64x64xf32>
    %370 = tpu.matmul %363, %366, %cst_169 {dimension_numbers = #tpu.dot_dimension_numbers<[1], [1], [0], [0], [0, 0, 1, 0], [], []>} : vector<64x50xf32>, vector<64x50xf32>, vector<64x64xf32> -> vector<64x64xf32>
    %cst_170 = arith.constant dense<0xFF800000> : vector<64xf32>
    %371 = vector.multi_reduction <maximumf>, %370, %cst_170 [1] : vector<64x64xf32> to vector<64xf32>
    %372 = vector.shape_cast %371 : vector<64xf32> to vector<64x1xf32>
    %373 = vector.broadcast %372 : vector<64x1xf32> to vector<64x64xf32>
    %374 = arith.subf %370, %373 : vector<64x64xf32>
    %375 = math.exp %374 : vector<64x64xf32>
    %cst_171 = arith.constant dense<0.000000e+00> : vector<64xf32>
    %376 = vector.multi_reduction <add>, %375, %cst_171 [1] : vector<64x64xf32> to vector<64xf32>
    %377 = vector.shape_cast %376 : vector<64xf32> to vector<64x1xf32>
    %378 = tpu.reciprocal %377 {approx = true} : vector<64x1xf32> -> vector<64x1xf32>
    %379 = vector.broadcast %378 : vector<64x1xf32> to vector<64x64xf32>
    %380 = arith.mulf %375, %379 : vector<64x64xf32>
    %cst_172 = arith.constant dense<0.000000e+00> : vector<64x50xf32>
    %381 = tpu.matmul %380, %369, %cst_172 {dimension_numbers = #tpu.dot_dimension_numbers<[1], [0], [0], [1], [0, 0, 1, 1], [], []>} : vector<64x64xf32>, vector<64x50xf32>, vector<64x50xf32> -> vector<64x50xf32>
    %382 = vector.extract_strided_slice %168 {offsets = [7, 0, 0], sizes = [1, 50, 32], strides = [1, 1, 1]} : vector<8x50x32xf32> to vector<1x50x32xf32>
    %383 = vector.shape_cast %382 : vector<1x50x32xf32> to vector<50x32xf32>
    %cst_173 = arith.constant dense<0.000000e+00> : vector<64x32xf32>
    %384 = tpu.matmul %381, %383, %cst_173 {dimension_numbers = #tpu.dot_dimension_numbers<[1], [0], [0], [1], [0, 0, 1, 1], [], []>} : vector<64x50xf32>, vector<50x32xf32>, vector<64x32xf32> -> vector<64x32xf32>
    %385 = arith.addf %358, %384 : vector<64x32xf32>
    %386 = vector.broadcast %170 : vector<1x32xf32> to vector<64x32xf32>
    %387 = arith.addf %385, %386 : vector<64x32xf32>
    %388 = arith.addf %134, %387 : vector<64x32xf32>
    %c0_174 = arith.constant 0 : index
    %c0_175 = arith.constant 0 : index
    %c0_176 = arith.constant 0 : index
    %389 = vector.load %arg27[%c0_174, %c0_175, %c0_176] : memref<1x1x32xf32, #tpu.memory_space<vmem>>, vector<1x1x32xf32>
    %390 = vector.shape_cast %389 : vector<1x1x32xf32> to vector<1x32xf32>
    %c0_177 = arith.constant 0 : index
    %c0_178 = arith.constant 0 : index
    %c0_179 = arith.constant 0 : index
    %391 = vector.load %arg28[%c0_177, %c0_178, %c0_179] : memref<1x1x32xf32, #tpu.memory_space<vmem>>, vector<1x1x32xf32>
    %392 = vector.shape_cast %391 : vector<1x1x32xf32> to vector<1x32xf32>
    %c0_180 = arith.constant 0 : index
    %c0_181 = arith.constant 0 : index
    %c0_182 = arith.constant 0 : index
    %393 = vector.load %arg29[%c0_180, %c0_181, %c0_182] : memref<1x32x128xf32, #tpu.memory_space<vmem>>, vector<1x32x128xf32>
    %394 = vector.shape_cast %393 : vector<1x32x128xf32> to vector<32x128xf32>
    %c0_183 = arith.constant 0 : index
    %c0_184 = arith.constant 0 : index
    %c0_185 = arith.constant 0 : index
    %395 = vector.load %arg30[%c0_183, %c0_184, %c0_185] : memref<1x1x128xf32, #tpu.memory_space<vmem>>, vector<1x1x128xf32>
    %396 = vector.shape_cast %395 : vector<1x1x128xf32> to vector<1x128xf32>
    %c0_186 = arith.constant 0 : index
    %c0_187 = arith.constant 0 : index
    %c0_188 = arith.constant 0 : index
    %397 = vector.load %arg31[%c0_186, %c0_187, %c0_188] : memref<1x32x128xf32, #tpu.memory_space<vmem>>, vector<1x32x128xf32>
    %398 = vector.shape_cast %397 : vector<1x32x128xf32> to vector<32x128xf32>
    %c0_189 = arith.constant 0 : index
    %c0_190 = arith.constant 0 : index
    %c0_191 = arith.constant 0 : index
    %399 = vector.load %arg32[%c0_189, %c0_190, %c0_191] : memref<1x1x128xf32, #tpu.memory_space<vmem>>, vector<1x1x128xf32>
    %400 = vector.shape_cast %399 : vector<1x1x128xf32> to vector<1x128xf32>
    %c0_192 = arith.constant 0 : index
    %c0_193 = arith.constant 0 : index
    %c0_194 = arith.constant 0 : index
    %401 = vector.load %arg33[%c0_192, %c0_193, %c0_194] : memref<1x128x32xf32, #tpu.memory_space<vmem>>, vector<1x128x32xf32>
    %402 = vector.shape_cast %401 : vector<1x128x32xf32> to vector<128x32xf32>
    %c0_195 = arith.constant 0 : index
    %c0_196 = arith.constant 0 : index
    %c0_197 = arith.constant 0 : index
    %403 = vector.load %arg34[%c0_195, %c0_196, %c0_197] : memref<1x1x32xf32, #tpu.memory_space<vmem>>, vector<1x1x32xf32>
    %404 = vector.shape_cast %403 : vector<1x1x32xf32> to vector<1x32xf32>
    %cst_198 = arith.constant dense<0.000000e+00> : vector<64xf32>
    %405 = vector.multi_reduction <add>, %388, %cst_198 [1] : vector<64x32xf32> to vector<64xf32>
    %406 = vector.shape_cast %405 : vector<64xf32> to vector<64x1xf32>
    %cst_199 = arith.constant 3.200000e+01 : f32
    %407 = vector.broadcast %cst_199 : f32 to vector<64x1xf32>
    %408 = arith.divf %406, %407 : vector<64x1xf32>
    %409 = vector.broadcast %408 : vector<64x1xf32> to vector<64x32xf32>
    %410 = arith.subf %388, %409 : vector<64x32xf32>
    %411 = arith.mulf %410, %410 : vector<64x32xf32>
    %cst_200 = arith.constant dense<0.000000e+00> : vector<64xf32>
    %412 = vector.multi_reduction <add>, %411, %cst_200 [1] : vector<64x32xf32> to vector<64xf32>
    %413 = vector.shape_cast %412 : vector<64xf32> to vector<64x1xf32>
    %cst_201 = arith.constant 3.200000e+01 : f32
    %414 = vector.broadcast %cst_201 : f32 to vector<64x1xf32>
    %415 = arith.divf %413, %414 : vector<64x1xf32>
    %416 = vector.broadcast %408 : vector<64x1xf32> to vector<64x32xf32>
    %417 = arith.subf %388, %416 : vector<64x32xf32>
    %cst_202 = arith.constant 9.99999974E-6 : f32
    %418 = vector.broadcast %cst_202 : f32 to vector<64x1xf32>
    %419 = arith.addf %415, %418 : vector<64x1xf32>
    %420 = math.rsqrt %419 : vector<64x1xf32>
    %421 = vector.broadcast %420 : vector<64x1xf32> to vector<64x32xf32>
    %422 = arith.mulf %417, %421 : vector<64x32xf32>
    %423 = vector.broadcast %390 : vector<1x32xf32> to vector<64x32xf32>
    %424 = arith.mulf %422, %423 : vector<64x32xf32>
    %425 = vector.broadcast %392 : vector<1x32xf32> to vector<64x32xf32>
    %426 = arith.addf %424, %425 : vector<64x32xf32>
    %cst_203 = arith.constant dense<0.000000e+00> : vector<64x128xf32>
    %427 = tpu.matmul %426, %394, %cst_203 {dimension_numbers = #tpu.dot_dimension_numbers<[1], [0], [0], [1], [0, 0, 1, 1], [], []>} : vector<64x32xf32>, vector<32x128xf32>, vector<64x128xf32> -> vector<64x128xf32>
    %428 = vector.broadcast %396 : vector<1x128xf32> to vector<64x128xf32>
    %429 = arith.addf %427, %428 : vector<64x128xf32>
    %cst_204 = arith.constant dense<0.000000e+00> : vector<64x128xf32>
    %430 = tpu.matmul %426, %398, %cst_204 {dimension_numbers = #tpu.dot_dimension_numbers<[1], [0], [0], [1], [0, 0, 1, 1], [], []>} : vector<64x32xf32>, vector<32x128xf32>, vector<64x128xf32> -> vector<64x128xf32>
    %431 = vector.broadcast %400 : vector<1x128xf32> to vector<64x128xf32>
    %432 = arith.addf %430, %431 : vector<64x128xf32>
    %433 = arith.mulf %432, %432 : vector<64x128xf32>
    %434 = arith.mulf %432, %433 : vector<64x128xf32>
    %cst_205 = arith.constant 4.471500e-02 : f32
    %435 = vector.broadcast %cst_205 : f32 to vector<64x128xf32>
    %436 = arith.mulf %435, %434 : vector<64x128xf32>
    %437 = arith.addf %432, %436 : vector<64x128xf32>
    %cst_206 = arith.constant 0.797884583 : f32
    %438 = vector.broadcast %cst_206 : f32 to vector<64x128xf32>
    %439 = arith.mulf %438, %437 : vector<64x128xf32>
    %440 = math.tanh %439 : vector<64x128xf32>
    %cst_207 = arith.constant 1.000000e+00 : f32
    %441 = vector.broadcast %cst_207 : f32 to vector<64x128xf32>
    %442 = arith.addf %441, %440 : vector<64x128xf32>
    %cst_208 = arith.constant 5.000000e-01 : f32
    %443 = vector.broadcast %cst_208 : f32 to vector<64x128xf32>
    %444 = arith.mulf %443, %442 : vector<64x128xf32>
    %445 = arith.mulf %432, %444 : vector<64x128xf32>
    %446 = arith.mulf %429, %445 : vector<64x128xf32>
    %cst_209 = arith.constant dense<0.000000e+00> : vector<64x32xf32>
    %447 = tpu.matmul %446, %402, %cst_209 {dimension_numbers = #tpu.dot_dimension_numbers<[1], [0], [0], [1], [0, 0, 1, 1], [], []>} : vector<64x128xf32>, vector<128x32xf32>, vector<64x32xf32> -> vector<64x32xf32>
    %448 = vector.broadcast %404 : vector<1x32xf32> to vector<64x32xf32>
    %449 = arith.addf %447, %448 : vector<64x32xf32>
    %450 = arith.addf %388, %449 : vector<64x32xf32>
    %c0_210 = arith.constant 0 : index
    %c0_211 = arith.constant 0 : index
    %c0_212 = arith.constant 0 : index
    %451 = vector.load %arg35[%c0_210, %c0_211, %c0_212] : memref<1x64x32xf32, #tpu.memory_space<vmem>>, vector<1x64x32xf32>
    %452 = vector.shape_cast %451 : vector<1x64x32xf32> to vector<64x32xf32>
    %453 = vector.shape_cast %450 : vector<64x32xf32> to vector<1x64x32xf32>
    tpu.vector_store %arg35[%c0_210, %c0_211, %c0_212], %453 {strides = array<i32>} : memref<1x64x32xf32, #tpu.memory_space<vmem>>, vector<1x64x32xf32>,
    return
  }
  func.func @transform_0(%arg0: i32) -> (i32, i32, i32) {
    %c0_i32 = arith.constant 0 : i32
    %c0_i32_0 = arith.constant 0 : i32
    %c0_i32_1 = arith.constant 0 : i32
    return %arg0, %c0_i32, %c0_i32_0 : i32, i32, i32
  }
  func.func @transform_1(%arg0: i32) -> (i32, i32) {
    %c0_i32 = arith.constant 0 : i32
    %c0_i32_0 = arith.constant 0 : i32
    %c0_i32_1 = arith.constant 0 : i32
    return %c0_i32, %c0_i32_0 : i32, i32
  }
  func.func @transform_2(%arg0: i32) -> (i32, i32) {
    %c0_i32 = arith.constant 0 : i32
    %c0_i32_0 = arith.constant 0 : i32
    %c0_i32_1 = arith.constant 0 : i32
    return %c0_i32, %c0_i32_0 : i32, i32
  }
  func.func @transform_3(%arg0: i32) -> (i32, i32) {
    %c0_i32 = arith.constant 0 : i32
    %c0_i32_0 = arith.constant 0 : i32
    %c0_i32_1 = arith.constant 0 : i32
    return %c0_i32, %c0_i32_0 : i32, i32
  }
  func.func @transform_4(%arg0: i32) -> (i32, i32) {
    %c0_i32 = arith.constant 0 : i32
    %c0_i32_0 = arith.constant 0 : i32
    %c0_i32_1 = arith.constant 0 : i32
    return %c0_i32, %c0_i32_0 : i32, i32
  }
  func.func @transform_5(%arg0: i32) -> (i32, i32) {
    %c0_i32 = arith.constant 0 : i32
    %c0_i32_0 = arith.constant 0 : i32
    %c0_i32_1 = arith.constant 0 : i32
    return %c0_i32, %c0_i32_0 : i32, i32
  }
  func.func @transform_6(%arg0: i32) -> (i32, i32, i32) {
    %c0_i32 = arith.constant 0 : i32
    %c0_i32_0 = arith.constant 0 : i32
    %c0_i32_1 = arith.constant 0 : i32
    %c0_i32_2 = arith.constant 0 : i32
    return %c0_i32, %c0_i32_0, %c0_i32_1 : i32, i32, i32
  }
  func.func @transform_7(%arg0: i32) -> (i32, i32, i32) {
    %c0_i32 = arith.constant 0 : i32
    %c0_i32_0 = arith.constant 0 : i32
    %c0_i32_1 = arith.constant 0 : i32
    %c0_i32_2 = arith.constant 0 : i32
    return %c0_i32, %c0_i32_0, %c0_i32_1 : i32, i32, i32
  }
  func.func @transform_8(%arg0: i32) -> (i32, i32, i32) {
    %c0_i32 = arith.constant 0 : i32
    %c0_i32_0 = arith.constant 0 : i32
    %c0_i32_1 = arith.constant 0 : i32
    %c0_i32_2 = arith.constant 0 : i32
    return %c0_i32, %c0_i32_0, %c0_i32_1 : i32, i32, i32
  }
  func.func @transform_9(%arg0: i32) -> (i32, i32, i32) {
    %c0_i32 = arith.constant 0 : i32
    %c0_i32_0 = arith.constant 0 : i32
    %c0_i32_1 = arith.constant 0 : i32
    %c0_i32_2 = arith.constant 0 : i32
    return %c0_i32, %c0_i32_0, %c0_i32_1 : i32, i32, i32
  }
  func.func @transform_10(%arg0: i32) -> (i32, i32) {
    %c0_i32 = arith.constant 0 : i32
    %c0_i32_0 = arith.constant 0 : i32
    %c0_i32_1 = arith.constant 0 : i32
    return %c0_i32, %c0_i32_0 : i32, i32
  }
  func.func @transform_11(%arg0: i32) -> (i32, i32) {
    %c0_i32 = arith.constant 0 : i32
    %c0_i32_0 = arith.constant 0 : i32
    %c0_i32_1 = arith.constant 0 : i32
    return %c0_i32, %c0_i32_0 : i32, i32
  }
  func.func @transform_12(%arg0: i32) -> (i32, i32) {
    %c0_i32 = arith.constant 0 : i32
    %c0_i32_0 = arith.constant 0 : i32
    %c0_i32_1 = arith.constant 0 : i32
    return %c0_i32, %c0_i32_0 : i32, i32
  }
  func.func @transform_13(%arg0: i32) -> (i32, i32) {
    %c0_i32 = arith.constant 0 : i32
    %c0_i32_0 = arith.constant 0 : i32
    %c0_i32_1 = arith.constant 0 : i32
    return %c0_i32, %c0_i32_0 : i32, i32
  }
  func.func @transform_14(%arg0: i32) -> (i32, i32) {
    %c0_i32 = arith.constant 0 : i32
    %c0_i32_0 = arith.constant 0 : i32
    %c0_i32_1 = arith.constant 0 : i32
    return %c0_i32, %c0_i32_0 : i32, i32
  }
  func.func @transform_15(%arg0: i32) -> (i32, i32) {
    %c0_i32 = arith.constant 0 : i32
    %c0_i32_0 = arith.constant 0 : i32
    %c0_i32_1 = arith.constant 0 : i32
    return %c0_i32, %c0_i32_0 : i32, i32
  }
  func.func @transform_16(%arg0: i32) -> (i32, i32) {
    %c0_i32 = arith.constant 0 : i32
    %c0_i32_0 = arith.constant 0 : i32
    %c0_i32_1 = arith.constant 0 : i32
    return %c0_i32, %c0_i32_0 : i32, i32
  }
  func.func @transform_17(%arg0: i32) -> (i32, i32) {
    %c0_i32 = arith.constant 0 : i32
    %c0_i32_0 = arith.constant 0 : i32
    %c0_i32_1 = arith.constant 0 : i32
    return %c0_i32, %c0_i32_0 : i32, i32
  }
  func.func @transform_18(%arg0: i32) -> (i32, i32) {
    %c0_i32 = arith.constant 0 : i32
    %c0_i32_0 = arith.constant 0 : i32
    %c0_i32_1 = arith.constant 0 : i32
    return %c0_i32, %c0_i32_0 : i32, i32
  }
  func.func @transform_19(%arg0: i32) -> (i32, i32, i32) {
    %c0_i32 = arith.constant 0 : i32
    %c0_i32_0 = arith.constant 0 : i32
    %c0_i32_1 = arith.constant 0 : i32
    %c0_i32_2 = arith.constant 0 : i32
    return %c0_i32, %c0_i32_0, %c0_i32_1 : i32, i32, i32
  }
  func.func @transform_20(%arg0: i32) -> (i32, i32, i32) {
    %c0_i32 = arith.constant 0 : i32
    %c0_i32_0 = arith.constant 0 : i32
    %c0_i32_1 = arith.constant 0 : i32
    %c0_i32_2 = arith.constant 0 : i32
    return %c0_i32, %c0_i32_0, %c0_i32_1 : i32, i32, i32
  }
  func.func @transform_21(%arg0: i32) -> (i32, i32, i32, i32) {
    %c0_i32 = arith.constant 0 : i32
    %c0_i32_0 = arith.constant 0 : i32
    %c0_i32_1 = arith.constant 0 : i32
    %c0_i32_2 = arith.constant 0 : i32
    %c0_i32_3 = arith.constant 0 : i32
    return %c0_i32, %c0_i32_0, %c0_i32_1, %c0_i32_2 : i32, i32, i32, i32
  }
  func.func @transform_22(%arg0: i32) -> (i32, i32, i32, i32) {
    %c0_i32 = arith.constant 0 : i32
    %c0_i32_0 = arith.constant 0 : i32
    %c0_i32_1 = arith.constant 0 : i32
    %c0_i32_2 = arith.constant 0 : i32
    %c0_i32_3 = arith.constant 0 : i32
    return %c0_i32, %c0_i32_0, %c0_i32_1, %c0_i32_2 : i32, i32, i32, i32
  }
  func.func @transform_23(%arg0: i32) -> (i32, i32, i32, i32) {
    %c0_i32 = arith.constant 0 : i32
    %c0_i32_0 = arith.constant 0 : i32
    %c0_i32_1 = arith.constant 0 : i32
    %c0_i32_2 = arith.constant 0 : i32
    %c0_i32_3 = arith.constant 0 : i32
    return %c0_i32, %c0_i32_0, %c0_i32_1, %c0_i32_2 : i32, i32, i32, i32
  }
  func.func @transform_24(%arg0: i32) -> (i32, i32, i32, i32) {
    %c0_i32 = arith.constant 0 : i32
    %c0_i32_0 = arith.constant 0 : i32
    %c0_i32_1 = arith.constant 0 : i32
    %c0_i32_2 = arith.constant 0 : i32
    %c0_i32_3 = arith.constant 0 : i32
    return %c0_i32, %c0_i32_0, %c0_i32_1, %c0_i32_2 : i32, i32, i32, i32
  }
  func.func @transform_25(%arg0: i32) -> (i32, i32, i32) {
    %c0_i32 = arith.constant 0 : i32
    %c0_i32_0 = arith.constant 0 : i32
    %c0_i32_1 = arith.constant 0 : i32
    %c0_i32_2 = arith.constant 0 : i32
    return %c0_i32, %c0_i32_0, %c0_i32_1 : i32, i32, i32
  }
  func.func @transform_26(%arg0: i32) -> (i32, i32, i32) {
    %c0_i32 = arith.constant 0 : i32
    %c0_i32_0 = arith.constant 0 : i32
    %c0_i32_1 = arith.constant 0 : i32
    %c0_i32_2 = arith.constant 0 : i32
    return %c0_i32, %c0_i32_0, %c0_i32_1 : i32, i32, i32
  }
  func.func @transform_27(%arg0: i32) -> (i32, i32, i32) {
    %c0_i32 = arith.constant 0 : i32
    %c0_i32_0 = arith.constant 0 : i32
    %c0_i32_1 = arith.constant 0 : i32
    %c0_i32_2 = arith.constant 0 : i32
    return %c0_i32, %c0_i32_0, %c0_i32_1 : i32, i32, i32
  }
  func.func @transform_28(%arg0: i32) -> (i32, i32, i32) {
    %c0_i32 = arith.constant 0 : i32
    %c0_i32_0 = arith.constant 0 : i32
    %c0_i32_1 = arith.constant 0 : i32
    %c0_i32_2 = arith.constant 0 : i32
    return %c0_i32, %c0_i32_0, %c0_i32_1 : i32, i32, i32
  }
  func.func @transform_29(%arg0: i32) -> (i32, i32, i32) {
    %c0_i32 = arith.constant 0 : i32
    %c0_i32_0 = arith.constant 0 : i32
    %c0_i32_1 = arith.constant 0 : i32
    %c0_i32_2 = arith.constant 0 : i32
    return %c0_i32, %c0_i32_0, %c0_i32_1 : i32, i32, i32
  }
  func.func @transform_30(%arg0: i32) -> (i32, i32, i32) {
    %c0_i32 = arith.constant 0 : i32
    %c0_i32_0 = arith.constant 0 : i32
    %c0_i32_1 = arith.constant 0 : i32
    %c0_i32_2 = arith.constant 0 : i32
    return %c0_i32, %c0_i32_0, %c0_i32_1 : i32, i32, i32
  }
  func.func @transform_31(%arg0: i32) -> (i32, i32, i32) {
    %c0_i32 = arith.constant 0 : i32
    %c0_i32_0 = arith.constant 0 : i32
    %c0_i32_1 = arith.constant 0 : i32
    %c0_i32_2 = arith.constant 0 : i32
    return %c0_i32, %c0_i32_0, %c0_i32_1 : i32, i32, i32
  }
  func.func @transform_32(%arg0: i32) -> (i32, i32, i32) {
    %c0_i32 = arith.constant 0 : i32
    %c0_i32_0 = arith.constant 0 : i32
    %c0_i32_1 = arith.constant 0 : i32
    %c0_i32_2 = arith.constant 0 : i32
    return %c0_i32, %c0_i32_0, %c0_i32_1 : i32, i32, i32
  }
  func.func @transform_33(%arg0: i32) -> (i32, i32, i32) {
    %c0_i32 = arith.constant 0 : i32
    %c0_i32_0 = arith.constant 0 : i32
    %c0_i32_1 = arith.constant 0 : i32
    %c0_i32_2 = arith.constant 0 : i32
    return %c0_i32, %c0_i32_0, %c0_i32_1 : i32, i32, i32
  }
  func.func @transform_34(%arg0: i32) -> (i32, i32, i32) {
    %c0_i32 = arith.constant 0 : i32
    %c0_i32_0 = arith.constant 0 : i32
    %c0_i32_1 = arith.constant 0 : i32
    return %arg0, %c0_i32, %c0_i32_0 : i32, i32, i32
  }
}

</mosaic_0001>

<bundles_post_ra>
// kernel: _lambda_.1
= control target key start
LH: loop header
LB: loop body
LE: loop exit
PB: predicated region body
PF: predicated region fallthrough
CT: control target
= control target key end

     0   :  { %s14332_s6 = smov 1   ;;  %s14333_s10 = smov 2   ;;  %s16648_s0 = inlined_call_operand.smem [shape: u32[35], index: -1, kind: input, shape index: {}] }
   0x1   :  { %s14391_s5 = sld [smem:[%s16648_s0]]   ;;  %s14334_s14 = smov 3  }
   0x2   :  { %s14396_s9 = sld [smem:[%s16648_s0 + %s14332_s6]]   ;;  %s14335_s18 = smov 4  }
   0x3   :  { %s14401_s13 = sld [smem:[%s16648_s0 + %s14333_s10]]   ;;  %s14336_s22 = smov 5  }
   0x4   :  { %s14406_s17 = sld [smem:[%s16648_s0 + %s14334_s14]]   ;;  %s14337_s26 = smov 6  }
   0x5   :  { %s14411_s21 = sld [smem:[%s16648_s0 + %s14335_s18]]   ;;  %s14338_s30 = smov 7  }
   0x6   :  { %s14416_s25 = sld [smem:[%s16648_s0 + %s14336_s22]]   ;;  %s14339_s4 = smov 8  }
   0x7   :  { %s14421_s29 = sld [smem:[%s16648_s0 + %s14337_s26]]   ;;  %s14340_s10 = smov 9  }
   0x8   :  { %s14426_s3 = sld [smem:[%s16648_s0 + %s14338_s30]]   ;;  %s14341_s15 = smov 10  }
   0x9   :  { %s14431_s8 = sld [smem:[%s16648_s0 + %s14339_s4]]   ;;  %s14342_s20 = smov 11  }
   0xa   :  { %16656 = sst [smem:[#allocation29_spill]] %s14406_s17  ;;  %s14343_s26 = smov 12  }
   0xb   :  { %16657 = sst [smem:[#allocation30_spill]] %s14411_s21  ;;  %s14344_s1 = smov 13  }
   0xc   :  { %16658 = sst [smem:[#allocation31_spill]] %s14416_s25  ;;  %s14345_s7 = smov 14  }
   0xd   :  { %s14436_s14 = sld [smem:[%s16648_s0 + %s14340_s10]]   ;;  %s14347_s22 = smov 16  }
   0xe   :  { %s14441_s19 = sld [smem:[%s16648_s0 + %s14341_s15]]   ;;  %s14346_s15 = smov 15  }
   0xf   :  { %s14446_s24 = sld [smem:[%s16648_s0 + %s14342_s20]]   ;;  %s14348_s28 = smov 17  }
  0x10   :  { %s14451_s30 = sld [smem:[%s16648_s0 + %s14343_s26]]  }
  0x11   :  { %s14456_s6 = sld [smem:[%s16648_s0 + %s14344_s1]]  }
  0x12   :  { %s14461_s12 = sld [smem:[%s16648_s0 + %s14345_s7]]   ;;  %s14349_s7 = smov 18  }
  0x13   :  { %s14466_s20 = sld [smem:[%s16648_s0 + %s14346_s15]]   ;;  %s14350_s15 = smov 19  }
  0x14   :  { %16659 = sst [smem:[#allocation32_spill]] %s14441_s19 }
  0x15   :  { %16660 = sst [smem:[#allocation33_spill]] %s14446_s24 }
  0x16   :  { %16661 = sst [smem:[#allocation34_spill]] %s14451_s30 }
  0x17   :  { %16662 = sst [smem:[#allocation35_spill]] %s14456_s6 }
  0x18   :  { %16663 = sst [smem:[#allocation36_spill]] %s14461_s12 }
  0x19   :  { %s14471_s27 = sld [smem:[%s16648_s0 + %s14347_s22]]   ;;  %s14351_s22 = smov 20  }
  0x1a   :  { %s14476_s4 = sld [smem:[%s16648_s0 + %s14348_s28]]   ;;  %s14352_s28 = smov 21  }
  0x1b   :  { %s14481_s12 = sld [smem:[%s16648_s0 + %s14349_s7]]   ;;  %s14353_s7 = smov 22  }
  0x1c   :  { %s14486_s30 = sld [smem:[%s16648_s0 + %s14350_s15]]   ;;  %s14354_s15 = smov 23  }
  0x1d   :  { %s14496_s24 = sld [smem:[%s16648_s0 + %s14352_s28]]   ;;  %s14356_s28 = smov 25  }
  0x1e   :  { %s14516_s19 = sld [smem:[%s16648_s0 + %s14356_s28]]   ;;  %s14360_s28 = smov 29  }
  0x1f   :  { %16664 = sst [smem:[#allocation37_spill]] %s14471_s27 }
  0x20   :  { %s14491_s27 = sld [smem:[%s16648_s0 + %s14351_s22]]   ;;  %s14355_s22 = smov 24  }
  0x21   :  { %16665 = sst [smem:[#allocation38_spill]] %s14481_s12 }
  0x22   :  { %16666 = sst [smem:[#allocation39_spill]] %s14486_s30 }
  0x23   :  { %s14501_s12 = sld [smem:[%s16648_s0 + %s14353_s7]]   ;;  %s14357_s7 = smov 26  }
  0x24   :  { %s14506_s30 = sld [smem:[%s16648_s0 + %s14354_s15]]   ;;  %s14358_s15 = smov 27  }
  0x25   :  { %16668 = sst [smem:[#allocation41_spill]] %s14516_s19 }
  0x26   :  { %16667 = sst [smem:[#allocation40_spill]] %s14491_s27 }
  0x27   :  { %s14511_s27 = sld [smem:[%s16648_s0 + %s14355_s22]]   ;;  %s14359_s22 = smov 28  }
  0x28   :  { %s14521_s25 = sld [smem:[%s16648_s0 + %s14357_s7]]   ;;  %s14361_s7 = smov 30  }
  0x29   :  { %s14526_s21 = sld [smem:[%s16648_s0 + %s14358_s15]]   ;;  %s14362_s15 = smov 31  }
  0x2a   :  { %s14531_s17 = sld [smem:[%s16648_s0 + %s14359_s22]]   ;;  %s14363_s22 = smov 32  }
  0x2b   :  { %s14536_s19 = sld [smem:[%s16648_s0 + %s14360_s28]]   ;;  %s14364_s28 = smov 33  }
  0x2e   :  { %16669 = sst [smem:[#allocation42_spill]] %s14521_s25 }
  0x2f   :  { %16670 = sst [smem:[#allocation43_spill]] %s14526_s21 }
  0x30   :  { %16671 = sst [smem:[#allocation44_spill]] %s14531_s17 }
  0x31   :  { %16672 = sst [smem:[#allocation45_spill]] %s14536_s19 }
  0x32   :  { %s14541_s25 = sld [smem:[%s16648_s0 + %s14361_s7]]   ;;  %s14365_s7 = smov 34  }
  0x33   :  { %s14546_s21 = sld [smem:[%s16648_s0 + %s14362_s15]]  }
  0x34   :  { %s14551_s17 = sld [smem:[%s16648_s0 + %s14363_s22]]  }
  0x35   :  { %s14556_s19 = sld [smem:[%s16648_s0 + %s14364_s28]]  }
  0x38   :  { %16673 = sst [smem:[#allocation46_spill]] %s14541_s25 }
  0x39   :  { %s14561_s25 = sld [smem:[%s16648_s0 + %s14365_s7]]  }
  0x3a   :  { %74 = vsyncpa [#allocation3], 0 }
  0x3b   :  { %75 = vsyncpa [#allocation5], 0 }
  0x3c   :  { %76 = vsyncpa [#allocation8], 0 }
  0x3d   :  { %77 = vsyncpa [#allocation11], 0 }
  0x3e   :  { %78 = vsyncpa [#allocation14], 0 }
  0x3f   :  { %79 = vsyncpa [#allocation17], 0 }
  0x40   :  { %80 = vsyncpa [#allocation20], 0  ;;  %s14563_s15 = smov 0  }
  0x41 LB: > { %s14569_s16 = sadd.s32 4294967295, %s14330_s15   ;;  %p10619_p0 = scmp.ge.s32.totalorder %s14330_s15, 1  ;;  %s14330_s15 = sphi %s14563_s15, %s86_s15  }
  0x42   : > { %p836_p1 = scmp.lt.s32.totalorder %s14330_s15, 3  ;;  %p16651_p2 = scmp.eq.s32.totalorder %s14569_s16, 0 }
  0x43   : > { %s14366_s18 = smov [#allocation4]   ;;  %s14367_s23 = smov [#allocation7]  }
  0x44   : > { %p14574_p3 = pnand %p10619_p0, %p836_p1  ;;  %s873_s22 = sshll.u32 %s14366_s18, 4  ;;  %s874_s22 = int_to_ptr.vmem [resolvable:$true] %s873_s22 }
  0x45   : > { %s898_s26 = sshll.u32 %s14367_s23, 4  ;;  %s14368_s1 = smov [#allocation10]   ;;  %s14580_s26 = int_to_ptr.vmem [resolvable:$true] %s898_s26 }
  0x46   : > { %p13447_p4 = pneg %p14574_p3  ;;  %s930_s2 = sshll.u32 %s14368_s1, 4  ;;  %s14588_s2 = int_to_ptr.vmem [resolvable:$true] %s930_s2 }
  0x47   : > { %s14369_s7 = smov [#allocation13]   ;;  %s13969_s18 = scalar_lea.vmem %s874_s22, 512 }
  0x48   : > { %p14584_p5 = pnand %p16651_p2, %p13447_p4  ;;  %s14590_s10 = sshll.u32 %s14369_s7, 4  ;;  %s963_s10 = int_to_ptr.vmem [resolvable:$true] %s14590_s10 }
  0x49   : > { %p13970_p7 = scmp.ne.s32.totalorder %s874_s22, %s13969_s18  ;;  %p13977_p10 = scmp.lt.s32.totalorder %s874_s22, %s874_s22 }
  0x4a   : > { %p14594_p6 = pneg %p14584_p5  ;;  %p13978_p11 = scmp.lt.s32.totalorder %s13969_s18, %s13969_s18 }
  0x4c   : > { %p13972_p8 = pnand %p13970_p7, %p14594_p6  ;;  %p13979_p12 = por %p13978_p11, %p13977_p10 }
  0x4e   : > { %p13973_p9 = pneg %p13972_p8 }
  0x50   : > { %p13980_p13 = pnand %p13979_p12, %p13973_p9 }
  0x52   : > { %13983 = shalt.err (!%p13980_p13)
}
  0x53   : > { %s14370_s23 = smov 128   ;;  %s14371_s1 = smov 8  }
  0x54   : > { %13453 = dma.hbm_to_vmem [thread:$0]  (!%p14584_p5), %s14421_s29, 512, %s874_s22, [#allocation5], %s14370_s23, %s14370_s23, %s14371_s1  }
  0x55   : > { %s13995_s7 = scalar_lea.vmem %s14580_s26, 64  ;;  %p14003_p7 = scmp.lt.s32.totalorder %s14580_s26, %s14580_s26 }
  0x56   : > { %p13996_p0 = scmp.ne.s32.totalorder %s14580_s26, %s13995_s7  ;;  %p14004_p8 = scmp.lt.s32.totalorder %s13995_s7, %s13995_s7 }
  0x58   : > { %p13998_p1 = pnand %p13996_p0, %p14594_p6  ;;  %p14005_p9 = por %p14004_p8, %p14003_p7 }
  0x5a   : > { %p13999_p4 = pneg %p13998_p1 }
  0x5c   : > { %p14006_p10 = pnand %p14005_p9, %p13999_p4 }
  0x5e   : > { %14009 = shalt.err (!%p14006_p10)
}
  0x5f   : > { %13459 = dma.hbm_to_vmem [thread:$0]  (!%p14584_p5), %s14431_s8, 64, %s14580_s26, [#allocation8]  }
  0x60   : > { %s14021_s22 = scalar_lea.vmem %s14588_s2, 512  ;;  %p14029_p0 = scmp.lt.s32.totalorder %s14588_s2, %s14588_s2 }
  0x61   : > { %p14022_p11 = scmp.ne.s32.totalorder %s14588_s2, %s14021_s22  ;;  %p14030_p1 = scmp.lt.s32.totalorder %s14021_s22, %s14021_s22 }
  0x63   : > { %p14024_p12 = pnand %p14022_p11, %p14594_p6  ;;  %p14031_p7 = por %p14030_p1, %p14029_p0 }
  0x65   : > { %p14025_p13 = pneg %p14024_p12 }
  0x67   : > { %p14032_p4 = pnand %p14031_p7, %p14025_p13 }
  0x69   : > { %14035 = shalt.err (!%p14032_p4)
}
  0x6a   : > { %s16677_s6 = sld [smem:[#allocation35_spill]]  ;;  %s14047_s26 = scalar_lea.vmem %s963_s10, 2048 }
  0x6b   : > { %p14048_p8 = scmp.ne.s32.totalorder %s963_s10, %s14047_s26  ;;  %p14055_p11 = scmp.lt.s32.totalorder %s963_s10, %s963_s10 }
  0x6c   : > { %p14056_p12 = scmp.lt.s32.totalorder %s14047_s26, %s14047_s26 }
  0x6d   : > { %p14050_p9 = pnand %p14048_p8, %p14594_p6 }
  0x6e   : > { %p14057_p13 = por %p14056_p12, %p14055_p11 }
  0x6f   : > { %p14051_p10 = pneg %p14050_p9 }
  0x70   : > { %13465 = dma.hbm_to_vmem [thread:$0]  (!%p14584_p5), %s16677_s6, 512, %s14588_s2, [#allocation11], %s14370_s23, %s14370_s23, %s14371_s1  }
  0x71   : > { %p14058_p0 = pnand %p14057_p13, %p14051_p10 }
  0x73   : > { %14061 = shalt.err (!%p14058_p0)
}
  0x74   : > { %13471 = dma.hbm_to_vmem [thread:$0]  (!%p14584_p5), %s14476_s4, 2048, %s963_s10, [#allocation14], %s14370_s23, %s14370_s23, %s14371_s1  }
  0x75   : > { %s14372_s2 = smov [#allocation16]   ;;  %s14373_s7 = smov [#allocation19]  }
  0x76   : > { %s997_s18 = sshll.u32 %s14372_s2, 4  ;;  %s1023_s22 = sshll.u32 %s14373_s7, 4  ;;  %s998_s18 = int_to_ptr.vmem [resolvable:$true] %s997_s18  ;;  %s1024_s22 = int_to_ptr.vmem [resolvable:$true] %s1023_s22 }
  0x77   : > { %s14073_s6 = scalar_lea.vmem %s998_s18, 4096  ;;  %p14081_p8 = scmp.lt.s32.totalorder %s998_s18, %s998_s18 }
  0x78   : > { %p14074_p1 = scmp.ne.s32.totalorder %s998_s18, %s14073_s6  ;;  %p14082_p9 = scmp.lt.s32.totalorder %s14073_s6, %s14073_s6 }
  0x7a   : > { %p14076_p7 = pnand %p14074_p1, %p14594_p6  ;;  %p14083_p10 = por %p14082_p9, %p14081_p8 }
  0x7c   : > { %p14077_p4 = pneg %p14076_p7 }
  0x7e   : > { %p14084_p11 = pnand %p14083_p10, %p14077_p4 }
  0x80   : > { %14087 = shalt.err (!%p14084_p11)
}
  0x81   : > { %13477 = dma.hbm_to_vmem [thread:$0]  (!%p14584_p5), %s14501_s12, 4096, %s998_s18, [#allocation17], %s14370_s23, %s14370_s23, %s14371_s1  }
  0x82   : > { %s14099_s10 = scalar_lea.vmem %s1024_s22, 7168  ;;  %p14107_p1 = scmp.lt.s32.totalorder %s1024_s22, %s1024_s22 }
  0x83   : > { %p14100_p12 = scmp.ne.s32.totalorder %s1024_s22, %s14099_s10  ;;  %p14108_p7 = scmp.lt.s32.totalorder %s14099_s10, %s14099_s10 }
  0x85   : > { %p14102_p13 = pnand %p14100_p12, %p14594_p6  ;;  %p14109_p2 = por %p14108_p7, %p14107_p1 }
  0x87   : > { %p14103_p0 = pneg %p14102_p13 }
  0x89   : > { %p14110_p8 = pnand %p14109_p2, %p14103_p0 }
  0x8b   : > { %14113 = shalt.err (!%p14110_p8)
}
  0x8c   : > { %13483 = dma.hbm_to_vmem [thread:$0]  (!%p14584_p5), %s14511_s27, 7168, %s1024_s22, [#allocation20], %s14370_s23, %s14370_s23, %s14371_s1  }
  0x8d   : > { %s14374_s6 = smov [#allocation2]   ;;  %s14375_s2 = smov [#allocation6]  }
  0x8e   : > { %s848_s26 = sshll.u32 %s14374_s6, 4  ;;  %s887_s18 = sshll.u32 %s14375_s2, 4  ;;  %s849_s26 = int_to_ptr.vmem [resolvable:$true] %s848_s26  ;;  %s888_s18 = int_to_ptr.vmem [resolvable:$true] %s887_s18 }
  0x8f   : > { %s14125_s7 = scalar_lea.vmem %s849_s26, 1024  ;;  %p14133_p2 = scmp.lt.s32.totalorder %s849_s26, %s849_s26 }
  0x90   : > { %p14126_p4 = scmp.ne.s32.totalorder %s849_s26, %s14125_s7  ;;  %p14134_p11 = scmp.lt.s32.totalorder %s14125_s7, %s14125_s7 }
  0x92   : > { %p14128_p9 = pnand %p14126_p4, %p14594_p6  ;;  %p14135_p12 = por %p14134_p11, %p14133_p2 }
  0x94   : > { %p14129_p10 = pneg %p14128_p9 }
  0x96   : > { %p14136_p13 = pnand %p14135_p12, %p14129_p10 }
  0x98   : > { %14139 = shalt.err (!%p14136_p13)
}
  0x99   : > { %13450 = dma.hbm_to_vmem [thread:$0]  (!%p14584_p5), %s14396_s9, 1024, %s849_s26, [#allocation3], %s14370_s23, %s14370_s23, %s14371_s1  }
  0x9a   : > { %s14151_s22 = scalar_lea.vmem %s888_s18, 64  ;;  %p14159_p8 = scmp.lt.s32.totalorder %s888_s18, %s888_s18 }
  0x9b   : > { %p14152_p0 = scmp.ne.s32.totalorder %s888_s18, %s14151_s22  ;;  %p14160_p4 = scmp.lt.s32.totalorder %s14151_s22, %s14151_s22 }
  0x9d   : > { %p14154_p1 = pnand %p14152_p0, %p14594_p6  ;;  %p14161_p9 = por %p14160_p4, %p14159_p8 }
  0x9f   : > { %p14155_p7 = pneg %p14154_p1 }
  0xa1   : > { %p14162_p2 = pnand %p14161_p9, %p14155_p7 }
  0xa3   : > { %14165 = shalt.err (!%p14162_p2)
}
  0xa4   : > { %13456 = dma.hbm_to_vmem [thread:$0]  (!%p14584_p5), %s14426_s3, 64, %s888_s18, [#allocation5]  }
  0xa5   : > { %s14376_s10 = smov [#allocation9]   ;;  %s14377_s26 = smov [#allocation12]  }
  0xa6   : > { %s908_s6 = sshll.u32 %s14376_s10, 4  ;;  %s946_s2 = sshll.u32 %s14377_s26, 4  ;;  %s909_s6 = int_to_ptr.vmem [resolvable:$true] %s908_s6  ;;  %s947_s2 = int_to_ptr.vmem [resolvable:$true] %s946_s2 }
  0xa7   : > { %s14177_s7 = scalar_lea.vmem %s909_s6, 896  ;;  %p14185_p13 = scmp.lt.s32.totalorder %s909_s6, %s909_s6 }
  0xa8   : > { %p14178_p10 = scmp.ne.s32.totalorder %s909_s6, %s14177_s7  ;;  %p14186_p0 = scmp.lt.s32.totalorder %s14177_s7, %s14177_s7 }
  0xaa   : > { %p14180_p11 = pnand %p14178_p10, %p14594_p6  ;;  %p14187_p1 = por %p14186_p0, %p14185_p13 }
  0xac   : > { %p14181_p12 = pneg %p14180_p11 }
  0xae   : > { %p14188_p7 = pnand %p14187_p1, %p14181_p12 }
  0xb0   : > { %14191 = shalt.err (!%p14188_p7)
}
  0xb1   : > { %13462 = dma.hbm_to_vmem [thread:$0]  (!%p14584_p5), %s14436_s14, 896, %s909_s6, [#allocation8], %s14370_s23, %s14370_s23, %s14371_s1  }
  0xb2   : > { %s14203_s18 = scalar_lea.vmem %s947_s2, 512  ;;  %p14211_p2 = scmp.lt.s32.totalorder %s947_s2, %s947_s2 }
  0xb3   : > { %p14204_p8 = scmp.ne.s32.totalorder %s947_s2, %s14203_s18  ;;  %p14212_p10 = scmp.lt.s32.totalorder %s14203_s18, %s14203_s18 }
  0xb5   : > { %p14206_p4 = pnand %p14204_p8, %p14594_p6  ;;  %p14213_p11 = por %p14212_p10, %p14211_p2 }
  0xb7   : > { %p14207_p9 = pneg %p14206_p4 }
  0xb9   : > { %p14214_p13 = pnand %p14213_p11, %p14207_p9 }
  0xbb   : > { %14217 = shalt.err (!%p14214_p13)
}
  0xbc   : > { %13468 = dma.hbm_to_vmem [thread:$0]  (!%p14584_p5), %s14466_s20, 512, %s947_s2, [#allocation11], %s14370_s23, %s14370_s23, %s14371_s1  }
  0xbd   : > { %s14378_s22 = smov [#allocation15]   ;;  %s14379_s6 = smov [#allocation18]  }
  0xbe   : > { %s984_s10 = sshll.u32 %s14378_s22, 4  ;;  %s1010_s26 = sshll.u32 %s14379_s6, 4  ;;  %s985_s10 = int_to_ptr.vmem [resolvable:$true] %s984_s10  ;;  %s1011_s26 = int_to_ptr.vmem [resolvable:$true] %s1010_s26 }
  0xbf   : > { %s14229_s7 = scalar_lea.vmem %s985_s10, 4096  ;;  %p14237_p7 = scmp.lt.s32.totalorder %s985_s10, %s985_s10 }
  0xc0   : > { %p14230_p12 = scmp.ne.s32.totalorder %s985_s10, %s14229_s7  ;;  %p14238_p8 = scmp.lt.s32.totalorder %s14229_s7, %s14229_s7 }
  0xc2   : > { %p14232_p0 = pnand %p14230_p12, %p14594_p6  ;;  %p14239_p4 = por %p14238_p8, %p14237_p7 }
  0xc4   : > { %p14233_p1 = pneg %p14232_p0 }
  0xc6   : > { %p14240_p9 = pnand %p14239_p4, %p14233_p1 }
  0xc8   : > { %14243 = shalt.err (!%p14240_p9)
}
  0xc9   : > { %13474 = dma.hbm_to_vmem [thread:$0]  (!%p14584_p5), %s14496_s24, 4096, %s985_s10, [#allocation14], %s14370_s23, %s14370_s23, %s14371_s1  }
  0xca   : > { %s14255_s2 = scalar_lea.vmem %s1011_s26, 4096  ;;  %p14263_p13 = scmp.lt.s32.totalorder %s1011_s26, %s1011_s26 }
  0xcb   : > { %p14256_p2 = scmp.ne.s32.totalorder %s1011_s26, %s14255_s2  ;;  %p14264_p12 = scmp.lt.s32.totalorder %s14255_s2, %s14255_s2 }
  0xcd   : > { %p14258_p10 = pnand %p14256_p2, %p14594_p6  ;;  %p14265_p0 = por %p14264_p12, %p14263_p13 }
  0xcf   : > { %p14259_p11 = pneg %p14258_p10 }
  0xd1   : > { %p14266_p7 = pnand %p14265_p0, %p14259_p11 }
  0xd3   : > { %14269 = shalt.err (!%p14266_p7)
}
  0xd4   : > { %13480 = dma.hbm_to_vmem [thread:$0]  (!%p14584_p5), %s14506_s30, 4096, %s1011_s26, [#allocation17], %s14370_s23, %s14370_s23, %s14371_s1  }
  0xd5   : > { %s14380_s18 = smov [#allocation21]  }
  0xd6   : > { %s1057_s22 = sshll.u32 %s14380_s18, 4  ;;  %s1058_s22 = int_to_ptr.vmem [resolvable:$true] %s1057_s22 }
  0xd7   : > { %s14281_s10 = scalar_lea.vmem %s1058_s22, 2048  ;;  %p14289_p9 = scmp.lt.s32.totalorder %s1058_s22, %s1058_s22 }
  0xd8   : > { %p14282_p1 = scmp.ne.s32.totalorder %s1058_s22, %s14281_s10  ;;  %p14290_p2 = scmp.lt.s32.totalorder %s14281_s10, %s14281_s10 }
  0xda   : > { %p14284_p8 = pnand %p14282_p1, %p14594_p6  ;;  %p14291_p10 = por %p14290_p2, %p14289_p9 }
  0xdc   : > { %p14285_p4 = pneg %p14284_p8 }
  0xde   : > { %p14292_p11 = pnand %p14291_p10, %p14285_p4 }
  0xe0   : > { %14295 = shalt.err (!%p14292_p11)
}
  0xe1   : > { %13486 = dma.hbm_to_vmem [thread:$0]  (!%p14584_p5), %s14551_s17, 2048, %s1058_s22, [#allocation20], %s14370_s23, %s14370_s23, %s14371_s1  }
  0xe2   : > { %1083 = sbr.rel (%p14574_p3) target bundleno = 11052 (0x2b2c), region = 156 }
  0xe7   : > { %p16678_p13 = scmp.eq.s32.totalorder %s14569_s16, 0 }
  0xe9   : > { %14301 = dma.done.wait (%p16678_p13), [#allocation3], 1024   ;;  %p16679_p6 = pmov %p16678_p13 }
  0xeb   : > { %14303 = vsyncadd (%p16679_p6), [#allocation3], 4294966272  ;;  %p16680_p12 = pmov %p16679_p6 }
  0xec   : > { %p16681_p0 = pmov %p16679_p6 }
  0xed   : > { %14305 = dma.done.wait (%p16680_p12), [#allocation5], 576  }
  0xee   : > { %14307 = vsyncadd (%p16681_p0), [#allocation5], 4294966720  ;;  %p16682_p7 = pmov %p16681_p0 }
  0xef   : > { %p16683_p5 = pmov %p16681_p0 }
  0xf0   : > { %14309 = dma.done.wait (%p16682_p7), [#allocation8], 960  }
  0xf1   : > { %14311 = vsyncadd (%p16683_p5), [#allocation8], 4294966336  ;;  %p16684_p3 = pmov %p16681_p0 }
  0xf2   : > { %p16685_p1 = pmov %p16681_p0 }
  0xf3   : > { %14313 = dma.done.wait (%p16684_p3), [#allocation11], 1024  }
  0xf4   : > { %14315 = vsyncadd (%p16685_p1), [#allocation11], 4294966272  ;;  %p16686_p8 = pmov %p16681_p0 }
  0xf5   : > { %p16687_p4 = pmov %p16681_p0 }
  0xf6   : > { %14317 = dma.done.wait (%p16686_p8), [#allocation14], 6144  }
  0xf7   : > { %14319 = vsyncadd (%p16687_p4), [#allocation14], 4294961152  ;;  %p16688_p9 = pmov %p16681_p0 }
  0xf8   : > { %p16689_p2 = pmov %p16681_p0 }
  0xf9   : > { %14321 = dma.done.wait (%p16688_p9), [#allocation17], 8192  }
  0xfa   : > { %14323 = vsyncadd (%p16689_p2), [#allocation17], 4294959104  ;;  %p16690_p10 = pmov %p16681_p0 }
  0xfb   : > { %p16691_p11 = pmov %p16681_p0 }
  0xfc   : > { %14325 = dma.done.wait (%p16690_p10), [#allocation20], 9216  }
  0xfd   : > { %14327 = vsyncadd (%p16691_p11), [#allocation20], 4294958080  ;;  %p1216_p13 = scmp.lt.s32.totalorder %s14569_s16, 1  ;;  %vm1236_vm0 = vcmask 261120   ;;  %vm1372_vm1 = vcmask 31744   ;;  %v14743_v0 = vld [vmem:[#allocation2] sm:$0xff] }
  0xfe   : > { %v14745_v1 = vld [vmem:[#allocation2 + $0x8] sm:$0xff]  ;;  %v1237_v3 = vsel %vm1236_vm0, %v14743_v0, 0.0  ;;  %v14750_v5 = vld [vmem:[#allocation2 + $0x10] sm:$0xff]  ;;  %v14756_v8 = vld [vmem:[#allocation2 + $0x18] sm:$0xff]  ;;  %vm1555_vm2 = vcmask 1043456   ;;  %vm14382_vm3 = vmmov 0  }
  0xff   : > { %s16718_s16 = smov (!%p1216_p13, %s14569_s16), 1  ;;  %1238 = vadd.xlane.f32.xlu0 %v1237_v3  ;;  %v1240_v6 = vsel %vm1236_vm0, %v14745_v1, 0.0  ;;  %v1243_v7 = vsel %vm1236_vm0, %v14750_v5, 0.0  ;;  %v14758_v9 = vld [vmem:[#allocation2 + $0x20] sm:$0xff]  ;;  %v1246_v10 = vsel %vm1236_vm0, %v14756_v8, 0.0  ;;  %v14764_v12 = vld [vmem:[#allocation2 + $0x28] sm:$0xff] }
 0x100   : > { %s10648_s0 = sshll.u32 %s16718_s16, 3  ;;  %v1249_v11 = vsel %vm1236_vm0, %v14758_v9, 0.0  ;;  %v14766_v13 = vld [vmem:[#allocation2 + $0x30] sm:$0xff]  ;;  %v1252_v14 = vsel %vm1236_vm0, %v14764_v12, 0.0  ;;  %v14772_v16 = vld [vmem:[#allocation2 + $0x38] sm:$0xff]  ;;  %v1402_v3 = vld [vmem:[#allocation4 + $0x8] sm:$0xff] }
 0x101   : > { %s1219_s28 = scalar_lea.vmem %s14391_s5, %s10648_s0  ;;  %v1255_v15 = vsel %vm1236_vm0, %v14766_v13, 0.0  ;;  %v1258_v17 = vsel %vm1236_vm0, %v14772_v16, 0.0  ;;  %v1404_v63 = vld [vmem:[#allocation4 + $0x18] sm:$0xff]  ;;  %s16692_s11 = sld [smem:[#allocation29_spill]]  ;;  %vm1702_vm4 = vcmask 408576   ;;  %vm1835_vm5 = vcmask 64512  }
 0x102   : > { %v1225_v2 = vld [vmem:[%s1219_s28] sm:$0xff]  ;;  %12007 = vmatprep.subr.mxu0 %v1404_v63  ;;  %s16693_s23 = sld [smem:[#allocation30_spill]]  ;;  %vm2083_vm6 = vcmask 1041408   ;;  %vm3593_vm7 = vcmask 523264  }
 0x103   : > { %v1373_v4 = vsel %vm1372_vm1, %v1225_v2, 0.0  ;;  %1241 = vadd.xlane.f32.xlu0 %v1240_v6  ;;  %12008 = vmatpush3.msra.mxu0 %v1404_v63  ;;  %v1405_v6 = vld [vmem:[#allocation6] sm:$0xf]  ;;  %s16694_s1 = sld [smem:[#allocation31_spill]] }
 0x104   : > { %1374 = vadd.xlane.f32.xlu1 %v1373_v4  ;;  %v1401_v4 = vld [vmem:[#allocation4] sm:$0xff]  ;;  %s16695_s6 = sld [smem:[#allocation32_spill]] }
 0x105   : > { %s16696_s26 = sld [smem:[#allocation33_spill]] }
 0x106   : > { %s16697_s7 = sld [smem:[#allocation34_spill]] }
 0x107   : > { %1247 = vadd.xlane.f32.xlu0 %v1246_v10  ;;  %s16698_s2 = sld [smem:[#allocation37_spill]] }
 0x108   : > { %1244 = vadd.xlane.f32.xlu1 %v1243_v7  ;;  %v14381_v7 = vmov 0.0   ;;  %s16699_s18 = sld [smem:[#allocation36_spill]] }
 0x109   : > { %12027 = vmatprep.subr.mxu1 %v14381_v7  ;;  %12029 = vmatprep.mubr.msk.f32.mxu1 %vm14382_vm3, %v14381_v7  ;;  %s16700_s22 = sld [smem:[#allocation38_spill]] }
 0x10a   : > { %12028 = vmatpush3.msk.msra.mxu1 %vm1555_vm2, %v1405_v6  ;;  %v1406_v6 = vld [vmem:[#allocation7] sm:$0xf]  ;;  %s16705_s10 = sld [smem:[#allocation39_spill]] }
 0x10b   : > { %1253 = vadd.xlane.f32.xlu0 %v1252_v14  ;;  %12032 = vmatprep.subr.mxu1 %v14381_v7  ;;  %s16706_s0 = sld [smem:[#allocation40_spill]] }
 0x10c   : > { %1250 = vadd.xlane.f32.xlu1 %v1249_v11  ;;  %s16707_s28 = sld [smem:[#allocation41_spill]] }
 0x10f   : > { %1259 = vadd.xlane.f32.xlu0 %v1258_v17 }
 0x110   : > { %1256 = vadd.xlane.f32.xlu1 %v1255_v15 }
 0x188   : > { %v1239_v18 = vpop.xlane.xlu0 %1238 }
 0x189   : > { %v1262_v20 = vmul.f32 0.03125, %v1239_v18 }
 0x18b   : > { %v14777_v22 = vsub.f32 %v14743_v0, %v1262_v20 }
 0x18c   : > { %v1242_v24 = vpop.xlane.xlu0 %1241 }
 0x18d   : > { %v1375_v19 = vpop.xlane.xlu1 %1374  ;;  %v1263_v26 = vmul.f32 0.03125, %v1242_v24  ;;  %v1278_v27 = vmul.f32 %v14777_v22, %v14777_v22 }
 0x18e   : > { %v1377_v21 = vmul.f32 0.25, %v1375_v19 }
 0x18f   : > { %v14786_v30 = vsub.f32 %v14745_v1, %v1263_v26  ;;  %v1286_v31 = vsel %vm1236_vm0, %v1278_v27, 0.0 }
 0x190   : > { %v14779_v23 = vsub.f32 %v1225_v2, %v1377_v21  ;;  %v1248_v33 = vpop.xlane.xlu0 %1247  ;;  %1287 = vadd.xlane.f32.xlu1 %v1286_v31  ;;  %v1403_v2 = vld [vmem:[#allocation4 + $0x10] sm:$0xff] }
 0x191   : > { %v1245_v25 = vpop.xlane.xlu1 %1244  ;;  %v1265_v36 = vmul.f32 0.03125, %v1248_v33  ;;  %v1279_v37 = vmul.f32 %v14786_v30, %v14786_v30  ;;  %12009 = vmatprep.subr.mxu0 %v1403_v2 }
 0x192   : > { %v1264_v28 = vmul.f32 0.03125, %v1245_v25  ;;  %v1379_v29 = vmul.f32 %v14779_v23, %v14779_v23  ;;  %12010 = vmatpush3.msra.mxu0 %v1403_v2 }
 0x193   : > { %v14798_v40 = vsub.f32 %v14756_v8, %v1265_v36  ;;  %v1289_v41 = vsel %vm1236_vm0, %v1279_v37, 0.0  ;;  %12011 = vmatprep.subr.mxu0 %v1402_v3 }
 0x194   : > { %v14790_v32 = vsub.f32 %v14750_v5, %v1264_v28  ;;  %v1380_v34 = vsel %vm1372_vm1, %v1379_v29, 0.0  ;;  %1290 = vadd.xlane.f32.xlu0 %v1289_v41  ;;  %v1254_v43 = vpop.xlane.xlu0 %1253  ;;  %12012 = vmatpush3.msra.mxu0 %v1402_v3 }
 0x195   : > { %v1251_v35 = vpop.xlane.xlu1 %1250  ;;  %1381 = vadd.xlane.f32.xlu1 %v1380_v34  ;;  %v1267_v46 = vmul.f32 0.03125, %v1254_v43  ;;  %v1281_v47 = vmul.f32 %v14798_v40, %v14798_v40  ;;  %12013 = vmatprep.subr.mxu0 %v1401_v4 }
 0x196   : > { %v1266_v38 = vmul.f32 0.03125, %v1251_v35  ;;  %v1280_v39 = vmul.f32 %v14790_v32, %v14790_v32  ;;  %12014 = vmatpush3.msra.mxu0 %v1401_v4 }
 0x197   : > { %v14810_v50 = vsub.f32 %v14764_v12, %v1267_v46  ;;  %v1295_v51 = vsel %vm1236_vm0, %v1281_v47, 0.0 }
 0x198   : > { %v14802_v42 = vsub.f32 %v14758_v9, %v1266_v38  ;;  %v1292_v44 = vsel %vm1236_vm0, %v1280_v39, 0.0  ;;  %v1260_v53 = vpop.xlane.xlu0 %1259 }
 0x199   : > { %v1257_v45 = vpop.xlane.xlu1 %1256  ;;  %1296 = vadd.xlane.f32.xlu1 %v1295_v51  ;;  %1293 = vadd.xlane.f32.xlu0 %v1292_v44  ;;  %v1269_v54 = vmul.f32 0.03125, %v1260_v53  ;;  %v1283_v55 = vmul.f32 %v14810_v50, %v14810_v50 }
 0x19a   : > { %v1268_v48 = vmul.f32 0.03125, %v1257_v45  ;;  %v1282_v49 = vmul.f32 %v14802_v42, %v14802_v42  ;;  %v10651_v45 = vld [vmem:[%s14401_s13] ss:$0 sm:$0xff] }
 0x19b   : > { %v14822_v58 = vsub.f32 %v14772_v16, %v1269_v54  ;;  %v1301_v59 = vsel %vm1236_vm0, %v1283_v55, 0.0 }
 0x19c   : > { %v14814_v52 = vsub.f32 %v14766_v13, %v1268_v48  ;;  %v1298_v56 = vsel %vm1236_vm0, %v1282_v49, 0.0  ;;  %v10652_v49 = vld [vmem:[%s16692_s11] ss:$0 sm:$0xff]  ;;  %s16712_s11 = sld [smem:[#allocation46_spill]] }
 0x19d   : > { %1302 = vadd.xlane.f32.xlu1 %v1301_v59  ;;  %1299 = vadd.xlane.f32.xlu0 %v1298_v56  ;;  %v1285_v60 = vmul.f32 %v14822_v58, %v14822_v58 }
 0x19e   : > { %v1284_v57 = vmul.f32 %v14814_v52, %v14814_v52 }
 0x19f   : > { %v1307_v62 = vsel %vm1236_vm0, %v1285_v60, 0.0 }
 0x1a0   : > { %v1304_v61 = vsel %vm1236_vm0, %v1284_v57, 0.0  ;;  %v10653_v57 = vld [vmem:[%s16693_s23] ss:$0 sm:$0xff]  ;;  %s16713_s23 = sld [smem:[#allocation44_spill]] }
 0x1a1   : > { %1308 = vadd.xlane.f32.xlu1 %v1307_v62  ;;  %1305 = vadd.xlane.f32.xlu0 %v1304_v61  ;;  %v10654_v61 = vld [vmem:[%s16694_s1] ss:$0 sm:$0xff]  ;;  %s16714_s1 = sld [smem:[#allocation42_spill]] }
 0x219   : > { %v1288_v10 = vpop.xlane.xlu1 %1287 }
 0x21a   : > { %v1310_v11 = vmul.f32 0.03125, %v1288_v10 }
 0x21c   : > { %v1318_v14 = vadd.f32 1e-05, %v1310_v11 }
 0x21d   : > { %v1291_v15 = vpop.xlane.xlu0 %1290 }
 0x21e   : > { %v1382_v17 = vpop.xlane.xlu1 %1381  ;;  %13572 = vrsqrt.f32 %v1318_v14  ;;  %v1311_v18 = vmul.f32 0.03125, %v1291_v15 }
 0x21f   : > { %v1383_v19 = vmul.f32 0.25, %v1382_v17 }
 0x220   : > { %v1319_v20 = vadd.f32 1e-05, %v1311_v18 }
 0x221   : > { %v1384_v21 = vadd.f32 1e-05, %v1383_v19 }
 0x222   : > { %v1294_v24 = vpop.xlane.xlu0 %1293  ;;  %v1297_v25 = vpop.xlane.xlu1 %1296  ;;  %13574 = vrsqrt.f32 %v1319_v20 }
 0x223   : > { %v1312_v26 = vmul.f32 0.03125, %v1294_v24  ;;  %v1313_v27 = vmul.f32 0.03125, %v1297_v25  ;;  %13576 = vrsqrt.f32 %v1384_v21 }
 0x225   : > { %v1320_v28 = vadd.f32 1e-05, %v1312_v26  ;;  %v1321_v29 = vadd.f32 1e-05, %v1313_v27 }
 0x226   : > { %v1300_v31 = vpop.xlane.xlu0 %1299  ;;  %v1303_v33 = vpop.xlane.xlu1 %1302 }
 0x227   : > { %13578 = vrsqrt.f32 %v1320_v28  ;;  %v1314_v34 = vmul.f32 0.03125, %v1300_v31  ;;  %v1315_v35 = vmul.f32 0.03125, %v1303_v33 }
 0x228   : > { %13580 = vrsqrt.f32 %v1321_v29 }
 0x229   : > { %v1322_v36 = vadd.f32 1e-05, %v1314_v34  ;;  %v1323_v37 = vadd.f32 1e-05, %v1315_v35 }
 0x22a   : > { %v1306_v38 = vpop.xlane.xlu0 %1305  ;;  %v1309_v39 = vpop.xlane.xlu1 %1308 }
 0x22b   : > { %13582 = vrsqrt.f32 %v1322_v36  ;;  %v1316_v41 = vmul.f32 0.03125, %v1306_v38  ;;  %v1317_v43 = vmul.f32 0.03125, %v1309_v39  ;;  %v13573_v44 = vpop.eup %13572 }
 0x22c   : > { %13584 = vrsqrt.f32 %v1323_v37  ;;  %v1334_v48 = vmul.f32 %v13573_v44, %v14777_v22 }
 0x22d   : > { %v1324_v46 = vadd.f32 1e-05, %v1316_v41  ;;  %v1325_v47 = vadd.f32 1e-05, %v1317_v43 }
 0x22e   : > { %v1348_v51 = vmul.f32 %v10651_v45, %v1334_v48 }
 0x22f   : > { %13586 = vrsqrt.f32 %v1324_v46  ;;  %v13575_v53 = vpop.eup %13574 }
 0x230   : > { %13588 = vrsqrt.f32 %v1325_v47  ;;  %v13577_v54 = vpop.eup %13576  ;;  %v1362_v55 = vadd.f32 %v10652_v49, %v1348_v51  ;;  %v1335_v56 = vmul.f32 %v13575_v53, %v14786_v30 }
 0x231   : > { %v1386_v59 = vmul.f32 %v13577_v54, %v14779_v23 }
 0x232   : > { %12015 = vmatprep.mubr.msk.f32.mxu0 %vm1236_vm0, %v1362_v55  ;;  %v1349_v60 = vmul.f32 %v10651_v45, %v1335_v56 }
 0x233   : > { %v1393_v63 = vmul.f32 %v10653_v57, %v1386_v59 }
 0x234   : > { %v13579_v62 = vpop.eup %13578  ;;  %v1363_v22 = vadd.f32 %v10652_v49, %v1349_v60 }
 0x235   : > { %v13581_v2 = vpop.eup %13580  ;;  %v1336_v3 = vmul.f32 %v13579_v62, %v14790_v32  ;;  %v1400_v4 = vadd.f32 %v10654_v61, %v1393_v63 }
 0x236   : > { %v1337_v10 = vmul.f32 %v13581_v2, %v14798_v40  ;;  %12016 = vmatmul.mubr.msk.f32.vlgmr.msra.gmra.mxu0 %vm1236_vm0, %v1363_v22 }
 0x237   : > { %v1350_v30 = vmul.f32 %v10651_v45, %v1336_v3  ;;  %12030 = vmatmul.mubr.msk.f32.vlgmr.msra.gmra.mxu1 %vm1372_vm1, %v1400_v4 }
 0x238   : > { %v13583_v11 = vpop.eup %13582  ;;  %v1351_v23 = vmul.f32 %v10651_v45, %v1337_v10  ;;  %12033 = vmatpush3.msk.msra.mxu1 %vm1555_vm2, %v1406_v6  ;;  %12034 = vmatprep.mubr.msk.f32.mxu1 %vm14382_vm3, %v14381_v7 }
 0x239   : > { %v13585_v14 = vpop.eup %13584  ;;  %v1364_v15 = vadd.f32 %v10652_v49, %v1350_v30  ;;  %v1338_v32 = vmul.f32 %v13583_v11, %v14802_v42 }
 0x23a   : > { %v1365_v17 = vadd.f32 %v10652_v49, %v1351_v23  ;;  %v1339_v18 = vmul.f32 %v13585_v14, %v14810_v50 }
 0x23b   : > { %12018 = vmatprep.mubr.msk.f32.mxu0 %vm1236_vm0, %v1364_v15  ;;  %v1352_v40 = vmul.f32 %v10651_v45, %v1338_v32  ;;  %12035 = vmatmul.mubr.msk.f32.vlgmr.msra.gmra.mxu1 %vm1372_vm1, %v1400_v4 }
 0x23c   : > { %v13587_v19 = vpop.eup %13586  ;;  %12019 = vmatmul.mubr.msk.f32.gmra.mxu0 %vm1236_vm0, %v1365_v17  ;;  %v1353_v20 = vmul.f32 %v10651_v45, %v1339_v18 }
 0x23d   : > { %v13589_v21 = vpop.eup %13588  ;;  %v1366_v24 = vadd.f32 %v10652_v49, %v1352_v40  ;;  %v1340_v25 = vmul.f32 %v13587_v19, %v14814_v52 }
 0x23e   : > { %v1367_v7 = vadd.f32 %v10652_v49, %v1353_v20  ;;  %v1341_v26 = vmul.f32 %v13589_v21, %v14822_v58 }
 0x23f   : > { %12021 = vmatprep.mubr.msk.f32.mxu0 %vm1236_vm0, %v1366_v24  ;;  %v1354_v42 = vmul.f32 %v10651_v45, %v1340_v25 }
 0x240   : > { %12022 = vmatmul.mubr.msk.f32.gmra.mxu0 %vm1236_vm0, %v1367_v7  ;;  %v1355_v50 = vmul.f32 %v10651_v45, %v1341_v26 }
 0x241   : > { %v1368_v27 = vadd.f32 %v10652_v49, %v1354_v42 }
 0x242   : > { %v1369_v28 = vadd.f32 %v10652_v49, %v1355_v50 }
 0x243   : > { %12024 = vmatprep.mubr.msk.f32.mxu0 %vm1236_vm0, %v1368_v27 }
 0x244   : > { %12025 = vmatmul.mubr.msk.f32.gmra.mxu0 %vm1236_vm0, %v1369_v28 }
 0x2f6   : > { %v12017_v29 = vpop.f32.mrf.mxu0 }
 0x2f7   : > { %v1625_v31 = vpop.f32.mrf.mxu1  ;;  %v1545_v34 = vmul.f32 0.14142136, %v12017_v29 }
 0x2f8   : > { %12037 = vmatprep.subr.msk.mxu1 %vm1702_vm4, %v1625_v31  ;;  %v1505_v52 = vpop.f32.mrf.mxu0 }
 0x2f9   : > { %v1544_v33 = vmul.f32 0.14142136, %v1505_v52  ;;  %v12031_v58 = vpop.f32.mrf.mxu1  ;;  %12038 = vmatpush3.xpose.msk.msra.mxu1 %vm1702_vm4, %v1625_v31 }
 0x2fb   : > { %v1698_v35 = vpop.f32.mrf.mxu1  ;;  %12039 = vmatprep.mubr.msk.f32.mxu1 %vm1702_vm4, %v1544_v33 }
 0x2fc   : > { %v12020_v36 = vpop.f32.mrf.mxu0  ;;  %12051 = vmatprep.subr.mxu1 %v1698_v35  ;;  %12040 = vmatmul.mubr.msk.f32.vlgmr.msra.gmra.mxu1 %vm1702_vm4, %v1545_v34 }
 0x2fd   : > { %v12036_v37 = vpop.f32.mrf.mxu1  ;;  %12052 = vmatpush3.msra.mxu1 %v1698_v35  ;;  %v1547_v41 = vmul.f32 0.14142136, %v12020_v36 }
 0x2fe   : > { %v1515_v38 = vpop.f32.mrf.mxu0 }
 0x2ff   : > { %v1546_v39 = vmul.f32 0.14142136, %v1515_v38 }
 0x300   : > { %v12023_v43 = vpop.f32.mrf.mxu0 }
 0x301   : > { %12042 = vmatprep.mubr.msk.f32.mxu1 %vm1702_vm4, %v1546_v39  ;;  %v1549_v46 = vmul.f32 0.14142136, %v12023_v43 }
 0x302   : > { %v1525_v44 = vpop.f32.mrf.mxu0  ;;  %12043 = vmatmul.mubr.msk.f32.gmra.mxu1 %vm1702_vm4, %v1547_v41 }
 0x303   : > { %v1548_v45 = vmul.f32 0.14142136, %v1525_v44 }
 0x304   : > { %v12026_v47 = vpop.f32.mrf.mxu0 }
 0x305   : > { %12045 = vmatprep.mubr.msk.f32.mxu1 %vm1702_vm4, %v1548_v45  ;;  %v1551_v51 = vmul.f32 0.14142136, %v12026_v47 }
 0x306   : > { %v1535_v48 = vpop.f32.mrf.mxu0  ;;  %12046 = vmatmul.mubr.msk.f32.gmra.mxu1 %vm1702_vm4, %v1549_v46 }
 0x307   : > { %v1550_v49 = vmul.f32 0.14142136, %v1535_v48 }
 0x309   : > { %12048 = vmatprep.mubr.msk.f32.mxu1 %vm1702_vm4, %v1550_v49 }
 0x30a   : > { %12049 = vmatmul.mubr.msk.f32.gmra.mxu1 %vm1702_vm4, %v1551_v51 }
 0x3bc   : > { %v12041_v53 = vpop.f32.mrf.mxu1 }
 0x3bd   : > { %v1839_v54 = vsel %vm1835_vm5, %v12041_v53, -inf }
 0x3be   : > { %1840 = vmax.xlane.f32.xlu1 %v1839_v54  ;;  %v1796_v55 = vpop.f32.mrf.mxu1 }
 0x3bf   : > { %v1836_v56 = vsel %vm1835_vm5, %v1796_v55, -inf }
 0x3c0   : > { %1837 = vmax.xlane.f32.xlu0 %v1836_v56 }
 0x3c2   : > { %v12044_v57 = vpop.f32.mrf.mxu1 }
 0x3c3   : > { %v1845_v59 = vsel %vm1835_vm5, %v12044_v57, -inf }
 0x3c4   : > { %1846 = vmax.xlane.f32.xlu1 %v1845_v59  ;;  %v1806_v60 = vpop.f32.mrf.mxu1 }
 0x3c5   : > { %v1842_v61 = vsel %vm1835_vm5, %v1806_v60, -inf }
 0x3c6   : > { %1843 = vmax.xlane.f32.xlu0 %v1842_v61  ;;  %v12047_v62 = vpop.f32.mrf.mxu1 }
 0x3c7   : > { %v1851_v63 = vsel %vm1835_vm5, %v12047_v62, -inf }
 0x3c8   : > { %1852 = vmax.xlane.f32.xlu1 %v1851_v63  ;;  %v1816_v2 = vpop.f32.mrf.mxu1 }
 0x3c9   : > { %v1848_v22 = vsel %vm1835_vm5, %v1816_v2, -inf }
 0x3ca   : > { %1849 = vmax.xlane.f32.xlu0 %v1848_v22  ;;  %v12050_v3 = vpop.f32.mrf.mxu1 }
 0x3cb   : > { %v1857_v4 = vsel %vm1835_vm5, %v12050_v3, -inf }
 0x3cc   : > { %1858 = vmax.xlane.f32.xlu1 %v1857_v4  ;;  %v1826_v6 = vpop.f32.mrf.mxu1  ;;  %v1412_v4 = vld [vmem:[#allocation9 + $0x28] sm:$0xff] }
 0x3cd   : > { %v1854_v10 = vsel %vm1835_vm5, %v1826_v6, -inf }
 0x3ce   : > { %1855 = vmax.xlane.f32.xlu0 %v1854_v10 }
 0x447   : > { %v1841_v30 = vpop.xlane.xlu1 %1840 }
 0x448   : > { %v1861_v11 = vsub.f32 %v12041_v53, %v1841_v30  ;;  %v1413_v53 = vld [vmem:[#allocation9 + $0x30] sm:$0x3]  ;;  %v1411_v30 = vld [vmem:[#allocation9 + $0x20] sm:$0xff] }
 0x449   : > { %v1838_v23 = vpop.xlane.xlu0 %1837  ;;  %12065 = vmatprep.subr.msk.mxu1 %vm2083_vm6, %v1413_v53 }
 0x44a   : > { %v1870_v14 = vmul.f32 1.442695, %v1861_v11  ;;  %v1860_v15 = vsub.f32 %v1796_v55, %v1838_v23 }
 0x44c   : > { %13590 = vpow2.f32 %v1870_v14  ;;  %v1868_v32 = vmul.f32 1.442695, %v1860_v15  ;;  %v1410_v15 = vld [vmem:[#allocation9 + $0x18] sm:$0xff] }
 0x44d   : > { %v1847_v17 = vpop.xlane.xlu1 %1846 }
 0x44e   : > { %v1863_v18 = vsub.f32 %v12044_v57, %v1847_v17  ;;  %13592 = vpow2.f32 %v1868_v32 }
 0x44f   : > { %v1844_v40 = vpop.xlane.xlu0 %1843 }
 0x450   : > { %v1874_v19 = vmul.f32 1.442695, %v1863_v18  ;;  %v1862_v20 = vsub.f32 %v1806_v60, %v1844_v40  ;;  %v1409_v18 = vld [vmem:[#allocation9 + $0x10] sm:$0xff] }
 0x451   : > { %v1853_v21 = vpop.xlane.xlu1 %1852 }
 0x452   : > { %13594 = vpow2.f32 %v1874_v19  ;;  %v1872_v24 = vmul.f32 1.442695, %v1862_v20  ;;  %v1865_v25 = vsub.f32 %v12047_v62, %v1853_v21 }
 0x453   : > { %v1850_v7 = vpop.xlane.xlu0 %1849 }
 0x454   : > { %13596 = vpow2.f32 %v1872_v24  ;;  %v1878_v26 = vmul.f32 1.442695, %v1865_v25  ;;  %v1864_v42 = vsub.f32 %v1816_v2, %v1850_v7  ;;  %v1408_v25 = vld [vmem:[#allocation9 + $0x8] sm:$0xff]  ;;  %v1407_v7 = vld [vmem:[#allocation9] sm:$0xff] }
 0x455   : > { %v1859_v50 = vpop.xlane.xlu1 %1858 }
 0x456   : > { %13598 = vpow2.f32 %v1878_v26  ;;  %v1876_v27 = vmul.f32 1.442695, %v1864_v42  ;;  %v1867_v28 = vsub.f32 %v12050_v3, %v1859_v50 }
 0x457   : > { %v1856_v29 = vpop.xlane.xlu0 %1855 }
 0x458   : > { %13600 = vpow2.f32 %v1876_v27  ;;  %v1882_v31 = vmul.f32 1.442695, %v1867_v28  ;;  %v1866_v52 = vsub.f32 %v1826_v6, %v1856_v29 }
 0x459   : > { %v13591_v33 = vpop.eup %13590 }
 0x45a   : > { %13602 = vpow2.f32 %v1882_v31  ;;  %v1880_v58 = vmul.f32 1.442695, %v1866_v52  ;;  %v1887_v34 = vsel %vm1835_vm5, %v13591_v33, 0.0 }
 0x45b   : > { %v13593_v35 = vpop.eup %13592  ;;  %1888 = vadd.xlane.f32.xlu1 %v1887_v34 }
 0x45c   : > { %13604 = vpow2.f32 %v1880_v58  ;;  %v1884_v36 = vsel %vm1835_vm5, %v13593_v35, 0.0 }
 0x45d   : > { %1885 = vadd.xlane.f32.xlu0 %v1884_v36 }
 0x45f   : > { %v13595_v37 = vpop.eup %13594 }
 0x460   : > { %v1893_v38 = vsel %vm1835_vm5, %v13595_v37, 0.0 }
 0x461   : > { %v13597_v39 = vpop.eup %13596  ;;  %1894 = vadd.xlane.f32.xlu1 %v1893_v38 }
 0x462   : > { %v1890_v41 = vsel %vm1835_vm5, %v13597_v39, 0.0 }
 0x463   : > { %v13599_v43 = vpop.eup %13598  ;;  %1891 = vadd.xlane.f32.xlu0 %v1890_v41 }
 0x464   : > { %v1899_v44 = vsel %vm1835_vm5, %v13599_v43, 0.0 }
 0x465   : > { %v13601_v45 = vpop.eup %13600  ;;  %1900 = vadd.xlane.f32.xlu1 %v1899_v44 }
 0x466   : > { %v1896_v46 = vsel %vm1835_vm5, %v13601_v45, 0.0 }
 0x467   : > { %v13603_v47 = vpop.eup %13602  ;;  %1897 = vadd.xlane.f32.xlu0 %v1896_v46 }
 0x468   : > { %v1905_v48 = vsel %vm1835_vm5, %v13603_v47, 0.0 }
 0x469   : > { %v13605_v49 = vpop.eup %13604  ;;  %1906 = vadd.xlane.f32.xlu1 %v1905_v48 }
 0x46a   : > { %v1902_v51 = vsel %vm1835_vm5, %v13605_v49, 0.0 }
 0x46b   : > { %1903 = vadd.xlane.f32.xlu0 %v1902_v51 }
 0x4e4   : > { %v1889_v54 = vpop.xlane.xlu1 %1888 }
 0x4e5   : > { %13606 = vrcp.f32 %v1889_v54 }
 0x4e6   : > { %v1886_v55 = vpop.xlane.xlu0 %1885 }
 0x4e7   : > { %13608 = vrcp.f32 %v1886_v55 }
 0x4ea   : > { %v1895_v56 = vpop.xlane.xlu1 %1894 }
 0x4eb   : > { %13610 = vrcp.f32 %v1895_v56 }
 0x4ec   : > { %v1892_v57 = vpop.xlane.xlu0 %1891 }
 0x4ed   : > { %13612 = vrcp.f32 %v1892_v57 }
 0x4ee   : > { %v1901_v59 = vpop.xlane.xlu1 %1900 }
 0x4ef   : > { %13614 = vrcp.f32 %v1901_v59 }
 0x4f0   : > { %v1898_v60 = vpop.xlane.xlu0 %1897 }
 0x4f1   : > { %13616 = vrcp.f32 %v1898_v60 }
 0x4f2   : > { %v1907_v61 = vpop.xlane.xlu1 %1906  ;;  %v13607_v62 = vpop.eup %13606 }
 0x4f3   : > { %13618 = vrcp.f32 %v1907_v61  ;;  %v1917_v3 = vmul.f32 %v13607_v62, %v13591_v33  ;;  %v10684_v33 = vld [vmem:[%s16695_s6] ss:$0 sm:$0xff]  ;;  %s16715_s6 = sld [smem:[#allocation43_spill]] }
 0x4f4   : > { %v1904_v63 = vpop.xlane.xlu0 %1903  ;;  %v13609_v2 = vpop.eup %13608 }
 0x4f5   : > { %13620 = vrcp.f32 %v1904_v63  ;;  %v1916_v22 = vmul.f32 %v13609_v2, %v13593_v35 }
 0x4f7   : > { %12053 = vmatprep.mubr.msk.f32.mxu1 %vm1835_vm5, %v1916_v22 }
 0x4f8   : > { %v13611_v6 = vpop.eup %13610  ;;  %12054 = vmatmul.mubr.msk.f32.vlgmr.msra.gmra.mxu1 %vm1835_vm5, %v1917_v3 }
 0x4f9   : > { %12066 = vmatpush3.msk.msra.mxu1 %vm2083_vm6, %v1413_v53  ;;  %v1919_v23 = vmul.f32 %v13611_v6, %v13595_v37 }
 0x4fa   : > { %v13613_v10 = vpop.eup %13612  ;;  %12067 = vmatprep.subr.mxu1 %v1412_v4 }
 0x4fb   : > { %v1918_v11 = vmul.f32 %v13613_v10, %v13597_v39  ;;  %12068 = vmatpush3.msra.mxu1 %v1412_v4 }
 0x4fc   : > { %v13615_v14 = vpop.eup %13614  ;;  %12069 = vmatprep.subr.mxu1 %v1411_v30 }
 0x4fd   : > { %12056 = vmatprep.mubr.msk.f32.mxu1 %vm1835_vm5, %v1918_v11  ;;  %12070 = vmatpush3.msra.mxu1 %v1411_v30  ;;  %v1921_v40 = vmul.f32 %v13615_v14, %v13599_v43 }
 0x4fe   : > { %v13617_v32 = vpop.eup %13616  ;;  %12057 = vmatmul.mubr.msk.f32.gmra.mxu1 %vm1835_vm5, %v1919_v23  ;;  %12071 = vmatprep.subr.mxu1 %v1410_v15 }
 0x4ff   : > { %v1920_v17 = vmul.f32 %v13617_v32, %v13601_v45  ;;  %12072 = vmatpush3.msra.mxu1 %v1410_v15 }
 0x500   : > { %v13619_v19 = vpop.eup %13618  ;;  %12073 = vmatprep.subr.mxu1 %v1409_v18 }
 0x501   : > { %12059 = vmatprep.mubr.msk.f32.mxu1 %vm1835_vm5, %v1920_v17  ;;  %12074 = vmatpush3.msra.mxu1 %v1409_v18  ;;  %v1923_v24 = vmul.f32 %v13619_v19, %v13603_v47 }
 0x502   : > { %v13621_v20 = vpop.eup %13620  ;;  %12060 = vmatmul.mubr.msk.f32.gmra.mxu1 %vm1835_vm5, %v1921_v40  ;;  %12075 = vmatprep.subr.mxu1 %v1408_v25 }
 0x503   : > { %v1922_v21 = vmul.f32 %v13621_v20, %v13605_v49  ;;  %12076 = vmatpush3.msra.mxu1 %v1408_v25 }
 0x504   : > { %12077 = vmatprep.subr.mxu1 %v1407_v7 }
 0x505   : > { %12062 = vmatprep.mubr.msk.f32.mxu1 %vm1835_vm5, %v1922_v21  ;;  %12078 = vmatpush3.msra.mxu1 %v1407_v7 }
 0x506   : > { %12063 = vmatmul.mubr.msk.f32.gmra.mxu1 %vm1835_vm5, %v1923_v24 }
 0x5b8   : > { %v12055_v26 = vpop.f32.mrf.mxu1 }
 0x5ba   : > { %v2014_v42 = vpop.f32.mrf.mxu1 }
 0x5bb   : > { %12079 = vmatprep.mubr.msk.f32.mxu1 %vm1702_vm4, %v2014_v42 }
 0x5bc   : > { %12080 = vmatmul.mubr.msk.f32.vlgmr.msra.gmra.mxu1 %vm1702_vm4, %v12055_v26 }
 0x5be   : > { %v12058_v50 = vpop.f32.mrf.mxu1 }
 0x5c0   : > { %v2024_v27 = vpop.f32.mrf.mxu1 }
 0x5c1   : > { %12082 = vmatprep.mubr.msk.f32.mxu1 %vm1702_vm4, %v2024_v27 }
 0x5c2   : > { %v12061_v28 = vpop.f32.mrf.mxu1  ;;  %12083 = vmatmul.mubr.msk.f32.gmra.mxu1 %vm1702_vm4, %v12058_v50 }
 0x5c4   : > { %v2034_v29 = vpop.f32.mrf.mxu1 }
 0x5c5   : > { %12085 = vmatprep.mubr.msk.f32.mxu1 %vm1702_vm4, %v2034_v29 }
 0x5c6   : > { %v12064_v31 = vpop.f32.mrf.mxu1  ;;  %12086 = vmatmul.mubr.msk.f32.gmra.mxu1 %vm1702_vm4, %v12061_v28 }
 0x5c8   : > { %v2044_v52 = vpop.f32.mrf.mxu1 }
 0x5c9   : > { %12088 = vmatprep.mubr.msk.f32.mxu1 %vm1702_vm4, %v2044_v52 }
 0x5ca   : > { %12089 = vmatmul.mubr.msk.f32.gmra.mxu1 %vm1702_vm4, %v12064_v31 }
 0x67c   : > { %v12081_v58 = vpop.f32.mrf.mxu1 }
 0x67d   : > { %v2159_v34 = vadd.f32 %v12081_v58, %v10684_v33 }
 0x67e   : > { %v2153_v35 = vpop.f32.mrf.mxu1 }
 0x67f   : > { %v14906_v36 = vadd.f32 %v2159_v34, %v14745_v1  ;;  %v2154_v37 = vadd.f32 %v10684_v33, %v2153_v35 }
 0x681   : > { %v14909_v38 = vadd.f32 %v2154_v37, %v14743_v0  ;;  %v2232_v41 = vsel %vm1236_vm0, %v14906_v36, 0.0 }
 0x682   : > { %v12084_v39 = vpop.f32.mrf.mxu1  ;;  %2233 = vadd.xlane.f32.xlu1 %v2232_v41 }
 0x683   : > { %v2169_v43 = vadd.f32 %v12084_v39, %v10684_v33  ;;  %v2229_v45 = vsel %vm1236_vm0, %v14909_v38, 0.0 }
 0x684   : > { %v2163_v44 = vpop.f32.mrf.mxu1  ;;  %2230 = vadd.xlane.f32.xlu0 %v2229_v45  ;;  %v2210_v45 = vld [vmem:[#allocation12 + $0x18] sm:$0xff] }
 0x685   : > { %v14916_v46 = vadd.f32 %v2169_v43, %v14756_v8  ;;  %v2164_v47 = vadd.f32 %v10684_v33, %v2163_v44  ;;  %12111 = vmatprep.subr.mxu1 %v2210_v45 }
 0x686   : > { %v12087_v1 = vpop.f32.mrf.mxu1  ;;  %12112 = vmatpush3.msra.mxu1 %v2210_v45 }
 0x687   : > { %v14919_v48 = vadd.f32 %v2164_v47, %v14750_v5  ;;  %v2179_v0 = vadd.f32 %v12087_v1, %v10684_v33  ;;  %v2238_v49 = vsel %vm1236_vm0, %v14916_v46, 0.0  ;;  %v2205_v47 = vld [vmem:[#allocation10 + $0x18] sm:$0xff]  ;;  %v2209_v1 = vld [vmem:[#allocation12 + $0x10] sm:$0xff] }
 0x688   : > { %2239 = vadd.xlane.f32.xlu1 %v2238_v49  ;;  %v2173_v51 = vpop.f32.mrf.mxu1  ;;  %12091 = vmatprep.subr.mxu0 %v2205_v47  ;;  %v2208_v49 = vld [vmem:[#allocation12 + $0x8] sm:$0xff] }
 0x689   : > { %v14924_v53 = vadd.f32 %v2179_v0, %v14764_v12  ;;  %v2174_v54 = vadd.f32 %v10684_v33, %v2173_v51  ;;  %v2235_v8 = vsel %vm1236_vm0, %v14919_v48, 0.0  ;;  %v2204_v0 = vld [vmem:[#allocation10 + $0x10] sm:$0xff]  ;;  %12092 = vmatpush3.msra.mxu0 %v2205_v47  ;;  %v2203_v51 = vld [vmem:[#allocation10 + $0x8] sm:$0xff]  ;;  %12113 = vmatprep.subr.mxu1 %v2209_v1 }
 0x68a   : > { %v12090_v55 = vpop.f32.mrf.mxu1  ;;  %2236 = vadd.xlane.f32.xlu0 %v2235_v8  ;;  %12093 = vmatprep.subr.mxu0 %v2204_v0  ;;  %v2202_v8 = vld [vmem:[#allocation10] sm:$0xff] }
 0x68b   : > { %v14929_v56 = vadd.f32 %v2174_v54, %v14758_v9  ;;  %v2189_v5 = vadd.f32 %v12090_v55, %v10684_v33  ;;  %v2244_v57 = vsel %vm1236_vm0, %v14924_v53, 0.0  ;;  %12114 = vmatpush3.msra.mxu1 %v2209_v1  ;;  %12094 = vmatpush3.msra.mxu0 %v2204_v0  ;;  %v2207_v54 = vld [vmem:[#allocation12] sm:$0xff] }
 0x68c   : > { %2245 = vadd.xlane.f32.xlu1 %v2244_v57  ;;  %v2183_v59 = vpop.f32.mrf.mxu1  ;;  %12115 = vmatprep.subr.mxu1 %v2208_v49 }
 0x68d   : > { %v14934_v60 = vadd.f32 %v2189_v5, %v14772_v16  ;;  %v2184_v12 = vadd.f32 %v10684_v33, %v2183_v59  ;;  %v2241_v61 = vsel %vm1236_vm0, %v14929_v56, 0.0  ;;  %12095 = vmatprep.subr.mxu0 %v2203_v51  ;;  %12116 = vmatpush3.msra.mxu1 %v2208_v49 }
 0x68e   : > { %2242 = vadd.xlane.f32.xlu0 %v2241_v61  ;;  %12096 = vmatpush3.msra.mxu0 %v2203_v51 }
 0x68f   : > { %v14939_v62 = vadd.f32 %v2184_v12, %v14766_v13  ;;  %v2250_v9 = vsel %vm1236_vm0, %v14934_v60, 0.0  ;;  %12117 = vmatprep.subr.mxu1 %v2207_v54  ;;  %12097 = vmatprep.subr.mxu0 %v2202_v8 }
 0x690   : > { %2251 = vadd.xlane.f32.xlu1 %v2250_v9  ;;  %12118 = vmatpush3.msra.mxu1 %v2207_v54 }
 0x691   : > { %v2247_v63 = vsel %vm1236_vm0, %v14939_v62, 0.0  ;;  %12098 = vmatpush3.msra.mxu0 %v2202_v8 }
 0x692   : > { %2248 = vadd.xlane.f32.xlu0 %v2247_v63 }
 0x70b   : > { %v2234_v2 = vpop.xlane.xlu1 %2233 }
 0x70c   : > { %v2254_v22 = vmul.f32 0.03125, %v2234_v2 }
 0x70d   : > { %v2231_v16 = vpop.xlane.xlu0 %2230 }
 0x70e   : > { %v14946_v3 = vsub.f32 %v14906_v36, %v2254_v22  ;;  %v2253_v4 = vmul.f32 0.03125, %v2231_v16 }
 0x710   : > { %v14949_v6 = vsub.f32 %v14909_v38, %v2253_v4  ;;  %v2270_v10 = vmul.f32 %v14946_v3, %v14946_v3 }
 0x711   : > { %v2240_v13 = vpop.xlane.xlu1 %2239 }
 0x712   : > { %v2256_v30 = vmul.f32 0.03125, %v2240_v13  ;;  %v2280_v23 = vsel %vm1236_vm0, %v2270_v10, 0.0  ;;  %v2269_v14 = vmul.f32 %v14949_v6, %v14949_v6 }
 0x713   : > { %v2237_v11 = vpop.xlane.xlu0 %2236  ;;  %2281 = vadd.xlane.f32.xlu1 %v2280_v23 }
 0x714   : > { %v14957_v15 = vsub.f32 %v14916_v46, %v2256_v30  ;;  %v2255_v32 = vmul.f32 0.03125, %v2237_v11  ;;  %v2277_v18 = vsel %vm1236_vm0, %v2269_v14, 0.0 }
 0x715   : > { %v2246_v17 = vpop.xlane.xlu1 %2245  ;;  %2278 = vadd.xlane.f32.xlu0 %v2277_v18 }
 0x716   : > { %v14961_v40 = vsub.f32 %v14919_v48, %v2255_v32  ;;  %v2258_v19 = vmul.f32 0.03125, %v2246_v17  ;;  %v2272_v20 = vmul.f32 %v14957_v15, %v14957_v15 }
 0x717   : > { %v2243_v21 = vpop.xlane.xlu0 %2242 }
 0x718   : > { %v14966_v24 = vsub.f32 %v14924_v53, %v2258_v19  ;;  %v2257_v25 = vmul.f32 0.03125, %v2243_v21  ;;  %v2286_v7 = vsel %vm1236_vm0, %v2272_v20, 0.0  ;;  %v2271_v26 = vmul.f32 %v14961_v40, %v14961_v40 }
 0x719   : > { %2287 = vadd.xlane.f32.xlu1 %v2286_v7  ;;  %v2252_v42 = vpop.xlane.xlu1 %2251  ;;  %v10694_v7 = vld [vmem:[%s16696_s26] ss:$0 sm:$0xff]  ;;  %s16716_s26 = sld [smem:[#allocation45_spill]] }
 0x71a   : > { %v14972_v50 = vsub.f32 %v14929_v56, %v2257_v25  ;;  %v2260_v27 = vmul.f32 0.03125, %v2252_v42  ;;  %v2283_v28 = vsel %vm1236_vm0, %v2271_v26, 0.0  ;;  %v2274_v29 = vmul.f32 %v14966_v24, %v14966_v24 }
 0x71b   : > { %2284 = vadd.xlane.f32.xlu0 %v2283_v28  ;;  %v2249_v31 = vpop.xlane.xlu0 %2248 }
 0x71c   : > { %v14978_v52 = vsub.f32 %v14934_v60, %v2260_v27  ;;  %v2259_v33 = vmul.f32 0.03125, %v2249_v31  ;;  %v2292_v58 = vsel %vm1236_vm0, %v2274_v29, 0.0  ;;  %v2273_v34 = vmul.f32 %v14972_v50, %v14972_v50  ;;  %v10695_v31 = vld [vmem:[%s16697_s7] ss:$0 sm:$0xff]  ;;  %s11197_s7 = sshll.u32 %s16718_s16, 6 }
 0x71d   : > { %2293 = vadd.xlane.f32.xlu1 %v2292_v58 }
 0x71e   : > { %v14984_v35 = vsub.f32 %v14939_v62, %v2259_v33  ;;  %v2289_v37 = vsel %vm1236_vm0, %v2273_v34, 0.0  ;;  %v2276_v39 = vmul.f32 %v14978_v52, %v14978_v52 }
 0x71f   : > { %2290 = vadd.xlane.f32.xlu0 %v2289_v37 }
 0x720   : > { %v2298_v41 = vsel %vm1236_vm0, %v2276_v39, 0.0  ;;  %v2275_v43 = vmul.f32 %v14984_v35, %v14984_v35 }
 0x721   : > { %2299 = vadd.xlane.f32.xlu1 %v2298_v41 }
 0x722   : > { %v2295_v44 = vsel %vm1236_vm0, %v2275_v43, 0.0 }
 0x723   : > { %2296 = vadd.xlane.f32.xlu0 %v2295_v44 }
 0x79c   : > { %v2282_v55 = vpop.xlane.xlu1 %2281 }
 0x79d   : > { %v2302_v5 = vmul.f32 0.03125, %v2282_v55 }
 0x79e   : > { %v2279_v57 = vpop.xlane.xlu0 %2278 }
 0x79f   : > { %v2310_v59 = vadd.f32 1e-05, %v2302_v5  ;;  %v2301_v12 = vmul.f32 0.03125, %v2279_v57 }
 0x7a1   : > { %13622 = vrsqrt.f32 %v2310_v59  ;;  %v2309_v61 = vadd.f32 1e-05, %v2301_v12  ;;  %v2226_v59 = vld [vmem:[#allocation13 + $0x70] sm:$0xff]  ;;  %v2225_v12 = vld [vmem:[#allocation13 + $0x68] sm:$0xff] }
 0x7a2   : > { %v2288_v9 = vpop.xlane.xlu1 %2287 }
 0x7a3   : > { %v2304_v63 = vmul.f32 0.03125, %v2288_v9  ;;  %13624 = vrsqrt.f32 %v2309_v61  ;;  %v2224_v61 = vld [vmem:[#allocation13 + $0x60] sm:$0xff]  ;;  %v2223_v9 = vld [vmem:[#allocation13 + $0x58] sm:$0xff] }
 0x7a4   : > { %v2285_v2 = vpop.xlane.xlu0 %2284 }
 0x7a5   : > { %v2312_v22 = vadd.f32 1e-05, %v2304_v63  ;;  %v2303_v16 = vmul.f32 0.03125, %v2285_v2  ;;  %v2222_v63 = vld [vmem:[#allocation13 + $0x50] sm:$0xff]  ;;  %v2221_v2 = vld [vmem:[#allocation13 + $0x48] sm:$0xff] }
 0x7a6   : > { %v2294_v4 = vpop.xlane.xlu1 %2293 }
 0x7a7   : > { %13626 = vrsqrt.f32 %v2312_v22  ;;  %v2311_v13 = vadd.f32 1e-05, %v2303_v16  ;;  %v2306_v10 = vmul.f32 0.03125, %v2294_v4  ;;  %v2220_v22 = vld [vmem:[#allocation13 + $0x40] sm:$0xff]  ;;  %v2219_v16 = vld [vmem:[#allocation13 + $0x38] sm:$0xff]  ;;  %v2218_v4 = vld [vmem:[#allocation13 + $0x30] sm:$0xff] }
 0x7a8   : > { %v2291_v30 = vpop.xlane.xlu0 %2290 }
 0x7a9   : > { %13628 = vrsqrt.f32 %v2311_v13  ;;  %v2314_v11 = vadd.f32 1e-05, %v2306_v10  ;;  %v2305_v23 = vmul.f32 0.03125, %v2291_v30  ;;  %v2217_v13 = vld [vmem:[#allocation13 + $0x28] sm:$0xff]  ;;  %v2216_v10 = vld [vmem:[#allocation13 + $0x20] sm:$0xff]  ;;  %v2215_v30 = vld [vmem:[#allocation13 + $0x18] sm:$0xff] }
 0x7aa   : > { %v2300_v14 = vpop.xlane.xlu1 %2299 }
 0x7ab   : > { %13630 = vrsqrt.f32 %v2314_v11  ;;  %v2313_v32 = vadd.f32 1e-05, %v2305_v23  ;;  %v2308_v17 = vmul.f32 0.03125, %v2300_v14  ;;  %v2214_v11 = vld [vmem:[#allocation13 + $0x10] sm:$0xff]  ;;  %v2213_v23 = vld [vmem:[#allocation13 + $0x8] sm:$0xff]  ;;  %v2212_v14 = vld [vmem:[#allocation13] sm:$0xff] }
 0x7ac   : > { %v2297_v18 = vpop.xlane.xlu0 %2296 }
 0x7ad   : > { %13632 = vrsqrt.f32 %v2313_v32  ;;  %v2316_v19 = vadd.f32 1e-05, %v2308_v17  ;;  %v2307_v20 = vmul.f32 0.03125, %v2297_v18  ;;  %v10705_v32 = vld [vmem:[%s16698_s2] ss:$0 sm:$0xff]  ;;  %s1224_s2 = scalar_lea.vmem %s14561_s25, %s11197_s7 }
 0x7ae   : > { %v13623_v21 = vpop.eup %13622 }
 0x7af   : > { %13634 = vrsqrt.f32 %v2316_v19  ;;  %v2315_v25 = vadd.f32 1e-05, %v2307_v20  ;;  %v2326_v26 = vmul.f32 %v13623_v21, %v14946_v3 }
 0x7b0   : > { %v13625_v42 = vpop.eup %13624 }
 0x7b1   : > { %13636 = vrsqrt.f32 %v2315_v25  ;;  %v2325_v27 = vmul.f32 %v13625_v42, %v14949_v6  ;;  %v2340_v28 = vmul.f32 %v10694_v7, %v2326_v26 }
 0x7b3   : > { %v2339_v33 = vmul.f32 %v10694_v7, %v2325_v27  ;;  %v2354_v39 = vadd.f32 %v10695_v31, %v2340_v28 }
 0x7b4   : > { %v13627_v29 = vpop.eup %13626 }
 0x7b5   : > { %v2328_v58 = vmul.f32 %v13627_v29, %v14957_v15  ;;  %v2353_v37 = vadd.f32 %v10695_v31, %v2339_v33 }
 0x7b6   : > { %v13629_v34 = vpop.eup %13628 }
 0x7b7   : > { %v2327_v41 = vmul.f32 %v13629_v34, %v14961_v40  ;;  %12099 = vmatprep.mubr.msk.f32.mxu0 %vm1236_vm0, %v2353_v37  ;;  %12119 = vmatprep.mubr.msk.f32.mxu1 %vm1236_vm0, %v2353_v37  ;;  %v2342_v3 = vmul.f32 %v10694_v7, %v2328_v58 }
 0x7b8   : > { %v13631_v43 = vpop.eup %13630  ;;  %12100 = vmatmul.mubr.msk.f32.vlgmr.msra.gmra.mxu0 %vm1236_vm0, %v2354_v39  ;;  %12120 = vmatmul.mubr.msk.f32.vlgmr.msra.gmra.mxu1 %vm1236_vm0, %v2354_v39 }
 0x7b9   : > { %v2341_v6 = vmul.f32 %v10694_v7, %v2327_v41  ;;  %v2330_v44 = vmul.f32 %v13631_v43, %v14966_v24  ;;  %v2356_v0 = vadd.f32 %v10695_v31, %v2342_v3 }
 0x7ba   : > { %v13633_v45 = vpop.eup %13632 }
 0x7bb   : > { %v2355_v15 = vadd.f32 %v10695_v31, %v2341_v6  ;;  %v2329_v47 = vmul.f32 %v13633_v45, %v14972_v50  ;;  %v2344_v40 = vmul.f32 %v10694_v7, %v2330_v44 }
 0x7bc   : > { %v13635_v1 = vpop.eup %13634 }
 0x7bd   : > { %12102 = vmatprep.mubr.msk.f32.mxu0 %vm1236_vm0, %v2355_v15  ;;  %12122 = vmatprep.mubr.msk.f32.mxu1 %vm1236_vm0, %v2355_v15  ;;  %v2343_v49 = vmul.f32 %v10694_v7, %v2329_v47  ;;  %v2332_v51 = vmul.f32 %v13635_v1, %v14978_v52  ;;  %v2358_v55 = vadd.f32 %v10695_v31, %v2344_v40 }
 0x7be   : > { %v13637_v54 = vpop.eup %13636  ;;  %12103 = vmatmul.mubr.msk.f32.gmra.mxu0 %vm1236_vm0, %v2356_v0  ;;  %12123 = vmatmul.mubr.msk.f32.gmra.mxu1 %vm1236_vm0, %v2356_v0 }
 0x7bf   : > { %v2357_v24 = vadd.f32 %v10695_v31, %v2343_v49  ;;  %v2331_v8 = vmul.f32 %v13637_v54, %v14984_v35  ;;  %v2346_v50 = vmul.f32 %v10694_v7, %v2332_v51  ;;  %v2227_v35 = vld [vmem:[#allocation13 + $0x78] sm:$0xff] }
 0x7c0   : > { %12131 = vmatprep.subr.mxu0 %v2227_v35 }
 0x7c1   : > { %12105 = vmatprep.mubr.msk.f32.mxu0 %vm1236_vm0, %v2357_v24  ;;  %12125 = vmatprep.mubr.msk.f32.mxu1 %vm1236_vm0, %v2357_v24  ;;  %v2345_v5 = vmul.f32 %v10694_v7, %v2331_v8  ;;  %v2360_v57 = vadd.f32 %v10695_v31, %v2346_v50 }
 0x7c2   : > { %12106 = vmatmul.mubr.msk.f32.gmra.mxu0 %vm1236_vm0, %v2358_v55  ;;  %12126 = vmatmul.mubr.msk.f32.gmra.mxu1 %vm1236_vm0, %v2358_v55 }
 0x7c3   : > { %v2359_v52 = vadd.f32 %v10695_v31, %v2345_v5  ;;  %12132 = vmatpush3.msra.mxu0 %v2227_v35 }
 0x7c4   : > { %12133 = vmatprep.subr.mxu0 %v2226_v59 }
 0x7c5   : > { %12108 = vmatprep.mubr.msk.f32.mxu0 %vm1236_vm0, %v2359_v52  ;;  %12128 = vmatprep.mubr.msk.f32.mxu1 %vm1236_vm0, %v2359_v52 }
 0x7c6   : > { %12109 = vmatmul.mubr.msk.f32.gmra.mxu0 %vm1236_vm0, %v2360_v57  ;;  %12129 = vmatmul.mubr.msk.f32.gmra.mxu1 %vm1236_vm0, %v2360_v57 }
 0x7c7   : > { %12134 = vmatpush3.msra.mxu0 %v2226_v59 }
 0x7c8   : > { %12135 = vmatprep.subr.mxu0 %v2225_v12 }
 0x7c9   : > { %12136 = vmatpush3.msra.mxu0 %v2225_v12 }
 0x7ca   : > { %12137 = vmatprep.subr.mxu0 %v2224_v61 }
 0x7cb   : > { %12138 = vmatpush3.msra.mxu0 %v2224_v61 }
 0x7cc   : > { %12139 = vmatprep.subr.mxu0 %v2223_v9 }
 0x7cd   : > { %12140 = vmatpush3.msra.mxu0 %v2223_v9 }
 0x7ce   : > { %12141 = vmatprep.subr.mxu0 %v2222_v63 }
 0x7cf   : > { %12142 = vmatpush3.msra.mxu0 %v2222_v63 }
 0x7d0   : > { %12143 = vmatprep.subr.mxu0 %v2221_v2 }
 0x7d1   : > { %12144 = vmatpush3.msra.mxu0 %v2221_v2 }
 0x7d2   : > { %12145 = vmatprep.subr.mxu0 %v2220_v22 }
 0x7d3   : > { %12146 = vmatpush3.msra.mxu0 %v2220_v22 }
 0x7d4   : > { %12147 = vmatprep.subr.mxu0 %v2219_v16 }
 0x7d5   : > { %12148 = vmatpush3.msra.mxu0 %v2219_v16 }
 0x7d6   : > { %12149 = vmatprep.subr.mxu0 %v2218_v4 }
 0x7d7   : > { %12150 = vmatpush3.msra.mxu0 %v2218_v4 }
 0x7d8   : > { %12151 = vmatprep.subr.mxu0 %v2217_v13 }
 0x7d9   : > { %12152 = vmatpush3.msra.mxu0 %v2217_v13 }
 0x7da   : > { %12153 = vmatprep.subr.mxu0 %v2216_v10 }
 0x7db   : > { %12154 = vmatpush3.msra.mxu0 %v2216_v10 }
 0x7dc   : > { %12155 = vmatprep.subr.mxu0 %v2215_v30 }
 0x7dd   : > { %12156 = vmatpush3.msra.mxu0 %v2215_v30 }
 0x7de   : > { %12157 = vmatprep.subr.mxu0 %v2214_v11 }
 0x7df   : > { %12158 = vmatpush3.msra.mxu0 %v2214_v11 }
 0x7e0   : > { %12159 = vmatprep.subr.mxu0 %v2213_v23 }
 0x7e1   : > { %12160 = vmatpush3.msra.mxu0 %v2213_v23 }
 0x7e2   : > { %12161 = vmatprep.subr.mxu0 %v2212_v14 }
 0x7e3   : > { %12162 = vmatpush3.msra.mxu0 %v2212_v14 }
 0x878   : > { %v12121_v17 = vpop.f32.mrf.mxu1  ;;  %v12101_v50 = vpop.f32.mrf.mxu0 }
 0x879   : > { %v15020_v18 = vadd.f32 %v12121_v17, %v10705_v32 }
 0x87a   : > { %v2568_v19 = vpop.f32.mrf.mxu1  ;;  %v2457_v16 = vpop.f32.mrf.mxu0 }
 0x87b   : > { %v2608_v20 = vmul.f32 %v15020_v18, %v15020_v18  ;;  %v15024_v21 = vadd.f32 %v10705_v32, %v2568_v19 }
 0x87d   : > { %v2616_v25 = vmul.f32 %v2608_v20, %v15020_v18  ;;  %v2607_v7 = vmul.f32 %v15024_v21, %v15024_v21 }
 0x87e   : > { %v12124_v26 = vpop.f32.mrf.mxu1 }
 0x87f   : > { %v15029_v42 = vadd.f32 %v12124_v26, %v10705_v32  ;;  %v2624_v27 = vmul.f32 0.044715, %v2616_v25  ;;  %v2615_v28 = vmul.f32 %v2607_v7, %v15024_v21 }
 0x880   : > { %v2578_v29 = vpop.f32.mrf.mxu1 }
 0x881   : > { %v2610_v31 = vmul.f32 %v15029_v42, %v15029_v42  ;;  %v15034_v33 = vadd.f32 %v10705_v32, %v2578_v29  ;;  %v2632_v58 = vadd.f32 %v2624_v27, %v15020_v18  ;;  %v2623_v34 = vmul.f32 0.044715, %v2615_v28 }
 0x882   : > { %v12127_v37 = vpop.f32.mrf.mxu1 }
 0x883   : > { %v2618_v39 = vmul.f32 %v2610_v31, %v15029_v42  ;;  %v2609_v41 = vmul.f32 %v15034_v33, %v15034_v33  ;;  %v15040_v43 = vadd.f32 %v12127_v37, %v10705_v32  ;;  %v2640_v3 = vmul.f32 0.7978846, %v2632_v58  ;;  %v10696_v58 = vld [vmem:[%s16699_s18] ss:$0 sm:$0xff] }
 0x884   : > { %v2631_v6 = vadd.f32 %v2623_v34, %v15024_v21  ;;  %v2588_v44 = vpop.f32.mrf.mxu1 }
 0x885   : > { %v2626_v45 = vmul.f32 0.044715, %v2618_v39  ;;  %v2617_v15 = vmul.f32 %v2609_v41, %v15034_v33  ;;  %v2612_v47 = vmul.f32 %v15040_v43, %v15040_v43  ;;  %13638 = vtanh.f32 %v2640_v3 }
 0x886   : > { %v2639_v1 = vmul.f32 0.7978846, %v2631_v6  ;;  %v15046_v0 = vadd.f32 %v10705_v32, %v2588_v44  ;;  %v12130_v40 = vpop.f32.mrf.mxu1  ;;  %v2458_v6 = vadd.f32 %v10696_v58, %v2457_v16 }
 0x887   : > { %v2634_v49 = vadd.f32 %v2626_v45, %v15029_v42  ;;  %v2625_v51 = vmul.f32 0.044715, %v2617_v15  ;;  %v2620_v54 = vmul.f32 %v2612_v47, %v15040_v43  ;;  %v15052_v8 = vadd.f32 %v12130_v40, %v10705_v32 }
 0x888   : > { %13640 = vtanh.f32 %v2639_v1  ;;  %v2611_v24 = vmul.f32 %v15046_v0, %v15046_v0  ;;  %v2598_v55 = vpop.f32.mrf.mxu1  ;;  %v2463_v45 = vadd.f32 %v12101_v50, %v10696_v58 }
 0x889   : > { %v2642_v5 = vmul.f32 0.7978846, %v2634_v49  ;;  %v2633_v52 = vadd.f32 %v2625_v51, %v15034_v33  ;;  %v2628_v57 = vmul.f32 0.044715, %v2620_v54  ;;  %v2614_v59 = vmul.f32 %v15052_v8, %v15052_v8 }
 0x88a   : > { %v2619_v35 = vmul.f32 %v2611_v24, %v15046_v0  ;;  %v15058_v12 = vadd.f32 %v10705_v32, %v2598_v55  ;;  %v12104_v32 = vpop.f32.mrf.mxu0 }
 0x88b   : > { %13642 = vtanh.f32 %v2642_v5  ;;  %v2641_v61 = vmul.f32 0.7978846, %v2633_v52  ;;  %v2636_v9 = vadd.f32 %v2628_v57, %v15040_v43  ;;  %v2622_v2 = vmul.f32 %v2614_v59, %v15052_v8 }
 0x88c   : > { %v2627_v63 = vmul.f32 0.044715, %v2619_v35  ;;  %v2613_v22 = vmul.f32 %v15058_v12, %v15058_v12  ;;  %v2467_v27 = vpop.f32.mrf.mxu0  ;;  %v2473_v35 = vadd.f32 %v12104_v32, %v10696_v58 }
 0x88d   : > { %13644 = vtanh.f32 %v2641_v61  ;;  %v2644_v4 = vmul.f32 0.7978846, %v2636_v9  ;;  %v2630_v10 = vmul.f32 0.044715, %v2622_v2 }
 0x88e   : > { %v2635_v13 = vadd.f32 %v2627_v63, %v15046_v0  ;;  %v2621_v30 = vmul.f32 %v2613_v22, %v15058_v12  ;;  %v12107_v39 = vpop.f32.mrf.mxu0 }
 0x88f   : > { %13646 = vtanh.f32 %v2644_v4  ;;  %v2638_v23 = vadd.f32 %v2630_v10, %v15052_v8 }
 0x890   : > { %v2643_v11 = vmul.f32 0.7978846, %v2635_v13  ;;  %v2629_v14 = vmul.f32 0.044715, %v2621_v30  ;;  %v2477_v51 = vpop.f32.mrf.mxu0 }
 0x891   : > { %v2646_v17 = vmul.f32 0.7978846, %v2638_v23  ;;  %v2478_v4 = vadd.f32 %v10696_v58, %v2477_v51 }
 0x892   : > { %13648 = vtanh.f32 %v2643_v11  ;;  %v2637_v19 = vadd.f32 %v2629_v14, %v15058_v12  ;;  %v13639_v20 = vpop.eup %13638  ;;  %v12110_v59 = vpop.f32.mrf.mxu0 }
 0x893   : > { %v2656_v25 = vadd.f32 1.0, %v13639_v20  ;;  %13650 = vtanh.f32 %v2646_v17  ;;  %v2493_v20 = vadd.f32 %v12110_v59, %v10696_v58 }
 0x894   : > { %v2645_v7 = vmul.f32 0.7978846, %v2637_v19  ;;  %v2487_v30 = vpop.f32.mrf.mxu0 }
 0x895   : > { %v13641_v26 = vpop.eup %13640  ;;  %v2664_v28 = vmul.f32 0.5, %v2656_v25  ;;  %v2488_v17 = vadd.f32 %v10696_v58, %v2487_v30 }
 0x896   : > { %13652 = vtanh.f32 %v2645_v7  ;;  %v2655_v29 = vadd.f32 1.0, %v13641_v26 }
 0x897   : > { %v2672_v37 = vmul.f32 %v2664_v28, %v15020_v18  ;;  %v2468_v18 = vadd.f32 %v10696_v58, %v2467_v27 }
 0x898   : > { %v13643_v31 = vpop.eup %13642  ;;  %v2663_v34 = vmul.f32 0.5, %v2655_v29 }
 0x899   : > { %v2658_v41 = vadd.f32 1.0, %v13643_v31  ;;  %v2680_v49 = vmul.f32 %v2672_v37, %v2463_v45 }
 0x89a   : > { %v13645_v3 = vpop.eup %13644  ;;  %v2671_v44 = vmul.f32 %v2663_v34, %v15024_v21 }
 0x89b   : > { %v2657_v15 = vadd.f32 1.0, %v13645_v3  ;;  %v2666_v47 = vmul.f32 0.5, %v2658_v41 }
 0x89c   : > { %v13647_v1 = vpop.eup %13646  ;;  %v2679_v40 = vmul.f32 %v2671_v44, %v2458_v6 }
 0x89d   : > { %v2665_v54 = vmul.f32 0.5, %v2657_v15  ;;  %v2660_v24 = vadd.f32 1.0, %v13647_v1  ;;  %v2674_v55 = vmul.f32 %v2666_v47, %v15029_v42 }
 0x89e   : > { %12163 = vmatprep.mubr.f32.mxu0 %v2679_v40 }
 0x89f   : > { %v13649_v5 = vpop.eup %13648  ;;  %12164 = vmatmul.mubr.f32.vlgmr.msra.gmra.mxu0 %v2680_v49  ;;  %v2673_v52 = vmul.f32 %v2665_v54, %v15034_v33  ;;  %v2668_v57 = vmul.f32 0.5, %v2660_v24  ;;  %v2682_v9 = vmul.f32 %v2674_v55, %v2473_v35  ;;  %v2483_v33 = vadd.f32 %v12107_v39, %v10696_v58 }
 0x8a0   : > { %v2659_v21 = vadd.f32 1.0, %v13649_v5  ;;  %v13651_v50 = vpop.eup %13650 }
 0x8a1   : > { %v2681_v61 = vmul.f32 %v2673_v52, %v2468_v18  ;;  %v2662_v2 = vadd.f32 1.0, %v13651_v50  ;;  %v2676_v16 = vmul.f32 %v2668_v57, %v15040_v43 }
 0x8a2   : > { %v2667_v63 = vmul.f32 0.5, %v2659_v21 }
 0x8a3   : > { %v13653_v22 = vpop.eup %13652  ;;  %12166 = vmatprep.mubr.f32.mxu0 %v2681_v61  ;;  %v2670_v10 = vmul.f32 0.5, %v2662_v2  ;;  %v2684_v14 = vmul.f32 %v2676_v16, %v2483_v33 }
 0x8a4   : > { %12167 = vmatmul.mubr.f32.gmra.mxu0 %v2682_v9  ;;  %v2675_v42 = vmul.f32 %v2667_v63, %v15046_v0  ;;  %v2661_v13 = vadd.f32 1.0, %v13653_v22  ;;  %v10714_v0 = vld [vmem:[%s16700_s22] ss:$0 sm:$0xff] }
 0x8a5   : > { %v2678_v32 = vmul.f32 %v2670_v10, %v15052_v8 }
 0x8a6   : > { %v2683_v11 = vmul.f32 %v2675_v42, %v2478_v4  ;;  %v2669_v23 = vmul.f32 0.5, %v2661_v13 }
 0x8a7   : > { %v2686_v25 = vmul.f32 %v2678_v32, %v2493_v20 }
 0x8a8   : > { %12169 = vmatprep.mubr.f32.mxu0 %v2683_v11  ;;  %v2677_v19 = vmul.f32 %v2669_v23, %v15058_v12 }
 0x8a9   : > { %12170 = vmatmul.mubr.f32.gmra.mxu0 %v2684_v14 }
 0x8aa   : > { %v2685_v43 = vmul.f32 %v2677_v19, %v2488_v17 }
 0x8ac   : > { %12172 = vmatprep.mubr.f32.mxu0 %v2685_v43 }
 0x8ad   : > { %12173 = vmatmul.mubr.f32.gmra.mxu0 %v2686_v25 }
 0x95f   : > { %v12165_v7 = vpop.f32.mrf.mxu0 }
 0x960   : > { %v2765_v26 = vadd.f32 %v12165_v7, %v10714_v0 }
 0x961   : > { %v2759_v27 = vpop.f32.mrf.mxu0 }
 0x962   : > { %v15079_v28 = vadd.f32 %v2765_v26, %v14906_v36  ;;  %v2760_v29 = vadd.f32 %v10714_v0, %v2759_v27 }
 0x964   : > { %v15082_v8 = vadd.f32 %v2760_v29, %v14909_v38  ;;  %v12168_v31 = vpop.f32.mrf.mxu0  ;;  %v2811_v12 = vsel %vm1236_vm0, %v15079_v28, 0.0 }
 0x965   : > { %v2775_v58 = vadd.f32 %v12168_v31, %v10714_v0  ;;  %2812 = vadd.xlane.f32.xlu1 %v2811_v12 }
 0x966   : > { %v2769_v34 = vpop.f32.mrf.mxu0  ;;  %v2808_v37 = vsel %vm1236_vm0, %v15082_v8, 0.0 }
 0x967   : > { %v15089_v39 = vadd.f32 %v2775_v58, %v14916_v46  ;;  %v2770_v41 = vadd.f32 %v10714_v0, %v2769_v34  ;;  %2809 = vadd.xlane.f32.xlu0 %v2808_v37  ;;  %v2943_v37 = vld [vmem:[#allocation15 + $0x18] sm:$0xff] }
 0x968   : > { %12175 = vmatprep.subr.mxu1 %v2943_v37 }
 0x969   : > { %v15092_v36 = vadd.f32 %v2770_v41, %v14919_v48  ;;  %v12171_v38 = vpop.f32.mrf.mxu0  ;;  %v2817_v3 = vsel %vm1236_vm0, %v15089_v39, 0.0  ;;  %v3007_v41 = vld [vmem:[#allocation18 + $0x18] sm:$0xff]  ;;  %12176 = vmatpush3.msra.mxu1 %v2943_v37 }
 0x96a   : > { %v2785_v6 = vadd.f32 %v12171_v38, %v10714_v0  ;;  %2818 = vadd.xlane.f32.xlu1 %v2817_v3  ;;  %12215 = vmatprep.subr.mxu0 %v3007_v41  ;;  %v2942_v38 = vld [vmem:[#allocation15 + $0x10] sm:$0xff] }
 0x96b   : > { %v2779_v44 = vpop.f32.mrf.mxu0  ;;  %v2814_v45 = vsel %vm1236_vm0, %v15092_v36, 0.0  ;;  %12216 = vmatpush3.msra.mxu0 %v3007_v41  ;;  %v3006_v3 = vld [vmem:[#allocation18 + $0x10] sm:$0xff]  ;;  %12177 = vmatprep.subr.mxu1 %v2942_v38 }
 0x96c   : > { %v15099_v15 = vadd.f32 %v2785_v6, %v14924_v53  ;;  %v2780_v46 = vadd.f32 %v10714_v0, %v2779_v44  ;;  %2815 = vadd.xlane.f32.xlu0 %v2814_v45  ;;  %12217 = vmatprep.subr.mxu0 %v3006_v3  ;;  %v2941_v6 = vld [vmem:[#allocation15 + $0x8] sm:$0xff]  ;;  %v2940_v45 = vld [vmem:[#allocation15] sm:$0xff] }
 0x96d   : > { %v12174_v47 = vpop.f32.mrf.mxu0  ;;  %12178 = vmatpush3.msra.mxu1 %v2942_v38  ;;  %12218 = vmatpush3.msra.mxu0 %v3006_v3  ;;  %v3005_v44 = vld [vmem:[#allocation18 + $0x8] sm:$0xff] }
 0x96e   : > { %16701 = vst [vmem:[#allocation47_spill] sm:$0xff] %v15099_v15  ;;  %v15102_v1 = vadd.f32 %v2780_v46, %v14929_v56  ;;  %v2795_v48 = vadd.f32 %v12174_v47, %v10714_v0  ;;  %v2823_v40 = vsel %vm1236_vm0, %v15099_v15, 0.0  ;;  %12179 = vmatprep.subr.mxu1 %v2941_v6  ;;  %12219 = vmatprep.subr.mxu0 %v3005_v44  ;;  %v3004_v46 = vld [vmem:[#allocation18] sm:$0xff]  ;;  %v2975_v47 = vld [vmem:[#allocation16 + $0x18] sm:$0xff] }
 0x96f   : > { %2824 = vadd.xlane.f32.xlu1 %v2823_v40  ;;  %v2789_v49 = vpop.f32.mrf.mxu0  ;;  %12180 = vmatpush3.msra.mxu1 %v2941_v6  ;;  %v2973_v6 = vld [vmem:[#allocation16 + $0x8] sm:$0xff] }
 0x970   : > { %16702 = vst [vmem:[#allocation48_spill] sm:$0xff] %v15102_v1  ;;  %v15107_v51 = vadd.f32 %v2795_v48, %v14934_v60  ;;  %v2790_v54 = vadd.f32 %v10714_v0, %v2789_v49  ;;  %v2820_v53 = vsel %vm1236_vm0, %v15102_v1, 0.0  ;;  %12220 = vmatpush3.msra.mxu0 %v3005_v44  ;;  %12181 = vmatprep.subr.mxu1 %v2940_v45 }
 0x971   : > { %2821 = vadd.xlane.f32.xlu0 %v2820_v53  ;;  %12221 = vmatprep.subr.mxu0 %v3004_v46 }
 0x972   : > { %16703 = vst [vmem:[#allocation49_spill] sm:$0xff] %v15107_v51  ;;  %v15112_v24 = vadd.f32 %v2790_v54, %v14939_v62  ;;  %v2829_v56 = vsel %vm1236_vm0, %v15107_v51, 0.0  ;;  %12182 = vmatpush3.msra.mxu1 %v2940_v45  ;;  %12222 = vmatpush3.msra.mxu0 %v3004_v46 }
 0x973   : > { %2830 = vadd.xlane.f32.xlu1 %v2829_v56  ;;  %12195 = vmatprep.subr.mxu1 %v2975_v47 }
 0x974   : > { %16704 = vst [vmem:[#allocation50_spill] sm:$0xff] %v15112_v24  ;;  %v2826_v55 = vsel %vm1236_vm0, %v15112_v24, 0.0 }
 0x975   : > { %2827 = vadd.xlane.f32.xlu0 %v2826_v55 }
 0x9ee   : > { %v2813_v5 = vpop.xlane.xlu1 %2812 }
 0x9ef   : > { %v2833_v18 = vmul.f32 0.03125, %v2813_v5 }
 0x9f0   : > { %v2810_v60 = vpop.xlane.xlu0 %2809 }
 0x9f1   : > { %v15119_v52 = vsub.f32 %v15079_v28, %v2833_v18  ;;  %v2832_v57 = vmul.f32 0.03125, %v2810_v60 }
 0x9f3   : > { %v15122_v35 = vsub.f32 %v15082_v8, %v2832_v57  ;;  %v2819_v62 = vpop.xlane.xlu1 %2818  ;;  %v2849_v21 = vmul.f32 %v15119_v52, %v15119_v52 }
 0x9f4   : > { %v2835_v50 = vmul.f32 0.03125, %v2819_v62 }
 0x9f5   : > { %v2816_v59 = vpop.xlane.xlu0 %2815  ;;  %v2859_v61 = vsel %vm1236_vm0, %v2849_v21, 0.0  ;;  %v2848_v9 = vmul.f32 %v15122_v35, %v15122_v35 }
 0x9f6   : > { %v15130_v63 = vsub.f32 %v15089_v39, %v2835_v50  ;;  %v2834_v2 = vmul.f32 0.03125, %v2816_v59  ;;  %2860 = vadd.xlane.f32.xlu1 %v2859_v61 }
 0x9f7   : > { %v2856_v22 = vsel %vm1236_vm0, %v2848_v9, 0.0 }
 0x9f8   : > { %v15134_v16 = vsub.f32 %v15092_v36, %v2834_v2  ;;  %v2825_v4 = vpop.xlane.xlu1 %2824  ;;  %2857 = vadd.xlane.f32.xlu0 %v2856_v22  ;;  %v2851_v42 = vmul.f32 %v15130_v63, %v15130_v63 }
 0x9f9   : > { %v2837_v13 = vmul.f32 0.03125, %v2825_v4 }
 0x9fa   : > { %v2822_v10 = vpop.xlane.xlu0 %2821  ;;  %v2865_v33 = vsel %vm1236_vm0, %v2851_v42, 0.0  ;;  %v2850_v30 = vmul.f32 %v15134_v16, %v15134_v16 }
 0x9fb   : > { %v15142_v11 = vsub.f32 %v15099_v15, %v2837_v13  ;;  %v2836_v23 = vmul.f32 0.03125, %v2822_v10  ;;  %2866 = vadd.xlane.f32.xlu1 %v2865_v33 }
 0x9fc   : > { %v2831_v14 = vpop.xlane.xlu1 %2830  ;;  %v2862_v32 = vsel %vm1236_vm0, %v2850_v30, 0.0  ;;  %v10715_v30 = vld [vmem:[%s16705_s10] ss:$0 sm:$0xff] }
 0x9fd   : > { %v15146_v17 = vsub.f32 %v15102_v1, %v2836_v23  ;;  %v2839_v19 = vmul.f32 0.03125, %v2831_v14  ;;  %2863 = vadd.xlane.f32.xlu0 %v2862_v32  ;;  %v2853_v20 = vmul.f32 %v15142_v11, %v15142_v11 }
 0x9fe   : > { %v2828_v43 = vpop.xlane.xlu0 %2827 }
 0x9ff   : > { %v15151_v25 = vsub.f32 %v15107_v51, %v2839_v19  ;;  %v2838_v0 = vmul.f32 0.03125, %v2828_v43  ;;  %v2871_v7 = vsel %vm1236_vm0, %v2853_v20, 0.0  ;;  %v2852_v26 = vmul.f32 %v15146_v17, %v15146_v17 }
 0xa00   : > { %2872 = vadd.xlane.f32.xlu1 %v2871_v7 }
 0xa01   : > { %v15157_v27 = vsub.f32 %v15112_v24, %v2838_v0  ;;  %v2868_v29 = vsel %vm1236_vm0, %v2852_v26, 0.0  ;;  %v2855_v31 = vmul.f32 %v15151_v25, %v15151_v25  ;;  %v10716_v0 = vld [vmem:[%s16706_s0] ss:$0 sm:$0xff] }
 0xa02   : > { %2869 = vadd.xlane.f32.xlu0 %v2868_v29 }
 0xa03   : > { %v2877_v12 = vsel %vm1236_vm0, %v2855_v31, 0.0  ;;  %v2854_v58 = vmul.f32 %v15157_v27, %v15157_v27 }
 0xa04   : > { %2878 = vadd.xlane.f32.xlu1 %v2877_v12 }
 0xa05   : > { %v2874_v34 = vsel %vm1236_vm0, %v2854_v58, 0.0 }
 0xa06   : > { %2875 = vadd.xlane.f32.xlu0 %v2874_v34 }
 0xa7f   : > { %v2861_v48 = vpop.xlane.xlu1 %2860 }
 0xa80   : > { %v2881_v40 = vmul.f32 0.03125, %v2861_v48 }
 0xa81   : > { %v2858_v49 = vpop.xlane.xlu0 %2857 }
 0xa82   : > { %v2889_v54 = vadd.f32 1e-05, %v2881_v40  ;;  %v2880_v53 = vmul.f32 0.03125, %v2858_v49 }
 0xa84   : > { %13654 = vrsqrt.f32 %v2889_v54  ;;  %v2888_v56 = vadd.f32 1e-05, %v2880_v53  ;;  %v2867_v55 = vpop.xlane.xlu1 %2866 }
 0xa85   : > { %v2883_v5 = vmul.f32 0.03125, %v2867_v55 }
 0xa86   : > { %13656 = vrsqrt.f32 %v2888_v56  ;;  %v2864_v18 = vpop.xlane.xlu0 %2863 }
 0xa87   : > { %v2891_v60 = vadd.f32 1e-05, %v2883_v5  ;;  %v2882_v57 = vmul.f32 0.03125, %v2864_v18 }
 0xa89   : > { %13658 = vrsqrt.f32 %v2891_v60  ;;  %v2890_v62 = vadd.f32 1e-05, %v2882_v57  ;;  %v2873_v21 = vpop.xlane.xlu1 %2872 }
 0xa8a   : > { %v2885_v50 = vmul.f32 0.03125, %v2873_v21 }
 0xa8b   : > { %13660 = vrsqrt.f32 %v2890_v62  ;;  %v2870_v59 = vpop.xlane.xlu0 %2869 }
 0xa8c   : > { %v2893_v61 = vadd.f32 1e-05, %v2885_v50  ;;  %v2884_v9 = vmul.f32 0.03125, %v2870_v59 }
 0xa8d   : > { %v2879_v2 = vpop.xlane.xlu1 %2878 }
 0xa8e   : > { %13662 = vrsqrt.f32 %v2893_v61  ;;  %v2892_v22 = vadd.f32 1e-05, %v2884_v9  ;;  %v2887_v4 = vmul.f32 0.03125, %v2879_v2 }
 0xa8f   : > { %v2876_v42 = vpop.xlane.xlu0 %2875 }
 0xa90   : > { %13664 = vrsqrt.f32 %v2892_v22  ;;  %v2895_v13 = vadd.f32 1e-05, %v2887_v4  ;;  %v2886_v10 = vmul.f32 0.03125, %v2876_v42 }
 0xa91   : > { %v13655_v33 = vpop.eup %13654 }
 0xa92   : > { %v2905_v23 = vmul.f32 %v13655_v33, %v15119_v52  ;;  %13666 = vrsqrt.f32 %v2895_v13  ;;  %v2894_v14 = vadd.f32 1e-05, %v2886_v10 }
 0xa93   : > { %v13657_v32 = vpop.eup %13656 }
 0xa94   : > { %v2904_v19 = vmul.f32 %v13657_v32, %v15122_v35  ;;  %13668 = vrsqrt.f32 %v2894_v14  ;;  %v2919_v20 = vmul.f32 %v10715_v30, %v2905_v23  ;;  %v2974_v35 = vld [vmem:[#allocation16 + $0x10] sm:$0xff] }
 0xa96   : > { %v13659_v43 = vpop.eup %13658  ;;  %v2918_v7 = vmul.f32 %v10715_v30, %v2904_v19  ;;  %v15173_v12 = vadd.f32 %v10716_v0, %v2919_v20 }
 0xa97   : > { %v2907_v26 = vmul.f32 %v13659_v43, %v15130_v63  ;;  %v2979_v43 = vld [vmem:[#allocation16 + $0x38] sm:$0xff] }
 0xa98   : > { %v13661_v29 = vpop.eup %13660  ;;  %v15171_v31 = vadd.f32 %v10716_v0, %v2918_v7 }
 0xa99   : > { %v2906_v58 = vmul.f32 %v13661_v29, %v15134_v16  ;;  %v2921_v52 = vmul.f32 %v10715_v30, %v2907_v26  ;;  %v2978_v26 = vld [vmem:[#allocation16 + $0x30] sm:$0xff]  ;;  %v2977_v29 = vld [vmem:[#allocation16 + $0x28] sm:$0xff] }
 0xa9a   : > { %12183 = vmatprep.mubr.msk.f32.mxu1 %vm1236_vm0, %v15171_v31  ;;  %12223 = vmatprep.mubr.msk.f32.mxu0 %vm1236_vm0, %v15171_v31 }
 0xa9b   : > { %v13663_v34 = vpop.eup %13662  ;;  %v2920_v37 = vmul.f32 %v10715_v30, %v2906_v58  ;;  %12184 = vmatmul.mubr.msk.f32.vlgmr.msra.gmra.mxu1 %vm1236_vm0, %v15173_v12  ;;  %12224 = vmatmul.mubr.msk.f32.vlgmr.msra.gmra.mxu0 %vm1236_vm0, %v15173_v12  ;;  %v15187_v38 = vadd.f32 %v10716_v0, %v2921_v52 }
 0xa9c   : > { %v2909_v63 = vmul.f32 %v13663_v34, %v15142_v11  ;;  %12196 = vmatpush3.msra.mxu1 %v2975_v47 }
 0xa9d   : > { %v13665_v16 = vpop.eup %13664  ;;  %v15185_v41 = vadd.f32 %v10716_v0, %v2920_v37  ;;  %12197 = vmatprep.subr.mxu1 %v2974_v35 }
 0xa9e   : > { %v2908_v3 = vmul.f32 %v13665_v16, %v15146_v17  ;;  %12198 = vmatpush3.msra.mxu1 %v2974_v35  ;;  %v2923_v45 = vmul.f32 %v10715_v30, %v2909_v63  ;;  %v2972_v17 = vld [vmem:[#allocation16] sm:$0xff] }
 0xa9f   : > { %v13667_v44 = vpop.eup %13666  ;;  %12186 = vmatprep.mubr.msk.f32.mxu1 %vm1236_vm0, %v15185_v41  ;;  %12226 = vmatprep.mubr.msk.f32.mxu0 %vm1236_vm0, %v15185_v41  ;;  %v2976_v35 = vld [vmem:[#allocation16 + $0x20] sm:$0xff] }
 0xaa0   : > { %v2922_v11 = vmul.f32 %v10715_v30, %v2908_v3  ;;  %v2911_v46 = vmul.f32 %v13667_v44, %v15151_v25  ;;  %12187 = vmatmul.mubr.msk.f32.gmra.mxu1 %vm1236_vm0, %v15187_v38  ;;  %12227 = vmatmul.mubr.msk.f32.gmra.mxu0 %vm1236_vm0, %v15187_v38  ;;  %v15202_v49 = vadd.f32 %v10716_v0, %v2923_v45 }
 0xaa1   : > { %v13669_v47 = vpop.eup %13668  ;;  %12199 = vmatprep.subr.mxu1 %v2973_v6 }
 0xaa2   : > { %v15199_v48 = vadd.f32 %v10716_v0, %v2922_v11  ;;  %v2910_v40 = vmul.f32 %v13669_v47, %v15157_v27  ;;  %12200 = vmatpush3.msra.mxu1 %v2973_v6  ;;  %v2925_v54 = vmul.f32 %v10715_v30, %v2911_v46 }
 0xaa3   : > { %12201 = vmatprep.subr.mxu1 %v2972_v17 }
 0xaa4   : > { %v2924_v53 = vmul.f32 %v10715_v30, %v2910_v40  ;;  %12189 = vmatprep.mubr.msk.f32.mxu1 %vm1236_vm0, %v15199_v48  ;;  %12229 = vmatprep.mubr.msk.f32.mxu0 %vm1236_vm0, %v15199_v48  ;;  %v15214_v27 = vadd.f32 %v10716_v0, %v2925_v54 }
 0xaa5   : > { %12190 = vmatmul.mubr.msk.f32.gmra.mxu1 %vm1236_vm0, %v15202_v49  ;;  %12230 = vmatmul.mubr.msk.f32.gmra.mxu0 %vm1236_vm0, %v15202_v49 }
 0xaa6   : > { %v15212_v25 = vadd.f32 %v10716_v0, %v2924_v53  ;;  %12202 = vmatpush3.msra.mxu1 %v2972_v17 }
 0xaa8   : > { %12192 = vmatprep.mubr.msk.f32.mxu1 %vm1236_vm0, %v15212_v25  ;;  %12232 = vmatprep.mubr.msk.f32.mxu0 %vm1236_vm0, %v15212_v25 }
 0xaa9   : > { %12193 = vmatmul.mubr.msk.f32.gmra.mxu1 %vm1236_vm0, %v15214_v27  ;;  %12233 = vmatmul.mubr.msk.f32.gmra.mxu0 %vm1236_vm0, %v15214_v27 }
 0xaaa   : > { %12203 = vmatprep.mubr.msk.f32.mxu1 %vm1236_vm0, %v15171_v31 }
 0xaad   : > { %12204 = vmatmul.mubr.msk.f32.vlgmr.msra.gmra.mxu1 %vm1236_vm0, %v15173_v12 }
 0xaae   : > { %12206 = vmatprep.mubr.msk.f32.mxu1 %vm1236_vm0, %v15185_v41 }
 0xab1   : > { %12207 = vmatmul.mubr.msk.f32.gmra.mxu1 %vm1236_vm0, %v15187_v38 }
 0xab2   : > { %12209 = vmatprep.mubr.msk.f32.mxu1 %vm1236_vm0, %v15199_v48 }
 0xab5   : > { %12210 = vmatmul.mubr.msk.f32.gmra.mxu1 %vm1236_vm0, %v15202_v49 }
 0xab6   : > { %12212 = vmatprep.mubr.msk.f32.mxu1 %vm1236_vm0, %v15212_v25 }
 0xab9   : > { %12213 = vmatmul.mubr.msk.f32.gmra.mxu1 %vm1236_vm0, %v15214_v27 }
 0xb5b   : > { %v12185_v56 = vpop.f32.mrf.mxu1  ;;  %v12225_v55 = vpop.f32.mrf.mxu0 }
 0xb5c   : > { %v3223_v0 = vmul.f32 0.14142136, %v12185_v56 }
 0xb5d   : > { %v3183_v5 = vpop.f32.mrf.mxu1  ;;  %v3401_v18 = vpop.f32.mrf.mxu0 }
 0xb5e   : > { %v3222_v60 = vmul.f32 0.14142136, %v3183_v5 }
 0xb60   : > { %v12188_v57 = vpop.f32.mrf.mxu1  ;;  %v12228_v62 = vpop.f32.mrf.mxu0  ;;  %12251 = vmatprep.mubr.msk.f32.mxu1 %vm1702_vm4, %v3222_v60 }
 0xb61   : > { %v3225_v58 = vmul.f32 0.14142136, %v12188_v57 }
 0xb62   : > { %v3193_v21 = vpop.f32.mrf.mxu1  ;;  %v3411_v50 = vpop.f32.mrf.mxu0 }
 0xb63   : > { %v3224_v7 = vmul.f32 0.14142136, %v3193_v21 }
 0xb65   : > { %v15241_v59 = vpop.f32.mrf.mxu1  ;;  %v12231_v61 = vpop.f32.mrf.mxu0 }
 0xb66   : > { %v3227_v34 = vmul.f32 0.14142136, %v15241_v59 }
 0xb67   : > { %v3203_v9 = vpop.f32.mrf.mxu1  ;;  %v3421_v2 = vpop.f32.mrf.mxu0 }
 0xb68   : > { %v3226_v52 = vmul.f32 0.14142136, %v3203_v9 }
 0xb69   : > { %v15243_v22 = vpop.f32.mrf.mxu1  ;;  %v12234_v4 = vpop.f32.mrf.mxu0 }
 0xb6a   : > { %12263 = vmatprep.subr.mxu0 %v12234_v4  ;;  %v3229_v63 = vmul.f32 0.14142136, %v15243_v22 }
 0xb6b   : > { %v3213_v42 = vpop.f32.mrf.mxu1  ;;  %v3431_v13 = vpop.f32.mrf.mxu0  ;;  %12264 = vmatpush3.msra.mxu0 %v12234_v4 }
 0xb6c   : > { %12265 = vmatprep.subr.mxu0 %v3431_v13  ;;  %v3228_v37 = vmul.f32 0.14142136, %v3213_v42 }
 0xb6d   : > { %v12205_v10 = vpop.f32.mrf.mxu1  ;;  %12266 = vmatpush3.msra.mxu0 %v3431_v13 }
 0xb6e   : > { %12267 = vmatprep.subr.mxu0 %v12231_v61 }
 0xb6f   : > { %v3296_v33 = vpop.f32.mrf.mxu1  ;;  %12268 = vmatpush3.msra.mxu0 %v12231_v61 }
 0xb70   : > { %12269 = vmatprep.subr.mxu0 %v3421_v2 }
 0xb71   : > { %v12208_v30 = vpop.f32.mrf.mxu1  ;;  %12270 = vmatpush3.msra.mxu0 %v3421_v2 }
 0xb72   : > { %12271 = vmatprep.subr.mxu0 %v12228_v62 }
 0xb73   : > { %v3306_v23 = vpop.f32.mrf.mxu1  ;;  %12272 = vmatpush3.msra.mxu0 %v12228_v62 }
 0xb74   : > { %12273 = vmatprep.subr.mxu0 %v3411_v50 }
 0xb75   : > { %v12211_v14 = vpop.f32.mrf.mxu1  ;;  %12274 = vmatpush3.msra.mxu0 %v3411_v50 }
 0xb76   : > { %12275 = vmatprep.subr.mxu0 %v12225_v55 }
 0xb77   : > { %v3316_v32 = vpop.f32.mrf.mxu1  ;;  %12276 = vmatpush3.msra.mxu0 %v12225_v55 }
 0xb78   : > { %12277 = vmatprep.subr.mxu0 %v3401_v18 }
 0xb79   : > { %v12214_v19 = vpop.f32.mrf.mxu1  ;;  %12278 = vmatpush3.msra.mxu0 %v3401_v18 }
 0xb7a   : > { %12235 = vmatprep.subr.msk.mxu1 %vm1702_vm4, %v12214_v19 }
 0xb7b   : > { %v3326_v20 = vpop.f32.mrf.mxu1  ;;  %12236 = vmatpush3.xpose.msk.msra.mxu1 %vm1702_vm4, %v12214_v19 }
 0xb7c   : > { %12237 = vmatprep.subr.msk.mxu1 %vm1702_vm4, %v3326_v20 }
 0xb7f   : > { %12238 = vmatpush3.xpose.msk.msra.mxu1 %vm1702_vm4, %v3326_v20 }
 0xb80   : > { %12239 = vmatprep.subr.msk.mxu1 %vm1702_vm4, %v12211_v14 }
 0xb83   : > { %12240 = vmatpush3.xpose.msk.msra.mxu1 %vm1702_vm4, %v12211_v14 }
 0xb84   : > { %12241 = vmatprep.subr.msk.mxu1 %vm1702_vm4, %v3316_v32 }
 0xb87   : > { %12242 = vmatpush3.xpose.msk.msra.mxu1 %vm1702_vm4, %v3316_v32 }
 0xb88   : > { %12243 = vmatprep.subr.msk.mxu1 %vm1702_vm4, %v12208_v30 }
 0xb8b   : > { %12244 = vmatpush3.xpose.msk.msra.mxu1 %vm1702_vm4, %v12208_v30 }
 0xb8c   : > { %12245 = vmatprep.subr.msk.mxu1 %vm1702_vm4, %v3306_v23 }
 0xb8f   : > { %12246 = vmatpush3.xpose.msk.msra.mxu1 %vm1702_vm4, %v3306_v23 }
 0xb90   : > { %12247 = vmatprep.subr.msk.mxu1 %vm1702_vm4, %v12205_v10 }
 0xb93   : > { %12248 = vmatpush3.xpose.msk.msra.mxu1 %vm1702_vm4, %v12205_v10 }
 0xb94   : > { %12249 = vmatprep.subr.msk.mxu1 %vm1702_vm4, %v3296_v33 }
 0xb97   : > { %12250 = vmatpush3.xpose.msk.msra.mxu1 %vm1702_vm4, %v3296_v33 }
 0xb98   : > { %12311 = vmatprep.subr.mxu1 %v2979_v43 }
 0xb9a   : > { %12252 = vmatmul.mubr.msk.f32.vlgmr.msra.gmra.mxu1 %vm1702_vm4, %v3223_v0 }
 0xb9b   : > { %12254 = vmatprep.mubr.msk.f32.mxu1 %vm1702_vm4, %v3224_v7  ;;  %12312 = vmatpush3.msra.mxu1 %v2979_v43 }
 0xb9c   : > { %12313 = vmatprep.subr.mxu1 %v2978_v26 }
 0xb9d   : > { %12314 = vmatpush3.msra.mxu1 %v2978_v26 }
 0xb9e   : > { %12255 = vmatmul.mubr.msk.f32.gmra.mxu1 %vm1702_vm4, %v3225_v58  ;;  %12315 = vmatprep.subr.mxu1 %v2977_v29 }
 0xb9f   : > { %12257 = vmatprep.mubr.msk.f32.mxu1 %vm1702_vm4, %v3226_v52  ;;  %12316 = vmatpush3.msra.mxu1 %v2977_v29 }
 0xba0   : > { %12317 = vmatprep.subr.mxu1 %v2976_v35 }
 0xba1   : > { %12318 = vmatpush3.msra.mxu1 %v2976_v35 }
 0xba2   : > { %12258 = vmatmul.mubr.msk.f32.gmra.mxu1 %vm1702_vm4, %v3227_v34 }
 0xba3   : > { %12260 = vmatprep.mubr.msk.f32.mxu1 %vm1702_vm4, %v3228_v37 }
 0xba6   : > { %12261 = vmatmul.mubr.msk.f32.gmra.mxu1 %vm1702_vm4, %v3229_v63 }
 0xba7   : > { %12319 = vmatprep.mubr.msk.f32.mxu1 %vm1236_vm0, %v15171_v31 }
 0xbaa   : > { %12320 = vmatmul.mubr.msk.f32.vlgmr.msra.gmra.mxu1 %vm1236_vm0, %v15173_v12 }
 0xbab   : > { %12322 = vmatprep.mubr.msk.f32.mxu1 %vm1236_vm0, %v15185_v41 }
 0xbae   : > { %12323 = vmatmul.mubr.msk.f32.gmra.mxu1 %vm1236_vm0, %v15187_v38 }
 0xbaf   : > { %12325 = vmatprep.mubr.msk.f32.mxu1 %vm1236_vm0, %v15199_v48 }
 0xbb2   : > { %12326 = vmatmul.mubr.msk.f32.gmra.mxu1 %vm1236_vm0, %v15202_v49 }
 0xbb3   : > { %12328 = vmatprep.mubr.msk.f32.mxu1 %vm1236_vm0, %v15212_v25 }
 0xbb6   : > { %12329 = vmatmul.mubr.msk.f32.gmra.mxu1 %vm1236_vm0, %v15214_v27 }
 0xc5a   : > { %v12253_v16 = vpop.f32.mrf.mxu1 }
 0xc5b   : > { %v3597_v3 = vsel %vm3593_vm7, %v12253_v16, -inf }
 0xc5c   : > { %3598 = vmax.xlane.f32.xlu1 %v3597_v3  ;;  %v3554_v6 = vpop.f32.mrf.mxu1 }
 0xc5d   : > { %v3594_v44 = vsel %vm3593_vm7, %v3554_v6, -inf }
 0xc5e   : > { %3595 = vmax.xlane.f32.xlu0 %v3594_v44  ;;  %v12256_v45 = vpop.f32.mrf.mxu1 }
 0xc5f   : > { %v3603_v11 = vsel %vm3593_vm7, %v12256_v45, -inf }
 0xc60   : > { %3604 = vmax.xlane.f32.xlu1 %v3603_v11  ;;  %v3564_v46 = vpop.f32.mrf.mxu1 }
 0xc61   : > { %v3600_v17 = vsel %vm3593_vm7, %v3564_v46, -inf }
 0xc62   : > { %3601 = vmax.xlane.f32.xlu0 %v3600_v17  ;;  %v12259_v47 = vpop.f32.mrf.mxu1 }
 0xc63   : > { %v3609_v40 = vsel %vm3593_vm7, %v12259_v47, -inf }
 0xc64   : > { %3610 = vmax.xlane.f32.xlu1 %v3609_v40  ;;  %v3574_v54 = vpop.f32.mrf.mxu1 }
 0xc65   : > { %v3606_v53 = vsel %vm3593_vm7, %v3574_v54, -inf }
 0xc66   : > { %3607 = vmax.xlane.f32.xlu0 %v3606_v53  ;;  %v12262_v56 = vpop.f32.mrf.mxu1 }
 0xc67   : > { %v3615_v55 = vsel %vm3593_vm7, %v12262_v56, -inf }
 0xc68   : > { %3616 = vmax.xlane.f32.xlu1 %v3615_v55  ;;  %v3584_v5 = vpop.f32.mrf.mxu1 }
 0xc69   : > { %v3612_v18 = vsel %vm3593_vm7, %v3584_v5, -inf }
 0xc6a   : > { %v12321_v60 = vpop.f32.mrf.mxu1  ;;  %3613 = vmax.xlane.f32.xlu0 %v3612_v18 }
 0xc6c   : > { %v3990_v57 = vpop.f32.mrf.mxu1 }
 0xc6e   : > { %v12324_v62 = vpop.f32.mrf.mxu1 }
 0xc70   : > { %v4000_v21 = vpop.f32.mrf.mxu1 }
 0xc72   : > { %v12327_v50 = vpop.f32.mrf.mxu1 }
 0xc74   : > { %v4010_v59 = vpop.f32.mrf.mxu1 }
 0xc76   : > { %v12330_v61 = vpop.f32.mrf.mxu1 }
 0xc77   : > { %12351 = vmatprep.subr.msk.mxu1 %vm1702_vm4, %v12330_v61 }
 0xc78   : > { %v4020_v9 = vpop.f32.mrf.mxu1  ;;  %12352 = vmatpush3.xpose.msk.msra.mxu1 %vm1702_vm4, %v12330_v61 }
 0xc79   : > { %12353 = vmatprep.subr.msk.mxu1 %vm1702_vm4, %v4020_v9 }
 0xc7c   : > { %12354 = vmatpush3.xpose.msk.msra.mxu1 %vm1702_vm4, %v4020_v9 }
 0xc7d   : > { %12355 = vmatprep.subr.msk.mxu1 %vm1702_vm4, %v12327_v50 }
 0xc80   : > { %12356 = vmatpush3.xpose.msk.msra.mxu1 %vm1702_vm4, %v12327_v50 }
 0xc81   : > { %12357 = vmatprep.subr.msk.mxu1 %vm1702_vm4, %v4010_v59 }
 0xc84   : > { %12358 = vmatpush3.xpose.msk.msra.mxu1 %vm1702_vm4, %v4010_v59 }
 0xc85   : > { %12359 = vmatprep.subr.msk.mxu1 %vm1702_vm4, %v12324_v62 }
 0xc88   : > { %12360 = vmatpush3.xpose.msk.msra.mxu1 %vm1702_vm4, %v12324_v62 }
 0xc89   : > { %12361 = vmatprep.subr.msk.mxu1 %vm1702_vm4, %v4000_v21 }
 0xc8c   : > { %12362 = vmatpush3.xpose.msk.msra.mxu1 %vm1702_vm4, %v4000_v21 }
 0xc8d   : > { %12363 = vmatprep.subr.msk.mxu1 %vm1702_vm4, %v12321_v60 }
 0xc90   : > { %12364 = vmatpush3.xpose.msk.msra.mxu1 %vm1702_vm4, %v12321_v60  ;;  %v2947_v60 = vld [vmem:[#allocation15 + $0x38] sm:$0xff] }
 0xc91   : > { %12365 = vmatprep.subr.msk.mxu1 %vm1702_vm4, %v3990_v57  ;;  %12291 = vmatprep.subr.mxu0 %v2947_v60 }
 0xc94   : > { %12366 = vmatpush3.xpose.msk.msra.mxu1 %vm1702_vm4, %v3990_v57 }
 0xce5   : > { %v3599_v2 = vpop.xlane.xlu1 %3598 }
 0xce6   : > { %v3619_v22 = vsub.f32 %v12253_v16, %v3599_v2 }
 0xce7   : > { %v3596_v4 = vpop.xlane.xlu0 %3595 }
 0xce8   : > { %v3628_v42 = vmul.f32 1.442695, %v3619_v22  ;;  %v3618_v13 = vsub.f32 %v3554_v6, %v3596_v4 }
 0xce9   : > { %v3605_v10 = vpop.xlane.xlu1 %3604 }
 0xcea   : > { %13670 = vpow2.f32 %v3628_v42  ;;  %v3626_v33 = vmul.f32 1.442695, %v3618_v13  ;;  %v3621_v30 = vsub.f32 %v12256_v45, %v3605_v10 }
 0xceb   : > { %v3602_v23 = vpop.xlane.xlu0 %3601 }
 0xcec   : > { %13672 = vpow2.f32 %v3626_v33  ;;  %v3632_v14 = vmul.f32 1.442695, %v3621_v30  ;;  %v3620_v32 = vsub.f32 %v3564_v46, %v3602_v23  ;;  %v2946_v33 = vld [vmem:[#allocation15 + $0x30] sm:$0xff] }
 0xced   : > { %v3611_v19 = vpop.xlane.xlu1 %3610 }
 0xcee   : > { %13674 = vpow2.f32 %v3632_v14  ;;  %v3630_v20 = vmul.f32 1.442695, %v3620_v32  ;;  %v3623_v43 = vsub.f32 %v12259_v47, %v3611_v19  ;;  %v2945_v14 = vld [vmem:[#allocation15 + $0x28] sm:$0xff] }
 0xcef   : > { %v3608_v0 = vpop.xlane.xlu0 %3607 }
 0xcf0   : > { %13676 = vpow2.f32 %v3630_v20  ;;  %v3636_v7 = vmul.f32 1.442695, %v3623_v43  ;;  %v3622_v26 = vsub.f32 %v3574_v54, %v3608_v0  ;;  %v2944_v20 = vld [vmem:[#allocation15 + $0x20] sm:$0xff] }
 0xcf1   : > { %v3617_v29 = vpop.xlane.xlu1 %3616 }
 0xcf2   : > { %13678 = vpow2.f32 %v3636_v7  ;;  %v3634_v58 = vmul.f32 1.442695, %v3622_v26  ;;  %v3625_v52 = vsub.f32 %v12262_v56, %v3617_v29  ;;  %v3011_v7 = vld [vmem:[#allocation18 + $0x38] sm:$0xff] }
 0xcf3   : > { %v3614_v35 = vpop.xlane.xlu0 %3613 }
 0xcf4   : > { %13680 = vpow2.f32 %v3634_v58  ;;  %v3640_v34 = vmul.f32 1.442695, %v3625_v52  ;;  %v3624_v37 = vsub.f32 %v3584_v5, %v3614_v35 }
 0xcf6   : > { %13682 = vpow2.f32 %v3640_v34  ;;  %v3638_v63 = vmul.f32 1.442695, %v3624_v37  ;;  %v3010_v34 = vld [vmem:[#allocation18 + $0x30] sm:$0xff]  ;;  %v3009_v37 = vld [vmem:[#allocation18 + $0x28] sm:$0xff] }
 0xcf7   : > { %v13671_v16 = vpop.eup %13670 }
 0xcf8   : > { %13684 = vpow2.f32 %v3638_v63  ;;  %v3645_v3 = vsel %vm3593_vm7, %v13671_v16, 0.0  ;;  %v3008_v63 = vld [vmem:[#allocation18 + $0x20] sm:$0xff] }
 0xcf9   : > { %v13673_v6 = vpop.eup %13672  ;;  %3646 = vadd.xlane.f32.xlu1 %v3645_v3 }
 0xcfa   : > { %v3642_v44 = vsel %vm3593_vm7, %v13673_v6, 0.0 }
 0xcfb   : > { %v13675_v45 = vpop.eup %13674  ;;  %3643 = vadd.xlane.f32.xlu0 %v3642_v44 }
 0xcfc   : > { %v3651_v11 = vsel %vm3593_vm7, %v13675_v45, 0.0 }
 0xcfd   : > { %v13677_v46 = vpop.eup %13676  ;;  %3652 = vadd.xlane.f32.xlu1 %v3651_v11 }
 0xcfe   : > { %v3648_v17 = vsel %vm3593_vm7, %v13677_v46, 0.0 }
 0xcff   : > { %v13679_v47 = vpop.eup %13678  ;;  %3649 = vadd.xlane.f32.xlu0 %v3648_v17 }
 0xd00   : > { %v3657_v40 = vsel %vm3593_vm7, %v13679_v47, 0.0 }
 0xd01   : > { %v13681_v54 = vpop.eup %13680  ;;  %3658 = vadd.xlane.f32.xlu1 %v3657_v40 }
 0xd02   : > { %v3654_v53 = vsel %vm3593_vm7, %v13681_v54, 0.0 }
 0xd03   : > { %v13683_v56 = vpop.eup %13682  ;;  %3655 = vadd.xlane.f32.xlu0 %v3654_v53 }
 0xd04   : > { %v3663_v55 = vsel %vm3593_vm7, %v13683_v56, 0.0 }
 0xd05   : > { %v13685_v5 = vpop.eup %13684  ;;  %3664 = vadd.xlane.f32.xlu1 %v3663_v55 }
 0xd06   : > { %v3660_v18 = vsel %vm3593_vm7, %v13685_v5, 0.0 }
 0xd07   : > { %3661 = vadd.xlane.f32.xlu0 %v3660_v18 }
 0xd82   : > { %v3647_v57 = vpop.xlane.xlu1 %3646 }
 0xd83   : > { %13686 = vrcp.f32 %v3647_v57  ;;  %v3040_v57 = vld [vmem:[#allocation19 + $0x20] sm:$0xff] }
 0xd84   : > { %v3644_v62 = vpop.xlane.xlu0 %3643 }
 0xd85   : > { %13688 = vrcp.f32 %v3644_v62 }
 0xd86   : > { %v3653_v21 = vpop.xlane.xlu1 %3652 }
 0xd87   : > { %13690 = vrcp.f32 %v3653_v21 }
 0xd88   : > { %v3650_v50 = vpop.xlane.xlu0 %3649 }
 0xd89   : > { %13692 = vrcp.f32 %v3650_v50  ;;  %v3039_v50 = vld [vmem:[#allocation19 + $0x18] sm:$0xff] }
 0xd8a   : > { %v3659_v59 = vpop.xlane.xlu1 %3658 }
 0xd8b   : > { %13694 = vrcp.f32 %v3659_v59 }
 0xd8c   : > { %v3656_v61 = vpop.xlane.xlu0 %3655 }
 0xd8d   : > { %13696 = vrcp.f32 %v3656_v61 }
 0xd8e   : > { %v3665_v9 = vpop.xlane.xlu1 %3664 }
 0xd8f   : > { %13698 = vrcp.f32 %v3665_v9  ;;  %v3038_v9 = vld [vmem:[#allocation19 + $0x10] sm:$0xff] }
 0xd90   : > { %v3662_v2 = vpop.xlane.xlu0 %3661  ;;  %v13687_v22 = vpop.eup %13686 }
 0xd91   : > { %13700 = vrcp.f32 %v3662_v2  ;;  %v3675_v13 = vmul.f32 %v13687_v22, %v13671_v16  ;;  %v3042_v16 = vld [vmem:[#allocation19 + $0x30] sm:$0x3] }
 0xd92   : > { %v13689_v4 = vpop.eup %13688  ;;  %12433 = vmatprep.subr.msk.mxu1 %vm2083_vm6, %v3042_v16 }
 0xd93   : > { %v3674_v42 = vmul.f32 %v13689_v4, %v13673_v6  ;;  %v3037_v4 = vld [vmem:[#allocation19 + $0x8] sm:$0xff] }
 0xd94   : > { %v13691_v10 = vpop.eup %13690 }
 0xd95   : > { %12279 = vmatprep.mubr.msk.f32.mxu0 %vm3593_vm7, %v3674_v42  ;;  %v3677_v32 = vmul.f32 %v13691_v10, %v13675_v45  ;;  %v3036_v10 = vld [vmem:[#allocation19] sm:$0xff] }
 0xd96   : > { %v13693_v30 = vpop.eup %13692  ;;  %12280 = vmatmul.mubr.msk.f32.vlgmr.msra.gmra.mxu0 %vm3593_vm7, %v3675_v13 }
 0xd97   : > { %12292 = vmatpush3.msra.mxu0 %v2947_v60  ;;  %v3676_v23 = vmul.f32 %v13693_v30, %v13677_v46 }
 0xd98   : > { %12293 = vmatprep.subr.mxu0 %v2946_v33  ;;  %v13695_v19 = vpop.eup %13694 }
 0xd99   : > { %12282 = vmatprep.mubr.msk.f32.mxu0 %vm3593_vm7, %v3676_v23  ;;  %12294 = vmatpush3.msra.mxu0 %v2946_v33  ;;  %v3679_v26 = vmul.f32 %v13695_v19, %v13679_v47  ;;  %v2983_v23 = vld [vmem:[#allocation16 + $0x58] sm:$0xff]  ;;  %v2982_v19 = vld [vmem:[#allocation16 + $0x50] sm:$0xff] }
 0xd9a   : > { %v13697_v43 = vpop.eup %13696  ;;  %12283 = vmatmul.mubr.msk.f32.gmra.mxu0 %vm3593_vm7, %v3677_v32  ;;  %12295 = vmatprep.subr.mxu0 %v2945_v14 }
 0xd9b   : > { %v3678_v0 = vmul.f32 %v13697_v43, %v13681_v54  ;;  %12296 = vmatpush3.msra.mxu0 %v2945_v14  ;;  %v2981_v43 = vld [vmem:[#allocation16 + $0x48] sm:$0xff] }
 0xd9c   : > { %12297 = vmatprep.subr.mxu0 %v2944_v20  ;;  %v13699_v29 = vpop.eup %13698 }
 0xd9d   : > { %12285 = vmatprep.mubr.msk.f32.mxu0 %vm3593_vm7, %v3678_v0  ;;  %12298 = vmatpush3.msra.mxu0 %v2944_v20  ;;  %v3681_v35 = vmul.f32 %v13699_v29, %v13683_v56 }
 0xd9e   : > { %v13701_v58 = vpop.eup %13700  ;;  %12286 = vmatmul.mubr.msk.f32.gmra.mxu0 %vm3593_vm7, %v3679_v26  ;;  %12331 = vmatprep.subr.mxu0 %v3011_v7 }
 0xd9f   : > { %v3680_v52 = vmul.f32 %v13701_v58, %v13685_v5  ;;  %v3041_v5 = vld [vmem:[#allocation19 + $0x28] sm:$0xff] }
 0xda1   : > { %12288 = vmatprep.mubr.msk.f32.mxu0 %vm3593_vm7, %v3680_v52 }
 0xda2   : > { %12289 = vmatmul.mubr.msk.f32.gmra.mxu0 %vm3593_vm7, %v3681_v35 }
 0xda3   : > { %12299 = vmatprep.mubr.msk.f32.mxu0 %vm1236_vm0, %v15171_v31 }
 0xda6   : > { %12300 = vmatmul.mubr.msk.f32.vlgmr.msra.gmra.mxu0 %vm1236_vm0, %v15173_v12 }
 0xda7   : > { %12302 = vmatprep.mubr.msk.f32.mxu0 %vm1236_vm0, %v15185_v41  ;;  %12332 = vmatpush3.msra.mxu0 %v3011_v7  ;;  %v2980_v7 = vld [vmem:[#allocation16 + $0x40] sm:$0xff] }
 0xda8   : > { %12333 = vmatprep.subr.mxu0 %v3010_v34 }
 0xda9   : > { %12334 = vmatpush3.msra.mxu0 %v3010_v34 }
 0xdaa   : > { %12303 = vmatmul.mubr.msk.f32.gmra.mxu0 %vm1236_vm0, %v15187_v38  ;;  %12335 = vmatprep.subr.mxu0 %v3009_v37 }
 0xdab   : > { %12305 = vmatprep.mubr.msk.f32.mxu0 %vm1236_vm0, %v15199_v48  ;;  %12336 = vmatpush3.msra.mxu0 %v3009_v37 }
 0xdac   : > { %12337 = vmatprep.subr.mxu0 %v3008_v63 }
 0xdad   : > { %12338 = vmatpush3.msra.mxu0 %v3008_v63 }
 0xdae   : > { %12306 = vmatmul.mubr.msk.f32.gmra.mxu0 %vm1236_vm0, %v15202_v49 }
 0xdaf   : > { %12308 = vmatprep.mubr.msk.f32.mxu0 %vm1236_vm0, %v15212_v25 }
 0xdb2   : > { %12309 = vmatmul.mubr.msk.f32.gmra.mxu0 %vm1236_vm0, %v15214_v27 }
 0xdb3   : > { %12339 = vmatprep.mubr.msk.f32.mxu0 %vm1236_vm0, %v15171_v31 }
 0xdb6   : > { %12340 = vmatmul.mubr.msk.f32.vlgmr.msra.gmra.mxu0 %vm1236_vm0, %v15173_v12 }
 0xdb7   : > { %12342 = vmatprep.mubr.msk.f32.mxu0 %vm1236_vm0, %v15185_v41 }
 0xdba   : > { %12343 = vmatmul.mubr.msk.f32.gmra.mxu0 %vm1236_vm0, %v15187_v38 }
 0xdbb   : > { %12345 = vmatprep.mubr.msk.f32.mxu0 %vm1236_vm0, %v15199_v48 }
 0xdbe   : > { %12346 = vmatmul.mubr.msk.f32.gmra.mxu0 %vm1236_vm0, %v15202_v49 }
 0xdbf   : > { %12348 = vmatprep.mubr.msk.f32.mxu0 %vm1236_vm0, %v15212_v25 }
 0xdc2   : > { %12349 = vmatmul.mubr.msk.f32.gmra.mxu0 %vm1236_vm0, %v15214_v27 }
 0xe56   : > { %v12281_v3 = vpop.f32.mrf.mxu0 }
 0xe58   : > { %v3772_v6 = vpop.f32.mrf.mxu0 }
 0xe5a   : > { %v15359_v44 = vpop.f32.mrf.mxu0 }
 0xe5c   : > { %v3782_v45 = vpop.f32.mrf.mxu0 }
 0xe5e   : > { %v15361_v11 = vpop.f32.mrf.mxu0 }
 0xe60   : > { %v15363_v46 = vpop.f32.mrf.mxu0 }
 0xe62   : > { %v15365_v17 = vpop.f32.mrf.mxu0 }
 0xe64   : > { %v15367_v47 = vpop.f32.mrf.mxu0 }
 0xe66   : > { %v12301_v40 = vpop.f32.mrf.mxu0 }
 0xe67   : > { %v3917_v56 = vmul.f32 0.14142136, %v12301_v40 }
 0xe68   : > { %v3877_v54 = vpop.f32.mrf.mxu0 }
 0xe69   : > { %v3916_v53 = vmul.f32 0.14142136, %v3877_v54 }
 0xe6a   : > { %v12304_v55 = vpop.f32.mrf.mxu0 }
 0xe6b   : > { %12367 = vmatprep.mubr.msk.f32.mxu1 %vm1702_vm4, %v3916_v53  ;;  %v3919_v62 = vmul.f32 0.14142136, %v12304_v55 }
 0xe6c   : > { %v3887_v18 = vpop.f32.mrf.mxu0  ;;  %12368 = vmatmul.mubr.msk.f32.vlgmr.msra.gmra.mxu1 %vm1702_vm4, %v3917_v56 }
 0xe6d   : > { %v3918_v60 = vmul.f32 0.14142136, %v3887_v18  ;;  %12434 = vmatpush3.msk.msra.mxu1 %vm2083_vm6, %v3042_v16 }
 0xe6e   : > { %v12307_v21 = vpop.f32.mrf.mxu0  ;;  %12435 = vmatprep.subr.mxu1 %v3041_v5 }
 0xe6f   : > { %12370 = vmatprep.mubr.msk.f32.mxu1 %vm1702_vm4, %v3918_v60  ;;  %12436 = vmatpush3.msra.mxu1 %v3041_v5  ;;  %v3921_v2 = vmul.f32 0.14142136, %v12307_v21 }
 0xe70   : > { %v3897_v59 = vpop.f32.mrf.mxu0  ;;  %12371 = vmatmul.mubr.msk.f32.gmra.mxu1 %vm1702_vm4, %v3919_v62  ;;  %12437 = vmatprep.subr.mxu1 %v3040_v57 }
 0xe71   : > { %v3920_v61 = vmul.f32 0.14142136, %v3897_v59  ;;  %12438 = vmatpush3.msra.mxu1 %v3040_v57 }
 0xe72   : > { %v12310_v22 = vpop.f32.mrf.mxu0  ;;  %12439 = vmatprep.subr.mxu1 %v3039_v50 }
 0xe73   : > { %12373 = vmatprep.mubr.msk.f32.mxu1 %vm1702_vm4, %v3920_v61  ;;  %12440 = vmatpush3.msra.mxu1 %v3039_v50  ;;  %v3923_v33 = vmul.f32 0.14142136, %v12310_v22 }
 0xe74   : > { %v3907_v42 = vpop.f32.mrf.mxu0  ;;  %12374 = vmatmul.mubr.msk.f32.gmra.mxu1 %vm1702_vm4, %v3921_v2  ;;  %12441 = vmatprep.subr.mxu1 %v3038_v9 }
 0xe75   : > { %v3922_v13 = vmul.f32 0.14142136, %v3907_v42  ;;  %12442 = vmatpush3.msra.mxu1 %v3038_v9 }
 0xe76   : > { %v12341_v30 = vpop.f32.mrf.mxu0  ;;  %12443 = vmatprep.subr.mxu1 %v3037_v4 }
 0xe77   : > { %12376 = vmatprep.mubr.msk.f32.mxu1 %vm1702_vm4, %v3922_v13  ;;  %12444 = vmatpush3.msra.mxu1 %v3037_v4 }
 0xe78   : > { %v4095_v14 = vpop.f32.mrf.mxu0  ;;  %12377 = vmatmul.mubr.msk.f32.gmra.mxu1 %vm1702_vm4, %v3923_v33  ;;  %12445 = vmatprep.subr.mxu1 %v3036_v10 }
 0xe79   : > { %12447 = vmatprep.mubr.msk.f32.mxu1 %vm1702_vm4, %v3772_v6  ;;  %12446 = vmatpush3.msra.mxu1 %v3036_v10 }
 0xe7a   : > { %v12344_v32 = vpop.f32.mrf.mxu0  ;;  %12479 = vmatprep.subr.mxu1 %v2983_v23 }
 0xe7c   : > { %v4105_v20 = vpop.f32.mrf.mxu0  ;;  %12448 = vmatmul.mubr.msk.f32.vlgmr.msra.gmra.mxu1 %vm1702_vm4, %v12281_v3 }
 0xe7d   : > { %12450 = vmatprep.mubr.msk.f32.mxu1 %vm1702_vm4, %v3782_v45  ;;  %12480 = vmatpush3.msra.mxu1 %v2983_v23 }
 0xe7e   : > { %v12347_v0 = vpop.f32.mrf.mxu0  ;;  %12481 = vmatprep.subr.mxu1 %v2982_v19 }
 0xe7f   : > { %12482 = vmatpush3.msra.mxu1 %v2982_v19 }
 0xe80   : > { %v4115_v26 = vpop.f32.mrf.mxu0  ;;  %12451 = vmatmul.mubr.msk.f32.gmra.mxu1 %vm1702_vm4, %v15359_v44  ;;  %12483 = vmatprep.subr.mxu1 %v2981_v43 }
 0xe81   : > { %12453 = vmatprep.mubr.msk.f32.mxu1 %vm1702_vm4, %v15363_v46  ;;  %12484 = vmatpush3.msra.mxu1 %v2981_v43 }
 0xe82   : > { %v12350_v29 = vpop.f32.mrf.mxu0  ;;  %12485 = vmatprep.subr.mxu1 %v2980_v7 }
 0xe83   : > { %12379 = vmatprep.subr.mxu0 %v12350_v29  ;;  %12486 = vmatpush3.msra.mxu1 %v2980_v7 }
 0xe84   : > { %v4125_v58 = vpop.f32.mrf.mxu0  ;;  %12380 = vmatpush3.msra.mxu0 %v12350_v29  ;;  %12454 = vmatmul.mubr.msk.f32.gmra.mxu1 %vm1702_vm4, %v15361_v11 }
 0xe85   : > { %12381 = vmatprep.subr.mxu0 %v4125_v58  ;;  %12456 = vmatprep.mubr.msk.f32.mxu1 %vm1702_vm4, %v15367_v47 }
 0xe86   : > { %12382 = vmatpush3.msra.mxu0 %v4125_v58 }
 0xe87   : > { %12383 = vmatprep.subr.mxu0 %v12347_v0 }
 0xe88   : > { %12384 = vmatpush3.msra.mxu0 %v12347_v0  ;;  %12457 = vmatmul.mubr.msk.f32.gmra.mxu1 %vm1702_vm4, %v15365_v17 }
 0xe89   : > { %12385 = vmatprep.subr.mxu0 %v4115_v26  ;;  %12487 = vmatprep.mubr.msk.f32.mxu1 %vm1236_vm0, %v15171_v31 }
 0xe8a   : > { %12386 = vmatpush3.msra.mxu0 %v4115_v26 }
 0xe8b   : > { %12387 = vmatprep.subr.mxu0 %v12344_v32 }
 0xe8c   : > { %12388 = vmatpush3.msra.mxu0 %v12344_v32  ;;  %12488 = vmatmul.mubr.msk.f32.vlgmr.msra.gmra.mxu1 %vm1236_vm0, %v15173_v12 }
 0xe8d   : > { %12389 = vmatprep.subr.mxu0 %v4105_v20  ;;  %12490 = vmatprep.mubr.msk.f32.mxu1 %vm1236_vm0, %v15185_v41 }
 0xe8e   : > { %12390 = vmatpush3.msra.mxu0 %v4105_v20 }
 0xe8f   : > { %12391 = vmatprep.subr.mxu0 %v12341_v30 }
 0xe90   : > { %12392 = vmatpush3.msra.mxu0 %v12341_v30  ;;  %12491 = vmatmul.mubr.msk.f32.gmra.mxu1 %vm1236_vm0, %v15187_v38 }
 0xe91   : > { %12393 = vmatprep.subr.mxu0 %v4095_v14  ;;  %12493 = vmatprep.mubr.msk.f32.mxu1 %vm1236_vm0, %v15199_v48 }
 0xe92   : > { %12394 = vmatpush3.msra.mxu0 %v4095_v14 }
 0xe94   : > { %12494 = vmatmul.mubr.msk.f32.gmra.mxu1 %vm1236_vm0, %v15202_v49 }
 0xe95   : > { %12496 = vmatprep.mubr.msk.f32.mxu1 %vm1236_vm0, %v15212_v25 }
 0xe98   : > { %12497 = vmatmul.mubr.msk.f32.gmra.mxu1 %vm1236_vm0, %v15214_v27 }
 0xf2c   : > { %v12369_v52 = vpop.f32.mrf.mxu1 }
 0xf2d   : > { %v4290_v35 = vsel %vm3593_vm7, %v12369_v52, -inf }
 0xf2e   : > { %4291 = vmax.xlane.f32.xlu1 %v4290_v35  ;;  %v4248_v34 = vpop.f32.mrf.mxu1 }
 0xf2f   : > { %v4287_v37 = vsel %vm3593_vm7, %v4248_v34, -inf }
 0xf30   : > { %4288 = vmax.xlane.f32.xlu0 %v4287_v37  ;;  %v12372_v63 = vpop.f32.mrf.mxu1 }
 0xf31   : > { %v4296_v16 = vsel %vm3593_vm7, %v12372_v63, -inf }
 0xf32   : > { %4297 = vmax.xlane.f32.xlu1 %v4296_v16  ;;  %v4258_v3 = vpop.f32.mrf.mxu1 }
 0xf33   : > { %v4293_v6 = vsel %vm3593_vm7, %v4258_v3, -inf }
 0xf34   : > { %4294 = vmax.xlane.f32.xlu0 %v4293_v6  ;;  %v15411_v44 = vpop.f32.mrf.mxu1 }
 0xf35   : > { %v4302_v45 = vsel %vm3593_vm7, %v15411_v44, -inf }
 0xf36   : > { %4303 = vmax.xlane.f32.xlu1 %v4302_v45  ;;  %v15415_v11 = vpop.f32.mrf.mxu1 }
 0xf37   : > { %v4299_v46 = vsel %vm3593_vm7, %v15415_v11, -inf }
 0xf38   : > { %4300 = vmax.xlane.f32.xlu0 %v4299_v46  ;;  %v15419_v17 = vpop.f32.mrf.mxu1 }
 0xf39   : > { %v4308_v47 = vsel %vm3593_vm7, %v15419_v17, -inf }
 0xf3a   : > { %4309 = vmax.xlane.f32.xlu1 %v4308_v47  ;;  %v15423_v40 = vpop.f32.mrf.mxu1 }
 0xf3b   : > { %v4305_v54 = vsel %vm3593_vm7, %v15423_v40, -inf }
 0xf3c   : > { %v15427_v53 = vpop.f32.mrf.mxu1  ;;  %4306 = vmax.xlane.f32.xlu0 %v4305_v54 }
 0xf3e   : > { %v15429_v56 = vpop.f32.mrf.mxu1 }
 0xf40   : > { %v15431_v55 = vpop.f32.mrf.mxu1 }
 0xf42   : > { %v15433_v5 = vpop.f32.mrf.mxu1 }
 0xf44   : > { %v15435_v18 = vpop.f32.mrf.mxu1 }
 0xf46   : > { %v15437_v60 = vpop.f32.mrf.mxu1 }
 0xf48   : > { %v15439_v57 = vpop.f32.mrf.mxu1 }
 0xf4a   : > { %v15441_v62 = vpop.f32.mrf.mxu1 }
 0xf4c   : > { %v12489_v21 = vpop.f32.mrf.mxu1 }
 0xf4e   : > { %v4947_v50 = vpop.f32.mrf.mxu1 }
 0xf50   : > { %v12492_v59 = vpop.f32.mrf.mxu1 }
 0xf52   : > { %v4957_v61 = vpop.f32.mrf.mxu1 }
 0xf54   : > { %v12495_v9 = vpop.f32.mrf.mxu1 }
 0xf56   : > { %v4967_v2 = vpop.f32.mrf.mxu1 }
 0xf58   : > { %v12498_v22 = vpop.f32.mrf.mxu1 }
 0xf59   : > { %12519 = vmatprep.subr.msk.mxu1 %vm1702_vm4, %v12498_v22 }
 0xf5a   : > { %v4977_v4 = vpop.f32.mrf.mxu1  ;;  %12520 = vmatpush3.xpose.msk.msra.mxu1 %vm1702_vm4, %v12498_v22 }
 0xf5b   : > { %12521 = vmatprep.subr.msk.mxu1 %vm1702_vm4, %v4977_v4 }
 0xf5e   : > { %12522 = vmatpush3.xpose.msk.msra.mxu1 %vm1702_vm4, %v4977_v4 }
 0xf5f   : > { %12523 = vmatprep.subr.msk.mxu1 %vm1702_vm4, %v12495_v9 }
 0xf62   : > { %12524 = vmatpush3.xpose.msk.msra.mxu1 %vm1702_vm4, %v12495_v9 }
 0xf63   : > { %12525 = vmatprep.subr.msk.mxu1 %vm1702_vm4, %v4967_v2 }
 0xf66   : > { %12526 = vmatpush3.xpose.msk.msra.mxu1 %vm1702_vm4, %v4967_v2 }
 0xf67   : > { %12527 = vmatprep.subr.msk.mxu1 %vm1702_vm4, %v12492_v59 }
 0xf6a   : > { %12528 = vmatpush3.xpose.msk.msra.mxu1 %vm1702_vm4, %v12492_v59 }
 0xf6b   : > { %12529 = vmatprep.subr.msk.mxu1 %vm1702_vm4, %v4957_v61 }
 0xf6e   : > { %12530 = vmatpush3.xpose.msk.msra.mxu1 %vm1702_vm4, %v4957_v61 }
 0xf6f   : > { %12531 = vmatprep.subr.msk.mxu1 %vm1702_vm4, %v12489_v21 }
 0xf72   : > { %12532 = vmatpush3.xpose.msk.msra.mxu1 %vm1702_vm4, %v12489_v21 }
 0xf73   : > { %12533 = vmatprep.subr.msk.mxu1 %vm1702_vm4, %v4947_v50 }
 0xf76   : > { %12534 = vmatpush3.xpose.msk.msra.mxu1 %vm1702_vm4, %v4947_v50 }
 0xfb7   : > { %v4292_v42 = vpop.xlane.xlu1 %4291 }
 0xfb8   : > { %v4312_v13 = vsub.f32 %v12369_v52, %v4292_v42  ;;  %v3049_v42 = vld [vmem:[#allocation19 + $0x68] sm:$0x3] }
 0xfb9   : > { %v4289_v10 = vpop.xlane.xlu0 %4288  ;;  %12407 = vmatprep.subr.msk.mxu0 %vm2083_vm6, %v3049_v42 }
 0xfba   : > { %v4321_v33 = vmul.f32 1.442695, %v4312_v13  ;;  %v4311_v30 = vsub.f32 %v4248_v34, %v4289_v10 }
 0xfbb   : > { %v4298_v23 = vpop.xlane.xlu1 %4297 }
 0xfbc   : > { %13702 = vpow2.f32 %v4321_v33  ;;  %v4319_v14 = vmul.f32 1.442695, %v4311_v30  ;;  %v4314_v32 = vsub.f32 %v12372_v63, %v4298_v23 }
 0xfbd   : > { %v4295_v19 = vpop.xlane.xlu0 %4294 }
 0xfbe   : > { %13704 = vpow2.f32 %v4319_v14  ;;  %v4325_v20 = vmul.f32 1.442695, %v4314_v32  ;;  %v4313_v43 = vsub.f32 %v4258_v3, %v4295_v19 }
 0xfbf   : > { %v4304_v0 = vpop.xlane.xlu1 %4303 }
 0xfc0   : > { %13706 = vpow2.f32 %v4325_v20  ;;  %v4323_v7 = vmul.f32 1.442695, %v4313_v43  ;;  %v4316_v26 = vsub.f32 %v15411_v44, %v4304_v0 }
 0xfc1   : > { %v4301_v29 = vpop.xlane.xlu0 %4300 }
 0xfc2   : > { %13708 = vpow2.f32 %v4323_v7  ;;  %v4329_v58 = vmul.f32 1.442695, %v4316_v26  ;;  %v4315_v52 = vsub.f32 %v15415_v11, %v4301_v29  ;;  %v3048_v29 = vld [vmem:[#allocation19 + $0x60] sm:$0xff] }
 0xfc3   : > { %v4310_v35 = vpop.xlane.xlu1 %4309 }
 0xfc4   : > { %13710 = vpow2.f32 %v4329_v58  ;;  %v4327_v34 = vmul.f32 1.442695, %v4315_v52  ;;  %v4318_v37 = vsub.f32 %v15419_v17, %v4310_v35  ;;  %v3047_v35 = vld [vmem:[#allocation19 + $0x58] sm:$0xff] }
 0xfc5   : > { %v4307_v63 = vpop.xlane.xlu0 %4306 }
 0xfc6   : > { %13712 = vpow2.f32 %v4327_v34  ;;  %v4333_v16 = vmul.f32 1.442695, %v4318_v37  ;;  %v4317_v3 = vsub.f32 %v15423_v40, %v4307_v63  ;;  %v3046_v63 = vld [vmem:[#allocation19 + $0x50] sm:$0xff] }
 0xfc8   : > { %13714 = vpow2.f32 %v4333_v16  ;;  %v4331_v6 = vmul.f32 1.442695, %v4317_v3 }
 0xfc9   : > { %v13703_v45 = vpop.eup %13702 }
 0xfca   : > { %13716 = vpow2.f32 %v4331_v6  ;;  %v4338_v44 = vsel %vm3593_vm7, %v13703_v45, 0.0  ;;  %v3045_v6 = vld [vmem:[#allocation19 + $0x48] sm:$0xff] }
 0xfcb   : > { %v13705_v46 = vpop.eup %13704  ;;  %4339 = vadd.xlane.f32.xlu1 %v4338_v44 }
 0xfcc   : > { %v4335_v11 = vsel %vm3593_vm7, %v13705_v46, 0.0 }
 0xfcd   : > { %v13707_v47 = vpop.eup %13706  ;;  %4336 = vadd.xlane.f32.xlu0 %v4335_v11 }
 0xfce   : > { %v4344_v54 = vsel %vm3593_vm7, %v13707_v47, 0.0 }
 0xfcf   : > { %v13709_v17 = vpop.eup %13708  ;;  %4345 = vadd.xlane.f32.xlu1 %v4344_v54 }
 0xfd0   : > { %v4341_v21 = vsel %vm3593_vm7, %v13709_v17, 0.0 }
 0xfd1   : > { %v13711_v50 = vpop.eup %13710  ;;  %4342 = vadd.xlane.f32.xlu0 %v4341_v21  ;;  %v2951_v21 = vld [vmem:[#allocation15 + $0x58] sm:$0xff] }
 0xfd2   : > { %v4350_v40 = vsel %vm3593_vm7, %v13711_v50, 0.0 }
 0xfd3   : > { %v13713_v59 = vpop.eup %13712  ;;  %4351 = vadd.xlane.f32.xlu1 %v4350_v40 }
 0xfd4   : > { %v4347_v61 = vsel %vm3593_vm7, %v13713_v59, 0.0 }
 0xfd5   : > { %v13715_v9 = vpop.eup %13714  ;;  %4348 = vadd.xlane.f32.xlu0 %v4347_v61 }
 0xfd6   : > { %v4356_v2 = vsel %vm3593_vm7, %v13715_v9, 0.0 }
 0xfd7   : > { %v13717_v22 = vpop.eup %13716  ;;  %4357 = vadd.xlane.f32.xlu1 %v4356_v2 }
 0xfd8   : > { %v4353_v4 = vsel %vm3593_vm7, %v13717_v22, 0.0 }
 0xfd9   : > { %4354 = vadd.xlane.f32.xlu0 %v4353_v4 }
0x1054   : > { %v4340_v13 = vpop.xlane.xlu1 %4339 }
0x1055   : > { %13718 = vrcp.f32 %v4340_v13 }
0x1056   : > { %v4337_v10 = vpop.xlane.xlu0 %4336 }
0x1057   : > { %13720 = vrcp.f32 %v4337_v10 }
0x1058   : > { %v4346_v33 = vpop.xlane.xlu1 %4345 }
0x1059   : > { %13722 = vrcp.f32 %v4346_v33 }
0x105a   : > { %v4343_v30 = vpop.xlane.xlu0 %4342 }
0x105b   : > { %13724 = vrcp.f32 %v4343_v30  ;;  %v3014_v30 = vld [vmem:[#allocation18 + $0x50] sm:$0xff] }
0x105c   : > { %v4352_v23 = vpop.xlane.xlu1 %4351 }
0x105d   : > { %13726 = vrcp.f32 %v4352_v23  ;;  %v3013_v23 = vld [vmem:[#allocation18 + $0x48] sm:$0xff] }
0x105e   : > { %v4349_v14 = vpop.xlane.xlu0 %4348 }
0x105f   : > { %13728 = vrcp.f32 %v4349_v14  ;;  %v3012_v14 = vld [vmem:[#allocation18 + $0x40] sm:$0xff] }
0x1060   : > { %v4358_v32 = vpop.xlane.xlu1 %4357 }
0x1061   : > { %13730 = vrcp.f32 %v4358_v32  ;;  %v2955_v32 = vld [vmem:[#allocation15 + $0x78] sm:$0xff] }
0x1062   : > { %v4355_v19 = vpop.xlane.xlu0 %4354  ;;  %v13719_v20 = vpop.eup %13718  ;;  %12601 = vmatprep.subr.mxu1 %v2955_v32 }
0x1063   : > { %13732 = vrcp.f32 %v4355_v19  ;;  %v4368_v7 = vmul.f32 %v13719_v20, %v13703_v45 }
0x1064   : > { %v13721_v43 = vpop.eup %13720 }
0x1065   : > { %v4367_v0 = vmul.f32 %v13721_v43, %v13705_v46  ;;  %v3044_v46 = vld [vmem:[#allocation19 + $0x40] sm:$0xff] }
0x1066   : > { %v13723_v26 = vpop.eup %13722 }
0x1067   : > { %12395 = vmatprep.mubr.msk.f32.mxu0 %vm3593_vm7, %v4367_v0  ;;  %v4370_v34 = vmul.f32 %v13723_v26, %v13707_v47 }
0x1068   : > { %v13725_v58 = vpop.eup %13724  ;;  %12396 = vmatmul.mubr.msk.f32.vlgmr.msra.gmra.mxu0 %vm3593_vm7, %v4368_v7 }
0x1069   : > { %v4369_v52 = vmul.f32 %v13725_v58, %v13709_v17  ;;  %12408 = vmatpush3.msk.msra.mxu0 %vm2083_vm6, %v3049_v42  ;;  %v3043_v17 = vld [vmem:[#allocation19 + $0x38] sm:$0xff] }
0x106a   : > { %12409 = vmatprep.subr.mxu0 %v3048_v29  ;;  %v13727_v37 = vpop.eup %13726  ;;  %v3015_v42 = vld [vmem:[#allocation18 + $0x58] sm:$0xff] }
0x106b   : > { %12398 = vmatprep.mubr.msk.f32.mxu0 %vm3593_vm7, %v4369_v52  ;;  %12410 = vmatpush3.msra.mxu0 %v3048_v29  ;;  %v4372_v45 = vmul.f32 %v13727_v37, %v13711_v50 }
0x106c   : > { %v13729_v16 = vpop.eup %13728  ;;  %12399 = vmatmul.mubr.msk.f32.gmra.mxu0 %vm3593_vm7, %v4370_v34  ;;  %12411 = vmatprep.subr.mxu0 %v3047_v35 }
0x106d   : > { %v4371_v3 = vmul.f32 %v13729_v16, %v13713_v59  ;;  %12412 = vmatpush3.msra.mxu0 %v3047_v35  ;;  %v2950_v59 = vld [vmem:[#allocation15 + $0x50] sm:$0xff] }
0x106e   : > { %12413 = vmatprep.subr.mxu0 %v3046_v63  ;;  %v13731_v44 = vpop.eup %13730  ;;  %v2954_v16 = vld [vmem:[#allocation15 + $0x70] sm:$0xff] }
0x106f   : > { %12401 = vmatprep.mubr.msk.f32.mxu0 %vm3593_vm7, %v4371_v3  ;;  %12414 = vmatpush3.msra.mxu0 %v3046_v63  ;;  %v4374_v54 = vmul.f32 %v13731_v44, %v13715_v9  ;;  %v2949_v9 = vld [vmem:[#allocation15 + $0x48] sm:$0xff] }
0x1070   : > { %v13733_v11 = vpop.eup %13732  ;;  %12402 = vmatmul.mubr.msk.f32.gmra.mxu0 %vm3593_vm7, %v4372_v45  ;;  %12415 = vmatprep.subr.mxu0 %v3045_v6  ;;  %v2953_v45 = vld [vmem:[#allocation15 + $0x68] sm:$0xff] }
0x1071   : > { %v4373_v47 = vmul.f32 %v13733_v11, %v13717_v22  ;;  %12416 = vmatpush3.msra.mxu0 %v3045_v6  ;;  %v2948_v22 = vld [vmem:[#allocation15 + $0x40] sm:$0xff] }
0x1072   : > { %12417 = vmatprep.subr.mxu0 %v3044_v46  ;;  %v2952_v11 = vld [vmem:[#allocation15 + $0x60] sm:$0xff] }
0x1073   : > { %12404 = vmatprep.mubr.msk.f32.mxu0 %vm3593_vm7, %v4373_v47  ;;  %12418 = vmatpush3.msra.mxu0 %v3044_v46 }
0x1074   : > { %12405 = vmatmul.mubr.msk.f32.gmra.mxu0 %vm3593_vm7, %v4374_v54  ;;  %12419 = vmatprep.subr.mxu0 %v3043_v17 }
0x1075   : > { %12420 = vmatpush3.msra.mxu0 %v3043_v17  ;;  %v3019_v17 = vld [vmem:[#allocation18 + $0x78] sm:$0xff] }
0x1076   : > { %12459 = vmatprep.subr.mxu0 %v2951_v21 }
0x1128   : > { %v12397_v50 = vpop.f32.mrf.mxu0 }
0x112a   : > { %v4465_v40 = vpop.f32.mrf.mxu0 }
0x112b   : > { %12421 = vmatprep.mubr.msk.f32.mxu0 %vm1702_vm4, %v4465_v40 }
0x112c   : > { %v12400_v61 = vpop.f32.mrf.mxu0  ;;  %12422 = vmatmul.mubr.msk.f32.vlgmr.msra.gmra.mxu0 %vm1702_vm4, %v12397_v50 }
0x112d   : > { %12460 = vmatpush3.msra.mxu0 %v2951_v21 }
0x112e   : > { %v4475_v2 = vpop.f32.mrf.mxu0  ;;  %12461 = vmatprep.subr.mxu0 %v2950_v59 }
0x112f   : > { %12424 = vmatprep.mubr.msk.f32.mxu0 %vm1702_vm4, %v4475_v2  ;;  %12462 = vmatpush3.msra.mxu0 %v2950_v59 }
0x1130   : > { %v12403_v4 = vpop.f32.mrf.mxu0  ;;  %12425 = vmatmul.mubr.msk.f32.gmra.mxu0 %vm1702_vm4, %v12400_v61  ;;  %12463 = vmatprep.subr.mxu0 %v2949_v9 }
0x1131   : > { %12464 = vmatpush3.msra.mxu0 %v2949_v9 }
0x1132   : > { %v4485_v13 = vpop.f32.mrf.mxu0  ;;  %12465 = vmatprep.subr.mxu0 %v2948_v22 }
0x1133   : > { %12427 = vmatprep.mubr.msk.f32.mxu0 %vm1702_vm4, %v4485_v13  ;;  %12466 = vmatpush3.msra.mxu0 %v2948_v22  ;;  %v3017_v13 = vld [vmem:[#allocation18 + $0x68] sm:$0xff] }
0x1134   : > { %v12406_v10 = vpop.f32.mrf.mxu0  ;;  %12428 = vmatmul.mubr.msk.f32.gmra.mxu0 %vm1702_vm4, %v12403_v4  ;;  %12499 = vmatprep.subr.mxu0 %v3015_v42  ;;  %v3018_v4 = vld [vmem:[#allocation18 + $0x70] sm:$0xff] }
0x1136   : > { %v4495_v33 = vpop.f32.mrf.mxu0 }
0x1137   : > { %12430 = vmatprep.mubr.msk.f32.mxu0 %vm1702_vm4, %v4495_v33  ;;  %v3016_v33 = vld [vmem:[#allocation18 + $0x60] sm:$0xff] }
0x1138   : > { %12431 = vmatmul.mubr.msk.f32.gmra.mxu0 %vm1702_vm4, %v12406_v10 }
0x1139   : > { %12467 = vmatprep.mubr.msk.f32.mxu0 %vm1236_vm0, %v15171_v31 }
0x113c   : > { %12468 = vmatmul.mubr.msk.f32.vlgmr.msra.gmra.mxu0 %vm1236_vm0, %v15173_v12 }
0x113d   : > { %12470 = vmatprep.mubr.msk.f32.mxu0 %vm1236_vm0, %v15185_v41  ;;  %12500 = vmatpush3.msra.mxu0 %v3015_v42 }
0x113e   : > { %12501 = vmatprep.subr.mxu0 %v3014_v30 }
0x113f   : > { %12502 = vmatpush3.msra.mxu0 %v3014_v30 }
0x1140   : > { %12471 = vmatmul.mubr.msk.f32.gmra.mxu0 %vm1236_vm0, %v15187_v38  ;;  %12503 = vmatprep.subr.mxu0 %v3013_v23 }
0x1141   : > { %12473 = vmatprep.mubr.msk.f32.mxu0 %vm1236_vm0, %v15199_v48  ;;  %12504 = vmatpush3.msra.mxu0 %v3013_v23 }
0x1142   : > { %12505 = vmatprep.subr.mxu0 %v3012_v14 }
0x1143   : > { %12506 = vmatpush3.msra.mxu0 %v3012_v14 }
0x1144   : > { %12474 = vmatmul.mubr.msk.f32.gmra.mxu0 %vm1236_vm0, %v15202_v49 }
0x1145   : > { %12476 = vmatprep.mubr.msk.f32.mxu0 %vm1236_vm0, %v15212_v25 }
0x1148   : > { %12477 = vmatmul.mubr.msk.f32.gmra.mxu0 %vm1236_vm0, %v15214_v27 }
0x1149   : > { %12507 = vmatprep.mubr.msk.f32.mxu0 %vm1236_vm0, %v15171_v31 }
0x114c   : > { %12508 = vmatmul.mubr.msk.f32.vlgmr.msra.gmra.mxu0 %vm1236_vm0, %v15173_v12 }
0x114d   : > { %12510 = vmatprep.mubr.msk.f32.mxu0 %vm1236_vm0, %v15185_v41 }
0x1150   : > { %12511 = vmatmul.mubr.msk.f32.gmra.mxu0 %vm1236_vm0, %v15187_v38 }
0x1151   : > { %12513 = vmatprep.mubr.msk.f32.mxu0 %vm1236_vm0, %v15199_v48 }
0x1154   : > { %12514 = vmatmul.mubr.msk.f32.gmra.mxu0 %vm1236_vm0, %v15202_v49 }
0x1155   : > { %12516 = vmatprep.mubr.msk.f32.mxu0 %vm1236_vm0, %v15212_v25 }
0x1158   : > { %12517 = vmatmul.mubr.msk.f32.gmra.mxu0 %vm1236_vm0, %v15214_v27 }
0x11ec   : > { %v15521_v19 = vpop.f32.mrf.mxu0 }
0x11ee   : > { %v15523_v20 = vpop.f32.mrf.mxu0 }
0x11f0   : > { %v15525_v43 = vpop.f32.mrf.mxu0 }
0x11f2   : > { %v15527_v0 = vpop.f32.mrf.mxu0 }
0x11f4   : > { %v15529_v7 = vpop.f32.mrf.mxu0 }
0x11f6   : > { %v15531_v26 = vpop.f32.mrf.mxu0 }
0x11f8   : > { %v15533_v29 = vpop.f32.mrf.mxu0 }
0x11fa   : > { %v15535_v58 = vpop.f32.mrf.mxu0 }
0x11fc   : > { %v12469_v52 = vpop.f32.mrf.mxu0 }
0x11fd   : > { %v4874_v37 = vmul.f32 0.14142136, %v12469_v52 }
0x11fe   : > { %v4834_v35 = vpop.f32.mrf.mxu0 }
0x11ff   : > { %v4873_v34 = vmul.f32 0.14142136, %v4834_v35 }
0x1200   : > { %v12472_v63 = vpop.f32.mrf.mxu0 }
0x1201   : > { %12535 = vmatprep.mubr.msk.f32.mxu1 %vm1702_vm4, %v4873_v34  ;;  %v4876_v44 = vmul.f32 0.14142136, %v12472_v63 }
0x1202   : > { %v4844_v3 = vpop.f32.mrf.mxu0  ;;  %12536 = vmatmul.mubr.msk.f32.vlgmr.msra.gmra.mxu1 %vm1702_vm4, %v4874_v37 }
0x1203   : > { %v4875_v6 = vmul.f32 0.14142136, %v4844_v3  ;;  %12602 = vmatpush3.msra.mxu1 %v2955_v32 }
0x1204   : > { %v12475_v46 = vpop.f32.mrf.mxu0  ;;  %12603 = vmatprep.subr.mxu1 %v2954_v16 }
0x1205   : > { %12538 = vmatprep.mubr.msk.f32.mxu1 %vm1702_vm4, %v4875_v6  ;;  %12604 = vmatpush3.msra.mxu1 %v2954_v16  ;;  %v4878_v21 = vmul.f32 0.14142136, %v12475_v46 }
0x1206   : > { %v4854_v47 = vpop.f32.mrf.mxu0  ;;  %12539 = vmatmul.mubr.msk.f32.gmra.mxu1 %vm1702_vm4, %v4876_v44  ;;  %12605 = vmatprep.subr.mxu1 %v2953_v45 }
0x1207   : > { %v4877_v54 = vmul.f32 0.14142136, %v4854_v47  ;;  %12606 = vmatpush3.msra.mxu1 %v2953_v45 }
0x1208   : > { %v12478_v50 = vpop.f32.mrf.mxu0  ;;  %12607 = vmatprep.subr.mxu1 %v2952_v11 }
0x1209   : > { %12541 = vmatprep.mubr.msk.f32.mxu1 %vm1702_vm4, %v4877_v54  ;;  %12608 = vmatpush3.msra.mxu1 %v2952_v11  ;;  %v4880_v61 = vmul.f32 0.14142136, %v12478_v50 }
0x120a   : > { %v4864_v40 = vpop.f32.mrf.mxu0  ;;  %12542 = vmatmul.mubr.msk.f32.gmra.mxu1 %vm1702_vm4, %v4878_v21  ;;  %12641 = vmatprep.subr.mxu1 %v3019_v17 }
0x120b   : > { %v4879_v59 = vmul.f32 0.14142136, %v4864_v40 }
0x120c   : > { %v12509_v9 = vpop.f32.mrf.mxu0 }
0x120d   : > { %12544 = vmatprep.mubr.msk.f32.mxu1 %vm1702_vm4, %v4879_v59 }
0x120e   : > { %v5052_v2 = vpop.f32.mrf.mxu0  ;;  %12545 = vmatmul.mubr.msk.f32.gmra.mxu1 %vm1702_vm4, %v4880_v61 }
0x120f   : > { %12609 = vmatprep.mubr.msk.f32.mxu1 %vm1236_vm0, %v15171_v31 }
0x1210   : > { %v12512_v22 = vpop.f32.mrf.mxu0 }
0x1212   : > { %v5062_v42 = vpop.f32.mrf.mxu0  ;;  %12610 = vmatmul.mubr.msk.f32.vlgmr.msra.gmra.mxu1 %vm1236_vm0, %v15173_v12 }
0x1213   : > { %12612 = vmatprep.mubr.msk.f32.mxu1 %vm1236_vm0, %v15185_v41  ;;  %12642 = vmatpush3.msra.mxu1 %v3019_v17 }
0x1214   : > { %v12515_v10 = vpop.f32.mrf.mxu0  ;;  %12643 = vmatprep.subr.mxu1 %v3018_v4 }
0x1215   : > { %12644 = vmatpush3.msra.mxu1 %v3018_v4 }
0x1216   : > { %v5072_v30 = vpop.f32.mrf.mxu0  ;;  %12613 = vmatmul.mubr.msk.f32.gmra.mxu1 %vm1236_vm0, %v15187_v38  ;;  %12645 = vmatprep.subr.mxu1 %v3017_v13 }
0x1217   : > { %12615 = vmatprep.mubr.msk.f32.mxu1 %vm1236_vm0, %v15199_v48  ;;  %12646 = vmatpush3.msra.mxu1 %v3017_v13 }
0x1218   : > { %v12518_v23 = vpop.f32.mrf.mxu0  ;;  %12647 = vmatprep.subr.mxu1 %v3016_v33 }
0x1219   : > { %12547 = vmatprep.subr.mxu0 %v12518_v23  ;;  %12648 = vmatpush3.msra.mxu1 %v3016_v33 }
0x121a   : > { %v5082_v14 = vpop.f32.mrf.mxu0  ;;  %12548 = vmatpush3.msra.mxu0 %v12518_v23  ;;  %12616 = vmatmul.mubr.msk.f32.gmra.mxu1 %vm1236_vm0, %v15202_v49 }
0x121b   : > { %12549 = vmatprep.subr.mxu0 %v5082_v14  ;;  %12618 = vmatprep.mubr.msk.f32.mxu1 %vm1236_vm0, %v15212_v25 }
0x121c   : > { %12550 = vmatpush3.msra.mxu0 %v5082_v14 }
0x121d   : > { %12551 = vmatprep.subr.mxu0 %v12515_v10 }
0x121e   : > { %12552 = vmatpush3.msra.mxu0 %v12515_v10  ;;  %12619 = vmatmul.mubr.msk.f32.gmra.mxu1 %vm1236_vm0, %v15214_v27 }
0x121f   : > { %12553 = vmatprep.subr.mxu0 %v5072_v30  ;;  %12649 = vmatprep.mubr.msk.f32.mxu1 %vm1236_vm0, %v15171_v31 }
0x1220   : > { %12554 = vmatpush3.msra.mxu0 %v5072_v30 }
0x1221   : > { %12555 = vmatprep.subr.mxu0 %v12512_v22 }
0x1222   : > { %12556 = vmatpush3.msra.mxu0 %v12512_v22  ;;  %12650 = vmatmul.mubr.msk.f32.vlgmr.msra.gmra.mxu1 %vm1236_vm0, %v15173_v12 }
0x1223   : > { %12557 = vmatprep.subr.mxu0 %v5062_v42  ;;  %12652 = vmatprep.mubr.msk.f32.mxu1 %vm1236_vm0, %v15185_v41 }
0x1224   : > { %12558 = vmatpush3.msra.mxu0 %v5062_v42 }
0x1225   : > { %12559 = vmatprep.subr.mxu0 %v12509_v9 }
0x1226   : > { %12560 = vmatpush3.msra.mxu0 %v12509_v9  ;;  %12653 = vmatmul.mubr.msk.f32.gmra.mxu1 %vm1236_vm0, %v15187_v38 }
0x1227   : > { %12561 = vmatprep.subr.mxu0 %v5052_v2  ;;  %12655 = vmatprep.mubr.msk.f32.mxu1 %vm1236_vm0, %v15199_v48 }
0x1228   : > { %12562 = vmatpush3.msra.mxu0 %v5052_v2 }
0x122a   : > { %12656 = vmatmul.mubr.msk.f32.gmra.mxu1 %vm1236_vm0, %v15202_v49 }
0x122b   : > { %12658 = vmatprep.mubr.msk.f32.mxu1 %vm1236_vm0, %v15212_v25 }
0x122e   : > { %12659 = vmatmul.mubr.msk.f32.gmra.mxu1 %vm1236_vm0, %v15214_v27 }
0x12c2   : > { %v12537_v32 = vpop.f32.mrf.mxu1 }
0x12c3   : > { %v5247_v52 = vsel %vm3593_vm7, %v12537_v32, -inf }
0x12c4   : > { %5248 = vmax.xlane.f32.xlu1 %v5247_v52  ;;  %v5205_v35 = vpop.f32.mrf.mxu1 }
0x12c5   : > { %v5244_v34 = vsel %vm3593_vm7, %v5205_v35, -inf }
0x12c6   : > { %5245 = vmax.xlane.f32.xlu0 %v5244_v34  ;;  %v12540_v37 = vpop.f32.mrf.mxu1 }
0x12c7   : > { %v5253_v63 = vsel %vm3593_vm7, %v12540_v37, -inf }
0x12c8   : > { %5254 = vmax.xlane.f32.xlu1 %v5253_v63  ;;  %v5215_v16 = vpop.f32.mrf.mxu1 }
0x12c9   : > { %v5250_v3 = vsel %vm3593_vm7, %v5215_v16, -inf }
0x12ca   : > { %5251 = vmax.xlane.f32.xlu0 %v5250_v3  ;;  %v15581_v6 = vpop.f32.mrf.mxu1 }
0x12cb   : > { %v5259_v45 = vsel %vm3593_vm7, %v15581_v6, -inf }
0x12cc   : > { %5260 = vmax.xlane.f32.xlu1 %v5259_v45  ;;  %v15585_v44 = vpop.f32.mrf.mxu1 }
0x12cd   : > { %v5256_v46 = vsel %vm3593_vm7, %v15585_v44, -inf }
0x12ce   : > { %5257 = vmax.xlane.f32.xlu0 %v5256_v46  ;;  %v15589_v11 = vpop.f32.mrf.mxu1 }
0x12cf   : > { %v5265_v47 = vsel %vm3593_vm7, %v15589_v11, -inf }
0x12d0   : > { %5266 = vmax.xlane.f32.xlu1 %v5265_v47  ;;  %v15593_v54 = vpop.f32.mrf.mxu1 }
0x12d1   : > { %v5262_v17 = vsel %vm3593_vm7, %v15593_v54, -inf }
0x12d2   : > { %v15597_v21 = vpop.f32.mrf.mxu1  ;;  %5263 = vmax.xlane.f32.xlu0 %v5262_v17 }
0x12d4   : > { %v15599_v50 = vpop.f32.mrf.mxu1 }
0x12d6   : > { %v15601_v40 = vpop.f32.mrf.mxu1 }
0x12d8   : > { %v15603_v59 = vpop.f32.mrf.mxu1 }
0x12da   : > { %v15605_v61 = vpop.f32.mrf.mxu1 }
0x12dc   : > { %v15607_v9 = vpop.f32.mrf.mxu1 }
0x12de   : > { %v15609_v2 = vpop.f32.mrf.mxu1 }
0x12e0   : > { %v15611_v22 = vpop.f32.mrf.mxu1 }
0x12e2   : > { %v12651_v4 = vpop.f32.mrf.mxu1 }
0x12e4   : > { %v5885_v42 = vpop.f32.mrf.mxu1 }
0x12e6   : > { %v12654_v13 = vpop.f32.mrf.mxu1 }
0x12e8   : > { %v5895_v10 = vpop.f32.mrf.mxu1 }
0x12ea   : > { %v12657_v33 = vpop.f32.mrf.mxu1 }
0x12ec   : > { %v5905_v30 = vpop.f32.mrf.mxu1 }
0x12ee   : > { %v12660_v23 = vpop.f32.mrf.mxu1 }
0x12ef   : > { %12689 = vmatprep.subr.mxu1 %v12660_v23 }
0x12f0   : > { %v5915_v14 = vpop.f32.mrf.mxu1  ;;  %12690 = vmatpush3.msra.mxu1 %v12660_v23 }
0x12f1   : > { %12691 = vmatprep.subr.mxu1 %v5915_v14 }
0x12f2   : > { %12692 = vmatpush3.msra.mxu1 %v5915_v14 }
0x12f3   : > { %12693 = vmatprep.subr.mxu1 %v12657_v33 }
0x12f4   : > { %12694 = vmatpush3.msra.mxu1 %v12657_v33 }
0x12f5   : > { %12695 = vmatprep.subr.mxu1 %v5905_v30 }
0x12f6   : > { %12696 = vmatpush3.msra.mxu1 %v5905_v30 }
0x12f7   : > { %12697 = vmatprep.subr.mxu1 %v12654_v13 }
0x12f8   : > { %12698 = vmatpush3.msra.mxu1 %v12654_v13 }
0x12f9   : > { %12699 = vmatprep.subr.mxu1 %v5895_v10 }
0x12fa   : > { %12700 = vmatpush3.msra.mxu1 %v5895_v10 }
0x12fb   : > { %12701 = vmatprep.subr.mxu1 %v12651_v4 }
0x12fc   : > { %12702 = vmatpush3.msra.mxu1 %v12651_v4 }
0x12fd   : > { %12703 = vmatprep.subr.mxu1 %v5885_v42 }
0x12fe   : > { %12704 = vmatpush3.msra.mxu1 %v5885_v42 }
0x134d   : > { %v5249_v52 = vpop.xlane.xlu1 %5248 }
0x134e   : > { %v5269_v34 = vsub.f32 %v12537_v32, %v5249_v52 }
0x134f   : > { %v5246_v63 = vpop.xlane.xlu0 %5245 }
0x1350   : > { %v5278_v3 = vmul.f32 1.442695, %v5269_v34  ;;  %v5268_v45 = vsub.f32 %v5205_v35, %v5246_v63 }
0x1351   : > { %v5255_v46 = vpop.xlane.xlu1 %5254 }
0x1352   : > { %13734 = vpow2.f32 %v5278_v3  ;;  %v5276_v47 = vmul.f32 1.442695, %v5268_v45  ;;  %v5271_v17 = vsub.f32 %v12540_v37, %v5255_v46 }
0x1353   : > { %v5252_v33 = vpop.xlane.xlu0 %5251 }
0x1354   : > { %13736 = vpow2.f32 %v5276_v47  ;;  %v5282_v30 = vmul.f32 1.442695, %v5271_v17  ;;  %v5270_v23 = vsub.f32 %v5215_v16, %v5252_v33 }
0x1355   : > { %v5261_v13 = vpop.xlane.xlu1 %5260 }
0x1356   : > { %13738 = vpow2.f32 %v5282_v30  ;;  %v5280_v10 = vmul.f32 1.442695, %v5270_v23  ;;  %v5273_v4 = vsub.f32 %v15581_v6, %v5261_v13 }
0x1357   : > { %v5258_v14 = vpop.xlane.xlu0 %5257 }
0x1358   : > { %13740 = vpow2.f32 %v5280_v10  ;;  %v5286_v42 = vmul.f32 1.442695, %v5273_v4  ;;  %v5272_v32 = vsub.f32 %v15585_v44, %v5258_v14 }
0x1359   : > { %v5267_v52 = vpop.xlane.xlu1 %5266 }
0x135a   : > { %13742 = vpow2.f32 %v5286_v42  ;;  %v5284_v35 = vmul.f32 1.442695, %v5272_v32  ;;  %v5275_v34 = vsub.f32 %v15589_v11, %v5267_v52  ;;  %v3056_v32 = vld [vmem:[#allocation19 + $0xa0] sm:$0x3] }
0x135b   : > { %v5264_v37 = vpop.xlane.xlu0 %5263  ;;  %12575 = vmatprep.subr.msk.mxu0 %vm2083_vm6, %v3056_v32 }
0x135c   : > { %13744 = vpow2.f32 %v5284_v35  ;;  %v5290_v63 = vmul.f32 1.442695, %v5275_v34  ;;  %v5274_v16 = vsub.f32 %v15593_v54, %v5264_v37 }
0x135e   : > { %13746 = vpow2.f32 %v5290_v63  ;;  %v5288_v3 = vmul.f32 1.442695, %v5274_v16 }
0x135f   : > { %v13735_v45 = vpop.eup %13734 }
0x1360   : > { %13748 = vpow2.f32 %v5288_v3  ;;  %v5295_v6 = vsel %vm3593_vm7, %v13735_v45, 0.0 }
0x1361   : > { %v13737_v46 = vpop.eup %13736  ;;  %5296 = vadd.xlane.f32.xlu1 %v5295_v6 }
0x1362   : > { %v5292_v44 = vsel %vm3593_vm7, %v13737_v46, 0.0 }
0x1363   : > { %v13739_v47 = vpop.eup %13738  ;;  %5293 = vadd.xlane.f32.xlu0 %v5292_v44 }
0x1364   : > { %v5301_v17 = vsel %vm3593_vm7, %v13739_v47, 0.0 }
0x1365   : > { %v13741_v11 = vpop.eup %13740  ;;  %5302 = vadd.xlane.f32.xlu1 %v5301_v17 }
0x1366   : > { %v5298_v33 = vsel %vm3593_vm7, %v13741_v11, 0.0 }
0x1367   : > { %v13743_v30 = vpop.eup %13742  ;;  %5299 = vadd.xlane.f32.xlu0 %v5298_v33 }
0x1368   : > { %v5307_v54 = vsel %vm3593_vm7, %v13743_v30, 0.0 }
0x1369   : > { %v13745_v23 = vpop.eup %13744  ;;  %5308 = vadd.xlane.f32.xlu1 %v5307_v54 }
0x136a   : > { %v5304_v13 = vsel %vm3593_vm7, %v13745_v23, 0.0 }
0x136b   : > { %v13747_v10 = vpop.eup %13746  ;;  %5305 = vadd.xlane.f32.xlu0 %v5304_v13 }
0x136c   : > { %v5313_v4 = vsel %vm3593_vm7, %v13747_v10, 0.0 }
0x136d   : > { %v13749_v14 = vpop.eup %13748  ;;  %5314 = vadd.xlane.f32.xlu1 %v5313_v4  ;;  %v3055_v4 = vld [vmem:[#allocation19 + $0x98] sm:$0xff] }
0x136e   : > { %v5310_v42 = vsel %vm3593_vm7, %v13749_v14, 0.0 }
0x136f   : > { %5311 = vadd.xlane.f32.xlu0 %v5310_v42 }
0x13ea   : > { %v5297_v52 = vpop.xlane.xlu1 %5296 }
0x13eb   : > { %13750 = vrcp.f32 %v5297_v52 }
0x13ec   : > { %v5294_v35 = vpop.xlane.xlu0 %5293 }
0x13ed   : > { %13752 = vrcp.f32 %v5294_v35  ;;  %v3054_v35 = vld [vmem:[#allocation19 + $0x90] sm:$0xff] }
0x13ee   : > { %v5303_v34 = vpop.xlane.xlu1 %5302 }
0x13ef   : > { %13754 = vrcp.f32 %v5303_v34 }
0x13f0   : > { %v5300_v37 = vpop.xlane.xlu0 %5299 }
0x13f1   : > { %13756 = vrcp.f32 %v5300_v37 }
0x13f2   : > { %v5309_v63 = vpop.xlane.xlu1 %5308 }
0x13f3   : > { %13758 = vrcp.f32 %v5309_v63  ;;  %v3053_v63 = vld [vmem:[#allocation19 + $0x88] sm:$0xff] }
0x13f4   : > { %v5306_v16 = vpop.xlane.xlu0 %5305 }
0x13f5   : > { %13760 = vrcp.f32 %v5306_v16  ;;  %v3052_v16 = vld [vmem:[#allocation19 + $0x80] sm:$0xff] }
0x13f6   : > { %v5315_v3 = vpop.xlane.xlu1 %5314 }
0x13f7   : > { %13762 = vrcp.f32 %v5315_v3 }
0x13f8   : > { %v5312_v6 = vpop.xlane.xlu0 %5311  ;;  %v13751_v44 = vpop.eup %13750 }
0x13f9   : > { %13764 = vrcp.f32 %v5312_v6  ;;  %v5325_v54 = vmul.f32 %v13751_v44, %v13735_v45 }
0x13fa   : > { %v13753_v17 = vpop.eup %13752 }
0x13fb   : > { %v5324_v33 = vmul.f32 %v13753_v17, %v13737_v46 }
0x13fc   : > { %v13755_v13 = vpop.eup %13754 }
0x13fd   : > { %12563 = vmatprep.mubr.msk.f32.mxu0 %vm3593_vm7, %v5324_v33  ;;  %v5327_v34 = vmul.f32 %v13755_v13, %v13739_v47  ;;  %v3051_v47 = vld [vmem:[#allocation19 + $0x78] sm:$0xff] }
0x13fe   : > { %v13757_v42 = vpop.eup %13756  ;;  %12564 = vmatmul.mubr.msk.f32.vlgmr.msra.gmra.mxu0 %vm3593_vm7, %v5325_v54  ;;  %v2986_v54 = vld [vmem:[#allocation16 + $0x70] sm:$0xff] }
0x13ff   : > { %v5326_v52 = vmul.f32 %v13757_v42, %v13741_v11  ;;  %12576 = vmatpush3.msk.msra.mxu0 %vm2083_vm6, %v3056_v32 }
0x1400   : > { %12577 = vmatprep.subr.mxu0 %v3055_v4  ;;  %v13759_v37 = vpop.eup %13758 }
0x1401   : > { %12566 = vmatprep.mubr.msk.f32.mxu0 %vm3593_vm7, %v5326_v52  ;;  %12578 = vmatpush3.msra.mxu0 %v3055_v4  ;;  %v5329_v3 = vmul.f32 %v13759_v37, %v13743_v30  ;;  %v3050_v30 = vld [vmem:[#allocation19 + $0x70] sm:$0xff]  ;;  %v2984_v4 = vld [vmem:[#allocation16 + $0x60] sm:$0xff]  ;;  %v5706_v37 = vmul.f32 0.14142136, %v15599_v50 }
0x1402   : > { %v13761_v46 = vpop.eup %13760  ;;  %12567 = vmatmul.mubr.msk.f32.gmra.mxu0 %vm3593_vm7, %v5327_v34  ;;  %12579 = vmatprep.subr.mxu0 %v3054_v35 }
0x1403   : > { %v5328_v45 = vmul.f32 %v13761_v46, %v13745_v23  ;;  %12580 = vmatpush3.msra.mxu0 %v3054_v35  ;;  %v2987_v23 = vld [vmem:[#allocation16 + $0x78] sm:$0xff] }
0x1404   : > { %12581 = vmatprep.subr.mxu0 %v3053_v63  ;;  %v13763_v11 = vpop.eup %13762 }
0x1405   : > { %12569 = vmatprep.mubr.msk.f32.mxu0 %vm3593_vm7, %v5328_v45  ;;  %12582 = vmatpush3.msra.mxu0 %v3053_v63  ;;  %v5331_v44 = vmul.f32 %v13763_v11, %v13747_v10  ;;  %v2985_v10 = vld [vmem:[#allocation16 + $0x68] sm:$0xff]  ;;  %v4735_v63 = vadd.f32 %v15427_v53, %v15521_v19  ;;  %v4765_v19 = vadd.f32 %v15439_v57, %v15533_v29  ;;  %v2959_v57 = vld [vmem:[#allocation15 + $0x98] sm:$0xff]  ;;  %v5707_v29 = vmul.f32 0.14142136, %v15597_v21 }
0x1406   : > { %v13765_v32 = vpop.eup %13764  ;;  %12570 = vmatmul.mubr.msk.f32.gmra.mxu0 %vm3593_vm7, %v5329_v3  ;;  %12583 = vmatprep.subr.mxu0 %v3052_v16  ;;  %v4745_v3 = vadd.f32 %v15431_v55, %v15525_v43  ;;  %v3023_v21 = vld [vmem:[#allocation18 + $0x98] sm:$0xff] }
0x1407   : > { %v5330_v6 = vmul.f32 %v13765_v32, %v13749_v14  ;;  %12584 = vmatpush3.msra.mxu0 %v3052_v16  ;;  %v4755_v32 = vadd.f32 %v15435_v18, %v15529_v7 }
0x1408   : > { %12585 = vmatprep.subr.mxu0 %v3051_v47 }
0x1409   : > { %12572 = vmatprep.mubr.msk.f32.mxu0 %vm3593_vm7, %v5330_v6  ;;  %12586 = vmatpush3.msra.mxu0 %v3051_v47 }
0x140a   : > { %12573 = vmatmul.mubr.msk.f32.gmra.mxu0 %vm3593_vm7, %v5331_v44  ;;  %12587 = vmatprep.subr.mxu0 %v3050_v30 }
0x140b   : > { %12588 = vmatpush3.msra.mxu0 %v3050_v30 }
0x140c   : > { %12621 = vmatprep.subr.mxu0 %v2987_v23 }
0x14be   : > { %v12565_v17 = vpop.f32.mrf.mxu0 }
0x14c0   : > { %v5422_v33 = vpop.f32.mrf.mxu0 }
0x14c1   : > { %12589 = vmatprep.mubr.msk.f32.mxu0 %vm1702_vm4, %v5422_v33 }
0x14c2   : > { %v12568_v13 = vpop.f32.mrf.mxu0  ;;  %12590 = vmatmul.mubr.msk.f32.vlgmr.msra.gmra.mxu0 %vm1702_vm4, %v12565_v17 }
0x14c3   : > { %12622 = vmatpush3.msra.mxu0 %v2987_v23 }
0x14c4   : > { %v5432_v14 = vpop.f32.mrf.mxu0  ;;  %12623 = vmatprep.subr.mxu0 %v2986_v54 }
0x14c5   : > { %12592 = vmatprep.mubr.msk.f32.mxu0 %vm1702_vm4, %v5432_v14  ;;  %12624 = vmatpush3.msra.mxu0 %v2986_v54  ;;  %v5708_v14 = vmul.f32 0.14142136, %v15603_v59  ;;  %v5711_v59 = vmul.f32 0.14142136, %v15605_v61  ;;  %v3021_v61 = vld [vmem:[#allocation18 + $0x88] sm:$0xff] }
0x14c6   : > { %v12571_v42 = vpop.f32.mrf.mxu0  ;;  %12593 = vmatmul.mubr.msk.f32.gmra.mxu0 %vm1702_vm4, %v12568_v13  ;;  %12625 = vmatprep.subr.mxu0 %v2985_v10 }
0x14c7   : > { %12626 = vmatpush3.msra.mxu0 %v2985_v10 }
0x14c8   : > { %v5442_v52 = vpop.f32.mrf.mxu0  ;;  %12627 = vmatprep.subr.mxu0 %v2984_v4 }
0x14c9   : > { %12595 = vmatprep.mubr.msk.f32.mxu0 %vm1702_vm4, %v5442_v52  ;;  %12628 = vmatpush3.msra.mxu0 %v2984_v4  ;;  %v2958_v4 = vld [vmem:[#allocation15 + $0x90] sm:$0xff]  ;;  %v5709_v52 = vmul.f32 0.14142136, %v15601_v40  ;;  %v5713_v40 = vmul.f32 0.14142136, %v15609_v2 }
0x14ca   : > { %v12574_v35 = vpop.f32.mrf.mxu0  ;;  %12596 = vmatmul.mubr.msk.f32.gmra.mxu0 %vm1702_vm4, %v12571_v42  ;;  %v2957_v42 = vld [vmem:[#allocation15 + $0x88] sm:$0xff] }
0x14cc   : > { %v5452_v34 = vpop.f32.mrf.mxu0 }
0x14cd   : > { %12598 = vmatprep.mubr.msk.f32.mxu0 %vm1702_vm4, %v5452_v34  ;;  %v2956_v34 = vld [vmem:[#allocation15 + $0x80] sm:$0xff] }
0x14ce   : > { %12599 = vmatmul.mubr.msk.f32.gmra.mxu0 %vm1702_vm4, %v12574_v35  ;;  %v5710_v35 = vmul.f32 0.14142136, %v15607_v9  ;;  %v3022_v9 = vld [vmem:[#allocation18 + $0x90] sm:$0xff] }
0x14cf   : > { %12629 = vmatprep.mubr.msk.f32.mxu0 %vm1236_vm0, %v15171_v31 }
0x14d2   : > { %12630 = vmatmul.mubr.msk.f32.vlgmr.msra.gmra.mxu0 %vm1236_vm0, %v15173_v12 }
0x14d3   : > { %12632 = vmatprep.mubr.msk.f32.mxu0 %vm1236_vm0, %v15185_v41 }
0x14d6   : > { %12633 = vmatmul.mubr.msk.f32.gmra.mxu0 %vm1236_vm0, %v15187_v38 }
0x14d7   : > { %12635 = vmatprep.mubr.msk.f32.mxu0 %vm1236_vm0, %v15199_v48 }
0x14da   : > { %12636 = vmatmul.mubr.msk.f32.gmra.mxu0 %vm1236_vm0, %v15202_v49 }
0x14db   : > { %12638 = vmatprep.mubr.msk.f32.mxu0 %vm1236_vm0, %v15212_v25 }
0x14de   : > { %12639 = vmatmul.mubr.msk.f32.gmra.mxu0 %vm1236_vm0, %v15214_v27 }
0x14df   : > { %12677 = vmatprep.mubr.msk.f32.mxu0 %vm1702_vm4, %v5706_v37  ;;  %v5712_v37 = vmul.f32 0.14142136, %v15611_v22  ;;  %v3020_v22 = vld [vmem:[#allocation18 + $0x80] sm:$0xff] }
0x1582   : > { %v12591_v46 = vpop.f32.mrf.mxu0 }
0x1583   : > { %v15663_v45 = vadd.f32 %v12591_v46, %v4735_v63 }
0x1584   : > { %v15665_v16 = vpop.f32.mrf.mxu0 }
0x1586   : > { %v12594_v11 = vpop.f32.mrf.mxu0 }
0x1587   : > { %v15669_v47 = vadd.f32 %v12594_v11, %v4745_v3 }
0x1588   : > { %v15671_v50 = vpop.f32.mrf.mxu0 }
0x158a   : > { %v12597_v6 = vpop.f32.mrf.mxu0 }
0x158b   : > { %v15675_v44 = vadd.f32 %v12597_v6, %v4755_v32 }
0x158c   : > { %v15677_v53 = vpop.f32.mrf.mxu0 }
0x158e   : > { %v12600_v30 = vpop.f32.mrf.mxu0 }
0x158f   : > { %v15681_v23 = vadd.f32 %v12600_v30, %v4765_v19 }
0x1590   : > { %v15683_v55 = vpop.f32.mrf.mxu0 }
0x1592   : > { %v12631_v43 = vpop.f32.mrf.mxu0 }
0x1594   : > { %v5780_v17 = vpop.f32.mrf.mxu0 }
0x1596   : > { %v12634_v33 = vpop.f32.mrf.mxu0 }
0x1598   : > { %v5790_v54 = vpop.f32.mrf.mxu0 }
0x159a   : > { %v12637_v13 = vpop.f32.mrf.mxu0 }
0x159c   : > { %v5800_v10 = vpop.f32.mrf.mxu0 }
0x159e   : > { %v12640_v18 = vpop.f32.mrf.mxu0 }
0x159f   : > { %12661 = vmatprep.subr.msk.mxu0 %vm1702_vm4, %v12640_v18 }
0x15a0   : > { %v5810_v7 = vpop.f32.mrf.mxu0  ;;  %12662 = vmatpush3.xpose.msk.msra.mxu0 %vm1702_vm4, %v12640_v18 }
0x15a1   : > { %12663 = vmatprep.subr.msk.mxu0 %vm1702_vm4, %v5810_v7 }
0x15a4   : > { %12664 = vmatpush3.xpose.msk.msra.mxu0 %vm1702_vm4, %v5810_v7 }
0x15a5   : > { %12665 = vmatprep.subr.msk.mxu0 %vm1702_vm4, %v12637_v13 }
0x15a8   : > { %12666 = vmatpush3.xpose.msk.msra.mxu0 %vm1702_vm4, %v12637_v13 }
0x15a9   : > { %12667 = vmatprep.subr.msk.mxu0 %vm1702_vm4, %v5800_v10 }
0x15ac   : > { %12668 = vmatpush3.xpose.msk.msra.mxu0 %vm1702_vm4, %v5800_v10 }
0x15ad   : > { %12669 = vmatprep.subr.msk.mxu0 %vm1702_vm4, %v12634_v33 }
0x15b0   : > { %12670 = vmatpush3.xpose.msk.msra.mxu0 %vm1702_vm4, %v12634_v33 }
0x15b1   : > { %12671 = vmatprep.subr.msk.mxu0 %vm1702_vm4, %v5790_v54 }
0x15b4   : > { %12672 = vmatpush3.xpose.msk.msra.mxu0 %vm1702_vm4, %v5790_v54 }
0x15b5   : > { %12673 = vmatprep.subr.msk.mxu0 %vm1702_vm4, %v12631_v43 }
0x15b8   : > { %12674 = vmatpush3.xpose.msk.msra.mxu0 %vm1702_vm4, %v12631_v43 }
0x15b9   : > { %12675 = vmatprep.subr.msk.mxu0 %vm1702_vm4, %v5780_v17 }
0x15bc   : > { %12676 = vmatpush3.xpose.msk.msra.mxu0 %vm1702_vm4, %v5780_v17 }
0x15bd   : > { %12743 = vmatprep.subr.mxu0 %v2959_v57 }
0x15bf   : > { %12678 = vmatmul.mubr.msk.f32.vlgmr.msra.gmra.mxu0 %vm1702_vm4, %v5707_v29 }
0x15c0   : > { %12680 = vmatprep.mubr.msk.f32.mxu0 %vm1702_vm4, %v5708_v14  ;;  %12744 = vmatpush3.msra.mxu0 %v2959_v57 }
0x15c1   : > { %12745 = vmatprep.subr.mxu0 %v2958_v4 }
0x15c2   : > { %12746 = vmatpush3.msra.mxu0 %v2958_v4 }
0x15c3   : > { %12681 = vmatmul.mubr.msk.f32.gmra.mxu0 %vm1702_vm4, %v5709_v52  ;;  %12747 = vmatprep.subr.mxu0 %v2957_v42 }
0x15c4   : > { %12683 = vmatprep.mubr.msk.f32.mxu0 %vm1702_vm4, %v5710_v35  ;;  %12748 = vmatpush3.msra.mxu0 %v2957_v42 }
0x15c5   : > { %12749 = vmatprep.subr.mxu0 %v2956_v34 }
0x15c6   : > { %12750 = vmatpush3.msra.mxu0 %v2956_v34 }
0x15c7   : > { %12684 = vmatmul.mubr.msk.f32.gmra.mxu0 %vm1702_vm4, %v5711_v59  ;;  %12783 = vmatprep.subr.mxu0 %v3023_v21 }
0x15c8   : > { %12686 = vmatprep.mubr.msk.f32.mxu0 %vm1702_vm4, %v5712_v37 }
0x15cb   : > { %12687 = vmatmul.mubr.msk.f32.gmra.mxu0 %vm1702_vm4, %v5713_v40 }
0x15cc   : > { %12751 = vmatprep.mubr.msk.f32.mxu0 %vm1236_vm0, %v15171_v31 }
0x15cf   : > { %12752 = vmatmul.mubr.msk.f32.vlgmr.msra.gmra.mxu0 %vm1236_vm0, %v15173_v12 }
0x15d0   : > { %12754 = vmatprep.mubr.msk.f32.mxu0 %vm1236_vm0, %v15185_v41  ;;  %12784 = vmatpush3.msra.mxu0 %v3023_v21 }
0x15d1   : > { %12785 = vmatprep.subr.mxu0 %v3022_v9 }
0x15d2   : > { %12786 = vmatpush3.msra.mxu0 %v3022_v9 }
0x15d3   : > { %12755 = vmatmul.mubr.msk.f32.gmra.mxu0 %vm1236_vm0, %v15187_v38  ;;  %12787 = vmatprep.subr.mxu0 %v3021_v61 }
0x15d4   : > { %12757 = vmatprep.mubr.msk.f32.mxu0 %vm1236_vm0, %v15199_v48  ;;  %12788 = vmatpush3.msra.mxu0 %v3021_v61 }
0x15d5   : > { %12789 = vmatprep.subr.mxu0 %v3020_v22 }
0x15d6   : > { %12790 = vmatpush3.msra.mxu0 %v3020_v22 }
0x15d7   : > { %12758 = vmatmul.mubr.msk.f32.gmra.mxu0 %vm1236_vm0, %v15202_v49 }
0x15d8   : > { %12760 = vmatprep.mubr.msk.f32.mxu0 %vm1236_vm0, %v15212_v25 }
0x15db   : > { %12761 = vmatmul.mubr.msk.f32.gmra.mxu0 %vm1236_vm0, %v15214_v27 }
0x15dc   : > { %12791 = vmatprep.mubr.msk.f32.mxu0 %vm1236_vm0, %v15171_v31 }
0x15df   : > { %12792 = vmatmul.mubr.msk.f32.vlgmr.msra.gmra.mxu0 %vm1236_vm0, %v15173_v12 }
0x15e0   : > { %12794 = vmatprep.mubr.msk.f32.mxu0 %vm1236_vm0, %v15185_v41 }
0x15e3   : > { %12795 = vmatmul.mubr.msk.f32.gmra.mxu0 %vm1236_vm0, %v15187_v38 }
0x15e4   : > { %12797 = vmatprep.mubr.msk.f32.mxu0 %vm1236_vm0, %v15199_v48 }
0x15e7   : > { %12798 = vmatmul.mubr.msk.f32.gmra.mxu0 %vm1236_vm0, %v15202_v49 }
0x15e8   : > { %12800 = vmatprep.mubr.msk.f32.mxu0 %vm1236_vm0, %v15212_v25 }
0x15eb   : > { %12801 = vmatmul.mubr.msk.f32.gmra.mxu0 %vm1236_vm0, %v15214_v27 }
0x167f   : > { %v12679_v2 = vpop.f32.mrf.mxu0 }
0x1680   : > { %v6080_v63 = vsel %vm3593_vm7, %v12679_v2, -inf }
0x1681   : > { %6081 = vmax.xlane.f32.xlu1 %v6080_v63  ;;  %v6038_v46 = vpop.f32.mrf.mxu0 }
0x1682   : > { %v6077_v3 = vsel %vm3593_vm7, %v6038_v46, -inf }
0x1683   : > { %6078 = vmax.xlane.f32.xlu0 %v6077_v3  ;;  %v12682_v11 = vpop.f32.mrf.mxu0 }
0x1684   : > { %v6086_v32 = vsel %vm3593_vm7, %v12682_v11, -inf }
0x1685   : > { %6087 = vmax.xlane.f32.xlu1 %v6086_v32  ;;  %v6048_v6 = vpop.f32.mrf.mxu0 }
0x1686   : > { %v6083_v19 = vsel %vm3593_vm7, %v6048_v6, -inf }
0x1687   : > { %6084 = vmax.xlane.f32.xlu0 %v6083_v19  ;;  %v15751_v30 = vpop.f32.mrf.mxu0 }
0x1688   : > { %v6092_v43 = vsel %vm3593_vm7, %v15751_v30, -inf }
0x1689   : > { %6093 = vmax.xlane.f32.xlu1 %v6092_v43  ;;  %v15755_v17 = vpop.f32.mrf.mxu0 }
0x168a   : > { %v6089_v33 = vsel %vm3593_vm7, %v15755_v17, -inf }
0x168b   : > { %6090 = vmax.xlane.f32.xlu0 %v6089_v33  ;;  %v15759_v54 = vpop.f32.mrf.mxu0 }
0x168c   : > { %v6098_v13 = vsel %vm3593_vm7, %v15759_v54, -inf }
0x168d   : > { %6099 = vmax.xlane.f32.xlu1 %v6098_v13  ;;  %v15763_v10 = vpop.f32.mrf.mxu0 }
0x168e   : > { %v6095_v18 = vsel %vm3593_vm7, %v15763_v10, -inf }
0x168f   : > { %v15767_v7 = vpop.f32.mrf.mxu0  ;;  %6096 = vmax.xlane.f32.xlu0 %v6095_v18 }
0x1691   : > { %v15769_v57 = vpop.f32.mrf.mxu0 }
0x1693   : > { %v15771_v29 = vpop.f32.mrf.mxu0 }
0x1695   : > { %v15773_v14 = vpop.f32.mrf.mxu0 }
0x1697   : > { %v15775_v4 = vpop.f32.mrf.mxu0 }
0x1699   : > { %v15777_v42 = vpop.f32.mrf.mxu0 }
0x169b   : > { %v15779_v52 = vpop.f32.mrf.mxu0 }
0x169d   : > { %v15781_v35 = vpop.f32.mrf.mxu0 }
0x169f   : > { %v12793_v34 = vpop.f32.mrf.mxu0 }
0x16a1   : > { %v6718_v21 = vpop.f32.mrf.mxu0 }
0x16a3   : > { %v12796_v59 = vpop.f32.mrf.mxu0 }
0x16a5   : > { %v6728_v37 = vpop.f32.mrf.mxu0 }
0x16a7   : > { %v12799_v40 = vpop.f32.mrf.mxu0 }
0x16a9   : > { %v6738_v9 = vpop.f32.mrf.mxu0 }
0x16ab   : > { %v12802_v61 = vpop.f32.mrf.mxu0 }
0x16ac   : > { %12831 = vmatprep.subr.mxu0 %v12802_v61 }
0x16ad   : > { %v6748_v22 = vpop.f32.mrf.mxu0  ;;  %12832 = vmatpush3.msra.mxu0 %v12802_v61 }
0x16ae   : > { %12833 = vmatprep.subr.mxu0 %v6748_v22 }
0x16af   : > { %12834 = vmatpush3.msra.mxu0 %v6748_v22 }
0x16b0   : > { %12835 = vmatprep.subr.mxu0 %v12799_v40 }
0x16b1   : > { %12836 = vmatpush3.msra.mxu0 %v12799_v40 }
0x16b2   : > { %12837 = vmatprep.subr.mxu0 %v6738_v9 }
0x16b3   : > { %12838 = vmatpush3.msra.mxu0 %v6738_v9 }
0x16b4   : > { %12839 = vmatprep.subr.mxu0 %v12796_v59 }
0x16b5   : > { %12840 = vmatpush3.msra.mxu0 %v12796_v59 }
0x16b6   : > { %12841 = vmatprep.subr.mxu0 %v6728_v37 }
0x16b7   : > { %12842 = vmatpush3.msra.mxu0 %v6728_v37 }
0x16b8   : > { %12843 = vmatprep.subr.mxu0 %v12793_v34 }
0x16b9   : > { %12844 = vmatpush3.msra.mxu0 %v12793_v34 }
0x16ba   : > { %12845 = vmatprep.subr.mxu0 %v6718_v21 }
0x16bb   : > { %12846 = vmatpush3.msra.mxu0 %v6718_v21 }
0x170a   : > { %v6082_v63 = vpop.xlane.xlu1 %6081 }
0x170b   : > { %v6102_v3 = vsub.f32 %v12679_v2, %v6082_v63 }
0x170c   : > { %v6079_v32 = vpop.xlane.xlu0 %6078 }
0x170d   : > { %v6111_v19 = vmul.f32 1.442695, %v6102_v3  ;;  %v6101_v43 = vsub.f32 %v6038_v46, %v6079_v32 }
0x170e   : > { %v6088_v33 = vpop.xlane.xlu1 %6087 }
0x170f   : > { %13766 = vpow2.f32 %v6111_v19  ;;  %v6109_v13 = vmul.f32 1.442695, %v6101_v43  ;;  %v6104_v18 = vsub.f32 %v12682_v11, %v6088_v33 }
0x1710   : > { %v6085_v40 = vpop.xlane.xlu0 %6084 }
0x1711   : > { %13768 = vpow2.f32 %v6109_v13  ;;  %v6115_v9 = vmul.f32 1.442695, %v6104_v18  ;;  %v6103_v61 = vsub.f32 %v6048_v6, %v6085_v40 }
0x1712   : > { %v6094_v59 = vpop.xlane.xlu1 %6093 }
0x1713   : > { %13770 = vpow2.f32 %v6115_v9  ;;  %v6113_v37 = vmul.f32 1.442695, %v6103_v61  ;;  %v6106_v34 = vsub.f32 %v15751_v30, %v6094_v59 }
0x1714   : > { %v6091_v22 = vpop.xlane.xlu0 %6090 }
0x1715   : > { %13772 = vpow2.f32 %v6113_v37  ;;  %v6119_v21 = vmul.f32 1.442695, %v6106_v34  ;;  %v6105_v2 = vsub.f32 %v15755_v17, %v6091_v22 }
0x1716   : > { %v6100_v63 = vpop.xlane.xlu1 %6099 }
0x1717   : > { %13774 = vpow2.f32 %v6119_v21  ;;  %v6117_v46 = vmul.f32 1.442695, %v6105_v2  ;;  %v6108_v3 = vsub.f32 %v15759_v54, %v6100_v63  ;;  %v3063_v2 = vld [vmem:[#allocation19 + $0xd8] sm:$0x3] }
0x1718   : > { %v6097_v11 = vpop.xlane.xlu0 %6096  ;;  %12717 = vmatprep.subr.msk.mxu1 %vm2083_vm6, %v3063_v2 }
0x1719   : > { %13776 = vpow2.f32 %v6117_v46  ;;  %v6123_v32 = vmul.f32 1.442695, %v6108_v3  ;;  %v6107_v6 = vsub.f32 %v15763_v10, %v6097_v11 }
0x171b   : > { %13778 = vpow2.f32 %v6123_v32  ;;  %v6121_v19 = vmul.f32 1.442695, %v6107_v6 }
0x171c   : > { %v13767_v43 = vpop.eup %13766 }
0x171d   : > { %13780 = vpow2.f32 %v6121_v19  ;;  %v6128_v30 = vsel %vm3593_vm7, %v13767_v43, 0.0 }
0x171e   : > { %v13769_v33 = vpop.eup %13768  ;;  %6129 = vadd.xlane.f32.xlu1 %v6128_v30 }
0x171f   : > { %v6125_v17 = vsel %vm3593_vm7, %v13769_v33, 0.0 }
0x1720   : > { %v13771_v13 = vpop.eup %13770  ;;  %6126 = vadd.xlane.f32.xlu0 %v6125_v17 }
0x1721   : > { %v6134_v18 = vsel %vm3593_vm7, %v13771_v13, 0.0 }
0x1722   : > { %v13773_v54 = vpop.eup %13772  ;;  %6135 = vadd.xlane.f32.xlu1 %v6134_v18 }
0x1723   : > { %v6131_v40 = vsel %vm3593_vm7, %v13773_v54, 0.0 }
0x1724   : > { %v13775_v9 = vpop.eup %13774  ;;  %6132 = vadd.xlane.f32.xlu0 %v6131_v40 }
0x1725   : > { %v6140_v10 = vsel %vm3593_vm7, %v13775_v9, 0.0 }
0x1726   : > { %v13777_v61 = vpop.eup %13776  ;;  %6141 = vadd.xlane.f32.xlu1 %v6140_v10 }
0x1727   : > { %v6137_v59 = vsel %vm3593_vm7, %v13777_v61, 0.0 }
0x1728   : > { %v13779_v37 = vpop.eup %13778  ;;  %6138 = vadd.xlane.f32.xlu0 %v6137_v59 }
0x1729   : > { %v6146_v34 = vsel %vm3593_vm7, %v13779_v37, 0.0 }
0x172a   : > { %v13781_v22 = vpop.eup %13780  ;;  %6147 = vadd.xlane.f32.xlu1 %v6146_v34  ;;  %v3062_v34 = vld [vmem:[#allocation19 + $0xd0] sm:$0xff] }
0x172b   : > { %v6143_v21 = vsel %vm3593_vm7, %v13781_v22, 0.0 }
0x172c   : > { %6144 = vadd.xlane.f32.xlu0 %v6143_v21 }
0x17a7   : > { %v6130_v63 = vpop.xlane.xlu1 %6129 }
0x17a8   : > { %13782 = vrcp.f32 %v6130_v63 }
0x17a9   : > { %v6127_v46 = vpop.xlane.xlu0 %6126 }
0x17aa   : > { %13784 = vrcp.f32 %v6127_v46  ;;  %v3061_v46 = vld [vmem:[#allocation19 + $0xc8] sm:$0xff] }
0x17ab   : > { %v6136_v3 = vpop.xlane.xlu1 %6135 }
0x17ac   : > { %13786 = vrcp.f32 %v6136_v3 }
0x17ad   : > { %v6133_v11 = vpop.xlane.xlu0 %6132 }
0x17ae   : > { %13788 = vrcp.f32 %v6133_v11 }
0x17af   : > { %v6142_v32 = vpop.xlane.xlu1 %6141 }
0x17b0   : > { %13790 = vrcp.f32 %v6142_v32  ;;  %v3060_v32 = vld [vmem:[#allocation19 + $0xc0] sm:$0xff] }
0x17b1   : > { %v6139_v6 = vpop.xlane.xlu0 %6138 }
0x17b2   : > { %13792 = vrcp.f32 %v6139_v6  ;;  %v3059_v6 = vld [vmem:[#allocation19 + $0xb8] sm:$0xff] }
0x17b3   : > { %v6148_v19 = vpop.xlane.xlu1 %6147 }
0x17b4   : > { %13794 = vrcp.f32 %v6148_v19 }
0x17b5   : > { %v6145_v30 = vpop.xlane.xlu0 %6144  ;;  %v13783_v17 = vpop.eup %13782 }
0x17b6   : > { %13796 = vrcp.f32 %v6145_v30  ;;  %v6158_v10 = vmul.f32 %v13783_v17, %v13767_v43 }
0x17b7   : > { %v13785_v18 = vpop.eup %13784 }
0x17b8   : > { %v6157_v40 = vmul.f32 %v13785_v18, %v13769_v33 }
0x17b9   : > { %v13787_v59 = vpop.eup %13786 }
0x17ba   : > { %12705 = vmatprep.mubr.msk.f32.mxu1 %vm3593_vm7, %v6157_v40  ;;  %v6160_v3 = vmul.f32 %v13787_v59, %v13771_v13  ;;  %v3058_v13 = vld [vmem:[#allocation19 + $0xb0] sm:$0xff] }
0x17bb   : > { %v13789_v21 = vpop.eup %13788  ;;  %12706 = vmatmul.mubr.msk.f32.vlgmr.msra.gmra.mxu1 %vm3593_vm7, %v6158_v10  ;;  %v2990_v10 = vld [vmem:[#allocation16 + $0x90] sm:$0xff] }
0x17bc   : > { %v6159_v63 = vmul.f32 %v13789_v21, %v13773_v54  ;;  %12718 = vmatpush3.msk.msra.mxu1 %vm2083_vm6, %v3063_v2 }
0x17bd   : > { %12719 = vmatprep.subr.mxu1 %v3062_v34  ;;  %v13791_v11 = vpop.eup %13790 }
0x17be   : > { %12708 = vmatprep.mubr.msk.f32.mxu1 %vm3593_vm7, %v6159_v63  ;;  %12720 = vmatpush3.msra.mxu1 %v3062_v34  ;;  %v6162_v19 = vmul.f32 %v13791_v11, %v13775_v9  ;;  %v3057_v9 = vld [vmem:[#allocation19 + $0xa8] sm:$0xff]  ;;  %v2988_v34 = vld [vmem:[#allocation16 + $0x80] sm:$0xff]  ;;  %v6539_v11 = vmul.f32 0.14142136, %v15769_v57 }
0x17bf   : > { %v13793_v33 = vpop.eup %13792  ;;  %12709 = vmatmul.mubr.msk.f32.gmra.mxu1 %vm3593_vm7, %v6160_v3  ;;  %12721 = vmatprep.subr.mxu1 %v3061_v46 }
0x17c0   : > { %v6161_v43 = vmul.f32 %v13793_v33, %v13777_v61  ;;  %12722 = vmatpush3.msra.mxu1 %v3061_v46  ;;  %v2991_v61 = vld [vmem:[#allocation16 + $0x98] sm:$0xff] }
0x17c1   : > { %12723 = vmatprep.subr.mxu1 %v3060_v32  ;;  %v13795_v54 = vpop.eup %13794 }
0x17c2   : > { %12711 = vmatprep.mubr.msk.f32.mxu1 %vm3593_vm7, %v6161_v43  ;;  %12724 = vmatpush3.msra.mxu1 %v3060_v32  ;;  %v6164_v17 = vmul.f32 %v13795_v54, %v13779_v37  ;;  %v2989_v37 = vld [vmem:[#allocation16 + $0x88] sm:$0xff] }
0x17c3   : > { %v13797_v2 = vpop.eup %13796  ;;  %12712 = vmatmul.mubr.msk.f32.gmra.mxu1 %vm3593_vm7, %v6162_v19  ;;  %12725 = vmatprep.subr.mxu1 %v3059_v6 }
0x17c4   : > { %v6163_v30 = vmul.f32 %v13797_v2, %v13781_v22  ;;  %12726 = vmatpush3.msra.mxu1 %v3059_v6 }
0x17c5   : > { %12727 = vmatprep.subr.mxu1 %v3058_v13 }
0x17c6   : > { %12714 = vmatprep.mubr.msk.f32.mxu1 %vm3593_vm7, %v6163_v30  ;;  %12728 = vmatpush3.msra.mxu1 %v3058_v13 }
0x17c7   : > { %12715 = vmatmul.mubr.msk.f32.gmra.mxu1 %vm3593_vm7, %v6164_v17  ;;  %12729 = vmatprep.subr.mxu1 %v3057_v9 }
0x17c8   : > { %12730 = vmatpush3.msra.mxu1 %v3057_v9 }
0x17c9   : > { %12763 = vmatprep.subr.mxu1 %v2991_v61 }
0x187b   : > { %v12707_v18 = vpop.f32.mrf.mxu1 }
0x187d   : > { %v6255_v40 = vpop.f32.mrf.mxu1 }
0x187e   : > { %12731 = vmatprep.mubr.msk.f32.mxu1 %vm1702_vm4, %v6255_v40 }
0x187f   : > { %v12710_v59 = vpop.f32.mrf.mxu1  ;;  %12732 = vmatmul.mubr.msk.f32.vlgmr.msra.gmra.mxu1 %vm1702_vm4, %v12707_v18 }
0x1880   : > { %12764 = vmatpush3.msra.mxu1 %v2991_v61 }
0x1881   : > { %v6265_v22 = vpop.f32.mrf.mxu1  ;;  %12765 = vmatprep.subr.mxu1 %v2990_v10 }
0x1882   : > { %12734 = vmatprep.mubr.msk.f32.mxu1 %vm1702_vm4, %v6265_v22  ;;  %12766 = vmatpush3.msra.mxu1 %v2990_v10  ;;  %v6541_v22 = vmul.f32 0.14142136, %v15773_v14  ;;  %v6544_v14 = vmul.f32 0.14142136, %v15775_v4  ;;  %v3025_v4 = vld [vmem:[#allocation18 + $0xa8] sm:$0xff] }
0x1883   : > { %v12713_v21 = vpop.f32.mrf.mxu1  ;;  %12735 = vmatmul.mubr.msk.f32.gmra.mxu1 %vm1702_vm4, %v12710_v59  ;;  %12767 = vmatprep.subr.mxu1 %v2989_v37 }
0x1884   : > { %12768 = vmatpush3.msra.mxu1 %v2989_v37 }
0x1885   : > { %v6275_v63 = vpop.f32.mrf.mxu1  ;;  %12769 = vmatprep.subr.mxu1 %v2988_v34 }
0x1886   : > { %12737 = vmatprep.mubr.msk.f32.mxu1 %vm1702_vm4, %v6275_v63  ;;  %12770 = vmatpush3.msra.mxu1 %v2988_v34  ;;  %v2962_v34 = vld [vmem:[#allocation15 + $0xb0] sm:$0xff]  ;;  %v6542_v63 = vmul.f32 0.14142136, %v15771_v29  ;;  %v6546_v29 = vmul.f32 0.14142136, %v15779_v52 }
0x1887   : > { %v12716_v46 = vpop.f32.mrf.mxu1  ;;  %12738 = vmatmul.mubr.msk.f32.gmra.mxu1 %vm1702_vm4, %v12713_v21  ;;  %v2961_v21 = vld [vmem:[#allocation15 + $0xa8] sm:$0xff] }
0x1889   : > { %v6285_v3 = vpop.f32.mrf.mxu1 }
0x188a   : > { %12740 = vmatprep.mubr.msk.f32.mxu1 %vm1702_vm4, %v6285_v3  ;;  %v2960_v3 = vld [vmem:[#allocation15 + $0xa0] sm:$0xff] }
0x188b   : > { %12741 = vmatmul.mubr.msk.f32.gmra.mxu1 %vm1702_vm4, %v12716_v46  ;;  %v6543_v46 = vmul.f32 0.14142136, %v15777_v42  ;;  %v3026_v42 = vld [vmem:[#allocation18 + $0xb0] sm:$0xff] }
0x188c   : > { %12771 = vmatprep.mubr.msk.f32.mxu1 %vm1236_vm0, %v15171_v31 }
0x188f   : > { %12772 = vmatmul.mubr.msk.f32.vlgmr.msra.gmra.mxu1 %vm1236_vm0, %v15173_v12 }
0x1890   : > { %12774 = vmatprep.mubr.msk.f32.mxu1 %vm1236_vm0, %v15185_v41 }
0x1893   : > { %12775 = vmatmul.mubr.msk.f32.gmra.mxu1 %vm1236_vm0, %v15187_v38 }
0x1894   : > { %12777 = vmatprep.mubr.msk.f32.mxu1 %vm1236_vm0, %v15199_v48 }
0x1897   : > { %12778 = vmatmul.mubr.msk.f32.gmra.mxu1 %vm1236_vm0, %v15202_v49 }
0x1898   : > { %12780 = vmatprep.mubr.msk.f32.mxu1 %vm1236_vm0, %v15212_v25 }
0x189b   : > { %12781 = vmatmul.mubr.msk.f32.gmra.mxu1 %vm1236_vm0, %v15214_v27 }
0x189c   : > { %12819 = vmatprep.mubr.msk.f32.mxu1 %vm1702_vm4, %v6539_v11  ;;  %v6545_v11 = vmul.f32 0.14142136, %v15781_v35  ;;  %v3024_v35 = vld [vmem:[#allocation18 + $0xa0] sm:$0xff] }
0x193f   : > { %v12733_v32 = vpop.f32.mrf.mxu1 }
0x1940   : > { %v15832_v33 = vadd.f32 %v12733_v32, %v15663_v45 }
0x1941   : > { %v15834_v43 = vpop.f32.mrf.mxu1 }
0x1943   : > { %v12736_v6 = vpop.f32.mrf.mxu1 }
0x1944   : > { %v15837_v19 = vadd.f32 %v12736_v6, %v15669_v47 }
0x1945   : > { %v15839_v54 = vpop.f32.mrf.mxu1 }
0x1947   : > { %v12739_v13 = vpop.f32.mrf.mxu1 }
0x1948   : > { %v15842_v57 = vadd.f32 %v12739_v13, %v15675_v44  ;;  %v2963_v44 = vld [vmem:[#allocation15 + $0xb8] sm:$0xff] }
0x1949   : > { %v15844_v2 = vpop.f32.mrf.mxu1 }
0x194b   : > { %v12742_v30 = vpop.f32.mrf.mxu1 }
0x194c   : > { %v15847_v17 = vadd.f32 %v12742_v30, %v15681_v23  ;;  %v6540_v23 = vmul.f32 0.14142136, %v15767_v7  ;;  %v3027_v7 = vld [vmem:[#allocation18 + $0xb8] sm:$0xff] }
0x194d   : > { %v15849_v45 = vpop.f32.mrf.mxu1 }
0x194f   : > { %v12773_v9 = vpop.f32.mrf.mxu1 }
0x1951   : > { %v6613_v61 = vpop.f32.mrf.mxu1 }
0x1953   : > { %v12776_v18 = vpop.f32.mrf.mxu1 }
0x1955   : > { %v6623_v40 = vpop.f32.mrf.mxu1 }
0x1957   : > { %v12779_v47 = vpop.f32.mrf.mxu1 }
0x1959   : > { %v6633_v10 = vpop.f32.mrf.mxu1 }
0x195b   : > { %v12782_v59 = vpop.f32.mrf.mxu1 }
0x195c   : > { %12803 = vmatprep.subr.msk.mxu1 %vm1702_vm4, %v12782_v59 }
0x195d   : > { %v6643_v37 = vpop.f32.mrf.mxu1  ;;  %12804 = vmatpush3.xpose.msk.msra.mxu1 %vm1702_vm4, %v12782_v59 }
0x195e   : > { %12805 = vmatprep.subr.msk.mxu1 %vm1702_vm4, %v6643_v37 }
0x1961   : > { %12806 = vmatpush3.xpose.msk.msra.mxu1 %vm1702_vm4, %v6643_v37 }
0x1962   : > { %12807 = vmatprep.subr.msk.mxu1 %vm1702_vm4, %v12779_v47 }
0x1965   : > { %12808 = vmatpush3.xpose.msk.msra.mxu1 %vm1702_vm4, %v12779_v47 }
0x1966   : > { %12809 = vmatprep.subr.msk.mxu1 %vm1702_vm4, %v6633_v10 }
0x1969   : > { %12810 = vmatpush3.xpose.msk.msra.mxu1 %vm1702_vm4, %v6633_v10 }
0x196a   : > { %12811 = vmatprep.subr.msk.mxu1 %vm1702_vm4, %v12776_v18 }
0x196d   : > { %12812 = vmatpush3.xpose.msk.msra.mxu1 %vm1702_vm4, %v12776_v18 }
0x196e   : > { %12813 = vmatprep.subr.msk.mxu1 %vm1702_vm4, %v6623_v40 }
0x1971   : > { %12814 = vmatpush3.xpose.msk.msra.mxu1 %vm1702_vm4, %v6623_v40 }
0x1972   : > { %12815 = vmatprep.subr.msk.mxu1 %vm1702_vm4, %v12773_v9 }
0x1975   : > { %12816 = vmatpush3.xpose.msk.msra.mxu1 %vm1702_vm4, %v12773_v9 }
0x1976   : > { %12817 = vmatprep.subr.msk.mxu1 %vm1702_vm4, %v6613_v61 }
0x1979   : > { %12818 = vmatpush3.xpose.msk.msra.mxu1 %vm1702_vm4, %v6613_v61 }
0x197a   : > { %12885 = vmatprep.subr.mxu1 %v2963_v44 }
0x197c   : > { %12820 = vmatmul.mubr.msk.f32.vlgmr.msra.gmra.mxu1 %vm1702_vm4, %v6540_v23 }
0x197d   : > { %12822 = vmatprep.mubr.msk.f32.mxu1 %vm1702_vm4, %v6541_v22  ;;  %12886 = vmatpush3.msra.mxu1 %v2963_v44 }
0x197e   : > { %12887 = vmatprep.subr.mxu1 %v2962_v34 }
0x197f   : > { %12888 = vmatpush3.msra.mxu1 %v2962_v34 }
0x1980   : > { %12823 = vmatmul.mubr.msk.f32.gmra.mxu1 %vm1702_vm4, %v6542_v63  ;;  %12889 = vmatprep.subr.mxu1 %v2961_v21 }
0x1981   : > { %12825 = vmatprep.mubr.msk.f32.mxu1 %vm1702_vm4, %v6543_v46  ;;  %12890 = vmatpush3.msra.mxu1 %v2961_v21 }
0x1982   : > { %12891 = vmatprep.subr.mxu1 %v2960_v3 }
0x1983   : > { %12892 = vmatpush3.msra.mxu1 %v2960_v3 }
0x1984   : > { %12826 = vmatmul.mubr.msk.f32.gmra.mxu1 %vm1702_vm4, %v6544_v14  ;;  %12925 = vmatprep.subr.mxu1 %v3027_v7 }
0x1985   : > { %12828 = vmatprep.mubr.msk.f32.mxu1 %vm1702_vm4, %v6545_v11 }
0x1988   : > { %12829 = vmatmul.mubr.msk.f32.gmra.mxu1 %vm1702_vm4, %v6546_v29 }
0x1989   : > { %12893 = vmatprep.mubr.msk.f32.mxu1 %vm1236_vm0, %v15171_v31 }
0x198c   : > { %12894 = vmatmul.mubr.msk.f32.vlgmr.msra.gmra.mxu1 %vm1236_vm0, %v15173_v12 }
0x198d   : > { %12896 = vmatprep.mubr.msk.f32.mxu1 %vm1236_vm0, %v15185_v41  ;;  %12926 = vmatpush3.msra.mxu1 %v3027_v7 }
0x198e   : > { %12927 = vmatprep.subr.mxu1 %v3026_v42 }
0x198f   : > { %12928 = vmatpush3.msra.mxu1 %v3026_v42 }
0x1990   : > { %12897 = vmatmul.mubr.msk.f32.gmra.mxu1 %vm1236_vm0, %v15187_v38  ;;  %12929 = vmatprep.subr.mxu1 %v3025_v4 }
0x1991   : > { %12899 = vmatprep.mubr.msk.f32.mxu1 %vm1236_vm0, %v15199_v48  ;;  %12930 = vmatpush3.msra.mxu1 %v3025_v4 }
0x1992   : > { %12931 = vmatprep.subr.mxu1 %v3024_v35 }
0x1993   : > { %12932 = vmatpush3.msra.mxu1 %v3024_v35 }
0x1994   : > { %12900 = vmatmul.mubr.msk.f32.gmra.mxu1 %vm1236_vm0, %v15202_v49 }
0x1995   : > { %12902 = vmatprep.mubr.msk.f32.mxu1 %vm1236_vm0, %v15212_v25 }
0x1998   : > { %12903 = vmatmul.mubr.msk.f32.gmra.mxu1 %vm1236_vm0, %v15214_v27 }
0x1999   : > { %12933 = vmatprep.mubr.msk.f32.mxu1 %vm1236_vm0, %v15171_v31 }
0x199c   : > { %12934 = vmatmul.mubr.msk.f32.vlgmr.msra.gmra.mxu1 %vm1236_vm0, %v15173_v12 }
0x199d   : > { %12936 = vmatprep.mubr.msk.f32.mxu1 %vm1236_vm0, %v15185_v41 }
0x19a0   : > { %12937 = vmatmul.mubr.msk.f32.gmra.mxu1 %vm1236_vm0, %v15187_v38 }
0x19a1   : > { %12939 = vmatprep.mubr.msk.f32.mxu1 %vm1236_vm0, %v15199_v48 }
0x19a4   : > { %12940 = vmatmul.mubr.msk.f32.gmra.mxu1 %vm1236_vm0, %v15202_v49 }
0x19a5   : > { %12942 = vmatprep.mubr.msk.f32.mxu1 %vm1236_vm0, %v15212_v25 }
0x19a8   : > { %12943 = vmatmul.mubr.msk.f32.gmra.mxu1 %vm1236_vm0, %v15214_v27 }
0x1a3c   : > { %v12821_v52 = vpop.f32.mrf.mxu1 }
0x1a3d   : > { %v6913_v32 = vsel %vm3593_vm7, %v12821_v52, -inf }
0x1a3e   : > { %6914 = vmax.xlane.f32.xlu1 %v6913_v32  ;;  %v6871_v6 = vpop.f32.mrf.mxu1 }
0x1a3f   : > { %v6910_v13 = vsel %vm3593_vm7, %v6871_v6, -inf }
0x1a40   : > { %6911 = vmax.xlane.f32.xlu0 %v6910_v13  ;;  %v12824_v30 = vpop.f32.mrf.mxu1 }
0x1a41   : > { %v6919_v9 = vsel %vm3593_vm7, %v12824_v30, -inf }
0x1a42   : > { %6920 = vmax.xlane.f32.xlu1 %v6919_v9  ;;  %v6881_v61 = vpop.f32.mrf.mxu1 }
0x1a43   : > { %v6916_v18 = vsel %vm3593_vm7, %v6881_v61, -inf }
0x1a44   : > { %6917 = vmax.xlane.f32.xlu0 %v6916_v18  ;;  %v15917_v40 = vpop.f32.mrf.mxu1 }
0x1a45   : > { %v6925_v47 = vsel %vm3593_vm7, %v15917_v40, -inf }
0x1a46   : > { %6926 = vmax.xlane.f32.xlu1 %v6925_v47  ;;  %v15921_v10 = vpop.f32.mrf.mxu1 }
0x1a47   : > { %v6922_v59 = vsel %vm3593_vm7, %v15921_v10, -inf }
0x1a48   : > { %6923 = vmax.xlane.f32.xlu0 %v6922_v59  ;;  %v15925_v37 = vpop.f32.mrf.mxu1 }
0x1a49   : > { %v6931_v44 = vsel %vm3593_vm7, %v15925_v37, -inf }
0x1a4a   : > { %6932 = vmax.xlane.f32.xlu1 %v6931_v44  ;;  %v15929_v23 = vpop.f32.mrf.mxu1 }
0x1a4b   : > { %v6928_v22 = vsel %vm3593_vm7, %v15929_v23, -inf }
0x1a4c   : > { %v15933_v34 = vpop.f32.mrf.mxu1  ;;  %6929 = vmax.xlane.f32.xlu0 %v6928_v22 }
0x1a4e   : > { %v15935_v21 = vpop.f32.mrf.mxu1 }
0x1a50   : > { %v15937_v63 = vpop.f32.mrf.mxu1 }
0x1a52   : > { %v15939_v46 = vpop.f32.mrf.mxu1 }
0x1a54   : > { %v15941_v3 = vpop.f32.mrf.mxu1 }
0x1a56   : > { %v15943_v7 = vpop.f32.mrf.mxu1 }
0x1a58   : > { %v15945_v14 = vpop.f32.mrf.mxu1 }
0x1a5a   : > { %v15947_v11 = vpop.f32.mrf.mxu1 }
0x1a5c   : > { %v12935_v29 = vpop.f32.mrf.mxu1 }
0x1a5e   : > { %v7551_v42 = vpop.f32.mrf.mxu1 }
0x1a60   : > { %v12938_v4 = vpop.f32.mrf.mxu1 }
0x1a62   : > { %v7561_v35 = vpop.f32.mrf.mxu1 }
0x1a64   : > { %v12941_v32 = vpop.f32.mrf.mxu1 }
0x1a66   : > { %v7571_v13 = vpop.f32.mrf.mxu1 }
0x1a68   : > { %v12944_v9 = vpop.f32.mrf.mxu1 }
0x1a69   : > { %12973 = vmatprep.subr.mxu1 %v12944_v9 }
0x1a6a   : > { %v7581_v18 = vpop.f32.mrf.mxu1  ;;  %12974 = vmatpush3.msra.mxu1 %v12944_v9 }
0x1a6b   : > { %12975 = vmatprep.subr.mxu1 %v7581_v18 }
0x1a6c   : > { %12976 = vmatpush3.msra.mxu1 %v7581_v18 }
0x1a6d   : > { %12977 = vmatprep.subr.mxu1 %v12941_v32 }
0x1a6e   : > { %12978 = vmatpush3.msra.mxu1 %v12941_v32 }
0x1a6f   : > { %12979 = vmatprep.subr.mxu1 %v7571_v13 }
0x1a70   : > { %12980 = vmatpush3.msra.mxu1 %v7571_v13 }
0x1a71   : > { %12981 = vmatprep.subr.mxu1 %v12938_v4 }
0x1a72   : > { %12982 = vmatpush3.msra.mxu1 %v12938_v4 }
0x1a73   : > { %12983 = vmatprep.subr.mxu1 %v7561_v35 }
0x1a74   : > { %12984 = vmatpush3.msra.mxu1 %v7561_v35 }
0x1a75   : > { %12985 = vmatprep.subr.mxu1 %v12935_v29 }
0x1a76   : > { %12986 = vmatpush3.msra.mxu1 %v12935_v29 }
0x1a77   : > { %12987 = vmatprep.subr.mxu1 %v7551_v42 }
0x1a78   : > { %12988 = vmatpush3.msra.mxu1 %v7551_v42 }
0x1ac7   : > { %v6915_v47 = vpop.xlane.xlu1 %6914 }
0x1ac8   : > { %v6935_v59 = vsub.f32 %v12821_v52, %v6915_v47 }
0x1ac9   : > { %v6912_v44 = vpop.xlane.xlu0 %6911 }
0x1aca   : > { %v6944_v22 = vmul.f32 1.442695, %v6935_v59  ;;  %v6934_v24 = vsub.f32 %v6871_v6, %v6912_v44 }
0x1acb   : > { %v6921_v9 = vpop.xlane.xlu1 %6920 }
0x1acc   : > { %13798 = vpow2.f32 %v6944_v22  ;;  %v6942_v18 = vmul.f32 1.442695, %v6934_v24  ;;  %v6937_v51 = vsub.f32 %v12824_v30, %v6921_v9 }
0x1acd   : > { %v6918_v32 = vpop.xlane.xlu0 %6917 }
0x1ace   : > { %13800 = vpow2.f32 %v6942_v18  ;;  %v6948_v13 = vmul.f32 1.442695, %v6937_v51  ;;  %v6936_v1 = vsub.f32 %v6881_v61, %v6918_v32 }
0x1acf   : > { %v6927_v4 = vpop.xlane.xlu1 %6926 }
0x1ad0   : > { %13802 = vpow2.f32 %v6948_v13  ;;  %v6946_v35 = vmul.f32 1.442695, %v6936_v1  ;;  %v6939_v29 = vsub.f32 %v15917_v40, %v6927_v4 }
0x1ad1   : > { %v6924_v15 = vpop.xlane.xlu0 %6923 }
0x1ad2   : > { %13804 = vpow2.f32 %v6946_v35  ;;  %v6952_v42 = vmul.f32 1.442695, %v6939_v29  ;;  %v6938_v52 = vsub.f32 %v15921_v10, %v6924_v15 }
0x1ad3   : > { %v6933_v47 = vpop.xlane.xlu1 %6932 }
0x1ad4   : > { %13806 = vpow2.f32 %v6952_v42  ;;  %v6950_v6 = vmul.f32 1.442695, %v6938_v52  ;;  %v6941_v24 = vsub.f32 %v15925_v37, %v6933_v47  ;;  %v3070_v52 = vld [vmem:[#allocation19 + $0x110] sm:$0x3] }
0x1ad5   : > { %v6930_v30 = vpop.xlane.xlu0 %6929  ;;  %12859 = vmatprep.subr.msk.mxu0 %vm2083_vm6, %v3070_v52 }
0x1ad6   : > { %13808 = vpow2.f32 %v6950_v6  ;;  %v6956_v59 = vmul.f32 1.442695, %v6941_v24  ;;  %v6940_v51 = vsub.f32 %v15929_v23, %v6930_v30 }
0x1ad8   : > { %13810 = vpow2.f32 %v6956_v59  ;;  %v6954_v61 = vmul.f32 1.442695, %v6940_v51 }
0x1ad9   : > { %v13799_v1 = vpop.eup %13798 }
0x1ada   : > { %13812 = vpow2.f32 %v6954_v61  ;;  %v6961_v40 = vsel %vm3593_vm7, %v13799_v1, 0.0 }
0x1adb   : > { %v13801_v44 = vpop.eup %13800  ;;  %6962 = vadd.xlane.f32.xlu1 %v6961_v40 }
0x1adc   : > { %v6958_v15 = vsel %vm3593_vm7, %v13801_v44, 0.0 }
0x1add   : > { %v13803_v10 = vpop.eup %13802  ;;  %6959 = vadd.xlane.f32.xlu0 %v6958_v15 }
0x1ade   : > { %v6967_v22 = vsel %vm3593_vm7, %v13803_v10, 0.0 }
0x1adf   : > { %v13805_v37 = vpop.eup %13804  ;;  %6968 = vadd.xlane.f32.xlu1 %v6967_v22 }
0x1ae0   : > { %v6964_v9 = vsel %vm3593_vm7, %v13805_v37, 0.0 }
0x1ae1   : > { %v13807_v18 = vpop.eup %13806  ;;  %6965 = vadd.xlane.f32.xlu0 %v6964_v9 }
0x1ae2   : > { %v6973_v23 = vsel %vm3593_vm7, %v13807_v18, 0.0 }
0x1ae3   : > { %v13809_v32 = vpop.eup %13808  ;;  %6974 = vadd.xlane.f32.xlu1 %v6973_v23 }
0x1ae4   : > { %v6970_v13 = vsel %vm3593_vm7, %v13809_v32, 0.0 }
0x1ae5   : > { %v13811_v4 = vpop.eup %13810  ;;  %6971 = vadd.xlane.f32.xlu0 %v6970_v13 }
0x1ae6   : > { %v6979_v35 = vsel %vm3593_vm7, %v13811_v4, 0.0 }
0x1ae7   : > { %v13813_v29 = vpop.eup %13812  ;;  %6980 = vadd.xlane.f32.xlu1 %v6979_v35  ;;  %v3069_v35 = vld [vmem:[#allocation19 + $0x108] sm:$0xff] }
0x1ae8   : > { %v6976_v42 = vsel %vm3593_vm7, %v13813_v29, 0.0 }
0x1ae9   : > { %6977 = vadd.xlane.f32.xlu0 %v6976_v42 }
0x1b64   : > { %v6963_v47 = vpop.xlane.xlu1 %6962 }
0x1b65   : > { %13814 = vrcp.f32 %v6963_v47 }
0x1b66   : > { %v6960_v6 = vpop.xlane.xlu0 %6959 }
0x1b67   : > { %13816 = vrcp.f32 %v6960_v6  ;;  %v3068_v6 = vld [vmem:[#allocation19 + $0x100] sm:$0xff] }
0x1b68   : > { %v6969_v24 = vpop.xlane.xlu1 %6968 }
0x1b69   : > { %13818 = vrcp.f32 %v6969_v24 }
0x1b6a   : > { %v6966_v30 = vpop.xlane.xlu0 %6965 }
0x1b6b   : > { %13820 = vrcp.f32 %v6966_v30 }
0x1b6c   : > { %v6975_v59 = vpop.xlane.xlu1 %6974 }
0x1b6d   : > { %13822 = vrcp.f32 %v6975_v59  ;;  %v3067_v59 = vld [vmem:[#allocation19 + $0xf8] sm:$0xff] }
0x1b6e   : > { %v6972_v51 = vpop.xlane.xlu0 %6971 }
0x1b6f   : > { %13824 = vrcp.f32 %v6972_v51  ;;  %v3066_v51 = vld [vmem:[#allocation19 + $0xf0] sm:$0xff] }
0x1b70   : > { %v6981_v61 = vpop.xlane.xlu1 %6980 }
0x1b71   : > { %13826 = vrcp.f32 %v6981_v61 }
0x1b72   : > { %v6978_v40 = vpop.xlane.xlu0 %6977  ;;  %v13815_v15 = vpop.eup %13814 }
0x1b73   : > { %13828 = vrcp.f32 %v6978_v40  ;;  %v6991_v23 = vmul.f32 %v13815_v15, %v13799_v1 }
0x1b74   : > { %v13817_v22 = vpop.eup %13816 }
0x1b75   : > { %v6990_v9 = vmul.f32 %v13817_v22, %v13801_v44 }
0x1b76   : > { %v13819_v13 = vpop.eup %13818 }
0x1b77   : > { %12847 = vmatprep.mubr.msk.f32.mxu0 %vm3593_vm7, %v6990_v9  ;;  %v6993_v24 = vmul.f32 %v13819_v13, %v13803_v10  ;;  %v3065_v10 = vld [vmem:[#allocation19 + $0xe8] sm:$0xff] }
0x1b78   : > { %v13821_v42 = vpop.eup %13820  ;;  %12848 = vmatmul.mubr.msk.f32.vlgmr.msra.gmra.mxu0 %vm3593_vm7, %v6991_v23  ;;  %v2994_v23 = vld [vmem:[#allocation16 + $0xb0] sm:$0xff] }
0x1b79   : > { %v6992_v47 = vmul.f32 %v13821_v42, %v13805_v37  ;;  %12860 = vmatpush3.msk.msra.mxu0 %vm2083_vm6, %v3070_v52 }
0x1b7a   : > { %12861 = vmatprep.subr.mxu0 %v3069_v35  ;;  %v13823_v30 = vpop.eup %13822 }
0x1b7b   : > { %12850 = vmatprep.mubr.msk.f32.mxu0 %vm3593_vm7, %v6992_v47  ;;  %12862 = vmatpush3.msra.mxu0 %v3069_v35  ;;  %v6995_v61 = vmul.f32 %v13823_v30, %v13807_v18  ;;  %v3064_v18 = vld [vmem:[#allocation19 + $0xe0] sm:$0xff]  ;;  %v7372_v30 = vmul.f32 0.14142136, %v15935_v21 }
0x1b7c   : > { %v13825_v44 = vpop.eup %13824  ;;  %12851 = vmatmul.mubr.msk.f32.gmra.mxu0 %vm3593_vm7, %v6993_v24  ;;  %12863 = vmatprep.subr.mxu0 %v3068_v6  ;;  %v2992_v35 = vld [vmem:[#allocation16 + $0xa0] sm:$0xff] }
0x1b7d   : > { %v6994_v1 = vmul.f32 %v13825_v44, %v13809_v32  ;;  %12864 = vmatpush3.msra.mxu0 %v3068_v6  ;;  %v2995_v32 = vld [vmem:[#allocation16 + $0xb8] sm:$0xff] }
0x1b7e   : > { %12865 = vmatprep.subr.mxu0 %v3067_v59  ;;  %v13827_v37 = vpop.eup %13826 }
0x1b7f   : > { %12853 = vmatprep.mubr.msk.f32.mxu0 %vm3593_vm7, %v6994_v1  ;;  %12866 = vmatpush3.msra.mxu0 %v3067_v59  ;;  %v6997_v15 = vmul.f32 %v13827_v37, %v13811_v4  ;;  %v2993_v4 = vld [vmem:[#allocation16 + $0xa8] sm:$0xff]  ;;  %v4730_v59 = vadd.f32 %v15429_v56, %v15523_v20  ;;  %v4750_v56 = vadd.f32 %v15437_v60, %v15531_v26 }
0x1b80   : > { %v13829_v52 = vpop.eup %13828  ;;  %12854 = vmatmul.mubr.msk.f32.gmra.mxu0 %vm3593_vm7, %v6995_v61  ;;  %12867 = vmatprep.subr.mxu0 %v3066_v51 }
0x1b81   : > { %v6996_v40 = vmul.f32 %v13829_v52, %v13813_v29  ;;  %12868 = vmatpush3.msra.mxu0 %v3066_v51  ;;  %v5593_v44 = vadd.f32 %v15665_v16, %v4730_v59  ;;  %v4740_v51 = vadd.f32 %v15433_v5, %v15527_v0  ;;  %v5597_v0 = vadd.f32 %v15677_v53, %v4750_v56 }
0x1b82   : > { %12869 = vmatprep.subr.mxu0 %v3065_v10 }
0x1b83   : > { %12856 = vmatprep.mubr.msk.f32.mxu0 %vm3593_vm7, %v6996_v40  ;;  %12870 = vmatpush3.msra.mxu0 %v3065_v10  ;;  %v6426_v61 = vadd.f32 %v15834_v43, %v5593_v44  ;;  %v5595_v10 = vadd.f32 %v15671_v50, %v4740_v51  ;;  %v4760_v50 = vadd.f32 %v15441_v62, %v15535_v58 }
0x1b84   : > { %12857 = vmatmul.mubr.msk.f32.gmra.mxu0 %vm3593_vm7, %v6997_v15  ;;  %12871 = vmatprep.subr.mxu0 %v3064_v18  ;;  %v6430_v15 = vadd.f32 %v15844_v2, %v5597_v0 }
0x1b85   : > { %12872 = vmatpush3.msra.mxu0 %v3064_v18  ;;  %v6428_v20 = vadd.f32 %v15839_v54, %v5595_v10  ;;  %v5599_v26 = vadd.f32 %v15683_v55, %v4760_v50 }
0x1b86   : > { %12905 = vmatprep.subr.mxu0 %v2995_v32 }
0x1c38   : > { %v12849_v22 = vpop.f32.mrf.mxu0 }
0x1c3a   : > { %v7088_v9 = vpop.f32.mrf.mxu0 }
0x1c3b   : > { %12873 = vmatprep.mubr.msk.f32.mxu0 %vm1702_vm4, %v7088_v9 }
0x1c3c   : > { %v12852_v13 = vpop.f32.mrf.mxu0  ;;  %12874 = vmatmul.mubr.msk.f32.vlgmr.msra.gmra.mxu0 %vm1702_vm4, %v12849_v22 }
0x1c3d   : > { %12906 = vmatpush3.msra.mxu0 %v2995_v32  ;;  %v6432_v32 = vadd.f32 %v15849_v45, %v5599_v26  ;;  %v7373_v45 = vmul.f32 0.14142136, %v15933_v34  ;;  %v3031_v34 = vld [vmem:[#allocation18 + $0xd8] sm:$0xff] }
0x1c3e   : > { %v7098_v29 = vpop.f32.mrf.mxu0  ;;  %12907 = vmatprep.subr.mxu0 %v2994_v23 }
0x1c3f   : > { %12876 = vmatprep.mubr.msk.f32.mxu0 %vm1702_vm4, %v7098_v29  ;;  %12908 = vmatpush3.msra.mxu0 %v2994_v23  ;;  %v7374_v29 = vmul.f32 0.14142136, %v15939_v46  ;;  %v7377_v46 = vmul.f32 0.14142136, %v15941_v3  ;;  %v3029_v3 = vld [vmem:[#allocation18 + $0xc8] sm:$0xff] }
0x1c40   : > { %v12855_v42 = vpop.f32.mrf.mxu0  ;;  %12877 = vmatmul.mubr.msk.f32.gmra.mxu0 %vm1702_vm4, %v12852_v13  ;;  %12909 = vmatprep.subr.mxu0 %v2993_v4 }
0x1c41   : > { %12910 = vmatpush3.msra.mxu0 %v2993_v4 }
0x1c42   : > { %v7108_v47 = vpop.f32.mrf.mxu0  ;;  %12911 = vmatprep.subr.mxu0 %v2992_v35 }
0x1c43   : > { %12879 = vmatprep.mubr.msk.f32.mxu0 %vm1702_vm4, %v7108_v47  ;;  %12912 = vmatpush3.msra.mxu0 %v2992_v35  ;;  %v2966_v35 = vld [vmem:[#allocation15 + $0xd0] sm:$0xff]  ;;  %v7375_v47 = vmul.f32 0.14142136, %v15937_v63  ;;  %v7379_v63 = vmul.f32 0.14142136, %v15945_v14 }
0x1c44   : > { %v12858_v6 = vpop.f32.mrf.mxu0  ;;  %12880 = vmatmul.mubr.msk.f32.gmra.mxu0 %vm1702_vm4, %v12855_v42  ;;  %v2965_v42 = vld [vmem:[#allocation15 + $0xc8] sm:$0xff] }
0x1c46   : > { %v7118_v24 = vpop.f32.mrf.mxu0 }
0x1c47   : > { %12882 = vmatprep.mubr.msk.f32.mxu0 %vm1702_vm4, %v7118_v24  ;;  %v2964_v24 = vld [vmem:[#allocation15 + $0xc0] sm:$0xff] }
0x1c48   : > { %12883 = vmatmul.mubr.msk.f32.gmra.mxu0 %vm1702_vm4, %v12858_v6  ;;  %v7376_v6 = vmul.f32 0.14142136, %v15943_v7  ;;  %v3030_v7 = vld [vmem:[#allocation18 + $0xd0] sm:$0xff] }
0x1c49   : > { %12913 = vmatprep.mubr.msk.f32.mxu0 %vm1236_vm0, %v15171_v31 }
0x1c4c   : > { %12914 = vmatmul.mubr.msk.f32.vlgmr.msra.gmra.mxu0 %vm1236_vm0, %v15173_v12 }
0x1c4d   : > { %12916 = vmatprep.mubr.msk.f32.mxu0 %vm1236_vm0, %v15185_v41 }
0x1c50   : > { %12917 = vmatmul.mubr.msk.f32.gmra.mxu0 %vm1236_vm0, %v15187_v38 }
0x1c51   : > { %12919 = vmatprep.mubr.msk.f32.mxu0 %vm1236_vm0, %v15199_v48 }
0x1c54   : > { %12920 = vmatmul.mubr.msk.f32.gmra.mxu0 %vm1236_vm0, %v15202_v49 }
0x1c55   : > { %12922 = vmatprep.mubr.msk.f32.mxu0 %vm1236_vm0, %v15212_v25 }
0x1c58   : > { %12923 = vmatmul.mubr.msk.f32.gmra.mxu0 %vm1236_vm0, %v15214_v27 }
0x1c59   : > { %12961 = vmatprep.mubr.msk.f32.mxu0 %vm1702_vm4, %v7372_v30  ;;  %v7378_v30 = vmul.f32 0.14142136, %v15947_v11  ;;  %v3028_v11 = vld [vmem:[#allocation18 + $0xc0] sm:$0xff] }
0x1cfc   : > { %v12875_v1 = vpop.f32.mrf.mxu0 }
0x1cfd   : > { %v16004_v37 = vadd.f32 %v12875_v1, %v15832_v33 }
0x1cfe   : > { %v7220_v21 = vpop.f32.mrf.mxu0 }
0x1cff   : > { %v16007_v52 = vadd.f32 %v7220_v21, %v6426_v61 }
0x1d00   : > { %v12878_v40 = vpop.f32.mrf.mxu0 }
0x1d01   : > { %v16013_v16 = vadd.f32 %v12878_v40, %v15837_v19 }
0x1d02   : > { %v7230_v5 = vpop.f32.mrf.mxu0 }
0x1d03   : > { %v16016_v43 = vadd.f32 %v7230_v5, %v6428_v20 }
0x1d04   : > { %v12881_v33 = vpop.f32.mrf.mxu0 }
0x1d05   : > { %v16022_v18 = vadd.f32 %v12881_v33, %v15842_v57 }
0x1d06   : > { %v7240_v60 = vpop.f32.mrf.mxu0 }
0x1d07   : > { %v16025_v54 = vadd.f32 %v7240_v60, %v6430_v15 }
0x1d08   : > { %v12884_v19 = vpop.f32.mrf.mxu0 }
0x1d09   : > { %v16029_v53 = vadd.f32 %v12884_v19, %v15847_v17  ;;  %v2967_v17 = vld [vmem:[#allocation15 + $0xd8] sm:$0xff] }
0x1d0a   : > { %v7250_v22 = vpop.f32.mrf.mxu0 }
0x1d0b   : > { %v16031_v9 = vadd.f32 %v7250_v22, %v6432_v32 }
0x1d0c   : > { %v12915_v62 = vpop.f32.mrf.mxu0 }
0x1d0e   : > { %v7446_v58 = vpop.f32.mrf.mxu0 }
0x1d10   : > { %v12918_v2 = vpop.f32.mrf.mxu0 }
0x1d12   : > { %v7456_v23 = vpop.f32.mrf.mxu0 }
0x1d14   : > { %v12921_v57 = vpop.f32.mrf.mxu0 }
0x1d16   : > { %v7466_v13 = vpop.f32.mrf.mxu0 }
0x1d18   : > { %v12924_v4 = vpop.f32.mrf.mxu0 }
0x1d19   : > { %12945 = vmatprep.subr.msk.mxu0 %vm1702_vm4, %v12924_v4 }
0x1d1a   : > { %v7476_v55 = vpop.f32.mrf.mxu0  ;;  %12946 = vmatpush3.xpose.msk.msra.mxu0 %vm1702_vm4, %v12924_v4 }
0x1d1b   : > { %12947 = vmatprep.subr.msk.mxu0 %vm1702_vm4, %v7476_v55 }
0x1d1e   : > { %12948 = vmatpush3.xpose.msk.msra.mxu0 %vm1702_vm4, %v7476_v55 }
0x1d1f   : > { %12949 = vmatprep.subr.msk.mxu0 %vm1702_vm4, %v12921_v57 }
0x1d22   : > { %12950 = vmatpush3.xpose.msk.msra.mxu0 %vm1702_vm4, %v12921_v57 }
0x1d23   : > { %12951 = vmatprep.subr.msk.mxu0 %vm1702_vm4, %v7466_v13 }
0x1d26   : > { %12952 = vmatpush3.xpose.msk.msra.mxu0 %vm1702_vm4, %v7466_v13 }
0x1d27   : > { %12953 = vmatprep.subr.msk.mxu0 %vm1702_vm4, %v12918_v2 }
0x1d2a   : > { %12954 = vmatpush3.xpose.msk.msra.mxu0 %vm1702_vm4, %v12918_v2 }
0x1d2b   : > { %12955 = vmatprep.subr.msk.mxu0 %vm1702_vm4, %v7456_v23 }
0x1d2e   : > { %12956 = vmatpush3.xpose.msk.msra.mxu0 %vm1702_vm4, %v7456_v23 }
0x1d2f   : > { %12957 = vmatprep.subr.msk.mxu0 %vm1702_vm4, %v12915_v62 }
0x1d32   : > { %12958 = vmatpush3.xpose.msk.msra.mxu0 %vm1702_vm4, %v12915_v62 }
0x1d33   : > { %12959 = vmatprep.subr.msk.mxu0 %vm1702_vm4, %v7446_v58 }
0x1d36   : > { %12960 = vmatpush3.xpose.msk.msra.mxu0 %vm1702_vm4, %v7446_v58 }
0x1d37   : > { %13027 = vmatprep.subr.mxu0 %v2967_v17 }
0x1d39   : > { %12962 = vmatmul.mubr.msk.f32.vlgmr.msra.gmra.mxu0 %vm1702_vm4, %v7373_v45 }
0x1d3a   : > { %12964 = vmatprep.mubr.msk.f32.mxu0 %vm1702_vm4, %v7374_v29  ;;  %13028 = vmatpush3.msra.mxu0 %v2967_v17 }
0x1d3b   : > { %13029 = vmatprep.subr.mxu0 %v2966_v35 }
0x1d3c   : > { %13030 = vmatpush3.msra.mxu0 %v2966_v35 }
0x1d3d   : > { %12965 = vmatmul.mubr.msk.f32.gmra.mxu0 %vm1702_vm4, %v7375_v47  ;;  %13031 = vmatprep.subr.mxu0 %v2965_v42 }
0x1d3e   : > { %12967 = vmatprep.mubr.msk.f32.mxu0 %vm1702_vm4, %v7376_v6  ;;  %13032 = vmatpush3.msra.mxu0 %v2965_v42 }
0x1d3f   : > { %13033 = vmatprep.subr.mxu0 %v2964_v24 }
0x1d40   : > { %13034 = vmatpush3.msra.mxu0 %v2964_v24 }
0x1d41   : > { %12968 = vmatmul.mubr.msk.f32.gmra.mxu0 %vm1702_vm4, %v7377_v46  ;;  %13067 = vmatprep.subr.mxu0 %v3031_v34 }
0x1d42   : > { %12970 = vmatprep.mubr.msk.f32.mxu0 %vm1702_vm4, %v7378_v30 }
0x1d45   : > { %12971 = vmatmul.mubr.msk.f32.gmra.mxu0 %vm1702_vm4, %v7379_v63 }
0x1d46   : > { %13035 = vmatprep.mubr.msk.f32.mxu0 %vm1236_vm0, %v15171_v31 }
0x1d49   : > { %13036 = vmatmul.mubr.msk.f32.vlgmr.msra.gmra.mxu0 %vm1236_vm0, %v15173_v12 }
0x1d4a   : > { %13038 = vmatprep.mubr.msk.f32.mxu0 %vm1236_vm0, %v15185_v41  ;;  %13068 = vmatpush3.msra.mxu0 %v3031_v34 }
0x1d4b   : > { %13069 = vmatprep.subr.mxu0 %v3030_v7 }
0x1d4c   : > { %13070 = vmatpush3.msra.mxu0 %v3030_v7 }
0x1d4d   : > { %13039 = vmatmul.mubr.msk.f32.gmra.mxu0 %vm1236_vm0, %v15187_v38  ;;  %13071 = vmatprep.subr.mxu0 %v3029_v3 }
0x1d4e   : > { %13041 = vmatprep.mubr.msk.f32.mxu0 %vm1236_vm0, %v15199_v48  ;;  %13072 = vmatpush3.msra.mxu0 %v3029_v3 }
0x1d4f   : > { %13073 = vmatprep.subr.mxu0 %v3028_v11 }
0x1d50   : > { %13074 = vmatpush3.msra.mxu0 %v3028_v11 }
0x1d51   : > { %13042 = vmatmul.mubr.msk.f32.gmra.mxu0 %vm1236_vm0, %v15202_v49 }
0x1d52   : > { %13044 = vmatprep.mubr.msk.f32.mxu0 %vm1236_vm0, %v15212_v25 }
0x1d55   : > { %13045 = vmatmul.mubr.msk.f32.gmra.mxu0 %vm1236_vm0, %v15214_v27 }
0x1d56   : > { %13075 = vmatprep.mubr.msk.f32.mxu0 %vm1236_vm0, %v15171_v31 }
0x1d59   : > { %13076 = vmatmul.mubr.msk.f32.vlgmr.msra.gmra.mxu0 %vm1236_vm0, %v15173_v12 }
0x1d5a   : > { %13078 = vmatprep.mubr.msk.f32.mxu0 %vm1236_vm0, %v15185_v41 }
0x1d5d   : > { %13079 = vmatmul.mubr.msk.f32.gmra.mxu0 %vm1236_vm0, %v15187_v38 }
0x1d5e   : > { %13081 = vmatprep.mubr.msk.f32.mxu0 %vm1236_vm0, %v15199_v48 }
0x1d61   : > { %13082 = vmatmul.mubr.msk.f32.gmra.mxu0 %vm1236_vm0, %v15202_v49 }
0x1d62   : > { %13084 = vmatprep.mubr.msk.f32.mxu0 %vm1236_vm0, %v15212_v25 }
0x1d65   : > { %13085 = vmatmul.mubr.msk.f32.gmra.mxu0 %vm1236_vm0, %v15214_v27 }
0x1df9   : > { %v12963_v14 = vpop.f32.mrf.mxu0 }
0x1dfa   : > { %v7746_v59 = vsel %vm3593_vm7, %v12963_v14, -inf }
0x1dfb   : > { %7747 = vmax.xlane.f32.xlu1 %v7746_v59  ;;  %v7704_v44 = vpop.f32.mrf.mxu0 }
0x1dfc   : > { %v7743_v1 = vsel %vm3593_vm7, %v7704_v44, -inf }
0x1dfd   : > { %7744 = vmax.xlane.f32.xlu0 %v7743_v1  ;;  %v12966_v51 = vpop.f32.mrf.mxu0 }
0x1dfe   : > { %v7752_v61 = vsel %vm3593_vm7, %v12966_v51, -inf }
0x1dff   : > { %7753 = vmax.xlane.f32.xlu1 %v7752_v61  ;;  %v7714_v21 = vpop.f32.mrf.mxu0 }
0x1e00   : > { %v7749_v10 = vsel %vm3593_vm7, %v7714_v21, -inf }
0x1e01   : > { %7750 = vmax.xlane.f32.xlu0 %v7749_v10  ;;  %v16099_v40 = vpop.f32.mrf.mxu0 }
0x1e02   : > { %v7758_v56 = vsel %vm3593_vm7, %v16099_v40, -inf }
0x1e03   : > { %7759 = vmax.xlane.f32.xlu1 %v7758_v56  ;;  %v16103_v20 = vpop.f32.mrf.mxu0 }
0x1e04   : > { %v7755_v5 = vsel %vm3593_vm7, %v16103_v20, -inf }
0x1e05   : > { %7756 = vmax.xlane.f32.xlu0 %v7755_v5  ;;  %v16107_v0 = vpop.f32.mrf.mxu0 }
0x1e06   : > { %v7764_v33 = vsel %vm3593_vm7, %v16107_v0, -inf }
0x1e07   : > { %7765 = vmax.xlane.f32.xlu1 %v7764_v33  ;;  %v16111_v50 = vpop.f32.mrf.mxu0 }
0x1e08   : > { %v7761_v15 = vsel %vm3593_vm7, %v16111_v50, -inf }
0x1e09   : > { %v16115_v60 = vpop.f32.mrf.mxu0  ;;  %7762 = vmax.xlane.f32.xlu0 %v7761_v15 }
0x1e0b   : > { %v16117_v26 = vpop.f32.mrf.mxu0 }
0x1e0d   : > { %v16119_v19 = vpop.f32.mrf.mxu0 }
0x1e0f   : > { %v16121_v32 = vpop.f32.mrf.mxu0 }
0x1e11   : > { %v16123_v22 = vpop.f32.mrf.mxu0 }
0x1e13   : > { %v16125_v62 = vpop.f32.mrf.mxu0 }
0x1e15   : > { %v16127_v58 = vpop.f32.mrf.mxu0 }
0x1e17   : > { %v16129_v2 = vpop.f32.mrf.mxu0 }
0x1e19   : > { %v13077_v23 = vpop.f32.mrf.mxu0 }
0x1e1b   : > { %v8384_v57 = vpop.f32.mrf.mxu0 }
0x1e1d   : > { %v13080_v13 = vpop.f32.mrf.mxu0 }
0x1e1f   : > { %v8394_v4 = vpop.f32.mrf.mxu0 }
0x1e21   : > { %v13083_v55 = vpop.f32.mrf.mxu0 }
0x1e23   : > { %v8404_v17 = vpop.f32.mrf.mxu0 }
0x1e25   : > { %v13086_v45 = vpop.f32.mrf.mxu0 }
0x1e26   : > { %13115 = vmatprep.subr.mxu0 %v13086_v45 }
0x1e27   : > { %v8414_v29 = vpop.f32.mrf.mxu0  ;;  %13116 = vmatpush3.msra.mxu0 %v13086_v45 }
0x1e28   : > { %13117 = vmatprep.subr.mxu0 %v8414_v29 }
0x1e29   : > { %13118 = vmatpush3.msra.mxu0 %v8414_v29 }
0x1e2a   : > { %13119 = vmatprep.subr.mxu0 %v13083_v55 }
0x1e2b   : > { %13120 = vmatpush3.msra.mxu0 %v13083_v55 }
0x1e2c   : > { %13121 = vmatprep.subr.mxu0 %v8404_v17 }
0x1e2d   : > { %13122 = vmatpush3.msra.mxu0 %v8404_v17 }
0x1e2e   : > { %13123 = vmatprep.subr.mxu0 %v13080_v13 }
0x1e2f   : > { %13124 = vmatpush3.msra.mxu0 %v13080_v13 }
0x1e30   : > { %13125 = vmatprep.subr.mxu0 %v8394_v4 }
0x1e31   : > { %13126 = vmatpush3.msra.mxu0 %v8394_v4 }
0x1e32   : > { %13127 = vmatprep.subr.mxu0 %v13077_v23 }
0x1e33   : > { %13128 = vmatpush3.msra.mxu0 %v13077_v23 }
0x1e34   : > { %13129 = vmatprep.subr.mxu0 %v8384_v57 }
0x1e35   : > { %13130 = vmatpush3.msra.mxu0 %v8384_v57 }
0x1e84   : > { %v7748_v35 = vpop.xlane.xlu1 %7747 }
0x1e85   : > { %v7768_v42 = vsub.f32 %v12963_v14, %v7748_v35 }
0x1e86   : > { %v7745_v47 = vpop.xlane.xlu0 %7744 }
0x1e87   : > { %v7777_v6 = vmul.f32 1.442695, %v7768_v42  ;;  %v7767_v24 = vsub.f32 %v7704_v44, %v7745_v47 }
0x1e88   : > { %v7754_v34 = vpop.xlane.xlu1 %7753 }
0x1e89   : > { %13830 = vpow2.f32 %v7777_v6  ;;  %v7775_v46 = vmul.f32 1.442695, %v7767_v24  ;;  %v7770_v30 = vsub.f32 %v12966_v51, %v7754_v34  ;;  %v3077_v24 = vld [vmem:[#allocation19 + $0x148] sm:$0x3] }
0x1e8a   : > { %v7751_v63 = vpop.xlane.xlu0 %7750  ;;  %13001 = vmatprep.subr.msk.mxu1 %vm2083_vm6, %v3077_v24 }
0x1e8b   : > { %13832 = vpow2.f32 %v7775_v46  ;;  %v7781_v7 = vmul.f32 1.442695, %v7770_v30  ;;  %v7769_v3 = vsub.f32 %v7714_v21, %v7751_v63 }
0x1e8c   : > { %v7760_v11 = vpop.xlane.xlu1 %7759 }
0x1e8d   : > { %13834 = vpow2.f32 %v7781_v7  ;;  %v7779_v59 = vmul.f32 1.442695, %v7769_v3  ;;  %v7772_v1 = vsub.f32 %v16099_v40, %v7760_v11 }
0x1e8e   : > { %v7757_v61 = vpop.xlane.xlu0 %7756 }
0x1e8f   : > { %13836 = vpow2.f32 %v7779_v59  ;;  %v7785_v10 = vmul.f32 1.442695, %v7772_v1  ;;  %v7771_v14 = vsub.f32 %v16103_v20, %v7757_v61 }
0x1e90   : > { %v7766_v56 = vpop.xlane.xlu1 %7765 }
0x1e91   : > { %13838 = vpow2.f32 %v7785_v10  ;;  %v7783_v44 = vmul.f32 1.442695, %v7771_v14  ;;  %v7774_v5 = vsub.f32 %v16107_v0, %v7766_v56 }
0x1e92   : > { %v7763_v51 = vpop.xlane.xlu0 %7762 }
0x1e93   : > { %13840 = vpow2.f32 %v7783_v44  ;;  %v7789_v33 = vmul.f32 1.442695, %v7774_v5  ;;  %v7773_v21 = vsub.f32 %v16111_v50, %v7763_v51  ;;  %v3076_v44 = vld [vmem:[#allocation19 + $0x140] sm:$0xff] }
0x1e95   : > { %13842 = vpow2.f32 %v7789_v33  ;;  %v7787_v15 = vmul.f32 1.442695, %v7773_v21  ;;  %v3075_v33 = vld [vmem:[#allocation19 + $0x138] sm:$0xff] }
0x1e96   : > { %v13831_v23 = vpop.eup %13830 }
0x1e97   : > { %13844 = vpow2.f32 %v7787_v15  ;;  %v7794_v40 = vsel %vm3593_vm7, %v13831_v23, 0.0 }
0x1e98   : > { %v13833_v57 = vpop.eup %13832  ;;  %7795 = vadd.xlane.f32.xlu1 %v7794_v40  ;;  %v3074_v40 = vld [vmem:[#allocation19 + $0x130] sm:$0xff] }
0x1e99   : > { %v7791_v20 = vsel %vm3593_vm7, %v13833_v57, 0.0 }
0x1e9a   : > { %v13835_v13 = vpop.eup %13834  ;;  %7792 = vadd.xlane.f32.xlu0 %v7791_v20  ;;  %v3073_v20 = vld [vmem:[#allocation19 + $0x128] sm:$0xff] }
0x1e9b   : > { %v7800_v4 = vsel %vm3593_vm7, %v13835_v13, 0.0 }
0x1e9c   : > { %v13837_v0 = vpop.eup %13836  ;;  %7801 = vadd.xlane.f32.xlu1 %v7800_v4 }
0x1e9d   : > { %v7797_v55 = vsel %vm3593_vm7, %v13837_v0, 0.0 }
0x1e9e   : > { %v13839_v17 = vpop.eup %13838  ;;  %7798 = vadd.xlane.f32.xlu0 %v7797_v55 }
0x1e9f   : > { %v7806_v50 = vsel %vm3593_vm7, %v13839_v17, 0.0 }
0x1ea0   : > { %v13841_v45 = vpop.eup %13840  ;;  %7807 = vadd.xlane.f32.xlu1 %v7806_v50 }
0x1ea1   : > { %v7803_v29 = vsel %vm3593_vm7, %v13841_v45, 0.0 }
0x1ea2   : > { %v13843_v35 = vpop.eup %13842  ;;  %7804 = vadd.xlane.f32.xlu0 %v7803_v29 }
0x1ea3   : > { %v7812_v42 = vsel %vm3593_vm7, %v13843_v35, 0.0 }
0x1ea4   : > { %v13845_v47 = vpop.eup %13844  ;;  %7813 = vadd.xlane.f32.xlu1 %v7812_v42 }
0x1ea5   : > { %v7809_v6 = vsel %vm3593_vm7, %v13845_v47, 0.0 }
0x1ea6   : > { %7810 = vadd.xlane.f32.xlu0 %v7809_v6 }
0x1f21   : > { %v7796_v34 = vpop.xlane.xlu1 %7795 }
0x1f22   : > { %13846 = vrcp.f32 %v7796_v34 }
0x1f23   : > { %v7793_v46 = vpop.xlane.xlu0 %7792 }
0x1f24   : > { %13848 = vrcp.f32 %v7793_v46  ;;  %v2996_v46 = vld [vmem:[#allocation16 + $0xc0] sm:$0xff] }
0x1f25   : > { %v7802_v30 = vpop.xlane.xlu1 %7801 }
0x1f26   : > { %13850 = vrcp.f32 %v7802_v30 }
0x1f27   : > { %v7799_v63 = vpop.xlane.xlu0 %7798 }
0x1f28   : > { %13852 = vrcp.f32 %v7799_v63 }
0x1f29   : > { %v7808_v7 = vpop.xlane.xlu1 %7807 }
0x1f2a   : > { %13854 = vrcp.f32 %v7808_v7 }
0x1f2b   : > { %v7805_v3 = vpop.xlane.xlu0 %7804 }
0x1f2c   : > { %13856 = vrcp.f32 %v7805_v3 }
0x1f2d   : > { %v7814_v11 = vpop.xlane.xlu1 %7813 }
0x1f2e   : > { %13858 = vrcp.f32 %v7814_v11  ;;  %v8205_v11 = vmul.f32 0.14142136, %v16117_v26 }
0x1f2f   : > { %v7811_v59 = vpop.xlane.xlu0 %7810  ;;  %v13847_v1 = vpop.eup %13846 }
0x1f30   : > { %13860 = vrcp.f32 %v7811_v59  ;;  %v7824_v14 = vmul.f32 %v13847_v1, %v13831_v23 }
0x1f31   : > { %v13849_v61 = vpop.eup %13848 }
0x1f32   : > { %v7823_v10 = vmul.f32 %v13849_v61, %v13833_v57 }
0x1f33   : > { %v13851_v56 = vpop.eup %13850 }
0x1f34   : > { %12989 = vmatprep.mubr.msk.f32.mxu1 %vm3593_vm7, %v7823_v10  ;;  %v7826_v21 = vmul.f32 %v13851_v56, %v13835_v13  ;;  %v3072_v13 = vld [vmem:[#allocation19 + $0x120] sm:$0xff] }
0x1f35   : > { %v13853_v5 = vpop.eup %13852  ;;  %12990 = vmatmul.mubr.msk.f32.vlgmr.msra.gmra.mxu1 %vm3593_vm7, %v7824_v14 }
0x1f36   : > { %v7825_v51 = vmul.f32 %v13853_v5, %v13837_v0  ;;  %13002 = vmatpush3.msk.msra.mxu1 %vm2083_vm6, %v3077_v24  ;;  %v2998_v24 = vld [vmem:[#allocation16 + $0xd0] sm:$0xff] }
0x1f37   : > { %13003 = vmatprep.subr.mxu1 %v3076_v44  ;;  %v13855_v15 = vpop.eup %13854 }
0x1f38   : > { %12992 = vmatprep.mubr.msk.f32.mxu1 %vm3593_vm7, %v7825_v51  ;;  %13004 = vmatpush3.msra.mxu1 %v3076_v44  ;;  %v7828_v4 = vmul.f32 %v13855_v15, %v13839_v17  ;;  %v3071_v17 = vld [vmem:[#allocation19 + $0x118] sm:$0xff] }
0x1f39   : > { %v13857_v57 = vpop.eup %13856  ;;  %12993 = vmatmul.mubr.msk.f32.gmra.mxu1 %vm3593_vm7, %v7826_v21  ;;  %13005 = vmatprep.subr.mxu1 %v3075_v33 }
0x1f3a   : > { %v7827_v23 = vmul.f32 %v13857_v57, %v13841_v45  ;;  %13006 = vmatpush3.msra.mxu1 %v3075_v33  ;;  %v2999_v45 = vld [vmem:[#allocation16 + $0xd8] sm:$0xff] }
0x1f3b   : > { %13007 = vmatprep.subr.mxu1 %v3074_v40  ;;  %v13859_v0 = vpop.eup %13858 }
0x1f3c   : > { %12995 = vmatprep.mubr.msk.f32.mxu1 %vm3593_vm7, %v7827_v23  ;;  %13008 = vmatpush3.msra.mxu1 %v3074_v40  ;;  %v7830_v29 = vmul.f32 %v13859_v0, %v13843_v35  ;;  %v2997_v35 = vld [vmem:[#allocation16 + $0xc8] sm:$0xff] }
0x1f3d   : > { %v13861_v55 = vpop.eup %13860  ;;  %12996 = vmatmul.mubr.msk.f32.gmra.mxu1 %vm3593_vm7, %v7828_v4  ;;  %13009 = vmatprep.subr.mxu1 %v3073_v20 }
0x1f3e   : > { %v7829_v50 = vmul.f32 %v13861_v55, %v13845_v47  ;;  %13010 = vmatpush3.msra.mxu1 %v3073_v20  ;;  %v2969_v55 = vld [vmem:[#allocation15 + $0xe8] sm:$0xff] }
0x1f3f   : > { %13011 = vmatprep.subr.mxu1 %v3072_v13 }
0x1f40   : > { %12998 = vmatprep.mubr.msk.f32.mxu1 %vm3593_vm7, %v7829_v50  ;;  %13012 = vmatpush3.msra.mxu1 %v3072_v13  ;;  %v2970_v13 = vld [vmem:[#allocation15 + $0xf0] sm:$0xff]  ;;  %v8208_v50 = vmul.f32 0.14142136, %v16119_v19  ;;  %v8212_v19 = vmul.f32 0.14142136, %v16127_v58 }
0x1f41   : > { %12999 = vmatmul.mubr.msk.f32.gmra.mxu1 %vm3593_vm7, %v7830_v29  ;;  %13013 = vmatprep.subr.mxu1 %v3071_v17  ;;  %v8209_v29 = vmul.f32 0.14142136, %v16125_v62  ;;  %v3034_v62 = vld [vmem:[#allocation18 + $0xf0] sm:$0xff] }
0x1f42   : > { %13014 = vmatpush3.msra.mxu1 %v3071_v17  ;;  %v2968_v17 = vld [vmem:[#allocation15 + $0xe0] sm:$0xff] }
0x1f43   : > { %13047 = vmatprep.subr.mxu1 %v2999_v45 }
0x1ff5   : > { %v12991_v42 = vpop.f32.mrf.mxu1 }
0x1ff7   : > { %v7921_v6 = vpop.f32.mrf.mxu1 }
0x1ff8   : > { %13015 = vmatprep.mubr.msk.f32.mxu1 %vm1702_vm4, %v7921_v6 }
0x1ff9   : > { %v12994_v34 = vpop.f32.mrf.mxu1  ;;  %13016 = vmatmul.mubr.msk.f32.vlgmr.msra.gmra.mxu1 %vm1702_vm4, %v12991_v42 }
0x1ffa   : > { %13048 = vmatpush3.msra.mxu1 %v2999_v45  ;;  %v8211_v45 = vmul.f32 0.14142136, %v16129_v2  ;;  %v3032_v2 = vld [vmem:[#allocation18 + $0xe0] sm:$0xff] }
0x1ffb   : > { %v7931_v47 = vpop.f32.mrf.mxu1  ;;  %13049 = vmatprep.subr.mxu1 %v2998_v24 }
0x1ffc   : > { %13018 = vmatprep.mubr.msk.f32.mxu1 %vm1702_vm4, %v7931_v47  ;;  %13050 = vmatpush3.msra.mxu1 %v2998_v24 }
0x1ffd   : > { %v12997_v30 = vpop.f32.mrf.mxu1  ;;  %13019 = vmatmul.mubr.msk.f32.gmra.mxu1 %vm1702_vm4, %v12994_v34  ;;  %13051 = vmatprep.subr.mxu1 %v2997_v35 }
0x1ffe   : > { %13052 = vmatpush3.msra.mxu1 %v2997_v35 }
0x1fff   : > { %v7941_v63 = vpop.f32.mrf.mxu1  ;;  %13053 = vmatprep.subr.mxu1 %v2996_v46 }
0x2000   : > { %13021 = vmatprep.mubr.msk.f32.mxu1 %vm1702_vm4, %v7941_v63  ;;  %13054 = vmatpush3.msra.mxu1 %v2996_v46 }
0x2001   : > { %v13000_v7 = vpop.f32.mrf.mxu1  ;;  %13022 = vmatmul.mubr.msk.f32.gmra.mxu1 %vm1702_vm4, %v12997_v30 }
0x2003   : > { %v7951_v3 = vpop.f32.mrf.mxu1 }
0x2004   : > { %13024 = vmatprep.mubr.msk.f32.mxu1 %vm1702_vm4, %v7951_v3 }
0x2005   : > { %13025 = vmatmul.mubr.msk.f32.gmra.mxu1 %vm1702_vm4, %v13000_v7 }
0x2006   : > { %13055 = vmatprep.mubr.msk.f32.mxu1 %vm1236_vm0, %v15171_v31 }
0x2009   : > { %13056 = vmatmul.mubr.msk.f32.vlgmr.msra.gmra.mxu1 %vm1236_vm0, %v15173_v12 }
0x200a   : > { %13058 = vmatprep.mubr.msk.f32.mxu1 %vm1236_vm0, %v15185_v41 }
0x200d   : > { %13059 = vmatmul.mubr.msk.f32.gmra.mxu1 %vm1236_vm0, %v15187_v38 }
0x200e   : > { %13061 = vmatprep.mubr.msk.f32.mxu1 %vm1236_vm0, %v15199_v48 }
0x2011   : > { %13062 = vmatmul.mubr.msk.f32.gmra.mxu1 %vm1236_vm0, %v15202_v49 }
0x2012   : > { %13064 = vmatprep.mubr.msk.f32.mxu1 %vm1236_vm0, %v15212_v25 }
0x2015   : > { %13065 = vmatmul.mubr.msk.f32.gmra.mxu1 %vm1236_vm0, %v15214_v27 }
0x2016   : > { %13103 = vmatprep.mubr.msk.f32.mxu1 %vm1702_vm4, %v8205_v11 }
0x20b9   : > { %v13017_v59 = vpop.f32.mrf.mxu1 }
0x20ba   : > { %v16180_v1 = vadd.f32 %v13017_v59, %v16004_v37 }
0x20bb   : > { %v8053_v61 = vpop.f32.mrf.mxu1 }
0x20bc   : > { %v16183_v10 = vadd.f32 %v8053_v61, %v16007_v52 }
0x20bd   : > { %v13020_v14 = vpop.f32.mrf.mxu1 }
0x20be   : > { %v16186_v56 = vadd.f32 %v13020_v14, %v16013_v16 }
0x20bf   : > { %v8063_v44 = vpop.f32.mrf.mxu1 }
0x20c0   : > { %v16189_v26 = vadd.f32 %v8063_v44, %v16016_v43 }
0x20c1   : > { %v13023_v5 = vpop.f32.mrf.mxu1 }
0x20c2   : > { %v16192_v51 = vadd.f32 %v13023_v5, %v16022_v18 }
0x20c3   : > { %v8073_v33 = vpop.f32.mrf.mxu1 }
0x20c4   : > { %v16195_v37 = vadd.f32 %v8073_v33, %v16025_v54  ;;  %v2971_v54 = vld [vmem:[#allocation15 + $0xf8] sm:$0xff] }
0x20c5   : > { %v13026_v21 = vpop.f32.mrf.mxu1 }
0x20c6   : > { %v16198_v52 = vadd.f32 %v13026_v21, %v16029_v53  ;;  %v8206_v53 = vmul.f32 0.14142136, %v16115_v60  ;;  %v3035_v60 = vld [vmem:[#allocation18 + $0xf8] sm:$0xff] }
0x20c7   : > { %v8083_v15 = vpop.f32.mrf.mxu1 }
0x20c8   : > { %v16201_v16 = vadd.f32 %v8083_v15, %v16031_v9  ;;  %v8207_v9 = vmul.f32 0.14142136, %v16121_v32  ;;  %v8210_v32 = vmul.f32 0.14142136, %v16123_v22  ;;  %v3033_v22 = vld [vmem:[#allocation18 + $0xe8] sm:$0xff] }
0x20c9   : > { %v13057_v40 = vpop.f32.mrf.mxu1 }
0x20cb   : > { %v8279_v57 = vpop.f32.mrf.mxu1 }
0x20cd   : > { %v13060_v43 = vpop.f32.mrf.mxu1 }
0x20cf   : > { %v8289_v23 = vpop.f32.mrf.mxu1 }
0x20d1   : > { %v13063_v20 = vpop.f32.mrf.mxu1 }
0x20d3   : > { %v8299_v4 = vpop.f32.mrf.mxu1 }
0x20d5   : > { %v13066_v18 = vpop.f32.mrf.mxu1 }
0x20d6   : > { %13087 = vmatprep.subr.msk.mxu1 %vm1702_vm4, %v13066_v18 }
0x20d7   : > { %v8309_v0 = vpop.f32.mrf.mxu1  ;;  %13088 = vmatpush3.xpose.msk.msra.mxu1 %vm1702_vm4, %v13066_v18 }
0x20d8   : > { %13089 = vmatprep.subr.msk.mxu1 %vm1702_vm4, %v8309_v0 }
0x20db   : > { %13090 = vmatpush3.xpose.msk.msra.mxu1 %vm1702_vm4, %v8309_v0 }
0x20dc   : > { %13091 = vmatprep.subr.msk.mxu1 %vm1702_vm4, %v13063_v20 }
0x20df   : > { %13092 = vmatpush3.xpose.msk.msra.mxu1 %vm1702_vm4, %v13063_v20 }
0x20e0   : > { %13093 = vmatprep.subr.msk.mxu1 %vm1702_vm4, %v8299_v4 }
0x20e3   : > { %13094 = vmatpush3.xpose.msk.msra.mxu1 %vm1702_vm4, %v8299_v4 }
0x20e4   : > { %13095 = vmatprep.subr.msk.mxu1 %vm1702_vm4, %v13060_v43 }
0x20e7   : > { %13096 = vmatpush3.xpose.msk.msra.mxu1 %vm1702_vm4, %v13060_v43 }
0x20e8   : > { %13097 = vmatprep.subr.msk.mxu1 %vm1702_vm4, %v8289_v23 }
0x20eb   : > { %13098 = vmatpush3.xpose.msk.msra.mxu1 %vm1702_vm4, %v8289_v23 }
0x20ec   : > { %13099 = vmatprep.subr.msk.mxu1 %vm1702_vm4, %v13057_v40 }
0x20ef   : > { %13100 = vmatpush3.xpose.msk.msra.mxu1 %vm1702_vm4, %v13057_v40 }
0x20f0   : > { %13101 = vmatprep.subr.msk.mxu1 %vm1702_vm4, %v8279_v57 }
0x20f3   : > { %13102 = vmatpush3.xpose.msk.msra.mxu1 %vm1702_vm4, %v8279_v57 }
0x20f4   : > { %13169 = vmatprep.subr.mxu1 %v2971_v54 }
0x20f6   : > { %13104 = vmatmul.mubr.msk.f32.vlgmr.msra.gmra.mxu1 %vm1702_vm4, %v8206_v53 }
0x20f7   : > { %13106 = vmatprep.mubr.msk.f32.mxu1 %vm1702_vm4, %v8207_v9  ;;  %13170 = vmatpush3.msra.mxu1 %v2971_v54 }
0x20f8   : > { %13171 = vmatprep.subr.mxu1 %v2970_v13 }
0x20f9   : > { %13172 = vmatpush3.msra.mxu1 %v2970_v13 }
0x20fa   : > { %13107 = vmatmul.mubr.msk.f32.gmra.mxu1 %vm1702_vm4, %v8208_v50  ;;  %13173 = vmatprep.subr.mxu1 %v2969_v55 }
0x20fb   : > { %13109 = vmatprep.mubr.msk.f32.mxu1 %vm1702_vm4, %v8209_v29  ;;  %13174 = vmatpush3.msra.mxu1 %v2969_v55 }
0x20fc   : > { %13175 = vmatprep.subr.mxu1 %v2968_v17 }
0x20fd   : > { %13176 = vmatpush3.msra.mxu1 %v2968_v17 }
0x20fe   : > { %13110 = vmatmul.mubr.msk.f32.gmra.mxu1 %vm1702_vm4, %v8210_v32  ;;  %13209 = vmatprep.subr.mxu1 %v3035_v60 }
0x20ff   : > { %13112 = vmatprep.mubr.msk.f32.mxu1 %vm1702_vm4, %v8211_v45 }
0x2102   : > { %13113 = vmatmul.mubr.msk.f32.gmra.mxu1 %vm1702_vm4, %v8212_v19 }
0x2103   : > { %13177 = vmatprep.mubr.msk.f32.mxu1 %vm1236_vm0, %v15171_v31 }
0x2106   : > { %13178 = vmatmul.mubr.msk.f32.vlgmr.msra.gmra.mxu1 %vm1236_vm0, %v15173_v12 }
0x2107   : > { %13180 = vmatprep.mubr.msk.f32.mxu1 %vm1236_vm0, %v15185_v41  ;;  %13210 = vmatpush3.msra.mxu1 %v3035_v60 }
0x2108   : > { %13211 = vmatprep.subr.mxu1 %v3034_v62 }
0x2109   : > { %13212 = vmatpush3.msra.mxu1 %v3034_v62 }
0x210a   : > { %13181 = vmatmul.mubr.msk.f32.gmra.mxu1 %vm1236_vm0, %v15187_v38  ;;  %13213 = vmatprep.subr.mxu1 %v3033_v22 }
0x210b   : > { %13183 = vmatprep.mubr.msk.f32.mxu1 %vm1236_vm0, %v15199_v48  ;;  %13214 = vmatpush3.msra.mxu1 %v3033_v22 }
0x210c   : > { %13215 = vmatprep.subr.mxu1 %v3032_v2 }
0x210d   : > { %13216 = vmatpush3.msra.mxu1 %v3032_v2 }
0x210e   : > { %13184 = vmatmul.mubr.msk.f32.gmra.mxu1 %vm1236_vm0, %v15202_v49 }
0x210f   : > { %13186 = vmatprep.mubr.msk.f32.mxu1 %vm1236_vm0, %v15212_v25 }
0x2112   : > { %13187 = vmatmul.mubr.msk.f32.gmra.mxu1 %vm1236_vm0, %v15214_v27 }
0x2113   : > { %13217 = vmatprep.mubr.msk.f32.mxu1 %vm1236_vm0, %v15171_v31 }
0x2116   : > { %13218 = vmatmul.mubr.msk.f32.vlgmr.msra.gmra.mxu1 %vm1236_vm0, %v15173_v12 }
0x2117   : > { %13220 = vmatprep.mubr.msk.f32.mxu1 %vm1236_vm0, %v15185_v41 }
0x211a   : > { %13221 = vmatmul.mubr.msk.f32.gmra.mxu1 %vm1236_vm0, %v15187_v38 }
0x211b   : > { %13223 = vmatprep.mubr.msk.f32.mxu1 %vm1236_vm0, %v15199_v48 }
0x211e   : > { %13224 = vmatmul.mubr.msk.f32.gmra.mxu1 %vm1236_vm0, %v15202_v49 }
0x211f   : > { %13226 = vmatprep.mubr.msk.f32.mxu1 %vm1236_vm0, %v15212_v25 }
0x2122   : > { %13227 = vmatmul.mubr.msk.f32.gmra.mxu1 %vm1236_vm0, %v15214_v27 }
0x21b6   : > { %v13105_v58 = vpop.f32.mrf.mxu1 }
0x21b7   : > { %v8579_v42 = vsel %vm3593_vm7, %v13105_v58, -inf }
0x21b8   : > { %8580 = vmax.xlane.f32.xlu1 %v8579_v42  ;;  %v8537_v6 = vpop.f32.mrf.mxu1 }
0x21b9   : > { %v8576_v24 = vsel %vm3593_vm7, %v8537_v6, -inf }
0x21ba   : > { %8577 = vmax.xlane.f32.xlu0 %v8576_v24  ;;  %v13108_v34 = vpop.f32.mrf.mxu1 }
0x21bb   : > { %v8585_v35 = vsel %vm3593_vm7, %v13108_v34, -inf }
0x21bc   : > { %8586 = vmax.xlane.f32.xlu1 %v8585_v35  ;;  %v8547_v47 = vpop.f32.mrf.mxu1 }
0x21bd   : > { %v8582_v46 = vsel %vm3593_vm7, %v8547_v47, -inf }
0x21be   : > { %8583 = vmax.xlane.f32.xlu0 %v8582_v46  ;;  %v16269_v30 = vpop.f32.mrf.mxu1 }
0x21bf   : > { %v8591_v63 = vsel %vm3593_vm7, %v16269_v30, -inf }
0x21c0   : > { %8592 = vmax.xlane.f32.xlu1 %v8591_v63  ;;  %v16273_v7 = vpop.f32.mrf.mxu1 }
0x21c1   : > { %v8588_v3 = vsel %vm3593_vm7, %v16273_v7, -inf }
0x21c2   : > { %8589 = vmax.xlane.f32.xlu0 %v8588_v3  ;;  %v16277_v11 = vpop.f32.mrf.mxu1 }
0x21c3   : > { %v8597_v59 = vsel %vm3593_vm7, %v16277_v11, -inf }
0x21c4   : > { %8598 = vmax.xlane.f32.xlu1 %v8597_v59  ;;  %v16281_v61 = vpop.f32.mrf.mxu1 }
0x21c5   : > { %v8594_v14 = vsel %vm3593_vm7, %v16281_v61, -inf }
0x21c6   : > { %v16285_v44 = vpop.f32.mrf.mxu1  ;;  %8595 = vmax.xlane.f32.xlu0 %v8594_v14 }
0x21c8   : > { %v16287_v5 = vpop.f32.mrf.mxu1 }
0x21ca   : > { %v16289_v33 = vpop.f32.mrf.mxu1 }
0x21cc   : > { %v16291_v21 = vpop.f32.mrf.mxu1 }
0x21ce   : > { %v16293_v15 = vpop.f32.mrf.mxu1 }
0x21d0   : > { %v16295_v40 = vpop.f32.mrf.mxu1 }
0x21d2   : > { %v16297_v57 = vpop.f32.mrf.mxu1 }
0x21d4   : > { %v16299_v43 = vpop.f32.mrf.mxu1 }
0x21d6   : > { %v13219_v23 = vpop.f32.mrf.mxu1 }
0x21d8   : > { %v9217_v20 = vpop.f32.mrf.mxu1 }
0x21da   : > { %v13222_v4 = vpop.f32.mrf.mxu1 }
0x21dc   : > { %v9227_v18 = vpop.f32.mrf.mxu1 }
0x21de   : > { %v13225_v0 = vpop.f32.mrf.mxu1 }
0x21e0   : > { %v9237_v54 = vpop.f32.mrf.mxu1 }
0x21e2   : > { %v13228_v53 = vpop.f32.mrf.mxu1 }
0x21e3   : > { %13257 = vmatprep.subr.mxu1 %v13228_v53 }
0x21e4   : > { %v9247_v9 = vpop.f32.mrf.mxu1  ;;  %13258 = vmatpush3.msra.mxu1 %v13228_v53 }
0x21e5   : > { %13259 = vmatprep.subr.mxu1 %v9247_v9 }
0x21e6   : > { %13260 = vmatpush3.msra.mxu1 %v9247_v9 }
0x21e7   : > { %13261 = vmatprep.subr.mxu1 %v13225_v0 }
0x21e8   : > { %13262 = vmatpush3.msra.mxu1 %v13225_v0 }
0x21e9   : > { %13263 = vmatprep.subr.mxu1 %v9237_v54 }
0x21ea   : > { %13264 = vmatpush3.msra.mxu1 %v9237_v54 }
0x21eb   : > { %13265 = vmatprep.subr.mxu1 %v13222_v4 }
0x21ec   : > { %13266 = vmatpush3.msra.mxu1 %v13222_v4 }
0x21ed   : > { %13267 = vmatprep.subr.mxu1 %v9227_v18 }
0x21ee   : > { %13268 = vmatpush3.msra.mxu1 %v9227_v18 }
0x21ef   : > { %13269 = vmatprep.subr.mxu1 %v13219_v23 }
0x21f0   : > { %13270 = vmatpush3.msra.mxu1 %v13219_v23 }
0x21f1   : > { %13271 = vmatprep.subr.mxu1 %v9217_v20 }
0x21f2   : > { %13272 = vmatpush3.msra.mxu1 %v9217_v20 }
0x2241   : > { %v8581_v13 = vpop.xlane.xlu1 %8580 }
0x2242   : > { %v8601_v55 = vsub.f32 %v13105_v58, %v8581_v13 }
0x2243   : > { %v8578_v50 = vpop.xlane.xlu0 %8577 }
0x2244   : > { %v8610_v29 = vmul.f32 1.442695, %v8601_v55  ;;  %v8600_v17 = vsub.f32 %v8537_v6, %v8578_v50 }
0x2245   : > { %v8587_v60 = vpop.xlane.xlu1 %8586 }
0x2246   : > { %13862 = vpow2.f32 %v8610_v29  ;;  %v8608_v32 = vmul.f32 1.442695, %v8600_v17  ;;  %v8603_v45 = vsub.f32 %v13108_v34, %v8587_v60  ;;  %v3084_v17 = vld [vmem:[#allocation19 + $0x180] sm:$0x3] }
0x2247   : > { %v8584_v19 = vpop.xlane.xlu0 %8583  ;;  %13143 = vmatprep.subr.msk.mxu0 %vm2083_vm6, %v3084_v17 }
0x2248   : > { %13864 = vpow2.f32 %v8608_v32  ;;  %v8614_v62 = vmul.f32 1.442695, %v8603_v45  ;;  %v8602_v22 = vsub.f32 %v8547_v47, %v8584_v19 }
0x2249   : > { %v8593_v2 = vpop.xlane.xlu1 %8592 }
0x224a   : > { %13866 = vpow2.f32 %v8614_v62  ;;  %v8612_v42 = vmul.f32 1.442695, %v8602_v22  ;;  %v8605_v24 = vsub.f32 %v16269_v30, %v8593_v2 }
0x224b   : > { %v8590_v35 = vpop.xlane.xlu0 %8589 }
0x224c   : > { %13868 = vpow2.f32 %v8612_v42  ;;  %v8618_v46 = vmul.f32 1.442695, %v8605_v24  ;;  %v8604_v58 = vsub.f32 %v16273_v7, %v8590_v35 }
0x224d   : > { %v8599_v63 = vpop.xlane.xlu1 %8598 }
0x224e   : > { %13870 = vpow2.f32 %v8618_v46  ;;  %v8616_v6 = vmul.f32 1.442695, %v8604_v58  ;;  %v8607_v3 = vsub.f32 %v16277_v11, %v8599_v63 }
0x224f   : > { %v8596_v34 = vpop.xlane.xlu0 %8595 }
0x2250   : > { %13872 = vpow2.f32 %v8616_v6  ;;  %v8622_v59 = vmul.f32 1.442695, %v8607_v3  ;;  %v8606_v47 = vsub.f32 %v16281_v61, %v8596_v34  ;;  %v3083_v6 = vld [vmem:[#allocation19 + $0x178] sm:$0xff] }
0x2252   : > { %13874 = vpow2.f32 %v8622_v59  ;;  %v8620_v14 = vmul.f32 1.442695, %v8606_v47  ;;  %v3082_v59 = vld [vmem:[#allocation19 + $0x170] sm:$0xff] }
0x2253   : > { %v13863_v23 = vpop.eup %13862 }
0x2254   : > { %13876 = vpow2.f32 %v8620_v14  ;;  %v8627_v30 = vsel %vm3593_vm7, %v13863_v23, 0.0 }
0x2255   : > { %v13865_v20 = vpop.eup %13864  ;;  %8628 = vadd.xlane.f32.xlu1 %v8627_v30  ;;  %v3081_v30 = vld [vmem:[#allocation19 + $0x168] sm:$0xff] }
0x2256   : > { %v8624_v7 = vsel %vm3593_vm7, %v13865_v20, 0.0 }
0x2257   : > { %v13867_v4 = vpop.eup %13866  ;;  %8625 = vadd.xlane.f32.xlu0 %v8624_v7  ;;  %v3080_v7 = vld [vmem:[#allocation19 + $0x160] sm:$0xff] }
0x2258   : > { %v8633_v18 = vsel %vm3593_vm7, %v13867_v4, 0.0 }
0x2259   : > { %v13869_v11 = vpop.eup %13868  ;;  %8634 = vadd.xlane.f32.xlu1 %v8633_v18 }
0x225a   : > { %v8630_v0 = vsel %vm3593_vm7, %v13869_v11, 0.0 }
0x225b   : > { %v13871_v54 = vpop.eup %13870  ;;  %8631 = vadd.xlane.f32.xlu0 %v8630_v0 }
0x225c   : > { %v8639_v61 = vsel %vm3593_vm7, %v13871_v54, 0.0 }
0x225d   : > { %v13873_v53 = vpop.eup %13872  ;;  %8640 = vadd.xlane.f32.xlu1 %v8639_v61 }
0x225e   : > { %v8636_v9 = vsel %vm3593_vm7, %v13873_v53, 0.0 }
0x225f   : > { %v13875_v13 = vpop.eup %13874  ;;  %8637 = vadd.xlane.f32.xlu0 %v8636_v9 }
0x2260   : > { %v8645_v55 = vsel %vm3593_vm7, %v13875_v13, 0.0 }
0x2261   : > { %v13877_v50 = vpop.eup %13876  ;;  %8646 = vadd.xlane.f32.xlu1 %v8645_v55 }
0x2262   : > { %v8642_v29 = vsel %vm3593_vm7, %v13877_v50, 0.0 }
0x2263   : > { %8643 = vadd.xlane.f32.xlu0 %v8642_v29 }
0x22de   : > { %v8629_v60 = vpop.xlane.xlu1 %8628 }
0x22df   : > { %13878 = vrcp.f32 %v8629_v60 }
0x22e0   : > { %v8626_v32 = vpop.xlane.xlu0 %8625 }
0x22e1   : > { %13880 = vrcp.f32 %v8626_v32  ;;  %v3000_v32 = vld [vmem:[#allocation16 + $0xe0] sm:$0xff] }
0x22e2   : > { %v8635_v45 = vpop.xlane.xlu1 %8634 }
0x22e3   : > { %13882 = vrcp.f32 %v8635_v45 }
0x22e4   : > { %v8632_v19 = vpop.xlane.xlu0 %8631 }
0x22e5   : > { %13884 = vrcp.f32 %v8632_v19 }
0x22e6   : > { %v8641_v62 = vpop.xlane.xlu1 %8640 }
0x22e7   : > { %13886 = vrcp.f32 %v8641_v62 }
0x22e8   : > { %v8638_v22 = vpop.xlane.xlu0 %8637 }
0x22e9   : > { %13888 = vrcp.f32 %v8638_v22 }
0x22ea   : > { %v8647_v2 = vpop.xlane.xlu1 %8646 }
0x22eb   : > { %13890 = vrcp.f32 %v8647_v2 }
0x22ec   : > { %v8644_v42 = vpop.xlane.xlu0 %8643  ;;  %v13879_v24 = vpop.eup %13878 }
0x22ed   : > { %13892 = vrcp.f32 %v8644_v42  ;;  %v8657_v58 = vmul.f32 %v13879_v24, %v13863_v23 }
0x22ee   : > { %v13881_v35 = vpop.eup %13880 }
0x22ef   : > { %v8656_v46 = vmul.f32 %v13881_v35, %v13865_v20 }
0x22f0   : > { %v13883_v63 = vpop.eup %13882 }
0x22f1   : > { %13131 = vmatprep.mubr.msk.f32.mxu0 %vm3593_vm7, %v8656_v46  ;;  %v8659_v47 = vmul.f32 %v13883_v63, %v13867_v4  ;;  %v3079_v4 = vld [vmem:[#allocation19 + $0x158] sm:$0xff] }
0x22f2   : > { %v13885_v3 = vpop.eup %13884  ;;  %13132 = vmatmul.mubr.msk.f32.vlgmr.msra.gmra.mxu0 %vm3593_vm7, %v8657_v58 }
0x22f3   : > { %v8658_v34 = vmul.f32 %v13885_v3, %v13869_v11  ;;  %13144 = vmatpush3.msk.msra.mxu0 %vm2083_vm6, %v3084_v17  ;;  %v3002_v17 = vld [vmem:[#allocation16 + $0xf0] sm:$0xff] }
0x22f4   : > { %13145 = vmatprep.subr.mxu0 %v3083_v6  ;;  %v13887_v14 = vpop.eup %13886 }
0x22f5   : > { %13134 = vmatprep.mubr.msk.f32.mxu0 %vm3593_vm7, %v8658_v34  ;;  %13146 = vmatpush3.msra.mxu0 %v3083_v6  ;;  %v8661_v18 = vmul.f32 %v13887_v14, %v13871_v54  ;;  %v3078_v54 = vld [vmem:[#allocation19 + $0x150] sm:$0xff]  ;;  %v9043_v14 = vmul.f32 0.14142136, %v16293_v15 }
0x22f6   : > { %v13889_v20 = vpop.eup %13888  ;;  %13135 = vmatmul.mubr.msk.f32.gmra.mxu0 %vm3593_vm7, %v8659_v47  ;;  %13147 = vmatprep.subr.mxu0 %v3082_v59  ;;  %v9042_v47 = vmul.f32 0.14142136, %v16295_v40 }
0x22f7   : > { %v8660_v23 = vmul.f32 %v13889_v20, %v13873_v53  ;;  %13148 = vmatpush3.msra.mxu0 %v3082_v59  ;;  %v3003_v53 = vld [vmem:[#allocation16 + $0xf8] sm:$0xff] }
0x22f8   : > { %13149 = vmatprep.subr.mxu0 %v3081_v30  ;;  %v13891_v11 = vpop.eup %13890 }
0x22f9   : > { %13137 = vmatprep.mubr.msk.f32.mxu0 %vm3593_vm7, %v8660_v23  ;;  %13150 = vmatpush3.msra.mxu0 %v3081_v30  ;;  %v8663_v9 = vmul.f32 %v13891_v11, %v13875_v13  ;;  %v3001_v13 = vld [vmem:[#allocation16 + $0xe8] sm:$0xff]  ;;  %v9044_v30 = vmul.f32 0.14142136, %v16299_v43 }
0x22fa   : > { %v13893_v0 = vpop.eup %13892  ;;  %13138 = vmatmul.mubr.msk.f32.gmra.mxu0 %vm3593_vm7, %v8661_v18  ;;  %13151 = vmatprep.subr.mxu0 %v3080_v7 }
0x22fb   : > { %v8662_v61 = vmul.f32 %v13893_v0, %v13877_v50  ;;  %13152 = vmatpush3.msra.mxu0 %v3080_v7 }
0x22fc   : > { %13153 = vmatprep.subr.mxu0 %v3079_v4 }
0x22fd   : > { %13140 = vmatprep.mubr.msk.f32.mxu0 %vm3593_vm7, %v8662_v61  ;;  %13154 = vmatpush3.msra.mxu0 %v3079_v4 }
0x22fe   : > { %13141 = vmatmul.mubr.msk.f32.gmra.mxu0 %vm3593_vm7, %v8663_v9  ;;  %13155 = vmatprep.subr.mxu0 %v3078_v54 }
0x22ff   : > { %13156 = vmatpush3.msra.mxu0 %v3078_v54 }
0x2300   : > { %13189 = vmatprep.subr.mxu0 %v3003_v53 }
0x23b2   : > { %v13133_v55 = vpop.f32.mrf.mxu0 }
0x23b4   : > { %v8754_v29 = vpop.f32.mrf.mxu0 }
0x23b5   : > { %13157 = vmatprep.mubr.msk.f32.mxu0 %vm1702_vm4, %v8754_v29 }
0x23b6   : > { %v13136_v60 = vpop.f32.mrf.mxu0  ;;  %13158 = vmatmul.mubr.msk.f32.vlgmr.msra.gmra.mxu0 %vm1702_vm4, %v13133_v55 }
0x23b7   : > { %13190 = vmatpush3.msra.mxu0 %v3003_v53 }
0x23b8   : > { %v8764_v50 = vpop.f32.mrf.mxu0  ;;  %13191 = vmatprep.subr.mxu0 %v3002_v17 }
0x23b9   : > { %13160 = vmatprep.mubr.msk.f32.mxu0 %vm1702_vm4, %v8764_v50  ;;  %13192 = vmatpush3.msra.mxu0 %v3002_v17 }
0x23ba   : > { %v13139_v45 = vpop.f32.mrf.mxu0  ;;  %13161 = vmatmul.mubr.msk.f32.gmra.mxu0 %vm1702_vm4, %v13136_v60  ;;  %13193 = vmatprep.subr.mxu0 %v3001_v13 }
0x23bb   : > { %13194 = vmatpush3.msra.mxu0 %v3001_v13 }
0x23bc   : > { %v8774_v19 = vpop.f32.mrf.mxu0  ;;  %13195 = vmatprep.subr.mxu0 %v3000_v32 }
0x23bd   : > { %13163 = vmatprep.mubr.msk.f32.mxu0 %vm1702_vm4, %v8774_v19  ;;  %13196 = vmatpush3.msra.mxu0 %v3000_v32 }
0x23be   : > { %v13142_v62 = vpop.f32.mrf.mxu0  ;;  %13164 = vmatmul.mubr.msk.f32.gmra.mxu0 %vm1702_vm4, %v13139_v45 }
0x23c0   : > { %v8784_v22 = vpop.f32.mrf.mxu0 }
0x23c1   : > { %13166 = vmatprep.mubr.msk.f32.mxu0 %vm1702_vm4, %v8784_v22 }
0x23c2   : > { %13167 = vmatmul.mubr.msk.f32.gmra.mxu0 %vm1702_vm4, %v13142_v62 }
0x23c3   : > { %13197 = vmatprep.mubr.msk.f32.mxu0 %vm1236_vm0, %v15171_v31  ;;  %v9038_v31 = vmul.f32 0.14142136, %v16287_v5 }
0x23c6   : > { %13198 = vmatmul.mubr.msk.f32.vlgmr.msra.gmra.mxu0 %vm1236_vm0, %v15173_v12 }
0x23c7   : > { %13200 = vmatprep.mubr.msk.f32.mxu0 %vm1236_vm0, %v15185_v41 }
0x23ca   : > { %13201 = vmatmul.mubr.msk.f32.gmra.mxu0 %vm1236_vm0, %v15187_v38 }
0x23cb   : > { %13203 = vmatprep.mubr.msk.f32.mxu0 %vm1236_vm0, %v15199_v48 }
0x23ce   : > { %13204 = vmatmul.mubr.msk.f32.gmra.mxu0 %vm1236_vm0, %v15202_v49 }
0x23cf   : > { %13206 = vmatprep.mubr.msk.f32.mxu0 %vm1236_vm0, %v15212_v25 }
0x23d2   : > { %13207 = vmatmul.mubr.msk.f32.gmra.mxu0 %vm1236_vm0, %v15214_v27 }
0x23d3   : > { %13245 = vmatprep.mubr.msk.f32.mxu0 %vm1702_vm4, %v9038_v31 }
0x2476   : > { %v13159_v12 = vpop.f32.mrf.mxu0 }
0x2477   : > { %v16350_v41 = vadd.f32 %v13159_v12, %v16180_v1 }
0x2478   : > { %v8886_v38 = vpop.f32.mrf.mxu0 }
0x2479   : > { %v16353_v48 = vadd.f32 %v8886_v38, %v16183_v10 }
0x247a   : > { %v13162_v2 = vpop.f32.mrf.mxu0 }
0x247b   : > { %v16356_v49 = vadd.f32 %v13162_v2, %v16186_v56 }
0x247c   : > { %v8896_v25 = vpop.f32.mrf.mxu0 }
0x247d   : > { %v16359_v5 = vadd.f32 %v8896_v25, %v16189_v26 }
0x247e   : > { %v13165_v42 = vpop.f32.mrf.mxu0 }
0x247f   : > { %v16362_v27 = vadd.f32 %v13165_v42, %v16192_v51 }
0x2480   : > { %v8906_v24 = vpop.f32.mrf.mxu0 }
0x2481   : > { %v16365_v1 = vadd.f32 %v8906_v24, %v16195_v37  ;;  %v9039_v37 = vmul.f32 0.14142136, %v16285_v44  ;;  %v9045_v44 = vmul.f32 0.14142136, %v16297_v57 }
0x2482   : > { %v13168_v35 = vpop.f32.mrf.mxu0 }
0x2483   : > { %v16368_v10 = vadd.f32 %v13168_v35, %v16198_v52  ;;  %v9040_v52 = vmul.f32 0.14142136, %v16291_v21 }
0x2484   : > { %v8916_v46 = vpop.f32.mrf.mxu0 }
0x2485   : > { %v16371_v56 = vadd.f32 %v8916_v46, %v16201_v16  ;;  %v9041_v16 = vmul.f32 0.14142136, %v16289_v33 }
0x2486   : > { %v13199_v58 = vpop.f32.mrf.mxu0 }
0x2488   : > { %v9112_v63 = vpop.f32.mrf.mxu0 }
0x248a   : > { %v13202_v26 = vpop.f32.mrf.mxu0 }
0x248c   : > { %v9122_v6 = vpop.f32.mrf.mxu0 }
0x248e   : > { %v13205_v3 = vpop.f32.mrf.mxu0 }
0x2490   : > { %v9132_v34 = vpop.f32.mrf.mxu0 }
0x2492   : > { %v13208_v51 = vpop.f32.mrf.mxu0 }
0x2493   : > { %13229 = vmatprep.subr.msk.mxu0 %vm1702_vm4, %v13208_v51 }
0x2494   : > { %v9142_v59 = vpop.f32.mrf.mxu0  ;;  %13230 = vmatpush3.xpose.msk.msra.mxu0 %vm1702_vm4, %v13208_v51 }
0x2495   : > { %13231 = vmatprep.subr.msk.mxu0 %vm1702_vm4, %v9142_v59 }
0x2498   : > { %13232 = vmatpush3.xpose.msk.msra.mxu0 %vm1702_vm4, %v9142_v59 }
0x2499   : > { %13233 = vmatprep.subr.msk.mxu0 %vm1702_vm4, %v13205_v3 }
0x249c   : > { %13234 = vmatpush3.xpose.msk.msra.mxu0 %vm1702_vm4, %v13205_v3 }
0x249d   : > { %13235 = vmatprep.subr.msk.mxu0 %vm1702_vm4, %v9132_v34 }
0x24a0   : > { %13236 = vmatpush3.xpose.msk.msra.mxu0 %vm1702_vm4, %v9132_v34 }
0x24a1   : > { %13237 = vmatprep.subr.msk.mxu0 %vm1702_vm4, %v13202_v26 }
0x24a4   : > { %13238 = vmatpush3.xpose.msk.msra.mxu0 %vm1702_vm4, %v13202_v26 }
0x24a5   : > { %13239 = vmatprep.subr.msk.mxu0 %vm1702_vm4, %v9122_v6 }
0x24a8   : > { %13240 = vmatpush3.xpose.msk.msra.mxu0 %vm1702_vm4, %v9122_v6 }
0x24a9   : > { %13241 = vmatprep.subr.msk.mxu0 %vm1702_vm4, %v13199_v58 }
0x24ac   : > { %13242 = vmatpush3.xpose.msk.msra.mxu0 %vm1702_vm4, %v13199_v58 }
0x24ad   : > { %13243 = vmatprep.subr.msk.mxu0 %vm1702_vm4, %v9112_v63 }
0x24b0   : > { %13244 = vmatpush3.xpose.msk.msra.mxu0 %vm1702_vm4, %v9112_v63 }
0x24b3   : > { %13246 = vmatmul.mubr.msk.f32.vlgmr.msra.gmra.mxu0 %vm1702_vm4, %v9039_v37 }
0x24b4   : > { %13248 = vmatprep.mubr.msk.f32.mxu0 %vm1702_vm4, %v9040_v52 }
0x24b7   : > { %13249 = vmatmul.mubr.msk.f32.gmra.mxu0 %vm1702_vm4, %v9041_v16 }
0x24b8   : > { %13251 = vmatprep.mubr.msk.f32.mxu0 %vm1702_vm4, %v9042_v47 }
0x24bb   : > { %13252 = vmatmul.mubr.msk.f32.gmra.mxu0 %vm1702_vm4, %v9043_v14 }
0x24bc   : > { %13254 = vmatprep.mubr.msk.f32.mxu0 %vm1702_vm4, %v9044_v30 }
0x24bf   : > { %13255 = vmatmul.mubr.msk.f32.gmra.mxu0 %vm1702_vm4, %v9045_v44 }
0x2573   : > { %v13247_v21 = vpop.f32.mrf.mxu0 }
0x2574   : > { %v9412_v33 = vsel %vm3593_vm7, %v13247_v21, -inf }
0x2575   : > { %9413 = vmax.xlane.f32.xlu1 %v9412_v33  ;;  %v9370_v40 = vpop.f32.mrf.mxu0 }
0x2576   : > { %v9409_v20 = vsel %vm3593_vm7, %v9370_v40, -inf }
0x2577   : > { %9410 = vmax.xlane.f32.xlu0 %v9409_v20  ;;  %v13250_v23 = vpop.f32.mrf.mxu0 }
0x2578   : > { %v9418_v15 = vsel %vm3593_vm7, %v13250_v23, -inf }
0x2579   : > { %9419 = vmax.xlane.f32.xlu1 %v9418_v15  ;;  %v9380_v43 = vpop.f32.mrf.mxu0 }
0x257a   : > { %v9415_v7 = vsel %vm3593_vm7, %v9380_v43, -inf }
0x257b   : > { %9416 = vmax.xlane.f32.xlu0 %v9415_v7  ;;  %v13253_v18 = vpop.f32.mrf.mxu0 }
0x257c   : > { %v9424_v57 = vsel %vm3593_vm7, %v13253_v18, -inf }
0x257d   : > { %9425 = vmax.xlane.f32.xlu1 %v9424_v57  ;;  %v9390_v11 = vpop.f32.mrf.mxu0 }
0x257e   : > { %v9421_v4 = vsel %vm3593_vm7, %v9390_v11, -inf }
0x257f   : > { %9422 = vmax.xlane.f32.xlu0 %v9421_v4  ;;  %v13256_v0 = vpop.f32.mrf.mxu0 }
0x2580   : > { %v9430_v61 = vsel %vm3593_vm7, %v13256_v0, -inf }
0x2581   : > { %9431 = vmax.xlane.f32.xlu1 %v9430_v61  ;;  %v9400_v9 = vpop.f32.mrf.mxu0 }
0x2582   : > { %v9427_v54 = vsel %vm3593_vm7, %v9400_v9, -inf }
0x2583   : > { %9428 = vmax.xlane.f32.xlu0 %v9427_v54 }
0x25fe   : > { %v9414_v53 = vpop.xlane.xlu1 %9413 }
0x25ff   : > { %v9434_v55 = vsub.f32 %v13247_v21, %v9414_v53 }
0x2600   : > { %v9411_v29 = vpop.xlane.xlu0 %9410 }
0x2601   : > { %v9443_v17 = vmul.f32 1.442695, %v9434_v55  ;;  %v9433_v60 = vsub.f32 %v9370_v40, %v9411_v29  ;;  %v3090_v29 = vld [vmem:[#allocation19 + $0x1b0] sm:$0xff] }
0x2602   : > { %v9420_v13 = vpop.xlane.xlu1 %9419 }
0x2603   : > { %13894 = vpow2.f32 %v9443_v17  ;;  %v9441_v50 = vmul.f32 1.442695, %v9433_v60  ;;  %v9436_v32 = vsub.f32 %v13250_v23, %v9420_v13  ;;  %v3091_v23 = vld [vmem:[#allocation19 + $0x1b8] sm:$0x3]  ;;  %v3089_v13 = vld [vmem:[#allocation19 + $0x1a8] sm:$0xff] }
0x2604   : > { %v9417_v45 = vpop.xlane.xlu0 %9416  ;;  %13285 = vmatprep.subr.msk.mxu1 %vm2083_vm6, %v3091_v23 }
0x2605   : > { %13896 = vpow2.f32 %v9441_v50  ;;  %v9447_v19 = vmul.f32 1.442695, %v9436_v32  ;;  %v9435_v62 = vsub.f32 %v9380_v43, %v9417_v45  ;;  %v3088_v45 = vld [vmem:[#allocation19 + $0x1a0] sm:$0xff] }
0x2606   : > { %v9426_v22 = vpop.xlane.xlu1 %9425 }
0x2607   : > { %13898 = vpow2.f32 %v9447_v19  ;;  %v9445_v31 = vmul.f32 1.442695, %v9435_v62  ;;  %v9438_v12 = vsub.f32 %v13253_v18, %v9426_v22  ;;  %v3087_v22 = vld [vmem:[#allocation19 + $0x198] sm:$0xff] }
0x2608   : > { %v9423_v38 = vpop.xlane.xlu0 %9422 }
0x2609   : > { %13900 = vpow2.f32 %v9445_v31  ;;  %v9451_v2 = vmul.f32 1.442695, %v9438_v12  ;;  %v9437_v25 = vsub.f32 %v9390_v11, %v9423_v38  ;;  %v3086_v38 = vld [vmem:[#allocation19 + $0x190] sm:$0xff] }
0x260a   : > { %v9432_v42 = vpop.xlane.xlu1 %9431 }
0x260b   : > { %13902 = vpow2.f32 %v9451_v2  ;;  %v9449_v24 = vmul.f32 1.442695, %v9437_v25  ;;  %v9440_v35 = vsub.f32 %v13256_v0, %v9432_v42 }
0x260c   : > { %v9429_v46 = vpop.xlane.xlu0 %9428 }
0x260d   : > { %13904 = vpow2.f32 %v9449_v24  ;;  %v9455_v58 = vmul.f32 1.442695, %v9440_v35  ;;  %v9439_v63 = vsub.f32 %v9400_v9, %v9429_v46  ;;  %v3085_v24 = vld [vmem:[#allocation19 + $0x188] sm:$0xff] }
0x260f   : > { %13906 = vpow2.f32 %v9455_v58  ;;  %v9453_v26 = vmul.f32 1.442695, %v9439_v63 }
0x2610   : > { %v13895_v6 = vpop.eup %13894 }
0x2611   : > { %13908 = vpow2.f32 %v9453_v26  ;;  %v9460_v3 = vsel %vm3593_vm7, %v13895_v6, 0.0 }
0x2612   : > { %v13897_v34 = vpop.eup %13896  ;;  %9461 = vadd.xlane.f32.xlu1 %v9460_v3 }
0x2613   : > { %v9457_v51 = vsel %vm3593_vm7, %v13897_v34, 0.0 }
0x2614   : > { %v13899_v59 = vpop.eup %13898  ;;  %9458 = vadd.xlane.f32.xlu0 %v9457_v51  ;;  %v11173_v51 = vld [vmem:[%s16707_s28] ss:$0 sm:$0xff] }
0x2615   : > { %v9466_v37 = vsel %vm3593_vm7, %v13899_v59, 0.0 }
0x2616   : > { %v13901_v52 = vpop.eup %13900  ;;  %9467 = vadd.xlane.f32.xlu1 %v9466_v37 }
0x2617   : > { %v9463_v16 = vsel %vm3593_vm7, %v13901_v52, 0.0 }
0x2618   : > { %v13903_v47 = vpop.eup %13902  ;;  %9464 = vadd.xlane.f32.xlu0 %v9463_v16 }
0x2619   : > { %v9472_v14 = vsel %vm3593_vm7, %v13903_v47, 0.0 }
0x261a   : > { %v13905_v30 = vpop.eup %13904  ;;  %9473 = vadd.xlane.f32.xlu1 %v9472_v14 }
0x261b   : > { %v9469_v44 = vsel %vm3593_vm7, %v13905_v30, 0.0 }
0x261c   : > { %v13907_v21 = vpop.eup %13906  ;;  %9470 = vadd.xlane.f32.xlu0 %v9469_v44 }
0x261d   : > { %v9478_v33 = vsel %vm3593_vm7, %v13907_v21, 0.0 }
0x261e   : > { %v13909_v40 = vpop.eup %13908  ;;  %9479 = vadd.xlane.f32.xlu1 %v9478_v33 }
0x261f   : > { %v9475_v20 = vsel %vm3593_vm7, %v13909_v40, 0.0 }
0x2620   : > { %9476 = vadd.xlane.f32.xlu0 %v9475_v20 }
0x269b   : > { %v9462_v15 = vpop.xlane.xlu1 %9461 }
0x269c   : > { %13910 = vrcp.f32 %v9462_v15 }
0x269d   : > { %v9459_v43 = vpop.xlane.xlu0 %9458 }
0x269e   : > { %13912 = vrcp.f32 %v9459_v43 }
0x269f   : > { %v9468_v7 = vpop.xlane.xlu1 %9467 }
0x26a0   : > { %13914 = vrcp.f32 %v9468_v7 }
0x26a1   : > { %v9465_v18 = vpop.xlane.xlu0 %9464 }
0x26a2   : > { %13916 = vrcp.f32 %v9465_v18 }
0x26a3   : > { %v9474_v57 = vpop.xlane.xlu1 %9473 }
0x26a4   : > { %13918 = vrcp.f32 %v9474_v57 }
0x26a5   : > { %v9471_v11 = vpop.xlane.xlu0 %9470 }
0x26a6   : > { %13920 = vrcp.f32 %v9471_v11  ;;  %v16708_v11 = vld [vmem:[#allocation47_spill] sm:$0xff] }
0x26a7   : > { %v9480_v4 = vpop.xlane.xlu1 %9479 }
0x26a8   : > { %13922 = vrcp.f32 %v9480_v4 }
0x26a9   : > { %v9477_v0 = vpop.xlane.xlu0 %9476  ;;  %v13911_v61 = vpop.eup %13910 }
0x26aa   : > { %13924 = vrcp.f32 %v9477_v0  ;;  %v9490_v53 = vmul.f32 %v13911_v61, %v13895_v6 }
0x26ab   : > { %v13913_v9 = vpop.eup %13912 }
0x26ac   : > { %v9489_v54 = vmul.f32 %v13913_v9, %v13897_v34  ;;  %v16709_v9 = vld [vmem:[#allocation48_spill] sm:$0xff] }
0x26ad   : > { %v13915_v55 = vpop.eup %13914 }
0x26ae   : > { %13273 = vmatprep.mubr.msk.f32.mxu1 %vm3593_vm7, %v9489_v54  ;;  %v9492_v50 = vmul.f32 %v13915_v55, %v13899_v59 }
0x26af   : > { %v13917_v17 = vpop.eup %13916  ;;  %13274 = vmatmul.mubr.msk.f32.vlgmr.msra.gmra.mxu1 %vm3593_vm7, %v9490_v53 }
0x26b0   : > { %v9491_v60 = vmul.f32 %v13917_v17, %v13901_v52  ;;  %13286 = vmatpush3.msk.msra.mxu1 %vm2083_vm6, %v3091_v23 }
0x26b1   : > { %13287 = vmatprep.subr.mxu1 %v3090_v29  ;;  %v13919_v32 = vpop.eup %13918 }
0x26b2   : > { %13276 = vmatprep.mubr.msk.f32.mxu1 %vm3593_vm7, %v9491_v60  ;;  %13288 = vmatpush3.msra.mxu1 %v3090_v29  ;;  %v9494_v31 = vmul.f32 %v13919_v32, %v13903_v47  ;;  %v16710_v29 = vld [vmem:[#allocation49_spill] sm:$0xff] }
0x26b3   : > { %v13921_v19 = vpop.eup %13920  ;;  %13277 = vmatmul.mubr.msk.f32.gmra.mxu1 %vm3593_vm7, %v9492_v50  ;;  %13289 = vmatprep.subr.mxu1 %v3089_v13 }
0x26b4   : > { %v9493_v62 = vmul.f32 %v13921_v19, %v13905_v30  ;;  %13290 = vmatpush3.msra.mxu1 %v3089_v13  ;;  %v16711_v13 = vld [vmem:[#allocation50_spill] sm:$0xff] }
0x26b5   : > { %13291 = vmatprep.subr.mxu1 %v3088_v45  ;;  %v13923_v12 = vpop.eup %13922 }
0x26b6   : > { %13279 = vmatprep.mubr.msk.f32.mxu1 %vm3593_vm7, %v9493_v62  ;;  %13292 = vmatpush3.msra.mxu1 %v3088_v45  ;;  %v9496_v42 = vmul.f32 %v13923_v12, %v13907_v21 }
0x26b7   : > { %v13925_v2 = vpop.eup %13924  ;;  %13280 = vmatmul.mubr.msk.f32.gmra.mxu1 %vm3593_vm7, %v9494_v31  ;;  %13293 = vmatprep.subr.mxu1 %v3087_v22 }
0x26b8   : > { %v9495_v25 = vmul.f32 %v13925_v2, %v13909_v40  ;;  %13294 = vmatpush3.msra.mxu1 %v3087_v22 }
0x26b9   : > { %13295 = vmatprep.subr.mxu1 %v3086_v38 }
0x26ba   : > { %13282 = vmatprep.mubr.msk.f32.mxu1 %vm3593_vm7, %v9495_v25  ;;  %13296 = vmatpush3.msra.mxu1 %v3086_v38 }
0x26bb   : > { %13283 = vmatmul.mubr.msk.f32.gmra.mxu1 %vm3593_vm7, %v9496_v42  ;;  %13297 = vmatprep.subr.mxu1 %v3085_v24 }
0x26bc   : > { %13298 = vmatpush3.msra.mxu1 %v3085_v24 }
0x276f   : > { %v13275_v35 = vpop.f32.mrf.mxu1 }
0x2771   : > { %v9587_v46 = vpop.f32.mrf.mxu1 }
0x2772   : > { %13299 = vmatprep.mubr.msk.f32.mxu1 %vm1702_vm4, %v9587_v46 }
0x2773   : > { %v13278_v58 = vpop.f32.mrf.mxu1  ;;  %13300 = vmatmul.mubr.msk.f32.vlgmr.msra.gmra.mxu1 %vm1702_vm4, %v13275_v35 }
0x2775   : > { %v9597_v63 = vpop.f32.mrf.mxu1 }
0x2776   : > { %13302 = vmatprep.mubr.msk.f32.mxu1 %vm1702_vm4, %v9597_v63 }
0x2777   : > { %v13281_v26 = vpop.f32.mrf.mxu1  ;;  %13303 = vmatmul.mubr.msk.f32.gmra.mxu1 %vm1702_vm4, %v13278_v58 }
0x2779   : > { %v9607_v6 = vpop.f32.mrf.mxu1 }
0x277a   : > { %13305 = vmatprep.mubr.msk.f32.mxu1 %vm1702_vm4, %v9607_v6 }
0x277b   : > { %v13284_v3 = vpop.f32.mrf.mxu1  ;;  %13306 = vmatmul.mubr.msk.f32.gmra.mxu1 %vm1702_vm4, %v13281_v26 }
0x277d   : > { %v9617_v34 = vpop.f32.mrf.mxu1 }
0x277e   : > { %13308 = vmatprep.mubr.msk.f32.mxu1 %vm1702_vm4, %v9617_v34 }
0x277f   : > { %13309 = vmatmul.mubr.msk.f32.gmra.mxu1 %vm1702_vm4, %v13284_v3 }
0x2833   : > { %v13301_v59 = vpop.f32.mrf.mxu1 }
0x2834   : > { %v9759_v37 = vadd.f32 %v13301_v59, %v16350_v41 }
0x2835   : > { %v9719_v52 = vpop.f32.mrf.mxu1 }
0x2836   : > { %v9773_v16 = vadd.f32 %v11173_v51, %v9759_v37  ;;  %v9758_v47 = vadd.f32 %v9719_v52, %v16353_v48 }
0x2837   : > { %v13304_v14 = vpop.f32.mrf.mxu1 }
0x2838   : > { %v16441_v30 = vadd.f32 %v9773_v16, %v15079_v28  ;;  %v9772_v44 = vadd.f32 %v11173_v51, %v9758_v47  ;;  %v9761_v21 = vadd.f32 %v13304_v14, %v16356_v49 }
0x2839   : > { %v9729_v33 = vpop.f32.mrf.mxu1 }
0x283a   : > { %v16445_v40 = vadd.f32 %v9772_v44, %v15082_v8  ;;  %v9775_v20 = vadd.f32 %v11173_v51, %v9761_v21  ;;  %v9760_v23 = vadd.f32 %v9729_v33, %v16359_v5  ;;  %v9820_v41 = vsel %vm1236_vm0, %v16441_v30, 0.0 }
0x283b   : > { %9821 = vadd.xlane.f32.xlu1 %v9820_v41  ;;  %v13307_v15 = vpop.f32.mrf.mxu1 }
0x283c   : > { %v16451_v48 = vadd.f32 %v9775_v20, %v15089_v39  ;;  %v9774_v28 = vadd.f32 %v11173_v51, %v9760_v23  ;;  %v9763_v43 = vadd.f32 %v13307_v15, %v16362_v27  ;;  %v9817_v49 = vsel %vm1236_vm0, %v16445_v40, 0.0 }
0x283d   : > { %9818 = vadd.xlane.f32.xlu0 %v9817_v49  ;;  %v9739_v8 = vpop.f32.mrf.mxu1 }
0x283e   : > { %v16457_v7 = vadd.f32 %v9774_v28, %v15092_v36  ;;  %v9777_v5 = vadd.f32 %v11173_v51, %v9763_v43  ;;  %v9762_v18 = vadd.f32 %v9739_v8, %v16365_v1  ;;  %v9826_v57 = vsel %vm1236_vm0, %v16451_v48, 0.0 }
0x283f   : > { %9827 = vadd.xlane.f32.xlu1 %v9826_v57  ;;  %v13310_v39 = vpop.f32.mrf.mxu1 }
0x2840   : > { %v16463_v4 = vadd.f32 %v9777_v5, %v16708_v11  ;;  %v9776_v27 = vadd.f32 %v11173_v51, %v9762_v18  ;;  %v9765_v0 = vadd.f32 %v13310_v39, %v16368_v10  ;;  %v9823_v61 = vsel %vm1236_vm0, %v16457_v7, 0.0  ;;  %v9798_v39 = vld [vmem:[%s16712_s11 + $0x18] sm:$0xff] }
0x2841   : > { %9824 = vadd.xlane.f32.xlu0 %v9823_v61  ;;  %v9749_v36 = vpop.f32.mrf.mxu1  ;;  %v9793_v11 = vld [vmem:[%s16713_s23 + $0x18] sm:$0xff]  ;;  %13331 = vmatprep.subr.mxu1 %v9798_v39  ;;  %v9796_v61 = vld [vmem:[%s16712_s11 + $0x8] sm:$0xff] }
0x2842   : > { %v16469_v54 = vadd.f32 %v9776_v27, %v16709_v9  ;;  %v9779_v1 = vadd.f32 %v11173_v51, %v9765_v0  ;;  %v9764_v53 = vadd.f32 %v9749_v36, %v16371_v56  ;;  %v9832_v55 = vsel %vm1236_vm0, %v16463_v4, 0.0  ;;  %13311 = vmatprep.subr.mxu0 %v9793_v11  ;;  %13332 = vmatpush3.msra.mxu1 %v9798_v39  ;;  %v9797_v27 = vld [vmem:[%s16712_s11 + $0x10] sm:$0xff]  ;;  %v9791_v36 = vld [vmem:[%s16713_s23 + $0x8] sm:$0xff]  ;;  %v9795_v9 = vld [vmem:[%s16712_s11] sm:$0xff] }
0x2843   : > { %9833 = vadd.xlane.f32.xlu1 %v9832_v55  ;;  %13312 = vmatpush3.msra.mxu0 %v9793_v11  ;;  %v9792_v0 = vld [vmem:[%s16713_s23 + $0x10] sm:$0xff] }
0x2844   : > { %v16475_v17 = vadd.f32 %v9779_v1, %v16710_v29  ;;  %v9778_v60 = vadd.f32 %v11173_v51, %v9764_v53  ;;  %v9829_v10 = vsel %vm1236_vm0, %v16469_v54, 0.0  ;;  %13333 = vmatprep.subr.mxu1 %v9797_v27  ;;  %13313 = vmatprep.subr.mxu0 %v9792_v0  ;;  %v9790_v1 = vld [vmem:[%s16713_s23] sm:$0xff] }
0x2845   : > { %9830 = vadd.xlane.f32.xlu0 %v9829_v10  ;;  %13334 = vmatpush3.msra.mxu1 %v9797_v27 }
0x2846   : > { %v16480_v50 = vadd.f32 %v9778_v60, %v16711_v13  ;;  %v9838_v32 = vsel %vm1236_vm0, %v16475_v17, 0.0  ;;  %13314 = vmatpush3.msra.mxu0 %v9792_v0  ;;  %13335 = vmatprep.subr.mxu1 %v9796_v61 }
0x2847   : > { %9839 = vadd.xlane.f32.xlu1 %v9838_v32  ;;  %13315 = vmatprep.subr.mxu0 %v9791_v36 }
0x2848   : > { %v9835_v56 = vsel %vm1236_vm0, %v16480_v50, 0.0  ;;  %13336 = vmatpush3.msra.mxu1 %v9796_v61  ;;  %13316 = vmatpush3.msra.mxu0 %v9791_v36 }
0x2849   : > { %9836 = vadd.xlane.f32.xlu0 %v9835_v56  ;;  %13337 = vmatprep.subr.mxu1 %v9795_v9 }
0x284a   : > { %13317 = vmatprep.subr.mxu0 %v9790_v1  ;;  %13338 = vmatpush3.msra.mxu1 %v9795_v9 }
0x284b   : > { %13318 = vmatpush3.msra.mxu0 %v9790_v1 }
0x28c4   : > { %v9822_v45 = vpop.xlane.xlu1 %9821 }
0x28c5   : > { %v9842_v19 = vmul.f32 0.03125, %v9822_v45 }
0x28c6   : > { %v9819_v62 = vpop.xlane.xlu0 %9818 }
0x28c7   : > { %v16487_v22 = vsub.f32 %v16441_v30, %v9842_v19  ;;  %v9841_v31 = vmul.f32 0.03125, %v9819_v62 }
0x28c8   : > { %v9828_v12 = vpop.xlane.xlu1 %9827 }
0x28c9   : > { %v16490_v38 = vsub.f32 %v16445_v40, %v9841_v31  ;;  %v9844_v2 = vmul.f32 0.03125, %v9828_v12  ;;  %v9858_v25 = vmul.f32 %v16487_v22, %v16487_v22 }
0x28ca   : > { %v9825_v42 = vpop.xlane.xlu0 %9824 }
0x28cb   : > { %v16495_v24 = vsub.f32 %v16451_v48, %v9844_v2  ;;  %v9843_v35 = vmul.f32 0.03125, %v9825_v42  ;;  %v9868_v46 = vsel %vm1236_vm0, %v9858_v25, 0.0  ;;  %v9857_v58 = vmul.f32 %v16490_v38, %v16490_v38 }
0x28cc   : > { %v9834_v63 = vpop.xlane.xlu1 %9833  ;;  %9869 = vadd.xlane.f32.xlu1 %v9868_v46 }
0x28cd   : > { %v16501_v26 = vsub.f32 %v16457_v7, %v9843_v35  ;;  %v9846_v6 = vmul.f32 0.03125, %v9834_v63  ;;  %v9865_v3 = vsel %vm1236_vm0, %v9857_v58, 0.0  ;;  %v9860_v34 = vmul.f32 %v16495_v24, %v16495_v24 }
0x28ce   : > { %v9831_v51 = vpop.xlane.xlu0 %9830  ;;  %9866 = vadd.xlane.f32.xlu0 %v9865_v3 }
0x28cf   : > { %v16507_v59 = vsub.f32 %v16463_v4, %v9846_v6  ;;  %v9845_v37 = vmul.f32 0.03125, %v9831_v51  ;;  %v9874_v52 = vsel %vm1236_vm0, %v9860_v34, 0.0  ;;  %v9859_v16 = vmul.f32 %v16501_v26, %v16501_v26 }
0x28d0   : > { %9875 = vadd.xlane.f32.xlu1 %v9874_v52  ;;  %v9840_v47 = vpop.xlane.xlu1 %9839  ;;  %v11174_v52 = vld [vmem:[%s16714_s1] ss:$0 sm:$0xff] }
0x28d1   : > { %v16513_v14 = vsub.f32 %v16469_v54, %v9845_v37  ;;  %v9848_v44 = vmul.f32 0.03125, %v9840_v47  ;;  %v9871_v21 = vsel %vm1236_vm0, %v9859_v16, 0.0  ;;  %v9862_v33 = vmul.f32 %v16507_v59, %v16507_v59 }
0x28d2   : > { %9872 = vadd.xlane.f32.xlu0 %v9871_v21  ;;  %v9837_v20 = vpop.xlane.xlu0 %9836 }
0x28d3   : > { %v16519_v23 = vsub.f32 %v16475_v17, %v9848_v44  ;;  %v9847_v41 = vmul.f32 0.03125, %v9837_v20  ;;  %v9880_v15 = vsel %vm1236_vm0, %v9862_v33, 0.0  ;;  %v9861_v28 = vmul.f32 %v16513_v14, %v16513_v14  ;;  %v11175_v20 = vld [vmem:[%s16715_s6] ss:$0 sm:$0xff] }
0x28d4   : > { %9881 = vadd.xlane.f32.xlu1 %v9880_v15 }
0x28d5   : > { %v16525_v43 = vsub.f32 %v16480_v50, %v9847_v41  ;;  %v9877_v49 = vsel %vm1236_vm0, %v9861_v28, 0.0  ;;  %v9864_v8 = vmul.f32 %v16519_v23, %v16519_v23 }
0x28d6   : > { %9878 = vadd.xlane.f32.xlu0 %v9877_v49 }
0x28d7   : > { %v9886_v5 = vsel %vm1236_vm0, %v9864_v8, 0.0  ;;  %v9863_v18 = vmul.f32 %v16525_v43, %v16525_v43 }
0x28d8   : > { %9887 = vadd.xlane.f32.xlu1 %v9886_v5 }
0x28d9   : > { %v9883_v57 = vsel %vm1236_vm0, %v9863_v18, 0.0 }
0x28da   : > { %9884 = vadd.xlane.f32.xlu0 %v9883_v57 }
0x2955   : > { %v9870_v53 = vpop.xlane.xlu1 %9869 }
0x2956   : > { %v9890_v55 = vmul.f32 0.03125, %v9870_v53 }
0x2957   : > { %v9867_v29 = vpop.xlane.xlu0 %9866 }
0x2958   : > { %v9898_v60 = vadd.f32 1e-05, %v9890_v55  ;;  %v9889_v10 = vmul.f32 0.03125, %v9867_v29 }
0x2959   : > { %v9876_v13 = vpop.xlane.xlu1 %9875 }
0x295a   : > { %13926 = vrsqrt.f32 %v9898_v60  ;;  %v9897_v32 = vadd.f32 1e-05, %v9889_v10  ;;  %v9892_v56 = vmul.f32 0.03125, %v9876_v13  ;;  %v9814_v60 = vld [vmem:[#allocation21 + $0x70] sm:$0xff]  ;;  %v9813_v10 = vld [vmem:[#allocation21 + $0x68] sm:$0xff]  ;;  %v9812_v13 = vld [vmem:[#allocation21 + $0x60] sm:$0xff] }
0x295b   : > { %v9873_v45 = vpop.xlane.xlu0 %9872 }
0x295c   : > { %13928 = vrsqrt.f32 %v9897_v32  ;;  %v9900_v19 = vadd.f32 1e-05, %v9892_v56  ;;  %v9891_v62 = vmul.f32 0.03125, %v9873_v45  ;;  %v9811_v32 = vld [vmem:[#allocation21 + $0x58] sm:$0xff]  ;;  %v9810_v56 = vld [vmem:[#allocation21 + $0x50] sm:$0xff]  ;;  %v9809_v45 = vld [vmem:[#allocation21 + $0x48] sm:$0xff] }
0x295d   : > { %v9882_v31 = vpop.xlane.xlu1 %9881 }
0x295e   : > { %13930 = vrsqrt.f32 %v9900_v19  ;;  %v9899_v12 = vadd.f32 1e-05, %v9891_v62  ;;  %v9894_v2 = vmul.f32 0.03125, %v9882_v31  ;;  %v9808_v19 = vld [vmem:[#allocation21 + $0x40] sm:$0xff]  ;;  %v9807_v62 = vld [vmem:[#allocation21 + $0x38] sm:$0xff]  ;;  %v9806_v31 = vld [vmem:[#allocation21 + $0x30] sm:$0xff] }
0x295f   : > { %v9879_v25 = vpop.xlane.xlu0 %9878 }
0x2960   : > { %13932 = vrsqrt.f32 %v9899_v12  ;;  %v9902_v42 = vadd.f32 1e-05, %v9894_v2  ;;  %v9893_v35 = vmul.f32 0.03125, %v9879_v25  ;;  %v9805_v12 = vld [vmem:[#allocation21 + $0x28] sm:$0xff]  ;;  %v9804_v2 = vld [vmem:[#allocation21 + $0x20] sm:$0xff]  ;;  %v9803_v25 = vld [vmem:[#allocation21 + $0x18] sm:$0xff] }
0x2961   : > { %v9888_v46 = vpop.xlane.xlu1 %9887 }
0x2962   : > { %13934 = vrsqrt.f32 %v9902_v42  ;;  %v9901_v58 = vadd.f32 1e-05, %v9893_v35  ;;  %v9896_v63 = vmul.f32 0.03125, %v9888_v46  ;;  %v9802_v42 = vld [vmem:[#allocation21 + $0x10] sm:$0xff]  ;;  %v9801_v35 = vld [vmem:[#allocation21 + $0x8] sm:$0xff]  ;;  %v9800_v46 = vld [vmem:[#allocation21] sm:$0xff] }
0x2963   : > { %v9885_v6 = vpop.xlane.xlu0 %9884 }
0x2964   : > { %13936 = vrsqrt.f32 %v9901_v58  ;;  %v9904_v3 = vadd.f32 1e-05, %v9896_v63  ;;  %v9895_v34 = vmul.f32 0.03125, %v9885_v6  ;;  %v11185_v58 = vld [vmem:[%s14546_s21] ss:$0 sm:$0xff] }
0x2966   : > { %13938 = vrsqrt.f32 %v9904_v3  ;;  %v9903_v51 = vadd.f32 1e-05, %v9895_v34 }
0x2967   : > { %v13927_v37 = vpop.eup %13926 }
0x2968   : > { %v9914_v16 = vmul.f32 %v13927_v37, %v16487_v22  ;;  %13940 = vrsqrt.f32 %v9903_v51 }
0x2969   : > { %v13929_v47 = vpop.eup %13928 }
0x296a   : > { %v9913_v44 = vmul.f32 %v13929_v47, %v16490_v38  ;;  %v9928_v33 = vmul.f32 %v11174_v52, %v9914_v16 }
0x296b   : > { %v13931_v21 = vpop.eup %13930 }
0x296c   : > { %v9916_v41 = vmul.f32 %v13931_v21, %v16495_v24  ;;  %v9927_v15 = vmul.f32 %v11174_v52, %v9913_v44  ;;  %v9942_v18 = vadd.f32 %v11175_v20, %v9928_v33 }
0x296d   : > { %v13933_v28 = vpop.eup %13932 }
0x296e   : > { %v9941_v49 = vadd.f32 %v11175_v20, %v9927_v15  ;;  %v9915_v8 = vmul.f32 %v13933_v28, %v16501_v26  ;;  %v9930_v57 = vmul.f32 %v11174_v52, %v9916_v41 }
0x296f   : > { %v13935_v5 = vpop.eup %13934 }
0x2970   : > { %v9918_v39 = vmul.f32 %v13935_v5, %v16507_v59  ;;  %13319 = vmatprep.mubr.msk.f32.mxu0 %vm1236_vm0, %v9941_v49  ;;  %13339 = vmatprep.mubr.msk.f32.mxu1 %vm1236_vm0, %v9941_v49  ;;  %v9929_v22 = vmul.f32 %v11174_v52, %v9915_v8  ;;  %v9944_v26 = vadd.f32 %v11175_v20, %v9930_v57 }
0x2971   : > { %v13937_v38 = vpop.eup %13936  ;;  %13320 = vmatmul.mubr.msk.f32.vlgmr.msra.gmra.mxu0 %vm1236_vm0, %v9942_v18  ;;  %13340 = vmatmul.mubr.msk.f32.vlgmr.msra.gmra.mxu1 %vm1236_vm0, %v9942_v18 }
0x2972   : > { %v9943_v24 = vadd.f32 %v11175_v20, %v9929_v22  ;;  %v9917_v11 = vmul.f32 %v13937_v38, %v16513_v14  ;;  %v9932_v0 = vmul.f32 %v11174_v52, %v9918_v39 }
0x2973   : > { %v13939_v27 = vpop.eup %13938 }
0x2974   : > { %v9920_v61 = vmul.f32 %v13939_v27, %v16519_v23  ;;  %13322 = vmatprep.mubr.msk.f32.mxu0 %vm1236_vm0, %v9943_v24  ;;  %13342 = vmatprep.mubr.msk.f32.mxu1 %vm1236_vm0, %v9943_v24  ;;  %v9931_v59 = vmul.f32 %v11174_v52, %v9917_v11  ;;  %v9946_v53 = vadd.f32 %v11175_v20, %v9932_v0 }
0x2975   : > { %v13941_v36 = vpop.eup %13940  ;;  %13323 = vmatmul.mubr.msk.f32.gmra.mxu0 %vm1236_vm0, %v9944_v26  ;;  %13343 = vmatmul.mubr.msk.f32.gmra.mxu1 %vm1236_vm0, %v9944_v26 }
0x2976   : > { %v9945_v9 = vadd.f32 %v11175_v20, %v9931_v59  ;;  %v9919_v1 = vmul.f32 %v13941_v36, %v16525_v43  ;;  %v9934_v14 = vmul.f32 %v11174_v52, %v9920_v61  ;;  %v9815_v43 = vld [vmem:[#allocation21 + $0x78] sm:$0xff] }
0x2977   : > { %13351 = vmatprep.subr.mxu0 %v9815_v43 }
0x2978   : > { %13325 = vmatprep.mubr.msk.f32.mxu0 %vm1236_vm0, %v9945_v9  ;;  %13345 = vmatprep.mubr.msk.f32.mxu1 %vm1236_vm0, %v9945_v9  ;;  %v9933_v23 = vmul.f32 %v11174_v52, %v9919_v1  ;;  %v9948_v29 = vadd.f32 %v11175_v20, %v9934_v14 }
0x2979   : > { %13326 = vmatmul.mubr.msk.f32.gmra.mxu0 %vm1236_vm0, %v9946_v53  ;;  %13346 = vmatmul.mubr.msk.f32.gmra.mxu1 %vm1236_vm0, %v9946_v53 }
0x297a   : > { %v9947_v55 = vadd.f32 %v11175_v20, %v9933_v23  ;;  %13352 = vmatpush3.msra.mxu0 %v9815_v43 }
0x297b   : > { %13353 = vmatprep.subr.mxu0 %v9814_v60 }
0x297c   : > { %13328 = vmatprep.mubr.msk.f32.mxu0 %vm1236_vm0, %v9947_v55  ;;  %13348 = vmatprep.mubr.msk.f32.mxu1 %vm1236_vm0, %v9947_v55 }
0x297d   : > { %13329 = vmatmul.mubr.msk.f32.gmra.mxu0 %vm1236_vm0, %v9948_v29  ;;  %13349 = vmatmul.mubr.msk.f32.gmra.mxu1 %vm1236_vm0, %v9948_v29 }
0x297e   : > { %13354 = vmatpush3.msra.mxu0 %v9814_v60 }
0x297f   : > { %13355 = vmatprep.subr.mxu0 %v9813_v10 }
0x2980   : > { %13356 = vmatpush3.msra.mxu0 %v9813_v10 }
0x2981   : > { %13357 = vmatprep.subr.mxu0 %v9812_v13 }
0x2982   : > { %13358 = vmatpush3.msra.mxu0 %v9812_v13 }
0x2983   : > { %13359 = vmatprep.subr.mxu0 %v9811_v32 }
0x2984   : > { %13360 = vmatpush3.msra.mxu0 %v9811_v32 }
0x2985   : > { %13361 = vmatprep.subr.mxu0 %v9810_v56 }
0x2986   : > { %13362 = vmatpush3.msra.mxu0 %v9810_v56 }
0x2987   : > { %13363 = vmatprep.subr.mxu0 %v9809_v45 }
0x2988   : > { %13364 = vmatpush3.msra.mxu0 %v9809_v45 }
0x2989   : > { %13365 = vmatprep.subr.mxu0 %v9808_v19 }
0x298a   : > { %13366 = vmatpush3.msra.mxu0 %v9808_v19 }
0x298b   : > { %13367 = vmatprep.subr.mxu0 %v9807_v62 }
0x298c   : > { %13368 = vmatpush3.msra.mxu0 %v9807_v62 }
0x298d   : > { %13369 = vmatprep.subr.mxu0 %v9806_v31 }
0x298e   : > { %13370 = vmatpush3.msra.mxu0 %v9806_v31 }
0x298f   : > { %13371 = vmatprep.subr.mxu0 %v9805_v12 }
0x2990   : > { %13372 = vmatpush3.msra.mxu0 %v9805_v12 }
0x2991   : > { %13373 = vmatprep.subr.mxu0 %v9804_v2 }
0x2992   : > { %13374 = vmatpush3.msra.mxu0 %v9804_v2 }
0x2993   : > { %13375 = vmatprep.subr.mxu0 %v9803_v25 }
0x2994   : > { %13376 = vmatpush3.msra.mxu0 %v9803_v25 }
0x2995   : > { %13377 = vmatprep.subr.mxu0 %v9802_v42 }
0x2996   : > { %13378 = vmatpush3.msra.mxu0 %v9802_v42 }
0x2997   : > { %13379 = vmatprep.subr.mxu0 %v9801_v35 }
0x2998   : > { %13380 = vmatpush3.msra.mxu0 %v9801_v35 }
0x2999   : > { %13381 = vmatprep.subr.mxu0 %v9800_v46 }
0x299a   : > { %13382 = vmatpush3.msra.mxu0 %v9800_v46 }
0x2a31   : > { %v13341_v63 = vpop.f32.mrf.mxu1  ;;  %v13321_v59 = vpop.f32.mrf.mxu0 }
0x2a32   : > { %v16569_v6 = vadd.f32 %v13341_v63, %v11185_v58 }
0x2a33   : > { %v10156_v3 = vpop.f32.mrf.mxu1  ;;  %v10045_v32 = vpop.f32.mrf.mxu0 }
0x2a34   : > { %v10196_v34 = vmul.f32 %v16569_v6, %v16569_v6  ;;  %v16573_v51 = vadd.f32 %v11185_v58, %v10156_v3 }
0x2a35   : > { %v13344_v37 = vpop.f32.mrf.mxu1  ;;  %v13324_v35 = vpop.f32.mrf.mxu0 }
0x2a36   : > { %v10204_v52 = vmul.f32 %v10196_v34, %v16569_v6  ;;  %v10195_v16 = vmul.f32 %v16573_v51, %v16573_v51  ;;  %v16578_v47 = vadd.f32 %v13344_v37, %v11185_v58 }
0x2a37   : > { %v10166_v44 = vpop.f32.mrf.mxu1 }
0x2a38   : > { %v10212_v21 = vmul.f32 0.044715, %v10204_v52  ;;  %v10203_v33 = vmul.f32 %v10195_v16, %v16573_v51  ;;  %v10198_v20 = vmul.f32 %v16578_v47, %v16578_v47  ;;  %v16583_v41 = vadd.f32 %v11185_v58, %v10166_v44  ;;  %v10055_v52 = vpop.f32.mrf.mxu0 }
0x2a39   : > { %v13347_v15 = vpop.f32.mrf.mxu1 }
0x2a3a   : > { %v10220_v28 = vadd.f32 %v10212_v21, %v16569_v6  ;;  %v10211_v49 = vmul.f32 0.044715, %v10203_v33  ;;  %v10206_v8 = vmul.f32 %v10198_v20, %v16578_v47  ;;  %v10197_v5 = vmul.f32 %v16583_v41, %v16583_v41 }
0x2a3b   : > { %v16589_v18 = vadd.f32 %v13347_v15, %v11185_v58  ;;  %v10176_v57 = vpop.f32.mrf.mxu1  ;;  %v13327_v15 = vpop.f32.mrf.mxu0 }
0x2a3c   : > { %v10228_v39 = vmul.f32 0.7978846, %v10220_v28  ;;  %v10219_v22 = vadd.f32 %v10211_v49, %v16573_v51  ;;  %v10214_v38 = vmul.f32 0.044715, %v10206_v8  ;;  %v10205_v24 = vmul.f32 %v10197_v5, %v16583_v41  ;;  %v11176_v28 = vld [vmem:[%s16716_s26] ss:$0 sm:$0xff] }
0x2a3d   : > { %v10200_v11 = vmul.f32 %v16589_v18, %v16589_v18  ;;  %v16595_v27 = vadd.f32 %v11185_v58, %v10176_v57  ;;  %v13350_v26 = vpop.f32.mrf.mxu1 }
0x2a3e   : > { %13942 = vtanh.f32 %v10228_v39  ;;  %v10227_v0 = vmul.f32 0.7978846, %v10219_v22  ;;  %v10222_v61 = vadd.f32 %v10214_v38, %v16578_v47  ;;  %v10213_v36 = vmul.f32 0.044715, %v10205_v24 }
0x2a3f   : > { %v10208_v9 = vmul.f32 %v10200_v11, %v16589_v18  ;;  %v10199_v1 = vmul.f32 %v16595_v27, %v16595_v27  ;;  %v16601_v53 = vadd.f32 %v13350_v26, %v11185_v58  ;;  %v10186_v14 = vpop.f32.mrf.mxu1  ;;  %v10046_v39 = vadd.f32 %v11176_v28, %v10045_v32  ;;  %v10065_v11 = vpop.f32.mrf.mxu0 }
0x2a40   : > { %13944 = vtanh.f32 %v10227_v0  ;;  %v10230_v23 = vmul.f32 0.7978846, %v10222_v61  ;;  %v16603_v55 = vadd.f32 %v11185_v58, %v10186_v14  ;;  %v10221_v29 = vadd.f32 %v10213_v36, %v16583_v41 }
0x2a41   : > { %v10216_v43 = vmul.f32 0.044715, %v10208_v9  ;;  %v10207_v60 = vmul.f32 %v10199_v1, %v16595_v27  ;;  %v10202_v10 = vmul.f32 %v16601_v53, %v16601_v53  ;;  %v10051_v24 = vadd.f32 %v13321_v59, %v11176_v28 }
0x2a42   : > { %13946 = vtanh.f32 %v10230_v23  ;;  %v10201_v13 = vmul.f32 %v16603_v55, %v16603_v55  ;;  %v10229_v56 = vmul.f32 0.7978846, %v10221_v29  ;;  %v10056_v29 = vadd.f32 %v11176_v28, %v10055_v52 }
0x2a43   : > { %v10224_v45 = vadd.f32 %v10216_v43, %v16589_v18  ;;  %v10215_v19 = vmul.f32 0.044715, %v10207_v60  ;;  %v10210_v62 = vmul.f32 %v10202_v10, %v16601_v53  ;;  %v10061_v59 = vadd.f32 %v13324_v35, %v11176_v28 }
0x2a44   : > { %v10209_v31 = vmul.f32 %v10201_v13, %v16603_v55  ;;  %13948 = vtanh.f32 %v10229_v56 }
0x2a45   : > { %v10232_v12 = vmul.f32 0.7978846, %v10224_v45  ;;  %v10223_v2 = vadd.f32 %v10215_v19, %v16595_v27  ;;  %v10218_v25 = vmul.f32 0.044715, %v10210_v62 }
0x2a46   : > { %v10217_v42 = vmul.f32 0.044715, %v10209_v31 }
0x2a47   : > { %13950 = vtanh.f32 %v10232_v12  ;;  %v10231_v46 = vmul.f32 0.7978846, %v10223_v2  ;;  %v10226_v58 = vadd.f32 %v10218_v25, %v16601_v53  ;;  %v10066_v12 = vadd.f32 %v11176_v28, %v10065_v11 }
0x2a48   : > { %v10225_v63 = vadd.f32 %v10217_v42, %v16603_v55  ;;  %v10071_v42 = vadd.f32 %v13327_v15, %v11176_v28 }
0x2a49   : > { %13952 = vtanh.f32 %v10231_v46  ;;  %v10234_v3 = vmul.f32 0.7978846, %v10226_v58 }
0x2a4a   : > { %v10233_v34 = vmul.f32 0.7978846, %v10225_v63 }
0x2a4b   : > { %v13943_v37 = vpop.eup %13942  ;;  %13954 = vtanh.f32 %v10234_v3 }
0x2a4c   : > { %v10244_v16 = vadd.f32 1.0, %v13943_v37  ;;  %13956 = vtanh.f32 %v10233_v34 }
0x2a4d   : > { %v13945_v44 = vpop.eup %13944 }
0x2a4e   : > { %v10252_v21 = vmul.f32 0.5, %v10244_v16  ;;  %v10243_v33 = vadd.f32 1.0, %v13945_v44 }
0x2a4f   : > { %v13947_v20 = vpop.eup %13946 }
0x2a50   : > { %v10246_v49 = vadd.f32 1.0, %v13947_v20  ;;  %v10251_v8 = vmul.f32 0.5, %v10243_v33  ;;  %v10260_v5 = vmul.f32 %v10252_v21, %v16569_v6  ;;  %v13330_v6 = vpop.f32.mrf.mxu0 }
0x2a51   : > { %v13949_v57 = vpop.eup %13948  ;;  %v10081_v3 = vadd.f32 %v13330_v6, %v11176_v28 }
0x2a52   : > { %v10254_v22 = vmul.f32 0.5, %v10246_v49  ;;  %v10259_v38 = vmul.f32 %v10251_v8, %v16573_v51  ;;  %v10245_v26 = vadd.f32 1.0, %v13949_v57  ;;  %v10268_v36 = vmul.f32 %v10260_v5, %v10051_v24  ;;  %v10075_v2 = vpop.f32.mrf.mxu0 }
0x2a53   : > { %v10076_v58 = vadd.f32 %v11176_v28, %v10075_v2 }
0x2a54   : > { %v13951_v0 = vpop.eup %13950  ;;  %v10267_v61 = vmul.f32 %v10259_v38, %v10046_v39  ;;  %v10253_v1 = vmul.f32 0.5, %v10245_v26  ;;  %v10262_v23 = vmul.f32 %v10254_v22, %v16578_v47 }
0x2a55   : > { %v10248_v9 = vadd.f32 1.0, %v13951_v0 }
0x2a56   : > { %v13953_v14 = vpop.eup %13952  ;;  %13383 = vmatprep.mubr.f32.mxu0 %v10267_v61  ;;  %v10261_v60 = vmul.f32 %v10253_v1, %v16583_v41  ;;  %v10270_v62 = vmul.f32 %v10262_v23, %v10061_v59 }
0x2a57   : > { %v10256_v43 = vmul.f32 0.5, %v10248_v9  ;;  %13384 = vmatmul.mubr.f32.vlgmr.msra.gmra.mxu0 %v10268_v36  ;;  %v10247_v10 = vadd.f32 1.0, %v13953_v14 }
0x2a58   : > { %v13955_v51 = vpop.eup %13954  ;;  %v10269_v56 = vmul.f32 %v10261_v60, %v10056_v29 }
0x2a59   : > { %v13957_v13 = vpop.eup %13956  ;;  %v10250_v32 = vadd.f32 1.0, %v13955_v51  ;;  %v10255_v45 = vmul.f32 0.5, %v10247_v10  ;;  %v10264_v19 = vmul.f32 %v10256_v43, %v16589_v18 }
0x2a5a   : > { %v10249_v31 = vadd.f32 1.0, %v13957_v13  ;;  %13386 = vmatprep.mubr.f32.mxu0 %v10269_v56 }
0x2a5b   : > { %v10258_v47 = vmul.f32 0.5, %v10250_v32  ;;  %v10263_v25 = vmul.f32 %v10255_v45, %v16595_v27  ;;  %13387 = vmatmul.mubr.f32.gmra.mxu0 %v10270_v62  ;;  %v10272_v63 = vmul.f32 %v10264_v19, %v10071_v42  ;;  %v11194_v27 = vld [vmem:[%s14556_s19] ss:$0 sm:$0xff] }
0x2a5c   : > { %v10257_v41 = vmul.f32 0.5, %v10249_v31 }
0x2a5d   : > { %v10271_v35 = vmul.f32 %v10263_v25, %v10066_v12  ;;  %v10266_v46 = vmul.f32 %v10258_v47, %v16601_v53 }
0x2a5e   : > { %v10265_v18 = vmul.f32 %v10257_v41, %v16603_v55 }
0x2a5f   : > { %13389 = vmatprep.mubr.f32.mxu0 %v10271_v35  ;;  %v10274_v37 = vmul.f32 %v10266_v46, %v10081_v3 }
0x2a60   : > { %13390 = vmatmul.mubr.f32.gmra.mxu0 %v10272_v63  ;;  %v10273_v34 = vmul.f32 %v10265_v18, %v10076_v58 }
0x2a62   : > { %13392 = vmatprep.mubr.f32.mxu0 %v10273_v34 }
0x2a64   : > { %13393 = vmatmul.mubr.f32.gmra.mxu0 %v10274_v37 }
0x2b17   : > { %v13385_v52 = vpop.f32.mrf.mxu0 }
0x2b18   : > { %v10353_v16 = vadd.f32 %v13385_v52, %v11194_v27 }
0x2b19   : > { %v10347_v44 = vpop.f32.mrf.mxu0 }
0x2b1a   : > { %v10387_v21 = vadd.f32 %v10353_v16, %v16441_v30  ;;  %v10348_v53 = vadd.f32 %v11194_v27, %v10347_v44 }
0x2b1b   : > { %v13388_v33 = vpop.f32.mrf.mxu0 }
0x2b1c   : > { %10395 = vst.msk [vmem:[%s1224_s2 + $0x8] sm:$0xff] %vm1236_vm0, %v10387_v21  ;;  %v10386_v55 = vadd.f32 %v10348_v53, %v16445_v40  ;;  %v10363_v20 = vadd.f32 %v13388_v33, %v11194_v27 }
0x2b1d   : > { %v10357_v15 = vpop.f32.mrf.mxu0 }
0x2b1e   : > { %10394 = vst.msk [vmem:[%s1224_s2] sm:$0xff] %vm1236_vm0, %v10386_v55  ;;  %v10389_v28 = vadd.f32 %v10363_v20, %v16451_v48  ;;  %v10358_v49 = vadd.f32 %v11194_v27, %v10357_v15 }
0x2b20   : > { %v13391_v8 = vpop.f32.mrf.mxu0  ;;  %10397 = vst.msk [vmem:[%s1224_s2 + $0x18] sm:$0xff] %vm1236_vm0, %v10389_v28  ;;  %v10388_v5 = vadd.f32 %v10358_v49, %v16457_v7 }
0x2b21   : > { %v10373_v57 = vadd.f32 %v13391_v8, %v11194_v27 }
0x2b22   : > { %v10367_v30 = vpop.f32.mrf.mxu0  ;;  %10396 = vst.msk [vmem:[%s1224_s2 + $0x10] sm:$0xff] %vm1236_vm0, %v10388_v5 }
0x2b23   : > { %v10391_v39 = vadd.f32 %v10373_v57, %v16463_v4  ;;  %v10368_v40 = vadd.f32 %v11194_v27, %v10367_v30 }
0x2b24   : > { %v13394_v22 = vpop.f32.mrf.mxu0 }
0x2b25   : > { %10399 = vst.msk [vmem:[%s1224_s2 + $0x28] sm:$0xff] %vm1236_vm0, %v10391_v39  ;;  %v10390_v38 = vadd.f32 %v10368_v40, %v16469_v54  ;;  %v10383_v24 = vadd.f32 %v13394_v22, %v11194_v27 }
0x2b26   : > { %v10377_v48 = vpop.f32.mrf.mxu0 }
0x2b27   : > { %10398 = vst.msk [vmem:[%s1224_s2 + $0x20] sm:$0xff] %vm1236_vm0, %v10390_v38  ;;  %v10393_v11 = vadd.f32 %v10383_v24, %v16475_v17  ;;  %v10378_v26 = vadd.f32 %v11194_v27, %v10377_v48 }
0x2b29   : > { %10401 = vst.msk [vmem:[%s1224_s2 + $0x38] sm:$0xff] %vm1236_vm0, %v10393_v11  ;;  %v10392_v7 = vadd.f32 %v10378_v26, %v16480_v50 }
0x2b2b   : > { %10400 = vst.msk [vmem:[%s1224_s2 + $0x30] sm:$0xff] %vm1236_vm0, %v10392_v7 }
0x2b2c PF: > { %s86_s15 = sadd.s32 1, %s14330_s15  }
0x2b2d   : > { %p83_p6 = scmp.ge.s32.totalorder %s86_s15, 4  }
0x2b2f   :  { %85 = sbr.rel (!%p83_p6) target bundleno = 65 (0x41), region = 273 }
0x2b34   :  { %10423 = vsyncpa [#allocation3], 1 }
0x2b35   :  { %10425 = vsyncpa [#allocation3 + $0x1], 1 }
0x2b36   :  { %10426 = vsyncpa [#allocation5], 1 }
0x2b37   :  { %10427 = vsyncpa [#allocation8], 1 }
0x2b38   :  { %10428 = vsyncpa [#allocation11], 1 }
0x2b39   :  { %10429 = vsyncpa [#allocation14], 1 }
0x2b3a   :  { %10430 = vsyncpa [#allocation17], 1 }
0x2b3b   :  { %10431 = vsyncpa [#allocation20], 1 }

</bundles_post_ra>
